<compile_context>
chip_gen: v5e
topology: v5e:2x2
jax: 0.10.0
libtpu: 0.0.40
codegen_flags: <defaults>
</compile_context>

<pallas_src>
import math

import jax
import jax.numpy as jnp
from jax.experimental import pallas as pl
from jax.experimental.pallas import tpu as pltpu


# ----------------------------- in-kernel helpers -----------------------------

def _lstm_scan(x_parts, wih_parts, whh, b, h0, c0, H, reverse=False):
    """Fully unrolled single-direction LSTM over a static-length sequence.

    x_parts:   list (length T); each element is a tuple of (B, Din_k) inputs.
    wih_parts: tuple of (Din_k, 4H) weights matching x_parts entries.
    whh:       (H, 4H); b: (1, 4H).  Gate order matches torch.nn.LSTM: i,f,g,o.
    Returns (list of per-step (B, H) hidden states in FORWARD time order,
             final h, final c).
    """
    T = len(x_parts)
    h, c = h0, c0
    outs = [None] * T
    time_iter = range(T - 1, -1, -1) if reverse else range(T)
    for t in time_iter:
        # One fused (., 4H) GEMM per operand instead of 4 per-gate matmuls.
        gates = jnp.dot(h, whh, preferred_element_type=jnp.float32) + b
        for xp, wp in zip(x_parts[t], wih_parts):
            gates = gates + jnp.dot(xp, wp, preferred_element_type=jnp.float32)
        i_g = jax.nn.sigmoid(gates[:, 0:H])
        f_g = jax.nn.sigmoid(gates[:, H:2 * H])
        g_g = jnp.tanh(gates[:, 2 * H:3 * H])
        o_g = jax.nn.sigmoid(gates[:, 3 * H:4 * H])
        c = f_g * c + i_g * g_g
        h = o_g * jnp.tanh(c)
        outs[t] = h
    return outs, h, c


# ------------------------------- fused kernel --------------------------------

def fused_forward_kernel(
        x_ref, xd_ref,
        # encoder layer 0, forward / backward directions
        e0f_wih, e0f_whh, e0f_b,
        e0b_wih, e0b_whh, e0b_b,
        # encoder layer 1 (input = concat(fwd, bwd) -> split matmul weights)
        e1f_wih_f, e1f_wih_b, e1f_whh, e1f_b,
        e1b_wih_f, e1b_wih_b, e1b_whh, e1b_b,
        # decoder layers
        d0_wih, d0_whh, d0_b,
        d1_wih, d1_whh, d1_b,
        # attention / output projections
        wa_ref, ba_ref, wc_hs_ref, wc_ctx_ref, bc_ref, wv_ref, bv_ref,
        # outputs
        logits_ref, aw_ref):
    S, B, _ = x_ref.shape
    Td = xd_ref.shape[0]
    H = wa_ref.shape[0]
    zeros = jnp.zeros((B, H), jnp.float32)

    # ---- EncoderRNN: 2-layer bidirectional LSTM (both directions fused) ----
    x_steps = [(x_ref[t],) for t in range(S)]
    f0, hf0, cf0 = _lstm_scan(x_steps, (e0f_wih[...],), e0f_whh[...], e0f_b[...],
                              zeros, zeros, H)
    b0, hb0, cb0 = _lstm_scan(x_steps, (e0b_wih[...],), e0b_whh[...], e0b_b[...],
                              zeros, zeros, H, reverse=True)

    # layer-1 input is concat([fwd_t, bwd_t]); implemented as split matmuls.
    l1_steps = [(f0[t], b0[t]) for t in range(S)]
    f1, hf1, cf1 = _lstm_scan(l1_steps, (e1f_wih_f[...], e1f_wih_b[...]),
                              e1f_whh[...], e1f_b[...], zeros, zeros, H)
    b1, hb1, cb1 = _lstm_scan(l1_steps, (e1b_wih_f[...], e1b_wih_b[...]),
                              e1b_whh[...], e1b_b[...], zeros, zeros, H,
                              reverse=True)

    # bidirectional merge (EncoderRNN.forward post-processing)
    ehs = [f1[t] + b1[t] for t in range(S)]                  # list of (B, H)
    h0_dec, c0_dec = hf0 + hb0, cf0 + cb0
    h1_dec, c1_dec = hf1 + hb1, cf1 + cb1

    # ---- Decoder LSTM (reply_generator), initial state from encoder ----
    xd_steps = [(xd_ref[t],) for t in range(Td)]
    d0_out, _, _ = _lstm_scan(xd_steps, (d0_wih[...],), d0_whh[...], d0_b[...],
                              h0_dec, c0_dec, H)
    d1_steps = [(d0_out[t],) for t in range(Td)]
    hs, _, _ = _lstm_scan(d1_steps, (d1_wih[...],), d1_whh[...], d1_b[...],
                          h1_dec, c1_dec, H)

    # ---- attention + context + concat/tanh + hidden2vocab ----
    wa = wa_ref[...]
    ba = ba_ref[...]
    wc_hs = wc_hs_ref[...]
    wc_ctx = wc_ctx_ref[...]
    bc = bc_ref[...]
    wv = wv_ref[...]
    bv = bv_ref[...]

    for bi in range(B):                                      # static batch loop
        ehs_b = jnp.concatenate([ehs[t][bi:bi + 1, :] for t in range(S)], axis=0)
        hs_b = jnp.concatenate([hs[t][bi:bi + 1, :] for t in range(Td)], axis=0)

        # s = (ehs @ Wa^T + ba) @ hs^T
        a = jnp.dot(ehs_b, wa, preferred_element_type=jnp.float32) + ba   # (S, H)
        s = jnp.dot(a, hs_b.T, preferred_element_type=jnp.float32)        # (S, Td)

        # softmax over the source axis (PyTorch dim=1 of (B, S, Td))
        s_max = jnp.max(s, axis=0, keepdims=True)
        e = jnp.exp(s - s_max)
        aw = e / jnp.sum(e, axis=0, keepdims=True)                        # (S, Td)
        aw_ref[bi] = aw

        # context, then concat Linear as a split matmul (no lane concat)
        ctx = jnp.dot(aw.T, ehs_b, preferred_element_type=jnp.float32)    # (Td, H)
        hc = jnp.tanh(jnp.dot(hs_b, wc_hs, preferred_element_type=jnp.float32)
                      + jnp.dot(ctx, wc_ctx, preferred_element_type=jnp.float32)
                      + bc)                                               # (Td, H)
        logits_ref[bi] = (jnp.dot(hc, wv, preferred_element_type=jnp.float32)
                          + bv)                                           # (Td, V)


def run_fused_forward(x, xd, e0f, e0b, e1f, e1b, d0, d1,
                      wa, ba, wc_hs, wc_ctx, bc, wv, bv):
    S, B, _ = x.shape
    Td = xd.shape[0]
    H = wa.shape[0]
    V = wv.shape[1]
    vmem = pl.BlockSpec(memory_space=pltpu.MemorySpace.VMEM)
    args = (x, xd, *e0f, *e0b, *e1f, *e1b, *d0, *d1,
            wa, ba, wc_hs, wc_ctx, bc, wv, bv)
    return pl.pallas_call(
        fused_forward_kernel,
        out_shape=(jax.ShapeDtypeStruct((B, Td, V), jnp.float32),
                   jax.ShapeDtypeStruct((B, S, Td), jnp.float32)),
        in_specs=[vmem] * len(args),
        out_specs=(vmem, vmem),
    )(*args)


# ----------------------------- parameter setup -----------------------------

def _uniform(key, shape, scale):
    return jax.random.uniform(key, shape, jnp.float32, -scale, scale)


def _make_lstm_params(keys, din, H):
    """Deterministic torch-style LSTM params, repacked for the fused-gate GEMM.

    Returns wih (Din, 4H), whh (H, 4H), b (1, 4H) with gate order [i, f, g, o].
    """
    k = 1.0 / math.sqrt(H)
    wih = _uniform(keys[0], (4 * H, din), k)          # torch (4H, Din)
    whh = _uniform(keys[1], (4 * H, H), k)
    bih = _uniform(keys[2], (4 * H,), k)
    bhh = _uniform(keys[3], (4 * H,), k)
    return wih.T, whh.T, (bih + bhh).reshape(1, 4 * H)


def _make_linear_params(keys, din, dout):
    k = 1.0 / math.sqrt(din)
    w = _uniform(keys[0], (dout, din), k)             # torch (Dout, Din)
    b = _uniform(keys[1], (dout,), k)
    return w, b


def init_params(key, vocab_size, embed_dim, hidden_dim):
    keys = iter(jax.random.split(key, 64))

    def take(n):
        return [next(keys) for _ in range(n)]

    H = hidden_dim
    p = {}
    p["embedding"] = jax.random.normal(next(keys), (vocab_size, embed_dim),
                                       jnp.float32) * 0.1

    # Encoder: 2-layer bidirectional LSTM
    p["enc_l0_fwd"] = _make_lstm_params(take(4), embed_dim, H)
    p["enc_l0_bwd"] = _make_lstm_params(take(4), embed_dim, H)
    wih, whh, b = _make_lstm_params(take(4), 2 * H, H)
    p["enc_l1_fwd"] = (wih[:H], wih[H:], whh, b)       # split for fwd/bwd halves
    wih, whh, b = _make_lstm_params(take(4), 2 * H, H)
    p["enc_l1_bwd"] = (wih[:H], wih[H:], whh, b)

    # Decoder: 2-layer unidirectional LSTM
    p["dec_l0"] = _make_lstm_params(take(4), embed_dim, H)
    p["dec_l1"] = _make_lstm_params(take(4), H, H)

    # Linear layers
    w, b = _make_linear_params(take(2), H, H)
    p["attn"] = (w.T, b.reshape(1, H))
    w, b = _make_linear_params(take(2), 2 * H, H)
    p["concat"] = (w[:, :H].T, w[:, H:].T, b.reshape(1, H))   # split matmul halves
    w, b = _make_linear_params(take(2), H, vocab_size)
    p["hidden2vocab"] = (w.T, b.reshape(1, vocab_size))
    return p


# ----------------------------- forward (wrapper) ---------------------------

def munoh2_forward(params, ids_txt, ids_reply, mask):
    """Mirrors Munoh2.forward given pre-tokenized ids (txt2ids is string glue)."""
    emb = params["embedding"]

    # ---- ids2vec (embedding gather, glue) + time-major layout ----
    vec_txt = jnp.take(emb, ids_txt, axis=0)                 # (B, S, E)
    x = jnp.transpose(vec_txt, (1, 0, 2))                    # (S, B, E)

    # ---- calc_decoder_io ----
    source = ids_reply[:, :-1]
    target = ids_reply[:, 1:]
    vec_source = jnp.take(emb, source, axis=0)               # (B, Td, E)
    xd = jnp.transpose(vec_source, (1, 0, 2))                # (Td, B, E)

    wa, ba = params["attn"]
    wc_hs, wc_ctx, bc = params["concat"]
    wv, bv = params["hidden2vocab"]

    logits, attention_weight = run_fused_forward(
        x, xd,
        params["enc_l0_fwd"], params["enc_l0_bwd"],
        params["enc_l1_fwd"], params["enc_l1_bwd"],
        params["dec_l0"], params["dec_l1"],
        wa, ba, wc_hs, wc_ctx, bc, wv, bv)

    return logits, target, mask, attention_weight


# ----------------------------------- main -----------------------------------

if __name__ == "__main__":
    B = 2          # batch
    S = 8          # source sequence length (after <BOS>/<EOS> padding)
    R = 9          # reply sequence length -> decoder length Td = R - 1 = 8
    H = 32         # hidden_dim
    E = 32         # word_embed / embedding_dim
    V = 64         # vocab_size

    root = jax.random.PRNGKey(0)
    k_param, k_txt, k_reply = jax.random.split(root, 3)

    params = init_params(k_param, V, E, H)

    ids_txt = jax.random.randint(k_txt, (B, S), 0, V, dtype=jnp.int32)
    ids_reply = jax.random.randint(k_reply, (B, R), 0, V, dtype=jnp.int32)
    lens = jnp.array([7, 5], dtype=jnp.int32)                 # positions past EOS
    mask = jnp.arange(R)[None, :] >= lens[:, None]            # (B, R) bool padding mask

    forward = jax.jit(munoh2_forward)
    logits, target, out_mask, attention_weight = forward(
        params, ids_txt, ids_reply, mask)

    jax.block_until_ready((logits, target, out_mask, attention_weight))

    assert logits.shape == (B, R - 1, V)
    assert target.shape == (B, R - 1)
    assert out_mask.shape == (B, R)
    assert attention_weight.shape == (B, S, R - 1)
    # attention weights must sum to 1 over the source axis (softmax dim=1)
    assert jnp.allclose(attention_weight.sum(axis=1), 1.0, atol=1e-5)

    print("KERNEL_OK")
</pallas_src>

<mosaic_0001>
module attributes {stable_mosaic.version = 11 : i64} {
  func.func @fused_forward_kernel(%arg0: memref<8x2x32xf32, #tpu.memory_space<vmem>>, %arg1: memref<8x2x32xf32, #tpu.memory_space<vmem>>, %arg2: memref<32x128xf32, #tpu.memory_space<vmem>>, %arg3: memref<32x128xf32, #tpu.memory_space<vmem>>, %arg4: memref<1x128xf32, #tpu.memory_space<vmem>>, %arg5: memref<32x128xf32, #tpu.memory_space<vmem>>, %arg6: memref<32x128xf32, #tpu.memory_space<vmem>>, %arg7: memref<1x128xf32, #tpu.memory_space<vmem>>, %arg8: memref<32x128xf32, #tpu.memory_space<vmem>>, %arg9: memref<32x128xf32, #tpu.memory_space<vmem>>, %arg10: memref<32x128xf32, #tpu.memory_space<vmem>>, %arg11: memref<1x128xf32, #tpu.memory_space<vmem>>, %arg12: memref<32x128xf32, #tpu.memory_space<vmem>>, %arg13: memref<32x128xf32, #tpu.memory_space<vmem>>, %arg14: memref<32x128xf32, #tpu.memory_space<vmem>>, %arg15: memref<1x128xf32, #tpu.memory_space<vmem>>, %arg16: memref<32x128xf32, #tpu.memory_space<vmem>>, %arg17: memref<32x128xf32, #tpu.memory_space<vmem>>, %arg18: memref<1x128xf32, #tpu.memory_space<vmem>>, %arg19: memref<32x128xf32, #tpu.memory_space<vmem>>, %arg20: memref<32x128xf32, #tpu.memory_space<vmem>>, %arg21: memref<1x128xf32, #tpu.memory_space<vmem>>, %arg22: memref<32x32xf32, #tpu.memory_space<vmem>>, %arg23: memref<1x32xf32, #tpu.memory_space<vmem>>, %arg24: memref<32x32xf32, #tpu.memory_space<vmem>>, %arg25: memref<32x32xf32, #tpu.memory_space<vmem>>, %arg26: memref<1x32xf32, #tpu.memory_space<vmem>>, %arg27: memref<32x64xf32, #tpu.memory_space<vmem>>, %arg28: memref<1x64xf32, #tpu.memory_space<vmem>>, %arg29: memref<2x8x64xf32, #tpu.memory_space<vmem>>, %arg30: memref<2x8x8xf32, #tpu.memory_space<vmem>>) attributes {dimension_semantics = [], scalar_prefetch = 0 : i64, scratch_operands = 0 : i64, tpu.core_type = #tpu.core_type<tc>} {
    %cst = arith.constant 0.000000e+00 : f32
    %0 = vector.broadcast %cst : f32 to vector<2x32xf32>
    %c0 = arith.constant 0 : index
    %c0_0 = arith.constant 0 : index
    %c0_1 = arith.constant 0 : index
    %1 = vector.load %arg0[%c0, %c0_0, %c0_1] : memref<8x2x32xf32, #tpu.memory_space<vmem>>, vector<1x2x32xf32>
    %2 = vector.shape_cast %1 : vector<1x2x32xf32> to vector<2x32xf32>
    %c1 = arith.constant 1 : index
    %c0_2 = arith.constant 0 : index
    %c0_3 = arith.constant 0 : index
    %3 = vector.load %arg0[%c1, %c0_2, %c0_3] : memref<8x2x32xf32, #tpu.memory_space<vmem>>, vector<1x2x32xf32>
    %4 = vector.shape_cast %3 : vector<1x2x32xf32> to vector<2x32xf32>
    %c2 = arith.constant 2 : index
    %c0_4 = arith.constant 0 : index
    %c0_5 = arith.constant 0 : index
    %5 = vector.load %arg0[%c2, %c0_4, %c0_5] : memref<8x2x32xf32, #tpu.memory_space<vmem>>, vector<1x2x32xf32>
    %6 = vector.shape_cast %5 : vector<1x2x32xf32> to vector<2x32xf32>
    %c3 = arith.constant 3 : index
    %c0_6 = arith.constant 0 : index
    %c0_7 = arith.constant 0 : index
    %7 = vector.load %arg0[%c3, %c0_6, %c0_7] : memref<8x2x32xf32, #tpu.memory_space<vmem>>, vector<1x2x32xf32>
    %8 = vector.shape_cast %7 : vector<1x2x32xf32> to vector<2x32xf32>
    %c4 = arith.constant 4 : index
    %c0_8 = arith.constant 0 : index
    %c0_9 = arith.constant 0 : index
    %9 = vector.load %arg0[%c4, %c0_8, %c0_9] : memref<8x2x32xf32, #tpu.memory_space<vmem>>, vector<1x2x32xf32>
    %10 = vector.shape_cast %9 : vector<1x2x32xf32> to vector<2x32xf32>
    %c5 = arith.constant 5 : index
    %c0_10 = arith.constant 0 : index
    %c0_11 = arith.constant 0 : index
    %11 = vector.load %arg0[%c5, %c0_10, %c0_11] : memref<8x2x32xf32, #tpu.memory_space<vmem>>, vector<1x2x32xf32>
    %12 = vector.shape_cast %11 : vector<1x2x32xf32> to vector<2x32xf32>
    %c6 = arith.constant 6 : index
    %c0_12 = arith.constant 0 : index
    %c0_13 = arith.constant 0 : index
    %13 = vector.load %arg0[%c6, %c0_12, %c0_13] : memref<8x2x32xf32, #tpu.memory_space<vmem>>, vector<1x2x32xf32>
    %14 = vector.shape_cast %13 : vector<1x2x32xf32> to vector<2x32xf32>
    %c7 = arith.constant 7 : index
    %c0_14 = arith.constant 0 : index
    %c0_15 = arith.constant 0 : index
    %15 = vector.load %arg0[%c7, %c0_14, %c0_15] : memref<8x2x32xf32, #tpu.memory_space<vmem>>, vector<1x2x32xf32>
    %16 = vector.shape_cast %15 : vector<1x2x32xf32> to vector<2x32xf32>
    %c0_16 = arith.constant 0 : index
    %c0_17 = arith.constant 0 : index
    %17 = vector.load %arg2[%c0_16, %c0_17] : memref<32x128xf32, #tpu.memory_space<vmem>>, vector<32x128xf32>
    %c0_18 = arith.constant 0 : index
    %c0_19 = arith.constant 0 : index
    %18 = vector.load %arg3[%c0_18, %c0_19] : memref<32x128xf32, #tpu.memory_space<vmem>>, vector<32x128xf32>
    %c0_20 = arith.constant 0 : index
    %c0_21 = arith.constant 0 : index
    %19 = vector.load %arg4[%c0_20, %c0_21] : memref<1x128xf32, #tpu.memory_space<vmem>>, vector<1x128xf32>
    %cst_22 = arith.constant dense<0.000000e+00> : vector<2x128xf32>
    %20 = tpu.matmul %0, %18, %cst_22 {dimension_numbers = #tpu.dot_dimension_numbers<[1], [0], [0], [1], [0, 0, 1, 1], [], []>} : vector<2x32xf32>, vector<32x128xf32>, vector<2x128xf32> -> vector<2x128xf32>
    %21 = vector.broadcast %19 : vector<1x128xf32> to vector<2x128xf32>
    %22 = arith.addf %20, %21 : vector<2x128xf32>
    %cst_23 = arith.constant dense<0.000000e+00> : vector<2x128xf32>
    %23 = tpu.matmul %2, %17, %cst_23 {dimension_numbers = #tpu.dot_dimension_numbers<[1], [0], [0], [1], [0, 0, 1, 1], [], []>} : vector<2x32xf32>, vector<32x128xf32>, vector<2x128xf32> -> vector<2x128xf32>
    %24 = arith.addf %22, %23 : vector<2x128xf32>
    %25 = vector.extract_strided_slice %24 {offsets = [0, 0], sizes = [2, 32], strides = [1, 1]} : vector<2x128xf32> to vector<2x32xf32>
    %26 = arith.negf %25 : vector<2x32xf32>
    %27 = math.exp %26 : vector<2x32xf32>
    %cst_24 = arith.constant 1.000000e+00 : f32
    %28 = vector.broadcast %cst_24 : f32 to vector<2x32xf32>
    %29 = arith.addf %28, %27 : vector<2x32xf32>
    %30 = arith.divf %28, %29 : vector<2x32xf32>
    %31 = vector.extract_strided_slice %24 {offsets = [0, 32], sizes = [2, 32], strides = [1, 1]} : vector<2x128xf32> to vector<2x32xf32>
    %32 = arith.negf %31 : vector<2x32xf32>
    %33 = math.exp %32 : vector<2x32xf32>
    %cst_25 = arith.constant 1.000000e+00 : f32
    %34 = vector.broadcast %cst_25 : f32 to vector<2x32xf32>
    %35 = arith.addf %34, %33 : vector<2x32xf32>
    %36 = arith.divf %34, %35 : vector<2x32xf32>
    %37 = vector.extract_strided_slice %24 {offsets = [0, 64], sizes = [2, 32], strides = [1, 1]} : vector<2x128xf32> to vector<2x32xf32>
    %38 = math.tanh %37 : vector<2x32xf32>
    %39 = vector.extract_strided_slice %24 {offsets = [0, 96], sizes = [2, 32], strides = [1, 1]} : vector<2x128xf32> to vector<2x32xf32>
    %40 = arith.negf %39 : vector<2x32xf32>
    %41 = math.exp %40 : vector<2x32xf32>
    %cst_26 = arith.constant 1.000000e+00 : f32
    %42 = vector.broadcast %cst_26 : f32 to vector<2x32xf32>
    %43 = arith.addf %42, %41 : vector<2x32xf32>
    %44 = arith.divf %42, %43 : vector<2x32xf32>
    %45 = arith.mulf %36, %0 : vector<2x32xf32>
    %46 = arith.mulf %30, %38 : vector<2x32xf32>
    %47 = arith.addf %45, %46 : vector<2x32xf32>
    %48 = math.tanh %47 : vector<2x32xf32>
    %49 = arith.mulf %44, %48 : vector<2x32xf32>
    %cst_27 = arith.constant dense<0.000000e+00> : vector<2x128xf32>
    %50 = tpu.matmul %49, %18, %cst_27 {dimension_numbers = #tpu.dot_dimension_numbers<[1], [0], [0], [1], [0, 0, 1, 1], [], []>} : vector<2x32xf32>, vector<32x128xf32>, vector<2x128xf32> -> vector<2x128xf32>
    %51 = vector.broadcast %19 : vector<1x128xf32> to vector<2x128xf32>
    %52 = arith.addf %50, %51 : vector<2x128xf32>
    %cst_28 = arith.constant dense<0.000000e+00> : vector<2x128xf32>
    %53 = tpu.matmul %4, %17, %cst_28 {dimension_numbers = #tpu.dot_dimension_numbers<[1], [0], [0], [1], [0, 0, 1, 1], [], []>} : vector<2x32xf32>, vector<32x128xf32>, vector<2x128xf32> -> vector<2x128xf32>
    %54 = arith.addf %52, %53 : vector<2x128xf32>
    %55 = vector.extract_strided_slice %54 {offsets = [0, 0], sizes = [2, 32], strides = [1, 1]} : vector<2x128xf32> to vector<2x32xf32>
    %56 = arith.negf %55 : vector<2x32xf32>
    %57 = math.exp %56 : vector<2x32xf32>
    %cst_29 = arith.constant 1.000000e+00 : f32
    %58 = vector.broadcast %cst_29 : f32 to vector<2x32xf32>
    %59 = arith.addf %58, %57 : vector<2x32xf32>
    %60 = arith.divf %58, %59 : vector<2x32xf32>
    %61 = vector.extract_strided_slice %54 {offsets = [0, 32], sizes = [2, 32], strides = [1, 1]} : vector<2x128xf32> to vector<2x32xf32>
    %62 = arith.negf %61 : vector<2x32xf32>
    %63 = math.exp %62 : vector<2x32xf32>
    %cst_30 = arith.constant 1.000000e+00 : f32
    %64 = vector.broadcast %cst_30 : f32 to vector<2x32xf32>
    %65 = arith.addf %64, %63 : vector<2x32xf32>
    %66 = arith.divf %64, %65 : vector<2x32xf32>
    %67 = vector.extract_strided_slice %54 {offsets = [0, 64], sizes = [2, 32], strides = [1, 1]} : vector<2x128xf32> to vector<2x32xf32>
    %68 = math.tanh %67 : vector<2x32xf32>
    %69 = vector.extract_strided_slice %54 {offsets = [0, 96], sizes = [2, 32], strides = [1, 1]} : vector<2x128xf32> to vector<2x32xf32>
    %70 = arith.negf %69 : vector<2x32xf32>
    %71 = math.exp %70 : vector<2x32xf32>
    %cst_31 = arith.constant 1.000000e+00 : f32
    %72 = vector.broadcast %cst_31 : f32 to vector<2x32xf32>
    %73 = arith.addf %72, %71 : vector<2x32xf32>
    %74 = arith.divf %72, %73 : vector<2x32xf32>
    %75 = arith.mulf %66, %47 : vector<2x32xf32>
    %76 = arith.mulf %60, %68 : vector<2x32xf32>
    %77 = arith.addf %75, %76 : vector<2x32xf32>
    %78 = math.tanh %77 : vector<2x32xf32>
    %79 = arith.mulf %74, %78 : vector<2x32xf32>
    %cst_32 = arith.constant dense<0.000000e+00> : vector<2x128xf32>
    %80 = tpu.matmul %79, %18, %cst_32 {dimension_numbers = #tpu.dot_dimension_numbers<[1], [0], [0], [1], [0, 0, 1, 1], [], []>} : vector<2x32xf32>, vector<32x128xf32>, vector<2x128xf32> -> vector<2x128xf32>
    %81 = vector.broadcast %19 : vector<1x128xf32> to vector<2x128xf32>
    %82 = arith.addf %80, %81 : vector<2x128xf32>
    %cst_33 = arith.constant dense<0.000000e+00> : vector<2x128xf32>
    %83 = tpu.matmul %6, %17, %cst_33 {dimension_numbers = #tpu.dot_dimension_numbers<[1], [0], [0], [1], [0, 0, 1, 1], [], []>} : vector<2x32xf32>, vector<32x128xf32>, vector<2x128xf32> -> vector<2x128xf32>
    %84 = arith.addf %82, %83 : vector<2x128xf32>
    %85 = vector.extract_strided_slice %84 {offsets = [0, 0], sizes = [2, 32], strides = [1, 1]} : vector<2x128xf32> to vector<2x32xf32>
    %86 = arith.negf %85 : vector<2x32xf32>
    %87 = math.exp %86 : vector<2x32xf32>
    %cst_34 = arith.constant 1.000000e+00 : f32
    %88 = vector.broadcast %cst_34 : f32 to vector<2x32xf32>
    %89 = arith.addf %88, %87 : vector<2x32xf32>
    %90 = arith.divf %88, %89 : vector<2x32xf32>
    %91 = vector.extract_strided_slice %84 {offsets = [0, 32], sizes = [2, 32], strides = [1, 1]} : vector<2x128xf32> to vector<2x32xf32>
    %92 = arith.negf %91 : vector<2x32xf32>
    %93 = math.exp %92 : vector<2x32xf32>
    %cst_35 = arith.constant 1.000000e+00 : f32
    %94 = vector.broadcast %cst_35 : f32 to vector<2x32xf32>
    %95 = arith.addf %94, %93 : vector<2x32xf32>
    %96 = arith.divf %94, %95 : vector<2x32xf32>
    %97 = vector.extract_strided_slice %84 {offsets = [0, 64], sizes = [2, 32], strides = [1, 1]} : vector<2x128xf32> to vector<2x32xf32>
    %98 = math.tanh %97 : vector<2x32xf32>
    %99 = vector.extract_strided_slice %84 {offsets = [0, 96], sizes = [2, 32], strides = [1, 1]} : vector<2x128xf32> to vector<2x32xf32>
    %100 = arith.negf %99 : vector<2x32xf32>
    %101 = math.exp %100 : vector<2x32xf32>
    %cst_36 = arith.constant 1.000000e+00 : f32
    %102 = vector.broadcast %cst_36 : f32 to vector<2x32xf32>
    %103 = arith.addf %102, %101 : vector<2x32xf32>
    %104 = arith.divf %102, %103 : vector<2x32xf32>
    %105 = arith.mulf %96, %77 : vector<2x32xf32>
    %106 = arith.mulf %90, %98 : vector<2x32xf32>
    %107 = arith.addf %105, %106 : vector<2x32xf32>
    %108 = math.tanh %107 : vector<2x32xf32>
    %109 = arith.mulf %104, %108 : vector<2x32xf32>
    %cst_37 = arith.constant dense<0.000000e+00> : vector<2x128xf32>
    %110 = tpu.matmul %109, %18, %cst_37 {dimension_numbers = #tpu.dot_dimension_numbers<[1], [0], [0], [1], [0, 0, 1, 1], [], []>} : vector<2x32xf32>, vector<32x128xf32>, vector<2x128xf32> -> vector<2x128xf32>
    %111 = vector.broadcast %19 : vector<1x128xf32> to vector<2x128xf32>
    %112 = arith.addf %110, %111 : vector<2x128xf32>
    %cst_38 = arith.constant dense<0.000000e+00> : vector<2x128xf32>
    %113 = tpu.matmul %8, %17, %cst_38 {dimension_numbers = #tpu.dot_dimension_numbers<[1], [0], [0], [1], [0, 0, 1, 1], [], []>} : vector<2x32xf32>, vector<32x128xf32>, vector<2x128xf32> -> vector<2x128xf32>
    %114 = arith.addf %112, %113 : vector<2x128xf32>
    %115 = vector.extract_strided_slice %114 {offsets = [0, 0], sizes = [2, 32], strides = [1, 1]} : vector<2x128xf32> to vector<2x32xf32>
    %116 = arith.negf %115 : vector<2x32xf32>
    %117 = math.exp %116 : vector<2x32xf32>
    %cst_39 = arith.constant 1.000000e+00 : f32
    %118 = vector.broadcast %cst_39 : f32 to vector<2x32xf32>
    %119 = arith.addf %118, %117 : vector<2x32xf32>
    %120 = arith.divf %118, %119 : vector<2x32xf32>
    %121 = vector.extract_strided_slice %114 {offsets = [0, 32], sizes = [2, 32], strides = [1, 1]} : vector<2x128xf32> to vector<2x32xf32>
    %122 = arith.negf %121 : vector<2x32xf32>
    %123 = math.exp %122 : vector<2x32xf32>
    %cst_40 = arith.constant 1.000000e+00 : f32
    %124 = vector.broadcast %cst_40 : f32 to vector<2x32xf32>
    %125 = arith.addf %124, %123 : vector<2x32xf32>
    %126 = arith.divf %124, %125 : vector<2x32xf32>
    %127 = vector.extract_strided_slice %114 {offsets = [0, 64], sizes = [2, 32], strides = [1, 1]} : vector<2x128xf32> to vector<2x32xf32>
    %128 = math.tanh %127 : vector<2x32xf32>
    %129 = vector.extract_strided_slice %114 {offsets = [0, 96], sizes = [2, 32], strides = [1, 1]} : vector<2x128xf32> to vector<2x32xf32>
    %130 = arith.negf %129 : vector<2x32xf32>
    %131 = math.exp %130 : vector<2x32xf32>
    %cst_41 = arith.constant 1.000000e+00 : f32
    %132 = vector.broadcast %cst_41 : f32 to vector<2x32xf32>
    %133 = arith.addf %132, %131 : vector<2x32xf32>
    %134 = arith.divf %132, %133 : vector<2x32xf32>
    %135 = arith.mulf %126, %107 : vector<2x32xf32>
    %136 = arith.mulf %120, %128 : vector<2x32xf32>
    %137 = arith.addf %135, %136 : vector<2x32xf32>
    %138 = math.tanh %137 : vector<2x32xf32>
    %139 = arith.mulf %134, %138 : vector<2x32xf32>
    %cst_42 = arith.constant dense<0.000000e+00> : vector<2x128xf32>
    %140 = tpu.matmul %139, %18, %cst_42 {dimension_numbers = #tpu.dot_dimension_numbers<[1], [0], [0], [1], [0, 0, 1, 1], [], []>} : vector<2x32xf32>, vector<32x128xf32>, vector<2x128xf32> -> vector<2x128xf32>
    %141 = vector.broadcast %19 : vector<1x128xf32> to vector<2x128xf32>
    %142 = arith.addf %140, %141 : vector<2x128xf32>
    %cst_43 = arith.constant dense<0.000000e+00> : vector<2x128xf32>
    %143 = tpu.matmul %10, %17, %cst_43 {dimension_numbers = #tpu.dot_dimension_numbers<[1], [0], [0], [1], [0, 0, 1, 1], [], []>} : vector<2x32xf32>, vector<32x128xf32>, vector<2x128xf32> -> vector<2x128xf32>
    %144 = arith.addf %142, %143 : vector<2x128xf32>
    %145 = vector.extract_strided_slice %144 {offsets = [0, 0], sizes = [2, 32], strides = [1, 1]} : vector<2x128xf32> to vector<2x32xf32>
    %146 = arith.negf %145 : vector<2x32xf32>
    %147 = math.exp %146 : vector<2x32xf32>
    %cst_44 = arith.constant 1.000000e+00 : f32
    %148 = vector.broadcast %cst_44 : f32 to vector<2x32xf32>
    %149 = arith.addf %148, %147 : vector<2x32xf32>
    %150 = arith.divf %148, %149 : vector<2x32xf32>
    %151 = vector.extract_strided_slice %144 {offsets = [0, 32], sizes = [2, 32], strides = [1, 1]} : vector<2x128xf32> to vector<2x32xf32>
    %152 = arith.negf %151 : vector<2x32xf32>
    %153 = math.exp %152 : vector<2x32xf32>
    %cst_45 = arith.constant 1.000000e+00 : f32
    %154 = vector.broadcast %cst_45 : f32 to vector<2x32xf32>
    %155 = arith.addf %154, %153 : vector<2x32xf32>
    %156 = arith.divf %154, %155 : vector<2x32xf32>
    %157 = vector.extract_strided_slice %144 {offsets = [0, 64], sizes = [2, 32], strides = [1, 1]} : vector<2x128xf32> to vector<2x32xf32>
    %158 = math.tanh %157 : vector<2x32xf32>
    %159 = vector.extract_strided_slice %144 {offsets = [0, 96], sizes = [2, 32], strides = [1, 1]} : vector<2x128xf32> to vector<2x32xf32>
    %160 = arith.negf %159 : vector<2x32xf32>
    %161 = math.exp %160 : vector<2x32xf32>
    %cst_46 = arith.constant 1.000000e+00 : f32
    %162 = vector.broadcast %cst_46 : f32 to vector<2x32xf32>
    %163 = arith.addf %162, %161 : vector<2x32xf32>
    %164 = arith.divf %162, %163 : vector<2x32xf32>
    %165 = arith.mulf %156, %137 : vector<2x32xf32>
    %166 = arith.mulf %150, %158 : vector<2x32xf32>
    %167 = arith.addf %165, %166 : vector<2x32xf32>
    %168 = math.tanh %167 : vector<2x32xf32>
    %169 = arith.mulf %164, %168 : vector<2x32xf32>
    %cst_47 = arith.constant dense<0.000000e+00> : vector<2x128xf32>
    %170 = tpu.matmul %169, %18, %cst_47 {dimension_numbers = #tpu.dot_dimension_numbers<[1], [0], [0], [1], [0, 0, 1, 1], [], []>} : vector<2x32xf32>, vector<32x128xf32>, vector<2x128xf32> -> vector<2x128xf32>
    %171 = vector.broadcast %19 : vector<1x128xf32> to vector<2x128xf32>
    %172 = arith.addf %170, %171 : vector<2x128xf32>
    %cst_48 = arith.constant dense<0.000000e+00> : vector<2x128xf32>
    %173 = tpu.matmul %12, %17, %cst_48 {dimension_numbers = #tpu.dot_dimension_numbers<[1], [0], [0], [1], [0, 0, 1, 1], [], []>} : vector<2x32xf32>, vector<32x128xf32>, vector<2x128xf32> -> vector<2x128xf32>
    %174 = arith.addf %172, %173 : vector<2x128xf32>
    %175 = vector.extract_strided_slice %174 {offsets = [0, 0], sizes = [2, 32], strides = [1, 1]} : vector<2x128xf32> to vector<2x32xf32>
    %176 = arith.negf %175 : vector<2x32xf32>
    %177 = math.exp %176 : vector<2x32xf32>
    %cst_49 = arith.constant 1.000000e+00 : f32
    %178 = vector.broadcast %cst_49 : f32 to vector<2x32xf32>
    %179 = arith.addf %178, %177 : vector<2x32xf32>
    %180 = arith.divf %178, %179 : vector<2x32xf32>
    %181 = vector.extract_strided_slice %174 {offsets = [0, 32], sizes = [2, 32], strides = [1, 1]} : vector<2x128xf32> to vector<2x32xf32>
    %182 = arith.negf %181 : vector<2x32xf32>
    %183 = math.exp %182 : vector<2x32xf32>
    %cst_50 = arith.constant 1.000000e+00 : f32
    %184 = vector.broadcast %cst_50 : f32 to vector<2x32xf32>
    %185 = arith.addf %184, %183 : vector<2x32xf32>
    %186 = arith.divf %184, %185 : vector<2x32xf32>
    %187 = vector.extract_strided_slice %174 {offsets = [0, 64], sizes = [2, 32], strides = [1, 1]} : vector<2x128xf32> to vector<2x32xf32>
    %188 = math.tanh %187 : vector<2x32xf32>
    %189 = vector.extract_strided_slice %174 {offsets = [0, 96], sizes = [2, 32], strides = [1, 1]} : vector<2x128xf32> to vector<2x32xf32>
    %190 = arith.negf %189 : vector<2x32xf32>
    %191 = math.exp %190 : vector<2x32xf32>
    %cst_51 = arith.constant 1.000000e+00 : f32
    %192 = vector.broadcast %cst_51 : f32 to vector<2x32xf32>
    %193 = arith.addf %192, %191 : vector<2x32xf32>
    %194 = arith.divf %192, %193 : vector<2x32xf32>
    %195 = arith.mulf %186, %167 : vector<2x32xf32>
    %196 = arith.mulf %180, %188 : vector<2x32xf32>
    %197 = arith.addf %195, %196 : vector<2x32xf32>
    %198 = math.tanh %197 : vector<2x32xf32>
    %199 = arith.mulf %194, %198 : vector<2x32xf32>
    %cst_52 = arith.constant dense<0.000000e+00> : vector<2x128xf32>
    %200 = tpu.matmul %199, %18, %cst_52 {dimension_numbers = #tpu.dot_dimension_numbers<[1], [0], [0], [1], [0, 0, 1, 1], [], []>} : vector<2x32xf32>, vector<32x128xf32>, vector<2x128xf32> -> vector<2x128xf32>
    %201 = vector.broadcast %19 : vector<1x128xf32> to vector<2x128xf32>
    %202 = arith.addf %200, %201 : vector<2x128xf32>
    %cst_53 = arith.constant dense<0.000000e+00> : vector<2x128xf32>
    %203 = tpu.matmul %14, %17, %cst_53 {dimension_numbers = #tpu.dot_dimension_numbers<[1], [0], [0], [1], [0, 0, 1, 1], [], []>} : vector<2x32xf32>, vector<32x128xf32>, vector<2x128xf32> -> vector<2x128xf32>
    %204 = arith.addf %202, %203 : vector<2x128xf32>
    %205 = vector.extract_strided_slice %204 {offsets = [0, 0], sizes = [2, 32], strides = [1, 1]} : vector<2x128xf32> to vector<2x32xf32>
    %206 = arith.negf %205 : vector<2x32xf32>
    %207 = math.exp %206 : vector<2x32xf32>
    %cst_54 = arith.constant 1.000000e+00 : f32
    %208 = vector.broadcast %cst_54 : f32 to vector<2x32xf32>
    %209 = arith.addf %208, %207 : vector<2x32xf32>
    %210 = arith.divf %208, %209 : vector<2x32xf32>
    %211 = vector.extract_strided_slice %204 {offsets = [0, 32], sizes = [2, 32], strides = [1, 1]} : vector<2x128xf32> to vector<2x32xf32>
    %212 = arith.negf %211 : vector<2x32xf32>
    %213 = math.exp %212 : vector<2x32xf32>
    %cst_55 = arith.constant 1.000000e+00 : f32
    %214 = vector.broadcast %cst_55 : f32 to vector<2x32xf32>
    %215 = arith.addf %214, %213 : vector<2x32xf32>
    %216 = arith.divf %214, %215 : vector<2x32xf32>
    %217 = vector.extract_strided_slice %204 {offsets = [0, 64], sizes = [2, 32], strides = [1, 1]} : vector<2x128xf32> to vector<2x32xf32>
    %218 = math.tanh %217 : vector<2x32xf32>
    %219 = vector.extract_strided_slice %204 {offsets = [0, 96], sizes = [2, 32], strides = [1, 1]} : vector<2x128xf32> to vector<2x32xf32>
    %220 = arith.negf %219 : vector<2x32xf32>
    %221 = math.exp %220 : vector<2x32xf32>
    %cst_56 = arith.constant 1.000000e+00 : f32
    %222 = vector.broadcast %cst_56 : f32 to vector<2x32xf32>
    %223 = arith.addf %222, %221 : vector<2x32xf32>
    %224 = arith.divf %222, %223 : vector<2x32xf32>
    %225 = arith.mulf %216, %197 : vector<2x32xf32>
    %226 = arith.mulf %210, %218 : vector<2x32xf32>
    %227 = arith.addf %225, %226 : vector<2x32xf32>
    %228 = math.tanh %227 : vector<2x32xf32>
    %229 = arith.mulf %224, %228 : vector<2x32xf32>
    %cst_57 = arith.constant dense<0.000000e+00> : vector<2x128xf32>
    %230 = tpu.matmul %229, %18, %cst_57 {dimension_numbers = #tpu.dot_dimension_numbers<[1], [0], [0], [1], [0, 0, 1, 1], [], []>} : vector<2x32xf32>, vector<32x128xf32>, vector<2x128xf32> -> vector<2x128xf32>
    %231 = vector.broadcast %19 : vector<1x128xf32> to vector<2x128xf32>
    %232 = arith.addf %230, %231 : vector<2x128xf32>
    %cst_58 = arith.constant dense<0.000000e+00> : vector<2x128xf32>
    %233 = tpu.matmul %16, %17, %cst_58 {dimension_numbers = #tpu.dot_dimension_numbers<[1], [0], [0], [1], [0, 0, 1, 1], [], []>} : vector<2x32xf32>, vector<32x128xf32>, vector<2x128xf32> -> vector<2x128xf32>
    %234 = arith.addf %232, %233 : vector<2x128xf32>
    %235 = vector.extract_strided_slice %234 {offsets = [0, 0], sizes = [2, 32], strides = [1, 1]} : vector<2x128xf32> to vector<2x32xf32>
    %236 = arith.negf %235 : vector<2x32xf32>
    %237 = math.exp %236 : vector<2x32xf32>
    %cst_59 = arith.constant 1.000000e+00 : f32
    %238 = vector.broadcast %cst_59 : f32 to vector<2x32xf32>
    %239 = arith.addf %238, %237 : vector<2x32xf32>
    %240 = arith.divf %238, %239 : vector<2x32xf32>
    %241 = vector.extract_strided_slice %234 {offsets = [0, 32], sizes = [2, 32], strides = [1, 1]} : vector<2x128xf32> to vector<2x32xf32>
    %242 = arith.negf %241 : vector<2x32xf32>
    %243 = math.exp %242 : vector<2x32xf32>
    %cst_60 = arith.constant 1.000000e+00 : f32
    %244 = vector.broadcast %cst_60 : f32 to vector<2x32xf32>
    %245 = arith.addf %244, %243 : vector<2x32xf32>
    %246 = arith.divf %244, %245 : vector<2x32xf32>
    %247 = vector.extract_strided_slice %234 {offsets = [0, 64], sizes = [2, 32], strides = [1, 1]} : vector<2x128xf32> to vector<2x32xf32>
    %248 = math.tanh %247 : vector<2x32xf32>
    %249 = vector.extract_strided_slice %234 {offsets = [0, 96], sizes = [2, 32], strides = [1, 1]} : vector<2x128xf32> to vector<2x32xf32>
    %250 = arith.negf %249 : vector<2x32xf32>
    %251 = math.exp %250 : vector<2x32xf32>
    %cst_61 = arith.constant 1.000000e+00 : f32
    %252 = vector.broadcast %cst_61 : f32 to vector<2x32xf32>
    %253 = arith.addf %252, %251 : vector<2x32xf32>
    %254 = arith.divf %252, %253 : vector<2x32xf32>
    %255 = arith.mulf %246, %227 : vector<2x32xf32>
    %256 = arith.mulf %240, %248 : vector<2x32xf32>
    %257 = arith.addf %255, %256 : vector<2x32xf32>
    %258 = math.tanh %257 : vector<2x32xf32>
    %259 = arith.mulf %254, %258 : vector<2x32xf32>
    %c0_62 = arith.constant 0 : index
    %c0_63 = arith.constant 0 : index
    %260 = vector.load %arg5[%c0_62, %c0_63] : memref<32x128xf32, #tpu.memory_space<vmem>>, vector<32x128xf32>
    %c0_64 = arith.constant 0 : index
    %c0_65 = arith.constant 0 : index
    %261 = vector.load %arg6[%c0_64, %c0_65] : memref<32x128xf32, #tpu.memory_space<vmem>>, vector<32x128xf32>
    %c0_66 = arith.constant 0 : index
    %c0_67 = arith.constant 0 : index
    %262 = vector.load %arg7[%c0_66, %c0_67] : memref<1x128xf32, #tpu.memory_space<vmem>>, vector<1x128xf32>
    %cst_68 = arith.constant dense<0.000000e+00> : vector<2x128xf32>
    %263 = tpu.matmul %0, %261, %cst_68 {dimension_numbers = #tpu.dot_dimension_numbers<[1], [0], [0], [1], [0, 0, 1, 1], [], []>} : vector<2x32xf32>, vector<32x128xf32>, vector<2x128xf32> -> vector<2x128xf32>
    %264 = vector.broadcast %262 : vector<1x128xf32> to vector<2x128xf32>
    %265 = arith.addf %263, %264 : vector<2x128xf32>
    %cst_69 = arith.constant dense<0.000000e+00> : vector<2x128xf32>
    %266 = tpu.matmul %16, %260, %cst_69 {dimension_numbers = #tpu.dot_dimension_numbers<[1], [0], [0], [1], [0, 0, 1, 1], [], []>} : vector<2x32xf32>, vector<32x128xf32>, vector<2x128xf32> -> vector<2x128xf32>
    %267 = arith.addf %265, %266 : vector<2x128xf32>
    %268 = vector.extract_strided_slice %267 {offsets = [0, 0], sizes = [2, 32], strides = [1, 1]} : vector<2x128xf32> to vector<2x32xf32>
    %269 = arith.negf %268 : vector<2x32xf32>
    %270 = math.exp %269 : vector<2x32xf32>
    %cst_70 = arith.constant 1.000000e+00 : f32
    %271 = vector.broadcast %cst_70 : f32 to vector<2x32xf32>
    %272 = arith.addf %271, %270 : vector<2x32xf32>
    %273 = arith.divf %271, %272 : vector<2x32xf32>
    %274 = vector.extract_strided_slice %267 {offsets = [0, 32], sizes = [2, 32], strides = [1, 1]} : vector<2x128xf32> to vector<2x32xf32>
    %275 = arith.negf %274 : vector<2x32xf32>
    %276 = math.exp %275 : vector<2x32xf32>
    %cst_71 = arith.constant 1.000000e+00 : f32
    %277 = vector.broadcast %cst_71 : f32 to vector<2x32xf32>
    %278 = arith.addf %277, %276 : vector<2x32xf32>
    %279 = arith.divf %277, %278 : vector<2x32xf32>
    %280 = vector.extract_strided_slice %267 {offsets = [0, 64], sizes = [2, 32], strides = [1, 1]} : vector<2x128xf32> to vector<2x32xf32>
    %281 = math.tanh %280 : vector<2x32xf32>
    %282 = vector.extract_strided_slice %267 {offsets = [0, 96], sizes = [2, 32], strides = [1, 1]} : vector<2x128xf32> to vector<2x32xf32>
    %283 = arith.negf %282 : vector<2x32xf32>
    %284 = math.exp %283 : vector<2x32xf32>
    %cst_72 = arith.constant 1.000000e+00 : f32
    %285 = vector.broadcast %cst_72 : f32 to vector<2x32xf32>
    %286 = arith.addf %285, %284 : vector<2x32xf32>
    %287 = arith.divf %285, %286 : vector<2x32xf32>
    %288 = arith.mulf %279, %0 : vector<2x32xf32>
    %289 = arith.mulf %273, %281 : vector<2x32xf32>
    %290 = arith.addf %288, %289 : vector<2x32xf32>
    %291 = math.tanh %290 : vector<2x32xf32>
    %292 = arith.mulf %287, %291 : vector<2x32xf32>
    %cst_73 = arith.constant dense<0.000000e+00> : vector<2x128xf32>
    %293 = tpu.matmul %292, %261, %cst_73 {dimension_numbers = #tpu.dot_dimension_numbers<[1], [0], [0], [1], [0, 0, 1, 1], [], []>} : vector<2x32xf32>, vector<32x128xf32>, vector<2x128xf32> -> vector<2x128xf32>
    %294 = vector.broadcast %262 : vector<1x128xf32> to vector<2x128xf32>
    %295 = arith.addf %293, %294 : vector<2x128xf32>
    %cst_74 = arith.constant dense<0.000000e+00> : vector<2x128xf32>
    %296 = tpu.matmul %14, %260, %cst_74 {dimension_numbers = #tpu.dot_dimension_numbers<[1], [0], [0], [1], [0, 0, 1, 1], [], []>} : vector<2x32xf32>, vector<32x128xf32>, vector<2x128xf32> -> vector<2x128xf32>
    %297 = arith.addf %295, %296 : vector<2x128xf32>
    %298 = vector.extract_strided_slice %297 {offsets = [0, 0], sizes = [2, 32], strides = [1, 1]} : vector<2x128xf32> to vector<2x32xf32>
    %299 = arith.negf %298 : vector<2x32xf32>
    %300 = math.exp %299 : vector<2x32xf32>
    %cst_75 = arith.constant 1.000000e+00 : f32
    %301 = vector.broadcast %cst_75 : f32 to vector<2x32xf32>
    %302 = arith.addf %301, %300 : vector<2x32xf32>
    %303 = arith.divf %301, %302 : vector<2x32xf32>
    %304 = vector.extract_strided_slice %297 {offsets = [0, 32], sizes = [2, 32], strides = [1, 1]} : vector<2x128xf32> to vector<2x32xf32>
    %305 = arith.negf %304 : vector<2x32xf32>
    %306 = math.exp %305 : vector<2x32xf32>
    %cst_76 = arith.constant 1.000000e+00 : f32
    %307 = vector.broadcast %cst_76 : f32 to vector<2x32xf32>
    %308 = arith.addf %307, %306 : vector<2x32xf32>
    %309 = arith.divf %307, %308 : vector<2x32xf32>
    %310 = vector.extract_strided_slice %297 {offsets = [0, 64], sizes = [2, 32], strides = [1, 1]} : vector<2x128xf32> to vector<2x32xf32>
    %311 = math.tanh %310 : vector<2x32xf32>
    %312 = vector.extract_strided_slice %297 {offsets = [0, 96], sizes = [2, 32], strides = [1, 1]} : vector<2x128xf32> to vector<2x32xf32>
    %313 = arith.negf %312 : vector<2x32xf32>
    %314 = math.exp %313 : vector<2x32xf32>
    %cst_77 = arith.constant 1.000000e+00 : f32
    %315 = vector.broadcast %cst_77 : f32 to vector<2x32xf32>
    %316 = arith.addf %315, %314 : vector<2x32xf32>
    %317 = arith.divf %315, %316 : vector<2x32xf32>
    %318 = arith.mulf %309, %290 : vector<2x32xf32>
    %319 = arith.mulf %303, %311 : vector<2x32xf32>
    %320 = arith.addf %318, %319 : vector<2x32xf32>
    %321 = math.tanh %320 : vector<2x32xf32>
    %322 = arith.mulf %317, %321 : vector<2x32xf32>
    %cst_78 = arith.constant dense<0.000000e+00> : vector<2x128xf32>
    %323 = tpu.matmul %322, %261, %cst_78 {dimension_numbers = #tpu.dot_dimension_numbers<[1], [0], [0], [1], [0, 0, 1, 1], [], []>} : vector<2x32xf32>, vector<32x128xf32>, vector<2x128xf32> -> vector<2x128xf32>
    %324 = vector.broadcast %262 : vector<1x128xf32> to vector<2x128xf32>
    %325 = arith.addf %323, %324 : vector<2x128xf32>
    %cst_79 = arith.constant dense<0.000000e+00> : vector<2x128xf32>
    %326 = tpu.matmul %12, %260, %cst_79 {dimension_numbers = #tpu.dot_dimension_numbers<[1], [0], [0], [1], [0, 0, 1, 1], [], []>} : vector<2x32xf32>, vector<32x128xf32>, vector<2x128xf32> -> vector<2x128xf32>
    %327 = arith.addf %325, %326 : vector<2x128xf32>
    %328 = vector.extract_strided_slice %327 {offsets = [0, 0], sizes = [2, 32], strides = [1, 1]} : vector<2x128xf32> to vector<2x32xf32>
    %329 = arith.negf %328 : vector<2x32xf32>
    %330 = math.exp %329 : vector<2x32xf32>
    %cst_80 = arith.constant 1.000000e+00 : f32
    %331 = vector.broadcast %cst_80 : f32 to vector<2x32xf32>
    %332 = arith.addf %331, %330 : vector<2x32xf32>
    %333 = arith.divf %331, %332 : vector<2x32xf32>
    %334 = vector.extract_strided_slice %327 {offsets = [0, 32], sizes = [2, 32], strides = [1, 1]} : vector<2x128xf32> to vector<2x32xf32>
    %335 = arith.negf %334 : vector<2x32xf32>
    %336 = math.exp %335 : vector<2x32xf32>
    %cst_81 = arith.constant 1.000000e+00 : f32
    %337 = vector.broadcast %cst_81 : f32 to vector<2x32xf32>
    %338 = arith.addf %337, %336 : vector<2x32xf32>
    %339 = arith.divf %337, %338 : vector<2x32xf32>
    %340 = vector.extract_strided_slice %327 {offsets = [0, 64], sizes = [2, 32], strides = [1, 1]} : vector<2x128xf32> to vector<2x32xf32>
    %341 = math.tanh %340 : vector<2x32xf32>
    %342 = vector.extract_strided_slice %327 {offsets = [0, 96], sizes = [2, 32], strides = [1, 1]} : vector<2x128xf32> to vector<2x32xf32>
    %343 = arith.negf %342 : vector<2x32xf32>
    %344 = math.exp %343 : vector<2x32xf32>
    %cst_82 = arith.constant 1.000000e+00 : f32
    %345 = vector.broadcast %cst_82 : f32 to vector<2x32xf32>
    %346 = arith.addf %345, %344 : vector<2x32xf32>
    %347 = arith.divf %345, %346 : vector<2x32xf32>
    %348 = arith.mulf %339, %320 : vector<2x32xf32>
    %349 = arith.mulf %333, %341 : vector<2x32xf32>
    %350 = arith.addf %348, %349 : vector<2x32xf32>
    %351 = math.tanh %350 : vector<2x32xf32>
    %352 = arith.mulf %347, %351 : vector<2x32xf32>
    %cst_83 = arith.constant dense<0.000000e+00> : vector<2x128xf32>
    %353 = tpu.matmul %352, %261, %cst_83 {dimension_numbers = #tpu.dot_dimension_numbers<[1], [0], [0], [1], [0, 0, 1, 1], [], []>} : vector<2x32xf32>, vector<32x128xf32>, vector<2x128xf32> -> vector<2x128xf32>
    %354 = vector.broadcast %262 : vector<1x128xf32> to vector<2x128xf32>
    %355 = arith.addf %353, %354 : vector<2x128xf32>
    %cst_84 = arith.constant dense<0.000000e+00> : vector<2x128xf32>
    %356 = tpu.matmul %10, %260, %cst_84 {dimension_numbers = #tpu.dot_dimension_numbers<[1], [0], [0], [1], [0, 0, 1, 1], [], []>} : vector<2x32xf32>, vector<32x128xf32>, vector<2x128xf32> -> vector<2x128xf32>
    %357 = arith.addf %355, %356 : vector<2x128xf32>
    %358 = vector.extract_strided_slice %357 {offsets = [0, 0], sizes = [2, 32], strides = [1, 1]} : vector<2x128xf32> to vector<2x32xf32>
    %359 = arith.negf %358 : vector<2x32xf32>
    %360 = math.exp %359 : vector<2x32xf32>
    %cst_85 = arith.constant 1.000000e+00 : f32
    %361 = vector.broadcast %cst_85 : f32 to vector<2x32xf32>
    %362 = arith.addf %361, %360 : vector<2x32xf32>
    %363 = arith.divf %361, %362 : vector<2x32xf32>
    %364 = vector.extract_strided_slice %357 {offsets = [0, 32], sizes = [2, 32], strides = [1, 1]} : vector<2x128xf32> to vector<2x32xf32>
    %365 = arith.negf %364 : vector<2x32xf32>
    %366 = math.exp %365 : vector<2x32xf32>
    %cst_86 = arith.constant 1.000000e+00 : f32
    %367 = vector.broadcast %cst_86 : f32 to vector<2x32xf32>
    %368 = arith.addf %367, %366 : vector<2x32xf32>
    %369 = arith.divf %367, %368 : vector<2x32xf32>
    %370 = vector.extract_strided_slice %357 {offsets = [0, 64], sizes = [2, 32], strides = [1, 1]} : vector<2x128xf32> to vector<2x32xf32>
    %371 = math.tanh %370 : vector<2x32xf32>
    %372 = vector.extract_strided_slice %357 {offsets = [0, 96], sizes = [2, 32], strides = [1, 1]} : vector<2x128xf32> to vector<2x32xf32>
    %373 = arith.negf %372 : vector<2x32xf32>
    %374 = math.exp %373 : vector<2x32xf32>
    %cst_87 = arith.constant 1.000000e+00 : f32
    %375 = vector.broadcast %cst_87 : f32 to vector<2x32xf32>
    %376 = arith.addf %375, %374 : vector<2x32xf32>
    %377 = arith.divf %375, %376 : vector<2x32xf32>
    %378 = arith.mulf %369, %350 : vector<2x32xf32>
    %379 = arith.mulf %363, %371 : vector<2x32xf32>
    %380 = arith.addf %378, %379 : vector<2x32xf32>
    %381 = math.tanh %380 : vector<2x32xf32>
    %382 = arith.mulf %377, %381 : vector<2x32xf32>
    %cst_88 = arith.constant dense<0.000000e+00> : vector<2x128xf32>
    %383 = tpu.matmul %382, %261, %cst_88 {dimension_numbers = #tpu.dot_dimension_numbers<[1], [0], [0], [1], [0, 0, 1, 1], [], []>} : vector<2x32xf32>, vector<32x128xf32>, vector<2x128xf32> -> vector<2x128xf32>
    %384 = vector.broadcast %262 : vector<1x128xf32> to vector<2x128xf32>
    %385 = arith.addf %383, %384 : vector<2x128xf32>
    %cst_89 = arith.constant dense<0.000000e+00> : vector<2x128xf32>
    %386 = tpu.matmul %8, %260, %cst_89 {dimension_numbers = #tpu.dot_dimension_numbers<[1], [0], [0], [1], [0, 0, 1, 1], [], []>} : vector<2x32xf32>, vector<32x128xf32>, vector<2x128xf32> -> vector<2x128xf32>
    %387 = arith.addf %385, %386 : vector<2x128xf32>
    %388 = vector.extract_strided_slice %387 {offsets = [0, 0], sizes = [2, 32], strides = [1, 1]} : vector<2x128xf32> to vector<2x32xf32>
    %389 = arith.negf %388 : vector<2x32xf32>
    %390 = math.exp %389 : vector<2x32xf32>
    %cst_90 = arith.constant 1.000000e+00 : f32
    %391 = vector.broadcast %cst_90 : f32 to vector<2x32xf32>
    %392 = arith.addf %391, %390 : vector<2x32xf32>
    %393 = arith.divf %391, %392 : vector<2x32xf32>
    %394 = vector.extract_strided_slice %387 {offsets = [0, 32], sizes = [2, 32], strides = [1, 1]} : vector<2x128xf32> to vector<2x32xf32>
    %395 = arith.negf %394 : vector<2x32xf32>
    %396 = math.exp %395 : vector<2x32xf32>
    %cst_91 = arith.constant 1.000000e+00 : f32
    %397 = vector.broadcast %cst_91 : f32 to vector<2x32xf32>
    %398 = arith.addf %397, %396 : vector<2x32xf32>
    %399 = arith.divf %397, %398 : vector<2x32xf32>
    %400 = vector.extract_strided_slice %387 {offsets = [0, 64], sizes = [2, 32], strides = [1, 1]} : vector<2x128xf32> to vector<2x32xf32>
    %401 = math.tanh %400 : vector<2x32xf32>
    %402 = vector.extract_strided_slice %387 {offsets = [0, 96], sizes = [2, 32], strides = [1, 1]} : vector<2x128xf32> to vector<2x32xf32>
    %403 = arith.negf %402 : vector<2x32xf32>
    %404 = math.exp %403 : vector<2x32xf32>
    %cst_92 = arith.constant 1.000000e+00 : f32
    %405 = vector.broadcast %cst_92 : f32 to vector<2x32xf32>
    %406 = arith.addf %405, %404 : vector<2x32xf32>
    %407 = arith.divf %405, %406 : vector<2x32xf32>
    %408 = arith.mulf %399, %380 : vector<2x32xf32>
    %409 = arith.mulf %393, %401 : vector<2x32xf32>
    %410 = arith.addf %408, %409 : vector<2x32xf32>
    %411 = math.tanh %410 : vector<2x32xf32>
    %412 = arith.mulf %407, %411 : vector<2x32xf32>
    %cst_93 = arith.constant dense<0.000000e+00> : vector<2x128xf32>
    %413 = tpu.matmul %412, %261, %cst_93 {dimension_numbers = #tpu.dot_dimension_numbers<[1], [0], [0], [1], [0, 0, 1, 1], [], []>} : vector<2x32xf32>, vector<32x128xf32>, vector<2x128xf32> -> vector<2x128xf32>
    %414 = vector.broadcast %262 : vector<1x128xf32> to vector<2x128xf32>
    %415 = arith.addf %413, %414 : vector<2x128xf32>
    %cst_94 = arith.constant dense<0.000000e+00> : vector<2x128xf32>
    %416 = tpu.matmul %6, %260, %cst_94 {dimension_numbers = #tpu.dot_dimension_numbers<[1], [0], [0], [1], [0, 0, 1, 1], [], []>} : vector<2x32xf32>, vector<32x128xf32>, vector<2x128xf32> -> vector<2x128xf32>
    %417 = arith.addf %415, %416 : vector<2x128xf32>
    %418 = vector.extract_strided_slice %417 {offsets = [0, 0], sizes = [2, 32], strides = [1, 1]} : vector<2x128xf32> to vector<2x32xf32>
    %419 = arith.negf %418 : vector<2x32xf32>
    %420 = math.exp %419 : vector<2x32xf32>
    %cst_95 = arith.constant 1.000000e+00 : f32
    %421 = vector.broadcast %cst_95 : f32 to vector<2x32xf32>
    %422 = arith.addf %421, %420 : vector<2x32xf32>
    %423 = arith.divf %421, %422 : vector<2x32xf32>
    %424 = vector.extract_strided_slice %417 {offsets = [0, 32], sizes = [2, 32], strides = [1, 1]} : vector<2x128xf32> to vector<2x32xf32>
    %425 = arith.negf %424 : vector<2x32xf32>
    %426 = math.exp %425 : vector<2x32xf32>
    %cst_96 = arith.constant 1.000000e+00 : f32
    %427 = vector.broadcast %cst_96 : f32 to vector<2x32xf32>
    %428 = arith.addf %427, %426 : vector<2x32xf32>
    %429 = arith.divf %427, %428 : vector<2x32xf32>
    %430 = vector.extract_strided_slice %417 {offsets = [0, 64], sizes = [2, 32], strides = [1, 1]} : vector<2x128xf32> to vector<2x32xf32>
    %431 = math.tanh %430 : vector<2x32xf32>
    %432 = vector.extract_strided_slice %417 {offsets = [0, 96], sizes = [2, 32], strides = [1, 1]} : vector<2x128xf32> to vector<2x32xf32>
    %433 = arith.negf %432 : vector<2x32xf32>
    %434 = math.exp %433 : vector<2x32xf32>
    %cst_97 = arith.constant 1.000000e+00 : f32
    %435 = vector.broadcast %cst_97 : f32 to vector<2x32xf32>
    %436 = arith.addf %435, %434 : vector<2x32xf32>
    %437 = arith.divf %435, %436 : vector<2x32xf32>
    %438 = arith.mulf %429, %410 : vector<2x32xf32>
    %439 = arith.mulf %423, %431 : vector<2x32xf32>
    %440 = arith.addf %438, %439 : vector<2x32xf32>
    %441 = math.tanh %440 : vector<2x32xf32>
    %442 = arith.mulf %437, %441 : vector<2x32xf32>
    %cst_98 = arith.constant dense<0.000000e+00> : vector<2x128xf32>
    %443 = tpu.matmul %442, %261, %cst_98 {dimension_numbers = #tpu.dot_dimension_numbers<[1], [0], [0], [1], [0, 0, 1, 1], [], []>} : vector<2x32xf32>, vector<32x128xf32>, vector<2x128xf32> -> vector<2x128xf32>
    %444 = vector.broadcast %262 : vector<1x128xf32> to vector<2x128xf32>
    %445 = arith.addf %443, %444 : vector<2x128xf32>
    %cst_99 = arith.constant dense<0.000000e+00> : vector<2x128xf32>
    %446 = tpu.matmul %4, %260, %cst_99 {dimension_numbers = #tpu.dot_dimension_numbers<[1], [0], [0], [1], [0, 0, 1, 1], [], []>} : vector<2x32xf32>, vector<32x128xf32>, vector<2x128xf32> -> vector<2x128xf32>
    %447 = arith.addf %445, %446 : vector<2x128xf32>
    %448 = vector.extract_strided_slice %447 {offsets = [0, 0], sizes = [2, 32], strides = [1, 1]} : vector<2x128xf32> to vector<2x32xf32>
    %449 = arith.negf %448 : vector<2x32xf32>
    %450 = math.exp %449 : vector<2x32xf32>
    %cst_100 = arith.constant 1.000000e+00 : f32
    %451 = vector.broadcast %cst_100 : f32 to vector<2x32xf32>
    %452 = arith.addf %451, %450 : vector<2x32xf32>
    %453 = arith.divf %451, %452 : vector<2x32xf32>
    %454 = vector.extract_strided_slice %447 {offsets = [0, 32], sizes = [2, 32], strides = [1, 1]} : vector<2x128xf32> to vector<2x32xf32>
    %455 = arith.negf %454 : vector<2x32xf32>
    %456 = math.exp %455 : vector<2x32xf32>
    %cst_101 = arith.constant 1.000000e+00 : f32
    %457 = vector.broadcast %cst_101 : f32 to vector<2x32xf32>
    %458 = arith.addf %457, %456 : vector<2x32xf32>
    %459 = arith.divf %457, %458 : vector<2x32xf32>
    %460 = vector.extract_strided_slice %447 {offsets = [0, 64], sizes = [2, 32], strides = [1, 1]} : vector<2x128xf32> to vector<2x32xf32>
    %461 = math.tanh %460 : vector<2x32xf32>
    %462 = vector.extract_strided_slice %447 {offsets = [0, 96], sizes = [2, 32], strides = [1, 1]} : vector<2x128xf32> to vector<2x32xf32>
    %463 = arith.negf %462 : vector<2x32xf32>
    %464 = math.exp %463 : vector<2x32xf32>
    %cst_102 = arith.constant 1.000000e+00 : f32
    %465 = vector.broadcast %cst_102 : f32 to vector<2x32xf32>
    %466 = arith.addf %465, %464 : vector<2x32xf32>
    %467 = arith.divf %465, %466 : vector<2x32xf32>
    %468 = arith.mulf %459, %440 : vector<2x32xf32>
    %469 = arith.mulf %453, %461 : vector<2x32xf32>
    %470 = arith.addf %468, %469 : vector<2x32xf32>
    %471 = math.tanh %470 : vector<2x32xf32>
    %472 = arith.mulf %467, %471 : vector<2x32xf32>
    %cst_103 = arith.constant dense<0.000000e+00> : vector<2x128xf32>
    %473 = tpu.matmul %472, %261, %cst_103 {dimension_numbers = #tpu.dot_dimension_numbers<[1], [0], [0], [1], [0, 0, 1, 1], [], []>} : vector<2x32xf32>, vector<32x128xf32>, vector<2x128xf32> -> vector<2x128xf32>
    %474 = vector.broadcast %262 : vector<1x128xf32> to vector<2x128xf32>
    %475 = arith.addf %473, %474 : vector<2x128xf32>
    %cst_104 = arith.constant dense<0.000000e+00> : vector<2x128xf32>
    %476 = tpu.matmul %2, %260, %cst_104 {dimension_numbers = #tpu.dot_dimension_numbers<[1], [0], [0], [1], [0, 0, 1, 1], [], []>} : vector<2x32xf32>, vector<32x128xf32>, vector<2x128xf32> -> vector<2x128xf32>
    %477 = arith.addf %475, %476 : vector<2x128xf32>
    %478 = vector.extract_strided_slice %477 {offsets = [0, 0], sizes = [2, 32], strides = [1, 1]} : vector<2x128xf32> to vector<2x32xf32>
    %479 = arith.negf %478 : vector<2x32xf32>
    %480 = math.exp %479 : vector<2x32xf32>
    %cst_105 = arith.constant 1.000000e+00 : f32
    %481 = vector.broadcast %cst_105 : f32 to vector<2x32xf32>
    %482 = arith.addf %481, %480 : vector<2x32xf32>
    %483 = arith.divf %481, %482 : vector<2x32xf32>
    %484 = vector.extract_strided_slice %477 {offsets = [0, 32], sizes = [2, 32], strides = [1, 1]} : vector<2x128xf32> to vector<2x32xf32>
    %485 = arith.negf %484 : vector<2x32xf32>
    %486 = math.exp %485 : vector<2x32xf32>
    %cst_106 = arith.constant 1.000000e+00 : f32
    %487 = vector.broadcast %cst_106 : f32 to vector<2x32xf32>
    %488 = arith.addf %487, %486 : vector<2x32xf32>
    %489 = arith.divf %487, %488 : vector<2x32xf32>
    %490 = vector.extract_strided_slice %477 {offsets = [0, 64], sizes = [2, 32], strides = [1, 1]} : vector<2x128xf32> to vector<2x32xf32>
    %491 = math.tanh %490 : vector<2x32xf32>
    %492 = vector.extract_strided_slice %477 {offsets = [0, 96], sizes = [2, 32], strides = [1, 1]} : vector<2x128xf32> to vector<2x32xf32>
    %493 = arith.negf %492 : vector<2x32xf32>
    %494 = math.exp %493 : vector<2x32xf32>
    %cst_107 = arith.constant 1.000000e+00 : f32
    %495 = vector.broadcast %cst_107 : f32 to vector<2x32xf32>
    %496 = arith.addf %495, %494 : vector<2x32xf32>
    %497 = arith.divf %495, %496 : vector<2x32xf32>
    %498 = arith.mulf %489, %470 : vector<2x32xf32>
    %499 = arith.mulf %483, %491 : vector<2x32xf32>
    %500 = arith.addf %498, %499 : vector<2x32xf32>
    %501 = math.tanh %500 : vector<2x32xf32>
    %502 = arith.mulf %497, %501 : vector<2x32xf32>
    %c0_108 = arith.constant 0 : index
    %c0_109 = arith.constant 0 : index
    %503 = vector.load %arg8[%c0_108, %c0_109] : memref<32x128xf32, #tpu.memory_space<vmem>>, vector<32x128xf32>
    %c0_110 = arith.constant 0 : index
    %c0_111 = arith.constant 0 : index
    %504 = vector.load %arg9[%c0_110, %c0_111] : memref<32x128xf32, #tpu.memory_space<vmem>>, vector<32x128xf32>
    %c0_112 = arith.constant 0 : index
    %c0_113 = arith.constant 0 : index
    %505 = vector.load %arg10[%c0_112, %c0_113] : memref<32x128xf32, #tpu.memory_space<vmem>>, vector<32x128xf32>
    %c0_114 = arith.constant 0 : index
    %c0_115 = arith.constant 0 : index
    %506 = vector.load %arg11[%c0_114, %c0_115] : memref<1x128xf32, #tpu.memory_space<vmem>>, vector<1x128xf32>
    %cst_116 = arith.constant dense<0.000000e+00> : vector<2x128xf32>
    %507 = tpu.matmul %0, %505, %cst_116 {dimension_numbers = #tpu.dot_dimension_numbers<[1], [0], [0], [1], [0, 0, 1, 1], [], []>} : vector<2x32xf32>, vector<32x128xf32>, vector<2x128xf32> -> vector<2x128xf32>
    %508 = vector.broadcast %506 : vector<1x128xf32> to vector<2x128xf32>
    %509 = arith.addf %507, %508 : vector<2x128xf32>
    %cst_117 = arith.constant dense<0.000000e+00> : vector<2x128xf32>
    %510 = tpu.matmul %49, %503, %cst_117 {dimension_numbers = #tpu.dot_dimension_numbers<[1], [0], [0], [1], [0, 0, 1, 1], [], []>} : vector<2x32xf32>, vector<32x128xf32>, vector<2x128xf32> -> vector<2x128xf32>
    %511 = arith.addf %509, %510 : vector<2x128xf32>
    %cst_118 = arith.constant dense<0.000000e+00> : vector<2x128xf32>
    %512 = tpu.matmul %502, %504, %cst_118 {dimension_numbers = #tpu.dot_dimension_numbers<[1], [0], [0], [1], [0, 0, 1, 1], [], []>} : vector<2x32xf32>, vector<32x128xf32>, vector<2x128xf32> -> vector<2x128xf32>
    %513 = arith.addf %511, %512 : vector<2x128xf32>
    %514 = vector.extract_strided_slice %513 {offsets = [0, 0], sizes = [2, 32], strides = [1, 1]} : vector<2x128xf32> to vector<2x32xf32>
    %515 = arith.negf %514 : vector<2x32xf32>
    %516 = math.exp %515 : vector<2x32xf32>
    %cst_119 = arith.constant 1.000000e+00 : f32
    %517 = vector.broadcast %cst_119 : f32 to vector<2x32xf32>
    %518 = arith.addf %517, %516 : vector<2x32xf32>
    %519 = arith.divf %517, %518 : vector<2x32xf32>
    %520 = vector.extract_strided_slice %513 {offsets = [0, 32], sizes = [2, 32], strides = [1, 1]} : vector<2x128xf32> to vector<2x32xf32>
    %521 = arith.negf %520 : vector<2x32xf32>
    %522 = math.exp %521 : vector<2x32xf32>
    %cst_120 = arith.constant 1.000000e+00 : f32
    %523 = vector.broadcast %cst_120 : f32 to vector<2x32xf32>
    %524 = arith.addf %523, %522 : vector<2x32xf32>
    %525 = arith.divf %523, %524 : vector<2x32xf32>
    %526 = vector.extract_strided_slice %513 {offsets = [0, 64], sizes = [2, 32], strides = [1, 1]} : vector<2x128xf32> to vector<2x32xf32>
    %527 = math.tanh %526 : vector<2x32xf32>
    %528 = vector.extract_strided_slice %513 {offsets = [0, 96], sizes = [2, 32], strides = [1, 1]} : vector<2x128xf32> to vector<2x32xf32>
    %529 = arith.negf %528 : vector<2x32xf32>
    %530 = math.exp %529 : vector<2x32xf32>
    %cst_121 = arith.constant 1.000000e+00 : f32
    %531 = vector.broadcast %cst_121 : f32 to vector<2x32xf32>
    %532 = arith.addf %531, %530 : vector<2x32xf32>
    %533 = arith.divf %531, %532 : vector<2x32xf32>
    %534 = arith.mulf %525, %0 : vector<2x32xf32>
    %535 = arith.mulf %519, %527 : vector<2x32xf32>
    %536 = arith.addf %534, %535 : vector<2x32xf32>
    %537 = math.tanh %536 : vector<2x32xf32>
    %538 = arith.mulf %533, %537 : vector<2x32xf32>
    %cst_122 = arith.constant dense<0.000000e+00> : vector<2x128xf32>
    %539 = tpu.matmul %538, %505, %cst_122 {dimension_numbers = #tpu.dot_dimension_numbers<[1], [0], [0], [1], [0, 0, 1, 1], [], []>} : vector<2x32xf32>, vector<32x128xf32>, vector<2x128xf32> -> vector<2x128xf32>
    %540 = vector.broadcast %506 : vector<1x128xf32> to vector<2x128xf32>
    %541 = arith.addf %539, %540 : vector<2x128xf32>
    %cst_123 = arith.constant dense<0.000000e+00> : vector<2x128xf32>
    %542 = tpu.matmul %79, %503, %cst_123 {dimension_numbers = #tpu.dot_dimension_numbers<[1], [0], [0], [1], [0, 0, 1, 1], [], []>} : vector<2x32xf32>, vector<32x128xf32>, vector<2x128xf32> -> vector<2x128xf32>
    %543 = arith.addf %541, %542 : vector<2x128xf32>
    %cst_124 = arith.constant dense<0.000000e+00> : vector<2x128xf32>
    %544 = tpu.matmul %472, %504, %cst_124 {dimension_numbers = #tpu.dot_dimension_numbers<[1], [0], [0], [1], [0, 0, 1, 1], [], []>} : vector<2x32xf32>, vector<32x128xf32>, vector<2x128xf32> -> vector<2x128xf32>
    %545 = arith.addf %543, %544 : vector<2x128xf32>
    %546 = vector.extract_strided_slice %545 {offsets = [0, 0], sizes = [2, 32], strides = [1, 1]} : vector<2x128xf32> to vector<2x32xf32>
    %547 = arith.negf %546 : vector<2x32xf32>
    %548 = math.exp %547 : vector<2x32xf32>
    %cst_125 = arith.constant 1.000000e+00 : f32
    %549 = vector.broadcast %cst_125 : f32 to vector<2x32xf32>
    %550 = arith.addf %549, %548 : vector<2x32xf32>
    %551 = arith.divf %549, %550 : vector<2x32xf32>
    %552 = vector.extract_strided_slice %545 {offsets = [0, 32], sizes = [2, 32], strides = [1, 1]} : vector<2x128xf32> to vector<2x32xf32>
    %553 = arith.negf %552 : vector<2x32xf32>
    %554 = math.exp %553 : vector<2x32xf32>
    %cst_126 = arith.constant 1.000000e+00 : f32
    %555 = vector.broadcast %cst_126 : f32 to vector<2x32xf32>
    %556 = arith.addf %555, %554 : vector<2x32xf32>
    %557 = arith.divf %555, %556 : vector<2x32xf32>
    %558 = vector.extract_strided_slice %545 {offsets = [0, 64], sizes = [2, 32], strides = [1, 1]} : vector<2x128xf32> to vector<2x32xf32>
    %559 = math.tanh %558 : vector<2x32xf32>
    %560 = vector.extract_strided_slice %545 {offsets = [0, 96], sizes = [2, 32], strides = [1, 1]} : vector<2x128xf32> to vector<2x32xf32>
    %561 = arith.negf %560 : vector<2x32xf32>
    %562 = math.exp %561 : vector<2x32xf32>
    %cst_127 = arith.constant 1.000000e+00 : f32
    %563 = vector.broadcast %cst_127 : f32 to vector<2x32xf32>
    %564 = arith.addf %563, %562 : vector<2x32xf32>
    %565 = arith.divf %563, %564 : vector<2x32xf32>
    %566 = arith.mulf %557, %536 : vector<2x32xf32>
    %567 = arith.mulf %551, %559 : vector<2x32xf32>
    %568 = arith.addf %566, %567 : vector<2x32xf32>
    %569 = math.tanh %568 : vector<2x32xf32>
    %570 = arith.mulf %565, %569 : vector<2x32xf32>
    %cst_128 = arith.constant dense<0.000000e+00> : vector<2x128xf32>
    %571 = tpu.matmul %570, %505, %cst_128 {dimension_numbers = #tpu.dot_dimension_numbers<[1], [0], [0], [1], [0, 0, 1, 1], [], []>} : vector<2x32xf32>, vector<32x128xf32>, vector<2x128xf32> -> vector<2x128xf32>
    %572 = vector.broadcast %506 : vector<1x128xf32> to vector<2x128xf32>
    %573 = arith.addf %571, %572 : vector<2x128xf32>
    %cst_129 = arith.constant dense<0.000000e+00> : vector<2x128xf32>
    %574 = tpu.matmul %109, %503, %cst_129 {dimension_numbers = #tpu.dot_dimension_numbers<[1], [0], [0], [1], [0, 0, 1, 1], [], []>} : vector<2x32xf32>, vector<32x128xf32>, vector<2x128xf32> -> vector<2x128xf32>
    %575 = arith.addf %573, %574 : vector<2x128xf32>
    %cst_130 = arith.constant dense<0.000000e+00> : vector<2x128xf32>
    %576 = tpu.matmul %442, %504, %cst_130 {dimension_numbers = #tpu.dot_dimension_numbers<[1], [0], [0], [1], [0, 0, 1, 1], [], []>} : vector<2x32xf32>, vector<32x128xf32>, vector<2x128xf32> -> vector<2x128xf32>
    %577 = arith.addf %575, %576 : vector<2x128xf32>
    %578 = vector.extract_strided_slice %577 {offsets = [0, 0], sizes = [2, 32], strides = [1, 1]} : vector<2x128xf32> to vector<2x32xf32>
    %579 = arith.negf %578 : vector<2x32xf32>
    %580 = math.exp %579 : vector<2x32xf32>
    %cst_131 = arith.constant 1.000000e+00 : f32
    %581 = vector.broadcast %cst_131 : f32 to vector<2x32xf32>
    %582 = arith.addf %581, %580 : vector<2x32xf32>
    %583 = arith.divf %581, %582 : vector<2x32xf32>
    %584 = vector.extract_strided_slice %577 {offsets = [0, 32], sizes = [2, 32], strides = [1, 1]} : vector<2x128xf32> to vector<2x32xf32>
    %585 = arith.negf %584 : vector<2x32xf32>
    %586 = math.exp %585 : vector<2x32xf32>
    %cst_132 = arith.constant 1.000000e+00 : f32
    %587 = vector.broadcast %cst_132 : f32 to vector<2x32xf32>
    %588 = arith.addf %587, %586 : vector<2x32xf32>
    %589 = arith.divf %587, %588 : vector<2x32xf32>
    %590 = vector.extract_strided_slice %577 {offsets = [0, 64], sizes = [2, 32], strides = [1, 1]} : vector<2x128xf32> to vector<2x32xf32>
    %591 = math.tanh %590 : vector<2x32xf32>
    %592 = vector.extract_strided_slice %577 {offsets = [0, 96], sizes = [2, 32], strides = [1, 1]} : vector<2x128xf32> to vector<2x32xf32>
    %593 = arith.negf %592 : vector<2x32xf32>
    %594 = math.exp %593 : vector<2x32xf32>
    %cst_133 = arith.constant 1.000000e+00 : f32
    %595 = vector.broadcast %cst_133 : f32 to vector<2x32xf32>
    %596 = arith.addf %595, %594 : vector<2x32xf32>
    %597 = arith.divf %595, %596 : vector<2x32xf32>
    %598 = arith.mulf %589, %568 : vector<2x32xf32>
    %599 = arith.mulf %583, %591 : vector<2x32xf32>
    %600 = arith.addf %598, %599 : vector<2x32xf32>
    %601 = math.tanh %600 : vector<2x32xf32>
    %602 = arith.mulf %597, %601 : vector<2x32xf32>
    %cst_134 = arith.constant dense<0.000000e+00> : vector<2x128xf32>
    %603 = tpu.matmul %602, %505, %cst_134 {dimension_numbers = #tpu.dot_dimension_numbers<[1], [0], [0], [1], [0, 0, 1, 1], [], []>} : vector<2x32xf32>, vector<32x128xf32>, vector<2x128xf32> -> vector<2x128xf32>
    %604 = vector.broadcast %506 : vector<1x128xf32> to vector<2x128xf32>
    %605 = arith.addf %603, %604 : vector<2x128xf32>
    %cst_135 = arith.constant dense<0.000000e+00> : vector<2x128xf32>
    %606 = tpu.matmul %139, %503, %cst_135 {dimension_numbers = #tpu.dot_dimension_numbers<[1], [0], [0], [1], [0, 0, 1, 1], [], []>} : vector<2x32xf32>, vector<32x128xf32>, vector<2x128xf32> -> vector<2x128xf32>
    %607 = arith.addf %605, %606 : vector<2x128xf32>
    %cst_136 = arith.constant dense<0.000000e+00> : vector<2x128xf32>
    %608 = tpu.matmul %412, %504, %cst_136 {dimension_numbers = #tpu.dot_dimension_numbers<[1], [0], [0], [1], [0, 0, 1, 1], [], []>} : vector<2x32xf32>, vector<32x128xf32>, vector<2x128xf32> -> vector<2x128xf32>
    %609 = arith.addf %607, %608 : vector<2x128xf32>
    %610 = vector.extract_strided_slice %609 {offsets = [0, 0], sizes = [2, 32], strides = [1, 1]} : vector<2x128xf32> to vector<2x32xf32>
    %611 = arith.negf %610 : vector<2x32xf32>
    %612 = math.exp %611 : vector<2x32xf32>
    %cst_137 = arith.constant 1.000000e+00 : f32
    %613 = vector.broadcast %cst_137 : f32 to vector<2x32xf32>
    %614 = arith.addf %613, %612 : vector<2x32xf32>
    %615 = arith.divf %613, %614 : vector<2x32xf32>
    %616 = vector.extract_strided_slice %609 {offsets = [0, 32], sizes = [2, 32], strides = [1, 1]} : vector<2x128xf32> to vector<2x32xf32>
    %617 = arith.negf %616 : vector<2x32xf32>
    %618 = math.exp %617 : vector<2x32xf32>
    %cst_138 = arith.constant 1.000000e+00 : f32
    %619 = vector.broadcast %cst_138 : f32 to vector<2x32xf32>
    %620 = arith.addf %619, %618 : vector<2x32xf32>
    %621 = arith.divf %619, %620 : vector<2x32xf32>
    %622 = vector.extract_strided_slice %609 {offsets = [0, 64], sizes = [2, 32], strides = [1, 1]} : vector<2x128xf32> to vector<2x32xf32>
    %623 = math.tanh %622 : vector<2x32xf32>
    %624 = vector.extract_strided_slice %609 {offsets = [0, 96], sizes = [2, 32], strides = [1, 1]} : vector<2x128xf32> to vector<2x32xf32>
    %625 = arith.negf %624 : vector<2x32xf32>
    %626 = math.exp %625 : vector<2x32xf32>
    %cst_139 = arith.constant 1.000000e+00 : f32
    %627 = vector.broadcast %cst_139 : f32 to vector<2x32xf32>
    %628 = arith.addf %627, %626 : vector<2x32xf32>
    %629 = arith.divf %627, %628 : vector<2x32xf32>
    %630 = arith.mulf %621, %600 : vector<2x32xf32>
    %631 = arith.mulf %615, %623 : vector<2x32xf32>
    %632 = arith.addf %630, %631 : vector<2x32xf32>
    %633 = math.tanh %632 : vector<2x32xf32>
    %634 = arith.mulf %629, %633 : vector<2x32xf32>
    %cst_140 = arith.constant dense<0.000000e+00> : vector<2x128xf32>
    %635 = tpu.matmul %634, %505, %cst_140 {dimension_numbers = #tpu.dot_dimension_numbers<[1], [0], [0], [1], [0, 0, 1, 1], [], []>} : vector<2x32xf32>, vector<32x128xf32>, vector<2x128xf32> -> vector<2x128xf32>
    %636 = vector.broadcast %506 : vector<1x128xf32> to vector<2x128xf32>
    %637 = arith.addf %635, %636 : vector<2x128xf32>
    %cst_141 = arith.constant dense<0.000000e+00> : vector<2x128xf32>
    %638 = tpu.matmul %169, %503, %cst_141 {dimension_numbers = #tpu.dot_dimension_numbers<[1], [0], [0], [1], [0, 0, 1, 1], [], []>} : vector<2x32xf32>, vector<32x128xf32>, vector<2x128xf32> -> vector<2x128xf32>
    %639 = arith.addf %637, %638 : vector<2x128xf32>
    %cst_142 = arith.constant dense<0.000000e+00> : vector<2x128xf32>
    %640 = tpu.matmul %382, %504, %cst_142 {dimension_numbers = #tpu.dot_dimension_numbers<[1], [0], [0], [1], [0, 0, 1, 1], [], []>} : vector<2x32xf32>, vector<32x128xf32>, vector<2x128xf32> -> vector<2x128xf32>
    %641 = arith.addf %639, %640 : vector<2x128xf32>
    %642 = vector.extract_strided_slice %641 {offsets = [0, 0], sizes = [2, 32], strides = [1, 1]} : vector<2x128xf32> to vector<2x32xf32>
    %643 = arith.negf %642 : vector<2x32xf32>
    %644 = math.exp %643 : vector<2x32xf32>
    %cst_143 = arith.constant 1.000000e+00 : f32
    %645 = vector.broadcast %cst_143 : f32 to vector<2x32xf32>
    %646 = arith.addf %645, %644 : vector<2x32xf32>
    %647 = arith.divf %645, %646 : vector<2x32xf32>
    %648 = vector.extract_strided_slice %641 {offsets = [0, 32], sizes = [2, 32], strides = [1, 1]} : vector<2x128xf32> to vector<2x32xf32>
    %649 = arith.negf %648 : vector<2x32xf32>
    %650 = math.exp %649 : vector<2x32xf32>
    %cst_144 = arith.constant 1.000000e+00 : f32
    %651 = vector.broadcast %cst_144 : f32 to vector<2x32xf32>
    %652 = arith.addf %651, %650 : vector<2x32xf32>
    %653 = arith.divf %651, %652 : vector<2x32xf32>
    %654 = vector.extract_strided_slice %641 {offsets = [0, 64], sizes = [2, 32], strides = [1, 1]} : vector<2x128xf32> to vector<2x32xf32>
    %655 = math.tanh %654 : vector<2x32xf32>
    %656 = vector.extract_strided_slice %641 {offsets = [0, 96], sizes = [2, 32], strides = [1, 1]} : vector<2x128xf32> to vector<2x32xf32>
    %657 = arith.negf %656 : vector<2x32xf32>
    %658 = math.exp %657 : vector<2x32xf32>
    %cst_145 = arith.constant 1.000000e+00 : f32
    %659 = vector.broadcast %cst_145 : f32 to vector<2x32xf32>
    %660 = arith.addf %659, %658 : vector<2x32xf32>
    %661 = arith.divf %659, %660 : vector<2x32xf32>
    %662 = arith.mulf %653, %632 : vector<2x32xf32>
    %663 = arith.mulf %647, %655 : vector<2x32xf32>
    %664 = arith.addf %662, %663 : vector<2x32xf32>
    %665 = math.tanh %664 : vector<2x32xf32>
    %666 = arith.mulf %661, %665 : vector<2x32xf32>
    %cst_146 = arith.constant dense<0.000000e+00> : vector<2x128xf32>
    %667 = tpu.matmul %666, %505, %cst_146 {dimension_numbers = #tpu.dot_dimension_numbers<[1], [0], [0], [1], [0, 0, 1, 1], [], []>} : vector<2x32xf32>, vector<32x128xf32>, vector<2x128xf32> -> vector<2x128xf32>
    %668 = vector.broadcast %506 : vector<1x128xf32> to vector<2x128xf32>
    %669 = arith.addf %667, %668 : vector<2x128xf32>
    %cst_147 = arith.constant dense<0.000000e+00> : vector<2x128xf32>
    %670 = tpu.matmul %199, %503, %cst_147 {dimension_numbers = #tpu.dot_dimension_numbers<[1], [0], [0], [1], [0, 0, 1, 1], [], []>} : vector<2x32xf32>, vector<32x128xf32>, vector<2x128xf32> -> vector<2x128xf32>
    %671 = arith.addf %669, %670 : vector<2x128xf32>
    %cst_148 = arith.constant dense<0.000000e+00> : vector<2x128xf32>
    %672 = tpu.matmul %352, %504, %cst_148 {dimension_numbers = #tpu.dot_dimension_numbers<[1], [0], [0], [1], [0, 0, 1, 1], [], []>} : vector<2x32xf32>, vector<32x128xf32>, vector<2x128xf32> -> vector<2x128xf32>
    %673 = arith.addf %671, %672 : vector<2x128xf32>
    %674 = vector.extract_strided_slice %673 {offsets = [0, 0], sizes = [2, 32], strides = [1, 1]} : vector<2x128xf32> to vector<2x32xf32>
    %675 = arith.negf %674 : vector<2x32xf32>
    %676 = math.exp %675 : vector<2x32xf32>
    %cst_149 = arith.constant 1.000000e+00 : f32
    %677 = vector.broadcast %cst_149 : f32 to vector<2x32xf32>
    %678 = arith.addf %677, %676 : vector<2x32xf32>
    %679 = arith.divf %677, %678 : vector<2x32xf32>
    %680 = vector.extract_strided_slice %673 {offsets = [0, 32], sizes = [2, 32], strides = [1, 1]} : vector<2x128xf32> to vector<2x32xf32>
    %681 = arith.negf %680 : vector<2x32xf32>
    %682 = math.exp %681 : vector<2x32xf32>
    %cst_150 = arith.constant 1.000000e+00 : f32
    %683 = vector.broadcast %cst_150 : f32 to vector<2x32xf32>
    %684 = arith.addf %683, %682 : vector<2x32xf32>
    %685 = arith.divf %683, %684 : vector<2x32xf32>
    %686 = vector.extract_strided_slice %673 {offsets = [0, 64], sizes = [2, 32], strides = [1, 1]} : vector<2x128xf32> to vector<2x32xf32>
    %687 = math.tanh %686 : vector<2x32xf32>
    %688 = vector.extract_strided_slice %673 {offsets = [0, 96], sizes = [2, 32], strides = [1, 1]} : vector<2x128xf32> to vector<2x32xf32>
    %689 = arith.negf %688 : vector<2x32xf32>
    %690 = math.exp %689 : vector<2x32xf32>
    %cst_151 = arith.constant 1.000000e+00 : f32
    %691 = vector.broadcast %cst_151 : f32 to vector<2x32xf32>
    %692 = arith.addf %691, %690 : vector<2x32xf32>
    %693 = arith.divf %691, %692 : vector<2x32xf32>
    %694 = arith.mulf %685, %664 : vector<2x32xf32>
    %695 = arith.mulf %679, %687 : vector<2x32xf32>
    %696 = arith.addf %694, %695 : vector<2x32xf32>
    %697 = math.tanh %696 : vector<2x32xf32>
    %698 = arith.mulf %693, %697 : vector<2x32xf32>
    %cst_152 = arith.constant dense<0.000000e+00> : vector<2x128xf32>
    %699 = tpu.matmul %698, %505, %cst_152 {dimension_numbers = #tpu.dot_dimension_numbers<[1], [0], [0], [1], [0, 0, 1, 1], [], []>} : vector<2x32xf32>, vector<32x128xf32>, vector<2x128xf32> -> vector<2x128xf32>
    %700 = vector.broadcast %506 : vector<1x128xf32> to vector<2x128xf32>
    %701 = arith.addf %699, %700 : vector<2x128xf32>
    %cst_153 = arith.constant dense<0.000000e+00> : vector<2x128xf32>
    %702 = tpu.matmul %229, %503, %cst_153 {dimension_numbers = #tpu.dot_dimension_numbers<[1], [0], [0], [1], [0, 0, 1, 1], [], []>} : vector<2x32xf32>, vector<32x128xf32>, vector<2x128xf32> -> vector<2x128xf32>
    %703 = arith.addf %701, %702 : vector<2x128xf32>
    %cst_154 = arith.constant dense<0.000000e+00> : vector<2x128xf32>
    %704 = tpu.matmul %322, %504, %cst_154 {dimension_numbers = #tpu.dot_dimension_numbers<[1], [0], [0], [1], [0, 0, 1, 1], [], []>} : vector<2x32xf32>, vector<32x128xf32>, vector<2x128xf32> -> vector<2x128xf32>
    %705 = arith.addf %703, %704 : vector<2x128xf32>
    %706 = vector.extract_strided_slice %705 {offsets = [0, 0], sizes = [2, 32], strides = [1, 1]} : vector<2x128xf32> to vector<2x32xf32>
    %707 = arith.negf %706 : vector<2x32xf32>
    %708 = math.exp %707 : vector<2x32xf32>
    %cst_155 = arith.constant 1.000000e+00 : f32
    %709 = vector.broadcast %cst_155 : f32 to vector<2x32xf32>
    %710 = arith.addf %709, %708 : vector<2x32xf32>
    %711 = arith.divf %709, %710 : vector<2x32xf32>
    %712 = vector.extract_strided_slice %705 {offsets = [0, 32], sizes = [2, 32], strides = [1, 1]} : vector<2x128xf32> to vector<2x32xf32>
    %713 = arith.negf %712 : vector<2x32xf32>
    %714 = math.exp %713 : vector<2x32xf32>
    %cst_156 = arith.constant 1.000000e+00 : f32
    %715 = vector.broadcast %cst_156 : f32 to vector<2x32xf32>
    %716 = arith.addf %715, %714 : vector<2x32xf32>
    %717 = arith.divf %715, %716 : vector<2x32xf32>
    %718 = vector.extract_strided_slice %705 {offsets = [0, 64], sizes = [2, 32], strides = [1, 1]} : vector<2x128xf32> to vector<2x32xf32>
    %719 = math.tanh %718 : vector<2x32xf32>
    %720 = vector.extract_strided_slice %705 {offsets = [0, 96], sizes = [2, 32], strides = [1, 1]} : vector<2x128xf32> to vector<2x32xf32>
    %721 = arith.negf %720 : vector<2x32xf32>
    %722 = math.exp %721 : vector<2x32xf32>
    %cst_157 = arith.constant 1.000000e+00 : f32
    %723 = vector.broadcast %cst_157 : f32 to vector<2x32xf32>
    %724 = arith.addf %723, %722 : vector<2x32xf32>
    %725 = arith.divf %723, %724 : vector<2x32xf32>
    %726 = arith.mulf %717, %696 : vector<2x32xf32>
    %727 = arith.mulf %711, %719 : vector<2x32xf32>
    %728 = arith.addf %726, %727 : vector<2x32xf32>
    %729 = math.tanh %728 : vector<2x32xf32>
    %730 = arith.mulf %725, %729 : vector<2x32xf32>
    %cst_158 = arith.constant dense<0.000000e+00> : vector<2x128xf32>
    %731 = tpu.matmul %730, %505, %cst_158 {dimension_numbers = #tpu.dot_dimension_numbers<[1], [0], [0], [1], [0, 0, 1, 1], [], []>} : vector<2x32xf32>, vector<32x128xf32>, vector<2x128xf32> -> vector<2x128xf32>
    %732 = vector.broadcast %506 : vector<1x128xf32> to vector<2x128xf32>
    %733 = arith.addf %731, %732 : vector<2x128xf32>
    %cst_159 = arith.constant dense<0.000000e+00> : vector<2x128xf32>
    %734 = tpu.matmul %259, %503, %cst_159 {dimension_numbers = #tpu.dot_dimension_numbers<[1], [0], [0], [1], [0, 0, 1, 1], [], []>} : vector<2x32xf32>, vector<32x128xf32>, vector<2x128xf32> -> vector<2x128xf32>
    %735 = arith.addf %733, %734 : vector<2x128xf32>
    %cst_160 = arith.constant dense<0.000000e+00> : vector<2x128xf32>
    %736 = tpu.matmul %292, %504, %cst_160 {dimension_numbers = #tpu.dot_dimension_numbers<[1], [0], [0], [1], [0, 0, 1, 1], [], []>} : vector<2x32xf32>, vector<32x128xf32>, vector<2x128xf32> -> vector<2x128xf32>
    %737 = arith.addf %735, %736 : vector<2x128xf32>
    %738 = vector.extract_strided_slice %737 {offsets = [0, 0], sizes = [2, 32], strides = [1, 1]} : vector<2x128xf32> to vector<2x32xf32>
    %739 = arith.negf %738 : vector<2x32xf32>
    %740 = math.exp %739 : vector<2x32xf32>
    %cst_161 = arith.constant 1.000000e+00 : f32
    %741 = vector.broadcast %cst_161 : f32 to vector<2x32xf32>
    %742 = arith.addf %741, %740 : vector<2x32xf32>
    %743 = arith.divf %741, %742 : vector<2x32xf32>
    %744 = vector.extract_strided_slice %737 {offsets = [0, 32], sizes = [2, 32], strides = [1, 1]} : vector<2x128xf32> to vector<2x32xf32>
    %745 = arith.negf %744 : vector<2x32xf32>
    %746 = math.exp %745 : vector<2x32xf32>
    %cst_162 = arith.constant 1.000000e+00 : f32
    %747 = vector.broadcast %cst_162 : f32 to vector<2x32xf32>
    %748 = arith.addf %747, %746 : vector<2x32xf32>
    %749 = arith.divf %747, %748 : vector<2x32xf32>
    %750 = vector.extract_strided_slice %737 {offsets = [0, 64], sizes = [2, 32], strides = [1, 1]} : vector<2x128xf32> to vector<2x32xf32>
    %751 = math.tanh %750 : vector<2x32xf32>
    %752 = vector.extract_strided_slice %737 {offsets = [0, 96], sizes = [2, 32], strides = [1, 1]} : vector<2x128xf32> to vector<2x32xf32>
    %753 = arith.negf %752 : vector<2x32xf32>
    %754 = math.exp %753 : vector<2x32xf32>
    %cst_163 = arith.constant 1.000000e+00 : f32
    %755 = vector.broadcast %cst_163 : f32 to vector<2x32xf32>
    %756 = arith.addf %755, %754 : vector<2x32xf32>
    %757 = arith.divf %755, %756 : vector<2x32xf32>
    %758 = arith.mulf %749, %728 : vector<2x32xf32>
    %759 = arith.mulf %743, %751 : vector<2x32xf32>
    %760 = arith.addf %758, %759 : vector<2x32xf32>
    %761 = math.tanh %760 : vector<2x32xf32>
    %762 = arith.mulf %757, %761 : vector<2x32xf32>
    %c0_164 = arith.constant 0 : index
    %c0_165 = arith.constant 0 : index
    %763 = vector.load %arg12[%c0_164, %c0_165] : memref<32x128xf32, #tpu.memory_space<vmem>>, vector<32x128xf32>
    %c0_166 = arith.constant 0 : index
    %c0_167 = arith.constant 0 : index
    %764 = vector.load %arg13[%c0_166, %c0_167] : memref<32x128xf32, #tpu.memory_space<vmem>>, vector<32x128xf32>
    %c0_168 = arith.constant 0 : index
    %c0_169 = arith.constant 0 : index
    %765 = vector.load %arg14[%c0_168, %c0_169] : memref<32x128xf32, #tpu.memory_space<vmem>>, vector<32x128xf32>
    %c0_170 = arith.constant 0 : index
    %c0_171 = arith.constant 0 : index
    %766 = vector.load %arg15[%c0_170, %c0_171] : memref<1x128xf32, #tpu.memory_space<vmem>>, vector<1x128xf32>
    %cst_172 = arith.constant dense<0.000000e+00> : vector<2x128xf32>
    %767 = tpu.matmul %0, %765, %cst_172 {dimension_numbers = #tpu.dot_dimension_numbers<[1], [0], [0], [1], [0, 0, 1, 1], [], []>} : vector<2x32xf32>, vector<32x128xf32>, vector<2x128xf32> -> vector<2x128xf32>
    %768 = vector.broadcast %766 : vector<1x128xf32> to vector<2x128xf32>
    %769 = arith.addf %767, %768 : vector<2x128xf32>
    %cst_173 = arith.constant dense<0.000000e+00> : vector<2x128xf32>
    %770 = tpu.matmul %259, %763, %cst_173 {dimension_numbers = #tpu.dot_dimension_numbers<[1], [0], [0], [1], [0, 0, 1, 1], [], []>} : vector<2x32xf32>, vector<32x128xf32>, vector<2x128xf32> -> vector<2x128xf32>
    %771 = arith.addf %769, %770 : vector<2x128xf32>
    %cst_174 = arith.constant dense<0.000000e+00> : vector<2x128xf32>
    %772 = tpu.matmul %292, %764, %cst_174 {dimension_numbers = #tpu.dot_dimension_numbers<[1], [0], [0], [1], [0, 0, 1, 1], [], []>} : vector<2x32xf32>, vector<32x128xf32>, vector<2x128xf32> -> vector<2x128xf32>
    %773 = arith.addf %771, %772 : vector<2x128xf32>
    %774 = vector.extract_strided_slice %773 {offsets = [0, 0], sizes = [2, 32], strides = [1, 1]} : vector<2x128xf32> to vector<2x32xf32>
    %775 = arith.negf %774 : vector<2x32xf32>
    %776 = math.exp %775 : vector<2x32xf32>
    %cst_175 = arith.constant 1.000000e+00 : f32
    %777 = vector.broadcast %cst_175 : f32 to vector<2x32xf32>
    %778 = arith.addf %777, %776 : vector<2x32xf32>
    %779 = arith.divf %777, %778 : vector<2x32xf32>
    %780 = vector.extract_strided_slice %773 {offsets = [0, 32], sizes = [2, 32], strides = [1, 1]} : vector<2x128xf32> to vector<2x32xf32>
    %781 = arith.negf %780 : vector<2x32xf32>
    %782 = math.exp %781 : vector<2x32xf32>
    %cst_176 = arith.constant 1.000000e+00 : f32
    %783 = vector.broadcast %cst_176 : f32 to vector<2x32xf32>
    %784 = arith.addf %783, %782 : vector<2x32xf32>
    %785 = arith.divf %783, %784 : vector<2x32xf32>
    %786 = vector.extract_strided_slice %773 {offsets = [0, 64], sizes = [2, 32], strides = [1, 1]} : vector<2x128xf32> to vector<2x32xf32>
    %787 = math.tanh %786 : vector<2x32xf32>
    %788 = vector.extract_strided_slice %773 {offsets = [0, 96], sizes = [2, 32], strides = [1, 1]} : vector<2x128xf32> to vector<2x32xf32>
    %789 = arith.negf %788 : vector<2x32xf32>
    %790 = math.exp %789 : vector<2x32xf32>
    %cst_177 = arith.constant 1.000000e+00 : f32
    %791 = vector.broadcast %cst_177 : f32 to vector<2x32xf32>
    %792 = arith.addf %791, %790 : vector<2x32xf32>
    %793 = arith.divf %791, %792 : vector<2x32xf32>
    %794 = arith.mulf %785, %0 : vector<2x32xf32>
    %795 = arith.mulf %779, %787 : vector<2x32xf32>
    %796 = arith.addf %794, %795 : vector<2x32xf32>
    %797 = math.tanh %796 : vector<2x32xf32>
    %798 = arith.mulf %793, %797 : vector<2x32xf32>
    %cst_178 = arith.constant dense<0.000000e+00> : vector<2x128xf32>
    %799 = tpu.matmul %798, %765, %cst_178 {dimension_numbers = #tpu.dot_dimension_numbers<[1], [0], [0], [1], [0, 0, 1, 1], [], []>} : vector<2x32xf32>, vector<32x128xf32>, vector<2x128xf32> -> vector<2x128xf32>
    %800 = vector.broadcast %766 : vector<1x128xf32> to vector<2x128xf32>
    %801 = arith.addf %799, %800 : vector<2x128xf32>
    %cst_179 = arith.constant dense<0.000000e+00> : vector<2x128xf32>
    %802 = tpu.matmul %229, %763, %cst_179 {dimension_numbers = #tpu.dot_dimension_numbers<[1], [0], [0], [1], [0, 0, 1, 1], [], []>} : vector<2x32xf32>, vector<32x128xf32>, vector<2x128xf32> -> vector<2x128xf32>
    %803 = arith.addf %801, %802 : vector<2x128xf32>
    %cst_180 = arith.constant dense<0.000000e+00> : vector<2x128xf32>
    %804 = tpu.matmul %322, %764, %cst_180 {dimension_numbers = #tpu.dot_dimension_numbers<[1], [0], [0], [1], [0, 0, 1, 1], [], []>} : vector<2x32xf32>, vector<32x128xf32>, vector<2x128xf32> -> vector<2x128xf32>
    %805 = arith.addf %803, %804 : vector<2x128xf32>
    %806 = vector.extract_strided_slice %805 {offsets = [0, 0], sizes = [2, 32], strides = [1, 1]} : vector<2x128xf32> to vector<2x32xf32>
    %807 = arith.negf %806 : vector<2x32xf32>
    %808 = math.exp %807 : vector<2x32xf32>
    %cst_181 = arith.constant 1.000000e+00 : f32
    %809 = vector.broadcast %cst_181 : f32 to vector<2x32xf32>
    %810 = arith.addf %809, %808 : vector<2x32xf32>
    %811 = arith.divf %809, %810 : vector<2x32xf32>
    %812 = vector.extract_strided_slice %805 {offsets = [0, 32], sizes = [2, 32], strides = [1, 1]} : vector<2x128xf32> to vector<2x32xf32>
    %813 = arith.negf %812 : vector<2x32xf32>
    %814 = math.exp %813 : vector<2x32xf32>
    %cst_182 = arith.constant 1.000000e+00 : f32
    %815 = vector.broadcast %cst_182 : f32 to vector<2x32xf32>
    %816 = arith.addf %815, %814 : vector<2x32xf32>
    %817 = arith.divf %815, %816 : vector<2x32xf32>
    %818 = vector.extract_strided_slice %805 {offsets = [0, 64], sizes = [2, 32], strides = [1, 1]} : vector<2x128xf32> to vector<2x32xf32>
    %819 = math.tanh %818 : vector<2x32xf32>
    %820 = vector.extract_strided_slice %805 {offsets = [0, 96], sizes = [2, 32], strides = [1, 1]} : vector<2x128xf32> to vector<2x32xf32>
    %821 = arith.negf %820 : vector<2x32xf32>
    %822 = math.exp %821 : vector<2x32xf32>
    %cst_183 = arith.constant 1.000000e+00 : f32
    %823 = vector.broadcast %cst_183 : f32 to vector<2x32xf32>
    %824 = arith.addf %823, %822 : vector<2x32xf32>
    %825 = arith.divf %823, %824 : vector<2x32xf32>
    %826 = arith.mulf %817, %796 : vector<2x32xf32>
    %827 = arith.mulf %811, %819 : vector<2x32xf32>
    %828 = arith.addf %826, %827 : vector<2x32xf32>
    %829 = math.tanh %828 : vector<2x32xf32>
    %830 = arith.mulf %825, %829 : vector<2x32xf32>
    %cst_184 = arith.constant dense<0.000000e+00> : vector<2x128xf32>
    %831 = tpu.matmul %830, %765, %cst_184 {dimension_numbers = #tpu.dot_dimension_numbers<[1], [0], [0], [1], [0, 0, 1, 1], [], []>} : vector<2x32xf32>, vector<32x128xf32>, vector<2x128xf32> -> vector<2x128xf32>
    %832 = vector.broadcast %766 : vector<1x128xf32> to vector<2x128xf32>
    %833 = arith.addf %831, %832 : vector<2x128xf32>
    %cst_185 = arith.constant dense<0.000000e+00> : vector<2x128xf32>
    %834 = tpu.matmul %199, %763, %cst_185 {dimension_numbers = #tpu.dot_dimension_numbers<[1], [0], [0], [1], [0, 0, 1, 1], [], []>} : vector<2x32xf32>, vector<32x128xf32>, vector<2x128xf32> -> vector<2x128xf32>
    %835 = arith.addf %833, %834 : vector<2x128xf32>
    %cst_186 = arith.constant dense<0.000000e+00> : vector<2x128xf32>
    %836 = tpu.matmul %352, %764, %cst_186 {dimension_numbers = #tpu.dot_dimension_numbers<[1], [0], [0], [1], [0, 0, 1, 1], [], []>} : vector<2x32xf32>, vector<32x128xf32>, vector<2x128xf32> -> vector<2x128xf32>
    %837 = arith.addf %835, %836 : vector<2x128xf32>
    %838 = vector.extract_strided_slice %837 {offsets = [0, 0], sizes = [2, 32], strides = [1, 1]} : vector<2x128xf32> to vector<2x32xf32>
    %839 = arith.negf %838 : vector<2x32xf32>
    %840 = math.exp %839 : vector<2x32xf32>
    %cst_187 = arith.constant 1.000000e+00 : f32
    %841 = vector.broadcast %cst_187 : f32 to vector<2x32xf32>
    %842 = arith.addf %841, %840 : vector<2x32xf32>
    %843 = arith.divf %841, %842 : vector<2x32xf32>
    %844 = vector.extract_strided_slice %837 {offsets = [0, 32], sizes = [2, 32], strides = [1, 1]} : vector<2x128xf32> to vector<2x32xf32>
    %845 = arith.negf %844 : vector<2x32xf32>
    %846 = math.exp %845 : vector<2x32xf32>
    %cst_188 = arith.constant 1.000000e+00 : f32
    %847 = vector.broadcast %cst_188 : f32 to vector<2x32xf32>
    %848 = arith.addf %847, %846 : vector<2x32xf32>
    %849 = arith.divf %847, %848 : vector<2x32xf32>
    %850 = vector.extract_strided_slice %837 {offsets = [0, 64], sizes = [2, 32], strides = [1, 1]} : vector<2x128xf32> to vector<2x32xf32>
    %851 = math.tanh %850 : vector<2x32xf32>
    %852 = vector.extract_strided_slice %837 {offsets = [0, 96], sizes = [2, 32], strides = [1, 1]} : vector<2x128xf32> to vector<2x32xf32>
    %853 = arith.negf %852 : vector<2x32xf32>
    %854 = math.exp %853 : vector<2x32xf32>
    %cst_189 = arith.constant 1.000000e+00 : f32
    %855 = vector.broadcast %cst_189 : f32 to vector<2x32xf32>
    %856 = arith.addf %855, %854 : vector<2x32xf32>
    %857 = arith.divf %855, %856 : vector<2x32xf32>
    %858 = arith.mulf %849, %828 : vector<2x32xf32>
    %859 = arith.mulf %843, %851 : vector<2x32xf32>
    %860 = arith.addf %858, %859 : vector<2x32xf32>
    %861 = math.tanh %860 : vector<2x32xf32>
    %862 = arith.mulf %857, %861 : vector<2x32xf32>
    %cst_190 = arith.constant dense<0.000000e+00> : vector<2x128xf32>
    %863 = tpu.matmul %862, %765, %cst_190 {dimension_numbers = #tpu.dot_dimension_numbers<[1], [0], [0], [1], [0, 0, 1, 1], [], []>} : vector<2x32xf32>, vector<32x128xf32>, vector<2x128xf32> -> vector<2x128xf32>
    %864 = vector.broadcast %766 : vector<1x128xf32> to vector<2x128xf32>
    %865 = arith.addf %863, %864 : vector<2x128xf32>
    %cst_191 = arith.constant dense<0.000000e+00> : vector<2x128xf32>
    %866 = tpu.matmul %169, %763, %cst_191 {dimension_numbers = #tpu.dot_dimension_numbers<[1], [0], [0], [1], [0, 0, 1, 1], [], []>} : vector<2x32xf32>, vector<32x128xf32>, vector<2x128xf32> -> vector<2x128xf32>
    %867 = arith.addf %865, %866 : vector<2x128xf32>
    %cst_192 = arith.constant dense<0.000000e+00> : vector<2x128xf32>
    %868 = tpu.matmul %382, %764, %cst_192 {dimension_numbers = #tpu.dot_dimension_numbers<[1], [0], [0], [1], [0, 0, 1, 1], [], []>} : vector<2x32xf32>, vector<32x128xf32>, vector<2x128xf32> -> vector<2x128xf32>
    %869 = arith.addf %867, %868 : vector<2x128xf32>
    %870 = vector.extract_strided_slice %869 {offsets = [0, 0], sizes = [2, 32], strides = [1, 1]} : vector<2x128xf32> to vector<2x32xf32>
    %871 = arith.negf %870 : vector<2x32xf32>
    %872 = math.exp %871 : vector<2x32xf32>
    %cst_193 = arith.constant 1.000000e+00 : f32
    %873 = vector.broadcast %cst_193 : f32 to vector<2x32xf32>
    %874 = arith.addf %873, %872 : vector<2x32xf32>
    %875 = arith.divf %873, %874 : vector<2x32xf32>
    %876 = vector.extract_strided_slice %869 {offsets = [0, 32], sizes = [2, 32], strides = [1, 1]} : vector<2x128xf32> to vector<2x32xf32>
    %877 = arith.negf %876 : vector<2x32xf32>
    %878 = math.exp %877 : vector<2x32xf32>
    %cst_194 = arith.constant 1.000000e+00 : f32
    %879 = vector.broadcast %cst_194 : f32 to vector<2x32xf32>
    %880 = arith.addf %879, %878 : vector<2x32xf32>
    %881 = arith.divf %879, %880 : vector<2x32xf32>
    %882 = vector.extract_strided_slice %869 {offsets = [0, 64], sizes = [2, 32], strides = [1, 1]} : vector<2x128xf32> to vector<2x32xf32>
    %883 = math.tanh %882 : vector<2x32xf32>
    %884 = vector.extract_strided_slice %869 {offsets = [0, 96], sizes = [2, 32], strides = [1, 1]} : vector<2x128xf32> to vector<2x32xf32>
    %885 = arith.negf %884 : vector<2x32xf32>
    %886 = math.exp %885 : vector<2x32xf32>
    %cst_195 = arith.constant 1.000000e+00 : f32
    %887 = vector.broadcast %cst_195 : f32 to vector<2x32xf32>
    %888 = arith.addf %887, %886 : vector<2x32xf32>
    %889 = arith.divf %887, %888 : vector<2x32xf32>
    %890 = arith.mulf %881, %860 : vector<2x32xf32>
    %891 = arith.mulf %875, %883 : vector<2x32xf32>
    %892 = arith.addf %890, %891 : vector<2x32xf32>
    %893 = math.tanh %892 : vector<2x32xf32>
    %894 = arith.mulf %889, %893 : vector<2x32xf32>
    %cst_196 = arith.constant dense<0.000000e+00> : vector<2x128xf32>
    %895 = tpu.matmul %894, %765, %cst_196 {dimension_numbers = #tpu.dot_dimension_numbers<[1], [0], [0], [1], [0, 0, 1, 1], [], []>} : vector<2x32xf32>, vector<32x128xf32>, vector<2x128xf32> -> vector<2x128xf32>
    %896 = vector.broadcast %766 : vector<1x128xf32> to vector<2x128xf32>
    %897 = arith.addf %895, %896 : vector<2x128xf32>
    %cst_197 = arith.constant dense<0.000000e+00> : vector<2x128xf32>
    %898 = tpu.matmul %139, %763, %cst_197 {dimension_numbers = #tpu.dot_dimension_numbers<[1], [0], [0], [1], [0, 0, 1, 1], [], []>} : vector<2x32xf32>, vector<32x128xf32>, vector<2x128xf32> -> vector<2x128xf32>
    %899 = arith.addf %897, %898 : vector<2x128xf32>
    %cst_198 = arith.constant dense<0.000000e+00> : vector<2x128xf32>
    %900 = tpu.matmul %412, %764, %cst_198 {dimension_numbers = #tpu.dot_dimension_numbers<[1], [0], [0], [1], [0, 0, 1, 1], [], []>} : vector<2x32xf32>, vector<32x128xf32>, vector<2x128xf32> -> vector<2x128xf32>
    %901 = arith.addf %899, %900 : vector<2x128xf32>
    %902 = vector.extract_strided_slice %901 {offsets = [0, 0], sizes = [2, 32], strides = [1, 1]} : vector<2x128xf32> to vector<2x32xf32>
    %903 = arith.negf %902 : vector<2x32xf32>
    %904 = math.exp %903 : vector<2x32xf32>
    %cst_199 = arith.constant 1.000000e+00 : f32
    %905 = vector.broadcast %cst_199 : f32 to vector<2x32xf32>
    %906 = arith.addf %905, %904 : vector<2x32xf32>
    %907 = arith.divf %905, %906 : vector<2x32xf32>
    %908 = vector.extract_strided_slice %901 {offsets = [0, 32], sizes = [2, 32], strides = [1, 1]} : vector<2x128xf32> to vector<2x32xf32>
    %909 = arith.negf %908 : vector<2x32xf32>
    %910 = math.exp %909 : vector<2x32xf32>
    %cst_200 = arith.constant 1.000000e+00 : f32
    %911 = vector.broadcast %cst_200 : f32 to vector<2x32xf32>
    %912 = arith.addf %911, %910 : vector<2x32xf32>
    %913 = arith.divf %911, %912 : vector<2x32xf32>
    %914 = vector.extract_strided_slice %901 {offsets = [0, 64], sizes = [2, 32], strides = [1, 1]} : vector<2x128xf32> to vector<2x32xf32>
    %915 = math.tanh %914 : vector<2x32xf32>
    %916 = vector.extract_strided_slice %901 {offsets = [0, 96], sizes = [2, 32], strides = [1, 1]} : vector<2x128xf32> to vector<2x32xf32>
    %917 = arith.negf %916 : vector<2x32xf32>
    %918 = math.exp %917 : vector<2x32xf32>
    %cst_201 = arith.constant 1.000000e+00 : f32
    %919 = vector.broadcast %cst_201 : f32 to vector<2x32xf32>
    %920 = arith.addf %919, %918 : vector<2x32xf32>
    %921 = arith.divf %919, %920 : vector<2x32xf32>
    %922 = arith.mulf %913, %892 : vector<2x32xf32>
    %923 = arith.mulf %907, %915 : vector<2x32xf32>
    %924 = arith.addf %922, %923 : vector<2x32xf32>
    %925 = math.tanh %924 : vector<2x32xf32>
    %926 = arith.mulf %921, %925 : vector<2x32xf32>
    %cst_202 = arith.constant dense<0.000000e+00> : vector<2x128xf32>
    %927 = tpu.matmul %926, %765, %cst_202 {dimension_numbers = #tpu.dot_dimension_numbers<[1], [0], [0], [1], [0, 0, 1, 1], [], []>} : vector<2x32xf32>, vector<32x128xf32>, vector<2x128xf32> -> vector<2x128xf32>
    %928 = vector.broadcast %766 : vector<1x128xf32> to vector<2x128xf32>
    %929 = arith.addf %927, %928 : vector<2x128xf32>
    %cst_203 = arith.constant dense<0.000000e+00> : vector<2x128xf32>
    %930 = tpu.matmul %109, %763, %cst_203 {dimension_numbers = #tpu.dot_dimension_numbers<[1], [0], [0], [1], [0, 0, 1, 1], [], []>} : vector<2x32xf32>, vector<32x128xf32>, vector<2x128xf32> -> vector<2x128xf32>
    %931 = arith.addf %929, %930 : vector<2x128xf32>
    %cst_204 = arith.constant dense<0.000000e+00> : vector<2x128xf32>
    %932 = tpu.matmul %442, %764, %cst_204 {dimension_numbers = #tpu.dot_dimension_numbers<[1], [0], [0], [1], [0, 0, 1, 1], [], []>} : vector<2x32xf32>, vector<32x128xf32>, vector<2x128xf32> -> vector<2x128xf32>
    %933 = arith.addf %931, %932 : vector<2x128xf32>
    %934 = vector.extract_strided_slice %933 {offsets = [0, 0], sizes = [2, 32], strides = [1, 1]} : vector<2x128xf32> to vector<2x32xf32>
    %935 = arith.negf %934 : vector<2x32xf32>
    %936 = math.exp %935 : vector<2x32xf32>
    %cst_205 = arith.constant 1.000000e+00 : f32
    %937 = vector.broadcast %cst_205 : f32 to vector<2x32xf32>
    %938 = arith.addf %937, %936 : vector<2x32xf32>
    %939 = arith.divf %937, %938 : vector<2x32xf32>
    %940 = vector.extract_strided_slice %933 {offsets = [0, 32], sizes = [2, 32], strides = [1, 1]} : vector<2x128xf32> to vector<2x32xf32>
    %941 = arith.negf %940 : vector<2x32xf32>
    %942 = math.exp %941 : vector<2x32xf32>
    %cst_206 = arith.constant 1.000000e+00 : f32
    %943 = vector.broadcast %cst_206 : f32 to vector<2x32xf32>
    %944 = arith.addf %943, %942 : vector<2x32xf32>
    %945 = arith.divf %943, %944 : vector<2x32xf32>
    %946 = vector.extract_strided_slice %933 {offsets = [0, 64], sizes = [2, 32], strides = [1, 1]} : vector<2x128xf32> to vector<2x32xf32>
    %947 = math.tanh %946 : vector<2x32xf32>
    %948 = vector.extract_strided_slice %933 {offsets = [0, 96], sizes = [2, 32], strides = [1, 1]} : vector<2x128xf32> to vector<2x32xf32>
    %949 = arith.negf %948 : vector<2x32xf32>
    %950 = math.exp %949 : vector<2x32xf32>
    %cst_207 = arith.constant 1.000000e+00 : f32
    %951 = vector.broadcast %cst_207 : f32 to vector<2x32xf32>
    %952 = arith.addf %951, %950 : vector<2x32xf32>
    %953 = arith.divf %951, %952 : vector<2x32xf32>
    %954 = arith.mulf %945, %924 : vector<2x32xf32>
    %955 = arith.mulf %939, %947 : vector<2x32xf32>
    %956 = arith.addf %954, %955 : vector<2x32xf32>
    %957 = math.tanh %956 : vector<2x32xf32>
    %958 = arith.mulf %953, %957 : vector<2x32xf32>
    %cst_208 = arith.constant dense<0.000000e+00> : vector<2x128xf32>
    %959 = tpu.matmul %958, %765, %cst_208 {dimension_numbers = #tpu.dot_dimension_numbers<[1], [0], [0], [1], [0, 0, 1, 1], [], []>} : vector<2x32xf32>, vector<32x128xf32>, vector<2x128xf32> -> vector<2x128xf32>
    %960 = vector.broadcast %766 : vector<1x128xf32> to vector<2x128xf32>
    %961 = arith.addf %959, %960 : vector<2x128xf32>
    %cst_209 = arith.constant dense<0.000000e+00> : vector<2x128xf32>
    %962 = tpu.matmul %79, %763, %cst_209 {dimension_numbers = #tpu.dot_dimension_numbers<[1], [0], [0], [1], [0, 0, 1, 1], [], []>} : vector<2x32xf32>, vector<32x128xf32>, vector<2x128xf32> -> vector<2x128xf32>
    %963 = arith.addf %961, %962 : vector<2x128xf32>
    %cst_210 = arith.constant dense<0.000000e+00> : vector<2x128xf32>
    %964 = tpu.matmul %472, %764, %cst_210 {dimension_numbers = #tpu.dot_dimension_numbers<[1], [0], [0], [1], [0, 0, 1, 1], [], []>} : vector<2x32xf32>, vector<32x128xf32>, vector<2x128xf32> -> vector<2x128xf32>
    %965 = arith.addf %963, %964 : vector<2x128xf32>
    %966 = vector.extract_strided_slice %965 {offsets = [0, 0], sizes = [2, 32], strides = [1, 1]} : vector<2x128xf32> to vector<2x32xf32>
    %967 = arith.negf %966 : vector<2x32xf32>
    %968 = math.exp %967 : vector<2x32xf32>
    %cst_211 = arith.constant 1.000000e+00 : f32
    %969 = vector.broadcast %cst_211 : f32 to vector<2x32xf32>
    %970 = arith.addf %969, %968 : vector<2x32xf32>
    %971 = arith.divf %969, %970 : vector<2x32xf32>
    %972 = vector.extract_strided_slice %965 {offsets = [0, 32], sizes = [2, 32], strides = [1, 1]} : vector<2x128xf32> to vector<2x32xf32>
    %973 = arith.negf %972 : vector<2x32xf32>
    %974 = math.exp %973 : vector<2x32xf32>
    %cst_212 = arith.constant 1.000000e+00 : f32
    %975 = vector.broadcast %cst_212 : f32 to vector<2x32xf32>
    %976 = arith.addf %975, %974 : vector<2x32xf32>
    %977 = arith.divf %975, %976 : vector<2x32xf32>
    %978 = vector.extract_strided_slice %965 {offsets = [0, 64], sizes = [2, 32], strides = [1, 1]} : vector<2x128xf32> to vector<2x32xf32>
    %979 = math.tanh %978 : vector<2x32xf32>
    %980 = vector.extract_strided_slice %965 {offsets = [0, 96], sizes = [2, 32], strides = [1, 1]} : vector<2x128xf32> to vector<2x32xf32>
    %981 = arith.negf %980 : vector<2x32xf32>
    %982 = math.exp %981 : vector<2x32xf32>
    %cst_213 = arith.constant 1.000000e+00 : f32
    %983 = vector.broadcast %cst_213 : f32 to vector<2x32xf32>
    %984 = arith.addf %983, %982 : vector<2x32xf32>
    %985 = arith.divf %983, %984 : vector<2x32xf32>
    %986 = arith.mulf %977, %956 : vector<2x32xf32>
    %987 = arith.mulf %971, %979 : vector<2x32xf32>
    %988 = arith.addf %986, %987 : vector<2x32xf32>
    %989 = math.tanh %988 : vector<2x32xf32>
    %990 = arith.mulf %985, %989 : vector<2x32xf32>
    %cst_214 = arith.constant dense<0.000000e+00> : vector<2x128xf32>
    %991 = tpu.matmul %990, %765, %cst_214 {dimension_numbers = #tpu.dot_dimension_numbers<[1], [0], [0], [1], [0, 0, 1, 1], [], []>} : vector<2x32xf32>, vector<32x128xf32>, vector<2x128xf32> -> vector<2x128xf32>
    %992 = vector.broadcast %766 : vector<1x128xf32> to vector<2x128xf32>
    %993 = arith.addf %991, %992 : vector<2x128xf32>
    %cst_215 = arith.constant dense<0.000000e+00> : vector<2x128xf32>
    %994 = tpu.matmul %49, %763, %cst_215 {dimension_numbers = #tpu.dot_dimension_numbers<[1], [0], [0], [1], [0, 0, 1, 1], [], []>} : vector<2x32xf32>, vector<32x128xf32>, vector<2x128xf32> -> vector<2x128xf32>
    %995 = arith.addf %993, %994 : vector<2x128xf32>
    %cst_216 = arith.constant dense<0.000000e+00> : vector<2x128xf32>
    %996 = tpu.matmul %502, %764, %cst_216 {dimension_numbers = #tpu.dot_dimension_numbers<[1], [0], [0], [1], [0, 0, 1, 1], [], []>} : vector<2x32xf32>, vector<32x128xf32>, vector<2x128xf32> -> vector<2x128xf32>
    %997 = arith.addf %995, %996 : vector<2x128xf32>
    %998 = vector.extract_strided_slice %997 {offsets = [0, 0], sizes = [2, 32], strides = [1, 1]} : vector<2x128xf32> to vector<2x32xf32>
    %999 = arith.negf %998 : vector<2x32xf32>
    %1000 = math.exp %999 : vector<2x32xf32>
    %cst_217 = arith.constant 1.000000e+00 : f32
    %1001 = vector.broadcast %cst_217 : f32 to vector<2x32xf32>
    %1002 = arith.addf %1001, %1000 : vector<2x32xf32>
    %1003 = arith.divf %1001, %1002 : vector<2x32xf32>
    %1004 = vector.extract_strided_slice %997 {offsets = [0, 32], sizes = [2, 32], strides = [1, 1]} : vector<2x128xf32> to vector<2x32xf32>
    %1005 = arith.negf %1004 : vector<2x32xf32>
    %1006 = math.exp %1005 : vector<2x32xf32>
    %cst_218 = arith.constant 1.000000e+00 : f32
    %1007 = vector.broadcast %cst_218 : f32 to vector<2x32xf32>
    %1008 = arith.addf %1007, %1006 : vector<2x32xf32>
    %1009 = arith.divf %1007, %1008 : vector<2x32xf32>
    %1010 = vector.extract_strided_slice %997 {offsets = [0, 64], sizes = [2, 32], strides = [1, 1]} : vector<2x128xf32> to vector<2x32xf32>
    %1011 = math.tanh %1010 : vector<2x32xf32>
    %1012 = vector.extract_strided_slice %997 {offsets = [0, 96], sizes = [2, 32], strides = [1, 1]} : vector<2x128xf32> to vector<2x32xf32>
    %1013 = arith.negf %1012 : vector<2x32xf32>
    %1014 = math.exp %1013 : vector<2x32xf32>
    %cst_219 = arith.constant 1.000000e+00 : f32
    %1015 = vector.broadcast %cst_219 : f32 to vector<2x32xf32>
    %1016 = arith.addf %1015, %1014 : vector<2x32xf32>
    %1017 = arith.divf %1015, %1016 : vector<2x32xf32>
    %1018 = arith.mulf %1009, %988 : vector<2x32xf32>
    %1019 = arith.mulf %1003, %1011 : vector<2x32xf32>
    %1020 = arith.addf %1018, %1019 : vector<2x32xf32>
    %1021 = math.tanh %1020 : vector<2x32xf32>
    %1022 = arith.mulf %1017, %1021 : vector<2x32xf32>
    %1023 = arith.addf %538, %1022 : vector<2x32xf32>
    %1024 = arith.addf %570, %990 : vector<2x32xf32>
    %1025 = arith.addf %602, %958 : vector<2x32xf32>
    %1026 = arith.addf %634, %926 : vector<2x32xf32>
    %1027 = arith.addf %666, %894 : vector<2x32xf32>
    %1028 = arith.addf %698, %862 : vector<2x32xf32>
    %1029 = arith.addf %730, %830 : vector<2x32xf32>
    %1030 = arith.addf %762, %798 : vector<2x32xf32>
    %1031 = arith.addf %259, %502 : vector<2x32xf32>
    %1032 = arith.addf %257, %500 : vector<2x32xf32>
    %1033 = arith.addf %762, %1022 : vector<2x32xf32>
    %1034 = arith.addf %760, %1020 : vector<2x32xf32>
    %c0_220 = arith.constant 0 : index
    %c0_221 = arith.constant 0 : index
    %c0_222 = arith.constant 0 : index
    %1035 = vector.load %arg1[%c0_220, %c0_221, %c0_222] : memref<8x2x32xf32, #tpu.memory_space<vmem>>, vector<1x2x32xf32>
    %1036 = vector.shape_cast %1035 : vector<1x2x32xf32> to vector<2x32xf32>
    %c1_223 = arith.constant 1 : index
    %c0_224 = arith.constant 0 : index
    %c0_225 = arith.constant 0 : index
    %1037 = vector.load %arg1[%c1_223, %c0_224, %c0_225] : memref<8x2x32xf32, #tpu.memory_space<vmem>>, vector<1x2x32xf32>
    %1038 = vector.shape_cast %1037 : vector<1x2x32xf32> to vector<2x32xf32>
    %c2_226 = arith.constant 2 : index
    %c0_227 = arith.constant 0 : index
    %c0_228 = arith.constant 0 : index
    %1039 = vector.load %arg1[%c2_226, %c0_227, %c0_228] : memref<8x2x32xf32, #tpu.memory_space<vmem>>, vector<1x2x32xf32>
    %1040 = vector.shape_cast %1039 : vector<1x2x32xf32> to vector<2x32xf32>
    %c3_229 = arith.constant 3 : index
    %c0_230 = arith.constant 0 : index
    %c0_231 = arith.constant 0 : index
    %1041 = vector.load %arg1[%c3_229, %c0_230, %c0_231] : memref<8x2x32xf32, #tpu.memory_space<vmem>>, vector<1x2x32xf32>
    %1042 = vector.shape_cast %1041 : vector<1x2x32xf32> to vector<2x32xf32>
    %c4_232 = arith.constant 4 : index
    %c0_233 = arith.constant 0 : index
    %c0_234 = arith.constant 0 : index
    %1043 = vector.load %arg1[%c4_232, %c0_233, %c0_234] : memref<8x2x32xf32, #tpu.memory_space<vmem>>, vector<1x2x32xf32>
    %1044 = vector.shape_cast %1043 : vector<1x2x32xf32> to vector<2x32xf32>
    %c5_235 = arith.constant 5 : index
    %c0_236 = arith.constant 0 : index
    %c0_237 = arith.constant 0 : index
    %1045 = vector.load %arg1[%c5_235, %c0_236, %c0_237] : memref<8x2x32xf32, #tpu.memory_space<vmem>>, vector<1x2x32xf32>
    %1046 = vector.shape_cast %1045 : vector<1x2x32xf32> to vector<2x32xf32>
    %c6_238 = arith.constant 6 : index
    %c0_239 = arith.constant 0 : index
    %c0_240 = arith.constant 0 : index
    %1047 = vector.load %arg1[%c6_238, %c0_239, %c0_240] : memref<8x2x32xf32, #tpu.memory_space<vmem>>, vector<1x2x32xf32>
    %1048 = vector.shape_cast %1047 : vector<1x2x32xf32> to vector<2x32xf32>
    %c7_241 = arith.constant 7 : index
    %c0_242 = arith.constant 0 : index
    %c0_243 = arith.constant 0 : index
    %1049 = vector.load %arg1[%c7_241, %c0_242, %c0_243] : memref<8x2x32xf32, #tpu.memory_space<vmem>>, vector<1x2x32xf32>
    %1050 = vector.shape_cast %1049 : vector<1x2x32xf32> to vector<2x32xf32>
    %c0_244 = arith.constant 0 : index
    %c0_245 = arith.constant 0 : index
    %1051 = vector.load %arg16[%c0_244, %c0_245] : memref<32x128xf32, #tpu.memory_space<vmem>>, vector<32x128xf32>
    %c0_246 = arith.constant 0 : index
    %c0_247 = arith.constant 0 : index
    %1052 = vector.load %arg17[%c0_246, %c0_247] : memref<32x128xf32, #tpu.memory_space<vmem>>, vector<32x128xf32>
    %c0_248 = arith.constant 0 : index
    %c0_249 = arith.constant 0 : index
    %1053 = vector.load %arg18[%c0_248, %c0_249] : memref<1x128xf32, #tpu.memory_space<vmem>>, vector<1x128xf32>
    %cst_250 = arith.constant dense<0.000000e+00> : vector<2x128xf32>
    %1054 = tpu.matmul %1031, %1052, %cst_250 {dimension_numbers = #tpu.dot_dimension_numbers<[1], [0], [0], [1], [0, 0, 1, 1], [], []>} : vector<2x32xf32>, vector<32x128xf32>, vector<2x128xf32> -> vector<2x128xf32>
    %1055 = vector.broadcast %1053 : vector<1x128xf32> to vector<2x128xf32>
    %1056 = arith.addf %1054, %1055 : vector<2x128xf32>
    %cst_251 = arith.constant dense<0.000000e+00> : vector<2x128xf32>
    %1057 = tpu.matmul %1036, %1051, %cst_251 {dimension_numbers = #tpu.dot_dimension_numbers<[1], [0], [0], [1], [0, 0, 1, 1], [], []>} : vector<2x32xf32>, vector<32x128xf32>, vector<2x128xf32> -> vector<2x128xf32>
    %1058 = arith.addf %1056, %1057 : vector<2x128xf32>
    %1059 = vector.extract_strided_slice %1058 {offsets = [0, 0], sizes = [2, 32], strides = [1, 1]} : vector<2x128xf32> to vector<2x32xf32>
    %1060 = arith.negf %1059 : vector<2x32xf32>
    %1061 = math.exp %1060 : vector<2x32xf32>
    %cst_252 = arith.constant 1.000000e+00 : f32
    %1062 = vector.broadcast %cst_252 : f32 to vector<2x32xf32>
    %1063 = arith.addf %1062, %1061 : vector<2x32xf32>
    %1064 = arith.divf %1062, %1063 : vector<2x32xf32>
    %1065 = vector.extract_strided_slice %1058 {offsets = [0, 32], sizes = [2, 32], strides = [1, 1]} : vector<2x128xf32> to vector<2x32xf32>
    %1066 = arith.negf %1065 : vector<2x32xf32>
    %1067 = math.exp %1066 : vector<2x32xf32>
    %cst_253 = arith.constant 1.000000e+00 : f32
    %1068 = vector.broadcast %cst_253 : f32 to vector<2x32xf32>
    %1069 = arith.addf %1068, %1067 : vector<2x32xf32>
    %1070 = arith.divf %1068, %1069 : vector<2x32xf32>
    %1071 = vector.extract_strided_slice %1058 {offsets = [0, 64], sizes = [2, 32], strides = [1, 1]} : vector<2x128xf32> to vector<2x32xf32>
    %1072 = math.tanh %1071 : vector<2x32xf32>
    %1073 = vector.extract_strided_slice %1058 {offsets = [0, 96], sizes = [2, 32], strides = [1, 1]} : vector<2x128xf32> to vector<2x32xf32>
    %1074 = arith.negf %1073 : vector<2x32xf32>
    %1075 = math.exp %1074 : vector<2x32xf32>
    %cst_254 = arith.constant 1.000000e+00 : f32
    %1076 = vector.broadcast %cst_254 : f32 to vector<2x32xf32>
    %1077 = arith.addf %1076, %1075 : vector<2x32xf32>
    %1078 = arith.divf %1076, %1077 : vector<2x32xf32>
    %1079 = arith.mulf %1070, %1032 : vector<2x32xf32>
    %1080 = arith.mulf %1064, %1072 : vector<2x32xf32>
    %1081 = arith.addf %1079, %1080 : vector<2x32xf32>
    %1082 = math.tanh %1081 : vector<2x32xf32>
    %1083 = arith.mulf %1078, %1082 : vector<2x32xf32>
    %cst_255 = arith.constant dense<0.000000e+00> : vector<2x128xf32>
    %1084 = tpu.matmul %1083, %1052, %cst_255 {dimension_numbers = #tpu.dot_dimension_numbers<[1], [0], [0], [1], [0, 0, 1, 1], [], []>} : vector<2x32xf32>, vector<32x128xf32>, vector<2x128xf32> -> vector<2x128xf32>
    %1085 = vector.broadcast %1053 : vector<1x128xf32> to vector<2x128xf32>
    %1086 = arith.addf %1084, %1085 : vector<2x128xf32>
    %cst_256 = arith.constant dense<0.000000e+00> : vector<2x128xf32>
    %1087 = tpu.matmul %1038, %1051, %cst_256 {dimension_numbers = #tpu.dot_dimension_numbers<[1], [0], [0], [1], [0, 0, 1, 1], [], []>} : vector<2x32xf32>, vector<32x128xf32>, vector<2x128xf32> -> vector<2x128xf32>
    %1088 = arith.addf %1086, %1087 : vector<2x128xf32>
    %1089 = vector.extract_strided_slice %1088 {offsets = [0, 0], sizes = [2, 32], strides = [1, 1]} : vector<2x128xf32> to vector<2x32xf32>
    %1090 = arith.negf %1089 : vector<2x32xf32>
    %1091 = math.exp %1090 : vector<2x32xf32>
    %cst_257 = arith.constant 1.000000e+00 : f32
    %1092 = vector.broadcast %cst_257 : f32 to vector<2x32xf32>
    %1093 = arith.addf %1092, %1091 : vector<2x32xf32>
    %1094 = arith.divf %1092, %1093 : vector<2x32xf32>
    %1095 = vector.extract_strided_slice %1088 {offsets = [0, 32], sizes = [2, 32], strides = [1, 1]} : vector<2x128xf32> to vector<2x32xf32>
    %1096 = arith.negf %1095 : vector<2x32xf32>
    %1097 = math.exp %1096 : vector<2x32xf32>
    %cst_258 = arith.constant 1.000000e+00 : f32
    %1098 = vector.broadcast %cst_258 : f32 to vector<2x32xf32>
    %1099 = arith.addf %1098, %1097 : vector<2x32xf32>
    %1100 = arith.divf %1098, %1099 : vector<2x32xf32>
    %1101 = vector.extract_strided_slice %1088 {offsets = [0, 64], sizes = [2, 32], strides = [1, 1]} : vector<2x128xf32> to vector<2x32xf32>
    %1102 = math.tanh %1101 : vector<2x32xf32>
    %1103 = vector.extract_strided_slice %1088 {offsets = [0, 96], sizes = [2, 32], strides = [1, 1]} : vector<2x128xf32> to vector<2x32xf32>
    %1104 = arith.negf %1103 : vector<2x32xf32>
    %1105 = math.exp %1104 : vector<2x32xf32>
    %cst_259 = arith.constant 1.000000e+00 : f32
    %1106 = vector.broadcast %cst_259 : f32 to vector<2x32xf32>
    %1107 = arith.addf %1106, %1105 : vector<2x32xf32>
    %1108 = arith.divf %1106, %1107 : vector<2x32xf32>
    %1109 = arith.mulf %1100, %1081 : vector<2x32xf32>
    %1110 = arith.mulf %1094, %1102 : vector<2x32xf32>
    %1111 = arith.addf %1109, %1110 : vector<2x32xf32>
    %1112 = math.tanh %1111 : vector<2x32xf32>
    %1113 = arith.mulf %1108, %1112 : vector<2x32xf32>
    %cst_260 = arith.constant dense<0.000000e+00> : vector<2x128xf32>
    %1114 = tpu.matmul %1113, %1052, %cst_260 {dimension_numbers = #tpu.dot_dimension_numbers<[1], [0], [0], [1], [0, 0, 1, 1], [], []>} : vector<2x32xf32>, vector<32x128xf32>, vector<2x128xf32> -> vector<2x128xf32>
    %1115 = vector.broadcast %1053 : vector<1x128xf32> to vector<2x128xf32>
    %1116 = arith.addf %1114, %1115 : vector<2x128xf32>
    %cst_261 = arith.constant dense<0.000000e+00> : vector<2x128xf32>
    %1117 = tpu.matmul %1040, %1051, %cst_261 {dimension_numbers = #tpu.dot_dimension_numbers<[1], [0], [0], [1], [0, 0, 1, 1], [], []>} : vector<2x32xf32>, vector<32x128xf32>, vector<2x128xf32> -> vector<2x128xf32>
    %1118 = arith.addf %1116, %1117 : vector<2x128xf32>
    %1119 = vector.extract_strided_slice %1118 {offsets = [0, 0], sizes = [2, 32], strides = [1, 1]} : vector<2x128xf32> to vector<2x32xf32>
    %1120 = arith.negf %1119 : vector<2x32xf32>
    %1121 = math.exp %1120 : vector<2x32xf32>
    %cst_262 = arith.constant 1.000000e+00 : f32
    %1122 = vector.broadcast %cst_262 : f32 to vector<2x32xf32>
    %1123 = arith.addf %1122, %1121 : vector<2x32xf32>
    %1124 = arith.divf %1122, %1123 : vector<2x32xf32>
    %1125 = vector.extract_strided_slice %1118 {offsets = [0, 32], sizes = [2, 32], strides = [1, 1]} : vector<2x128xf32> to vector<2x32xf32>
    %1126 = arith.negf %1125 : vector<2x32xf32>
    %1127 = math.exp %1126 : vector<2x32xf32>
    %cst_263 = arith.constant 1.000000e+00 : f32
    %1128 = vector.broadcast %cst_263 : f32 to vector<2x32xf32>
    %1129 = arith.addf %1128, %1127 : vector<2x32xf32>
    %1130 = arith.divf %1128, %1129 : vector<2x32xf32>
    %1131 = vector.extract_strided_slice %1118 {offsets = [0, 64], sizes = [2, 32], strides = [1, 1]} : vector<2x128xf32> to vector<2x32xf32>
    %1132 = math.tanh %1131 : vector<2x32xf32>
    %1133 = vector.extract_strided_slice %1118 {offsets = [0, 96], sizes = [2, 32], strides = [1, 1]} : vector<2x128xf32> to vector<2x32xf32>
    %1134 = arith.negf %1133 : vector<2x32xf32>
    %1135 = math.exp %1134 : vector<2x32xf32>
    %cst_264 = arith.constant 1.000000e+00 : f32
    %1136 = vector.broadcast %cst_264 : f32 to vector<2x32xf32>
    %1137 = arith.addf %1136, %1135 : vector<2x32xf32>
    %1138 = arith.divf %1136, %1137 : vector<2x32xf32>
    %1139 = arith.mulf %1130, %1111 : vector<2x32xf32>
    %1140 = arith.mulf %1124, %1132 : vector<2x32xf32>
    %1141 = arith.addf %1139, %1140 : vector<2x32xf32>
    %1142 = math.tanh %1141 : vector<2x32xf32>
    %1143 = arith.mulf %1138, %1142 : vector<2x32xf32>
    %cst_265 = arith.constant dense<0.000000e+00> : vector<2x128xf32>
    %1144 = tpu.matmul %1143, %1052, %cst_265 {dimension_numbers = #tpu.dot_dimension_numbers<[1], [0], [0], [1], [0, 0, 1, 1], [], []>} : vector<2x32xf32>, vector<32x128xf32>, vector<2x128xf32> -> vector<2x128xf32>
    %1145 = vector.broadcast %1053 : vector<1x128xf32> to vector<2x128xf32>
    %1146 = arith.addf %1144, %1145 : vector<2x128xf32>
    %cst_266 = arith.constant dense<0.000000e+00> : vector<2x128xf32>
    %1147 = tpu.matmul %1042, %1051, %cst_266 {dimension_numbers = #tpu.dot_dimension_numbers<[1], [0], [0], [1], [0, 0, 1, 1], [], []>} : vector<2x32xf32>, vector<32x128xf32>, vector<2x128xf32> -> vector<2x128xf32>
    %1148 = arith.addf %1146, %1147 : vector<2x128xf32>
    %1149 = vector.extract_strided_slice %1148 {offsets = [0, 0], sizes = [2, 32], strides = [1, 1]} : vector<2x128xf32> to vector<2x32xf32>
    %1150 = arith.negf %1149 : vector<2x32xf32>
    %1151 = math.exp %1150 : vector<2x32xf32>
    %cst_267 = arith.constant 1.000000e+00 : f32
    %1152 = vector.broadcast %cst_267 : f32 to vector<2x32xf32>
    %1153 = arith.addf %1152, %1151 : vector<2x32xf32>
    %1154 = arith.divf %1152, %1153 : vector<2x32xf32>
    %1155 = vector.extract_strided_slice %1148 {offsets = [0, 32], sizes = [2, 32], strides = [1, 1]} : vector<2x128xf32> to vector<2x32xf32>
    %1156 = arith.negf %1155 : vector<2x32xf32>
    %1157 = math.exp %1156 : vector<2x32xf32>
    %cst_268 = arith.constant 1.000000e+00 : f32
    %1158 = vector.broadcast %cst_268 : f32 to vector<2x32xf32>
    %1159 = arith.addf %1158, %1157 : vector<2x32xf32>
    %1160 = arith.divf %1158, %1159 : vector<2x32xf32>
    %1161 = vector.extract_strided_slice %1148 {offsets = [0, 64], sizes = [2, 32], strides = [1, 1]} : vector<2x128xf32> to vector<2x32xf32>
    %1162 = math.tanh %1161 : vector<2x32xf32>
    %1163 = vector.extract_strided_slice %1148 {offsets = [0, 96], sizes = [2, 32], strides = [1, 1]} : vector<2x128xf32> to vector<2x32xf32>
    %1164 = arith.negf %1163 : vector<2x32xf32>
    %1165 = math.exp %1164 : vector<2x32xf32>
    %cst_269 = arith.constant 1.000000e+00 : f32
    %1166 = vector.broadcast %cst_269 : f32 to vector<2x32xf32>
    %1167 = arith.addf %1166, %1165 : vector<2x32xf32>
    %1168 = arith.divf %1166, %1167 : vector<2x32xf32>
    %1169 = arith.mulf %1160, %1141 : vector<2x32xf32>
    %1170 = arith.mulf %1154, %1162 : vector<2x32xf32>
    %1171 = arith.addf %1169, %1170 : vector<2x32xf32>
    %1172 = math.tanh %1171 : vector<2x32xf32>
    %1173 = arith.mulf %1168, %1172 : vector<2x32xf32>
    %cst_270 = arith.constant dense<0.000000e+00> : vector<2x128xf32>
    %1174 = tpu.matmul %1173, %1052, %cst_270 {dimension_numbers = #tpu.dot_dimension_numbers<[1], [0], [0], [1], [0, 0, 1, 1], [], []>} : vector<2x32xf32>, vector<32x128xf32>, vector<2x128xf32> -> vector<2x128xf32>
    %1175 = vector.broadcast %1053 : vector<1x128xf32> to vector<2x128xf32>
    %1176 = arith.addf %1174, %1175 : vector<2x128xf32>
    %cst_271 = arith.constant dense<0.000000e+00> : vector<2x128xf32>
    %1177 = tpu.matmul %1044, %1051, %cst_271 {dimension_numbers = #tpu.dot_dimension_numbers<[1], [0], [0], [1], [0, 0, 1, 1], [], []>} : vector<2x32xf32>, vector<32x128xf32>, vector<2x128xf32> -> vector<2x128xf32>
    %1178 = arith.addf %1176, %1177 : vector<2x128xf32>
    %1179 = vector.extract_strided_slice %1178 {offsets = [0, 0], sizes = [2, 32], strides = [1, 1]} : vector<2x128xf32> to vector<2x32xf32>
    %1180 = arith.negf %1179 : vector<2x32xf32>
    %1181 = math.exp %1180 : vector<2x32xf32>
    %cst_272 = arith.constant 1.000000e+00 : f32
    %1182 = vector.broadcast %cst_272 : f32 to vector<2x32xf32>
    %1183 = arith.addf %1182, %1181 : vector<2x32xf32>
    %1184 = arith.divf %1182, %1183 : vector<2x32xf32>
    %1185 = vector.extract_strided_slice %1178 {offsets = [0, 32], sizes = [2, 32], strides = [1, 1]} : vector<2x128xf32> to vector<2x32xf32>
    %1186 = arith.negf %1185 : vector<2x32xf32>
    %1187 = math.exp %1186 : vector<2x32xf32>
    %cst_273 = arith.constant 1.000000e+00 : f32
    %1188 = vector.broadcast %cst_273 : f32 to vector<2x32xf32>
    %1189 = arith.addf %1188, %1187 : vector<2x32xf32>
    %1190 = arith.divf %1188, %1189 : vector<2x32xf32>
    %1191 = vector.extract_strided_slice %1178 {offsets = [0, 64], sizes = [2, 32], strides = [1, 1]} : vector<2x128xf32> to vector<2x32xf32>
    %1192 = math.tanh %1191 : vector<2x32xf32>
    %1193 = vector.extract_strided_slice %1178 {offsets = [0, 96], sizes = [2, 32], strides = [1, 1]} : vector<2x128xf32> to vector<2x32xf32>
    %1194 = arith.negf %1193 : vector<2x32xf32>
    %1195 = math.exp %1194 : vector<2x32xf32>
    %cst_274 = arith.constant 1.000000e+00 : f32
    %1196 = vector.broadcast %cst_274 : f32 to vector<2x32xf32>
    %1197 = arith.addf %1196, %1195 : vector<2x32xf32>
    %1198 = arith.divf %1196, %1197 : vector<2x32xf32>
    %1199 = arith.mulf %1190, %1171 : vector<2x32xf32>
    %1200 = arith.mulf %1184, %1192 : vector<2x32xf32>
    %1201 = arith.addf %1199, %1200 : vector<2x32xf32>
    %1202 = math.tanh %1201 : vector<2x32xf32>
    %1203 = arith.mulf %1198, %1202 : vector<2x32xf32>
    %cst_275 = arith.constant dense<0.000000e+00> : vector<2x128xf32>
    %1204 = tpu.matmul %1203, %1052, %cst_275 {dimension_numbers = #tpu.dot_dimension_numbers<[1], [0], [0], [1], [0, 0, 1, 1], [], []>} : vector<2x32xf32>, vector<32x128xf32>, vector<2x128xf32> -> vector<2x128xf32>
    %1205 = vector.broadcast %1053 : vector<1x128xf32> to vector<2x128xf32>
    %1206 = arith.addf %1204, %1205 : vector<2x128xf32>
    %cst_276 = arith.constant dense<0.000000e+00> : vector<2x128xf32>
    %1207 = tpu.matmul %1046, %1051, %cst_276 {dimension_numbers = #tpu.dot_dimension_numbers<[1], [0], [0], [1], [0, 0, 1, 1], [], []>} : vector<2x32xf32>, vector<32x128xf32>, vector<2x128xf32> -> vector<2x128xf32>
    %1208 = arith.addf %1206, %1207 : vector<2x128xf32>
    %1209 = vector.extract_strided_slice %1208 {offsets = [0, 0], sizes = [2, 32], strides = [1, 1]} : vector<2x128xf32> to vector<2x32xf32>
    %1210 = arith.negf %1209 : vector<2x32xf32>
    %1211 = math.exp %1210 : vector<2x32xf32>
    %cst_277 = arith.constant 1.000000e+00 : f32
    %1212 = vector.broadcast %cst_277 : f32 to vector<2x32xf32>
    %1213 = arith.addf %1212, %1211 : vector<2x32xf32>
    %1214 = arith.divf %1212, %1213 : vector<2x32xf32>
    %1215 = vector.extract_strided_slice %1208 {offsets = [0, 32], sizes = [2, 32], strides = [1, 1]} : vector<2x128xf32> to vector<2x32xf32>
    %1216 = arith.negf %1215 : vector<2x32xf32>
    %1217 = math.exp %1216 : vector<2x32xf32>
    %cst_278 = arith.constant 1.000000e+00 : f32
    %1218 = vector.broadcast %cst_278 : f32 to vector<2x32xf32>
    %1219 = arith.addf %1218, %1217 : vector<2x32xf32>
    %1220 = arith.divf %1218, %1219 : vector<2x32xf32>
    %1221 = vector.extract_strided_slice %1208 {offsets = [0, 64], sizes = [2, 32], strides = [1, 1]} : vector<2x128xf32> to vector<2x32xf32>
    %1222 = math.tanh %1221 : vector<2x32xf32>
    %1223 = vector.extract_strided_slice %1208 {offsets = [0, 96], sizes = [2, 32], strides = [1, 1]} : vector<2x128xf32> to vector<2x32xf32>
    %1224 = arith.negf %1223 : vector<2x32xf32>
    %1225 = math.exp %1224 : vector<2x32xf32>
    %cst_279 = arith.constant 1.000000e+00 : f32
    %1226 = vector.broadcast %cst_279 : f32 to vector<2x32xf32>
    %1227 = arith.addf %1226, %1225 : vector<2x32xf32>
    %1228 = arith.divf %1226, %1227 : vector<2x32xf32>
    %1229 = arith.mulf %1220, %1201 : vector<2x32xf32>
    %1230 = arith.mulf %1214, %1222 : vector<2x32xf32>
    %1231 = arith.addf %1229, %1230 : vector<2x32xf32>
    %1232 = math.tanh %1231 : vector<2x32xf32>
    %1233 = arith.mulf %1228, %1232 : vector<2x32xf32>
    %cst_280 = arith.constant dense<0.000000e+00> : vector<2x128xf32>
    %1234 = tpu.matmul %1233, %1052, %cst_280 {dimension_numbers = #tpu.dot_dimension_numbers<[1], [0], [0], [1], [0, 0, 1, 1], [], []>} : vector<2x32xf32>, vector<32x128xf32>, vector<2x128xf32> -> vector<2x128xf32>
    %1235 = vector.broadcast %1053 : vector<1x128xf32> to vector<2x128xf32>
    %1236 = arith.addf %1234, %1235 : vector<2x128xf32>
    %cst_281 = arith.constant dense<0.000000e+00> : vector<2x128xf32>
    %1237 = tpu.matmul %1048, %1051, %cst_281 {dimension_numbers = #tpu.dot_dimension_numbers<[1], [0], [0], [1], [0, 0, 1, 1], [], []>} : vector<2x32xf32>, vector<32x128xf32>, vector<2x128xf32> -> vector<2x128xf32>
    %1238 = arith.addf %1236, %1237 : vector<2x128xf32>
    %1239 = vector.extract_strided_slice %1238 {offsets = [0, 0], sizes = [2, 32], strides = [1, 1]} : vector<2x128xf32> to vector<2x32xf32>
    %1240 = arith.negf %1239 : vector<2x32xf32>
    %1241 = math.exp %1240 : vector<2x32xf32>
    %cst_282 = arith.constant 1.000000e+00 : f32
    %1242 = vector.broadcast %cst_282 : f32 to vector<2x32xf32>
    %1243 = arith.addf %1242, %1241 : vector<2x32xf32>
    %1244 = arith.divf %1242, %1243 : vector<2x32xf32>
    %1245 = vector.extract_strided_slice %1238 {offsets = [0, 32], sizes = [2, 32], strides = [1, 1]} : vector<2x128xf32> to vector<2x32xf32>
    %1246 = arith.negf %1245 : vector<2x32xf32>
    %1247 = math.exp %1246 : vector<2x32xf32>
    %cst_283 = arith.constant 1.000000e+00 : f32
    %1248 = vector.broadcast %cst_283 : f32 to vector<2x32xf32>
    %1249 = arith.addf %1248, %1247 : vector<2x32xf32>
    %1250 = arith.divf %1248, %1249 : vector<2x32xf32>
    %1251 = vector.extract_strided_slice %1238 {offsets = [0, 64], sizes = [2, 32], strides = [1, 1]} : vector<2x128xf32> to vector<2x32xf32>
    %1252 = math.tanh %1251 : vector<2x32xf32>
    %1253 = vector.extract_strided_slice %1238 {offsets = [0, 96], sizes = [2, 32], strides = [1, 1]} : vector<2x128xf32> to vector<2x32xf32>
    %1254 = arith.negf %1253 : vector<2x32xf32>
    %1255 = math.exp %1254 : vector<2x32xf32>
    %cst_284 = arith.constant 1.000000e+00 : f32
    %1256 = vector.broadcast %cst_284 : f32 to vector<2x32xf32>
    %1257 = arith.addf %1256, %1255 : vector<2x32xf32>
    %1258 = arith.divf %1256, %1257 : vector<2x32xf32>
    %1259 = arith.mulf %1250, %1231 : vector<2x32xf32>
    %1260 = arith.mulf %1244, %1252 : vector<2x32xf32>
    %1261 = arith.addf %1259, %1260 : vector<2x32xf32>
    %1262 = math.tanh %1261 : vector<2x32xf32>
    %1263 = arith.mulf %1258, %1262 : vector<2x32xf32>
    %cst_285 = arith.constant dense<0.000000e+00> : vector<2x128xf32>
    %1264 = tpu.matmul %1263, %1052, %cst_285 {dimension_numbers = #tpu.dot_dimension_numbers<[1], [0], [0], [1], [0, 0, 1, 1], [], []>} : vector<2x32xf32>, vector<32x128xf32>, vector<2x128xf32> -> vector<2x128xf32>
    %1265 = vector.broadcast %1053 : vector<1x128xf32> to vector<2x128xf32>
    %1266 = arith.addf %1264, %1265 : vector<2x128xf32>
    %cst_286 = arith.constant dense<0.000000e+00> : vector<2x128xf32>
    %1267 = tpu.matmul %1050, %1051, %cst_286 {dimension_numbers = #tpu.dot_dimension_numbers<[1], [0], [0], [1], [0, 0, 1, 1], [], []>} : vector<2x32xf32>, vector<32x128xf32>, vector<2x128xf32> -> vector<2x128xf32>
    %1268 = arith.addf %1266, %1267 : vector<2x128xf32>
    %1269 = vector.extract_strided_slice %1268 {offsets = [0, 0], sizes = [2, 32], strides = [1, 1]} : vector<2x128xf32> to vector<2x32xf32>
    %1270 = arith.negf %1269 : vector<2x32xf32>
    %1271 = math.exp %1270 : vector<2x32xf32>
    %cst_287 = arith.constant 1.000000e+00 : f32
    %1272 = vector.broadcast %cst_287 : f32 to vector<2x32xf32>
    %1273 = arith.addf %1272, %1271 : vector<2x32xf32>
    %1274 = arith.divf %1272, %1273 : vector<2x32xf32>
    %1275 = vector.extract_strided_slice %1268 {offsets = [0, 32], sizes = [2, 32], strides = [1, 1]} : vector<2x128xf32> to vector<2x32xf32>
    %1276 = arith.negf %1275 : vector<2x32xf32>
    %1277 = math.exp %1276 : vector<2x32xf32>
    %cst_288 = arith.constant 1.000000e+00 : f32
    %1278 = vector.broadcast %cst_288 : f32 to vector<2x32xf32>
    %1279 = arith.addf %1278, %1277 : vector<2x32xf32>
    %1280 = arith.divf %1278, %1279 : vector<2x32xf32>
    %1281 = vector.extract_strided_slice %1268 {offsets = [0, 64], sizes = [2, 32], strides = [1, 1]} : vector<2x128xf32> to vector<2x32xf32>
    %1282 = math.tanh %1281 : vector<2x32xf32>
    %1283 = vector.extract_strided_slice %1268 {offsets = [0, 96], sizes = [2, 32], strides = [1, 1]} : vector<2x128xf32> to vector<2x32xf32>
    %1284 = arith.negf %1283 : vector<2x32xf32>
    %1285 = math.exp %1284 : vector<2x32xf32>
    %cst_289 = arith.constant 1.000000e+00 : f32
    %1286 = vector.broadcast %cst_289 : f32 to vector<2x32xf32>
    %1287 = arith.addf %1286, %1285 : vector<2x32xf32>
    %1288 = arith.divf %1286, %1287 : vector<2x32xf32>
    %1289 = arith.mulf %1280, %1261 : vector<2x32xf32>
    %1290 = arith.mulf %1274, %1282 : vector<2x32xf32>
    %1291 = arith.addf %1289, %1290 : vector<2x32xf32>
    %1292 = math.tanh %1291 : vector<2x32xf32>
    %1293 = arith.mulf %1288, %1292 : vector<2x32xf32>
    %c0_290 = arith.constant 0 : index
    %c0_291 = arith.constant 0 : index
    %1294 = vector.load %arg19[%c0_290, %c0_291] : memref<32x128xf32, #tpu.memory_space<vmem>>, vector<32x128xf32>
    %c0_292 = arith.constant 0 : index
    %c0_293 = arith.constant 0 : index
    %1295 = vector.load %arg20[%c0_292, %c0_293] : memref<32x128xf32, #tpu.memory_space<vmem>>, vector<32x128xf32>
    %c0_294 = arith.constant 0 : index
    %c0_295 = arith.constant 0 : index
    %1296 = vector.load %arg21[%c0_294, %c0_295] : memref<1x128xf32, #tpu.memory_space<vmem>>, vector<1x128xf32>
    %cst_296 = arith.constant dense<0.000000e+00> : vector<2x128xf32>
    %1297 = tpu.matmul %1033, %1295, %cst_296 {dimension_numbers = #tpu.dot_dimension_numbers<[1], [0], [0], [1], [0, 0, 1, 1], [], []>} : vector<2x32xf32>, vector<32x128xf32>, vector<2x128xf32> -> vector<2x128xf32>
    %1298 = vector.broadcast %1296 : vector<1x128xf32> to vector<2x128xf32>
    %1299 = arith.addf %1297, %1298 : vector<2x128xf32>
    %cst_297 = arith.constant dense<0.000000e+00> : vector<2x128xf32>
    %1300 = tpu.matmul %1083, %1294, %cst_297 {dimension_numbers = #tpu.dot_dimension_numbers<[1], [0], [0], [1], [0, 0, 1, 1], [], []>} : vector<2x32xf32>, vector<32x128xf32>, vector<2x128xf32> -> vector<2x128xf32>
    %1301 = arith.addf %1299, %1300 : vector<2x128xf32>
    %1302 = vector.extract_strided_slice %1301 {offsets = [0, 0], sizes = [2, 32], strides = [1, 1]} : vector<2x128xf32> to vector<2x32xf32>
    %1303 = arith.negf %1302 : vector<2x32xf32>
    %1304 = math.exp %1303 : vector<2x32xf32>
    %cst_298 = arith.constant 1.000000e+00 : f32
    %1305 = vector.broadcast %cst_298 : f32 to vector<2x32xf32>
    %1306 = arith.addf %1305, %1304 : vector<2x32xf32>
    %1307 = arith.divf %1305, %1306 : vector<2x32xf32>
    %1308 = vector.extract_strided_slice %1301 {offsets = [0, 32], sizes = [2, 32], strides = [1, 1]} : vector<2x128xf32> to vector<2x32xf32>
    %1309 = arith.negf %1308 : vector<2x32xf32>
    %1310 = math.exp %1309 : vector<2x32xf32>
    %cst_299 = arith.constant 1.000000e+00 : f32
    %1311 = vector.broadcast %cst_299 : f32 to vector<2x32xf32>
    %1312 = arith.addf %1311, %1310 : vector<2x32xf32>
    %1313 = arith.divf %1311, %1312 : vector<2x32xf32>
    %1314 = vector.extract_strided_slice %1301 {offsets = [0, 64], sizes = [2, 32], strides = [1, 1]} : vector<2x128xf32> to vector<2x32xf32>
    %1315 = math.tanh %1314 : vector<2x32xf32>
    %1316 = vector.extract_strided_slice %1301 {offsets = [0, 96], sizes = [2, 32], strides = [1, 1]} : vector<2x128xf32> to vector<2x32xf32>
    %1317 = arith.negf %1316 : vector<2x32xf32>
    %1318 = math.exp %1317 : vector<2x32xf32>
    %cst_300 = arith.constant 1.000000e+00 : f32
    %1319 = vector.broadcast %cst_300 : f32 to vector<2x32xf32>
    %1320 = arith.addf %1319, %1318 : vector<2x32xf32>
    %1321 = arith.divf %1319, %1320 : vector<2x32xf32>
    %1322 = arith.mulf %1313, %1034 : vector<2x32xf32>
    %1323 = arith.mulf %1307, %1315 : vector<2x32xf32>
    %1324 = arith.addf %1322, %1323 : vector<2x32xf32>
    %1325 = math.tanh %1324 : vector<2x32xf32>
    %1326 = arith.mulf %1321, %1325 : vector<2x32xf32>
    %cst_301 = arith.constant dense<0.000000e+00> : vector<2x128xf32>
    %1327 = tpu.matmul %1326, %1295, %cst_301 {dimension_numbers = #tpu.dot_dimension_numbers<[1], [0], [0], [1], [0, 0, 1, 1], [], []>} : vector<2x32xf32>, vector<32x128xf32>, vector<2x128xf32> -> vector<2x128xf32>
    %1328 = vector.broadcast %1296 : vector<1x128xf32> to vector<2x128xf32>
    %1329 = arith.addf %1327, %1328 : vector<2x128xf32>
    %cst_302 = arith.constant dense<0.000000e+00> : vector<2x128xf32>
    %1330 = tpu.matmul %1113, %1294, %cst_302 {dimension_numbers = #tpu.dot_dimension_numbers<[1], [0], [0], [1], [0, 0, 1, 1], [], []>} : vector<2x32xf32>, vector<32x128xf32>, vector<2x128xf32> -> vector<2x128xf32>
    %1331 = arith.addf %1329, %1330 : vector<2x128xf32>
    %1332 = vector.extract_strided_slice %1331 {offsets = [0, 0], sizes = [2, 32], strides = [1, 1]} : vector<2x128xf32> to vector<2x32xf32>
    %1333 = arith.negf %1332 : vector<2x32xf32>
    %1334 = math.exp %1333 : vector<2x32xf32>
    %cst_303 = arith.constant 1.000000e+00 : f32
    %1335 = vector.broadcast %cst_303 : f32 to vector<2x32xf32>
    %1336 = arith.addf %1335, %1334 : vector<2x32xf32>
    %1337 = arith.divf %1335, %1336 : vector<2x32xf32>
    %1338 = vector.extract_strided_slice %1331 {offsets = [0, 32], sizes = [2, 32], strides = [1, 1]} : vector<2x128xf32> to vector<2x32xf32>
    %1339 = arith.negf %1338 : vector<2x32xf32>
    %1340 = math.exp %1339 : vector<2x32xf32>
    %cst_304 = arith.constant 1.000000e+00 : f32
    %1341 = vector.broadcast %cst_304 : f32 to vector<2x32xf32>
    %1342 = arith.addf %1341, %1340 : vector<2x32xf32>
    %1343 = arith.divf %1341, %1342 : vector<2x32xf32>
    %1344 = vector.extract_strided_slice %1331 {offsets = [0, 64], sizes = [2, 32], strides = [1, 1]} : vector<2x128xf32> to vector<2x32xf32>
    %1345 = math.tanh %1344 : vector<2x32xf32>
    %1346 = vector.extract_strided_slice %1331 {offsets = [0, 96], sizes = [2, 32], strides = [1, 1]} : vector<2x128xf32> to vector<2x32xf32>
    %1347 = arith.negf %1346 : vector<2x32xf32>
    %1348 = math.exp %1347 : vector<2x32xf32>
    %cst_305 = arith.constant 1.000000e+00 : f32
    %1349 = vector.broadcast %cst_305 : f32 to vector<2x32xf32>
    %1350 = arith.addf %1349, %1348 : vector<2x32xf32>
    %1351 = arith.divf %1349, %1350 : vector<2x32xf32>
    %1352 = arith.mulf %1343, %1324 : vector<2x32xf32>
    %1353 = arith.mulf %1337, %1345 : vector<2x32xf32>
    %1354 = arith.addf %1352, %1353 : vector<2x32xf32>
    %1355 = math.tanh %1354 : vector<2x32xf32>
    %1356 = arith.mulf %1351, %1355 : vector<2x32xf32>
    %cst_306 = arith.constant dense<0.000000e+00> : vector<2x128xf32>
    %1357 = tpu.matmul %1356, %1295, %cst_306 {dimension_numbers = #tpu.dot_dimension_numbers<[1], [0], [0], [1], [0, 0, 1, 1], [], []>} : vector<2x32xf32>, vector<32x128xf32>, vector<2x128xf32> -> vector<2x128xf32>
    %1358 = vector.broadcast %1296 : vector<1x128xf32> to vector<2x128xf32>
    %1359 = arith.addf %1357, %1358 : vector<2x128xf32>
    %cst_307 = arith.constant dense<0.000000e+00> : vector<2x128xf32>
    %1360 = tpu.matmul %1143, %1294, %cst_307 {dimension_numbers = #tpu.dot_dimension_numbers<[1], [0], [0], [1], [0, 0, 1, 1], [], []>} : vector<2x32xf32>, vector<32x128xf32>, vector<2x128xf32> -> vector<2x128xf32>
    %1361 = arith.addf %1359, %1360 : vector<2x128xf32>
    %1362 = vector.extract_strided_slice %1361 {offsets = [0, 0], sizes = [2, 32], strides = [1, 1]} : vector<2x128xf32> to vector<2x32xf32>
    %1363 = arith.negf %1362 : vector<2x32xf32>
    %1364 = math.exp %1363 : vector<2x32xf32>
    %cst_308 = arith.constant 1.000000e+00 : f32
    %1365 = vector.broadcast %cst_308 : f32 to vector<2x32xf32>
    %1366 = arith.addf %1365, %1364 : vector<2x32xf32>
    %1367 = arith.divf %1365, %1366 : vector<2x32xf32>
    %1368 = vector.extract_strided_slice %1361 {offsets = [0, 32], sizes = [2, 32], strides = [1, 1]} : vector<2x128xf32> to vector<2x32xf32>
    %1369 = arith.negf %1368 : vector<2x32xf32>
    %1370 = math.exp %1369 : vector<2x32xf32>
    %cst_309 = arith.constant 1.000000e+00 : f32
    %1371 = vector.broadcast %cst_309 : f32 to vector<2x32xf32>
    %1372 = arith.addf %1371, %1370 : vector<2x32xf32>
    %1373 = arith.divf %1371, %1372 : vector<2x32xf32>
    %1374 = vector.extract_strided_slice %1361 {offsets = [0, 64], sizes = [2, 32], strides = [1, 1]} : vector<2x128xf32> to vector<2x32xf32>
    %1375 = math.tanh %1374 : vector<2x32xf32>
    %1376 = vector.extract_strided_slice %1361 {offsets = [0, 96], sizes = [2, 32], strides = [1, 1]} : vector<2x128xf32> to vector<2x32xf32>
    %1377 = arith.negf %1376 : vector<2x32xf32>
    %1378 = math.exp %1377 : vector<2x32xf32>
    %cst_310 = arith.constant 1.000000e+00 : f32
    %1379 = vector.broadcast %cst_310 : f32 to vector<2x32xf32>
    %1380 = arith.addf %1379, %1378 : vector<2x32xf32>
    %1381 = arith.divf %1379, %1380 : vector<2x32xf32>
    %1382 = arith.mulf %1373, %1354 : vector<2x32xf32>
    %1383 = arith.mulf %1367, %1375 : vector<2x32xf32>
    %1384 = arith.addf %1382, %1383 : vector<2x32xf32>
    %1385 = math.tanh %1384 : vector<2x32xf32>
    %1386 = arith.mulf %1381, %1385 : vector<2x32xf32>
    %cst_311 = arith.constant dense<0.000000e+00> : vector<2x128xf32>
    %1387 = tpu.matmul %1386, %1295, %cst_311 {dimension_numbers = #tpu.dot_dimension_numbers<[1], [0], [0], [1], [0, 0, 1, 1], [], []>} : vector<2x32xf32>, vector<32x128xf32>, vector<2x128xf32> -> vector<2x128xf32>
    %1388 = vector.broadcast %1296 : vector<1x128xf32> to vector<2x128xf32>
    %1389 = arith.addf %1387, %1388 : vector<2x128xf32>
    %cst_312 = arith.constant dense<0.000000e+00> : vector<2x128xf32>
    %1390 = tpu.matmul %1173, %1294, %cst_312 {dimension_numbers = #tpu.dot_dimension_numbers<[1], [0], [0], [1], [0, 0, 1, 1], [], []>} : vector<2x32xf32>, vector<32x128xf32>, vector<2x128xf32> -> vector<2x128xf32>
    %1391 = arith.addf %1389, %1390 : vector<2x128xf32>
    %1392 = vector.extract_strided_slice %1391 {offsets = [0, 0], sizes = [2, 32], strides = [1, 1]} : vector<2x128xf32> to vector<2x32xf32>
    %1393 = arith.negf %1392 : vector<2x32xf32>
    %1394 = math.exp %1393 : vector<2x32xf32>
    %cst_313 = arith.constant 1.000000e+00 : f32
    %1395 = vector.broadcast %cst_313 : f32 to vector<2x32xf32>
    %1396 = arith.addf %1395, %1394 : vector<2x32xf32>
    %1397 = arith.divf %1395, %1396 : vector<2x32xf32>
    %1398 = vector.extract_strided_slice %1391 {offsets = [0, 32], sizes = [2, 32], strides = [1, 1]} : vector<2x128xf32> to vector<2x32xf32>
    %1399 = arith.negf %1398 : vector<2x32xf32>
    %1400 = math.exp %1399 : vector<2x32xf32>
    %cst_314 = arith.constant 1.000000e+00 : f32
    %1401 = vector.broadcast %cst_314 : f32 to vector<2x32xf32>
    %1402 = arith.addf %1401, %1400 : vector<2x32xf32>
    %1403 = arith.divf %1401, %1402 : vector<2x32xf32>
    %1404 = vector.extract_strided_slice %1391 {offsets = [0, 64], sizes = [2, 32], strides = [1, 1]} : vector<2x128xf32> to vector<2x32xf32>
    %1405 = math.tanh %1404 : vector<2x32xf32>
    %1406 = vector.extract_strided_slice %1391 {offsets = [0, 96], sizes = [2, 32], strides = [1, 1]} : vector<2x128xf32> to vector<2x32xf32>
    %1407 = arith.negf %1406 : vector<2x32xf32>
    %1408 = math.exp %1407 : vector<2x32xf32>
    %cst_315 = arith.constant 1.000000e+00 : f32
    %1409 = vector.broadcast %cst_315 : f32 to vector<2x32xf32>
    %1410 = arith.addf %1409, %1408 : vector<2x32xf32>
    %1411 = arith.divf %1409, %1410 : vector<2x32xf32>
    %1412 = arith.mulf %1403, %1384 : vector<2x32xf32>
    %1413 = arith.mulf %1397, %1405 : vector<2x32xf32>
    %1414 = arith.addf %1412, %1413 : vector<2x32xf32>
    %1415 = math.tanh %1414 : vector<2x32xf32>
    %1416 = arith.mulf %1411, %1415 : vector<2x32xf32>
    %cst_316 = arith.constant dense<0.000000e+00> : vector<2x128xf32>
    %1417 = tpu.matmul %1416, %1295, %cst_316 {dimension_numbers = #tpu.dot_dimension_numbers<[1], [0], [0], [1], [0, 0, 1, 1], [], []>} : vector<2x32xf32>, vector<32x128xf32>, vector<2x128xf32> -> vector<2x128xf32>
    %1418 = vector.broadcast %1296 : vector<1x128xf32> to vector<2x128xf32>
    %1419 = arith.addf %1417, %1418 : vector<2x128xf32>
    %cst_317 = arith.constant dense<0.000000e+00> : vector<2x128xf32>
    %1420 = tpu.matmul %1203, %1294, %cst_317 {dimension_numbers = #tpu.dot_dimension_numbers<[1], [0], [0], [1], [0, 0, 1, 1], [], []>} : vector<2x32xf32>, vector<32x128xf32>, vector<2x128xf32> -> vector<2x128xf32>
    %1421 = arith.addf %1419, %1420 : vector<2x128xf32>
    %1422 = vector.extract_strided_slice %1421 {offsets = [0, 0], sizes = [2, 32], strides = [1, 1]} : vector<2x128xf32> to vector<2x32xf32>
    %1423 = arith.negf %1422 : vector<2x32xf32>
    %1424 = math.exp %1423 : vector<2x32xf32>
    %cst_318 = arith.constant 1.000000e+00 : f32
    %1425 = vector.broadcast %cst_318 : f32 to vector<2x32xf32>
    %1426 = arith.addf %1425, %1424 : vector<2x32xf32>
    %1427 = arith.divf %1425, %1426 : vector<2x32xf32>
    %1428 = vector.extract_strided_slice %1421 {offsets = [0, 32], sizes = [2, 32], strides = [1, 1]} : vector<2x128xf32> to vector<2x32xf32>
    %1429 = arith.negf %1428 : vector<2x32xf32>
    %1430 = math.exp %1429 : vector<2x32xf32>
    %cst_319 = arith.constant 1.000000e+00 : f32
    %1431 = vector.broadcast %cst_319 : f32 to vector<2x32xf32>
    %1432 = arith.addf %1431, %1430 : vector<2x32xf32>
    %1433 = arith.divf %1431, %1432 : vector<2x32xf32>
    %1434 = vector.extract_strided_slice %1421 {offsets = [0, 64], sizes = [2, 32], strides = [1, 1]} : vector<2x128xf32> to vector<2x32xf32>
    %1435 = math.tanh %1434 : vector<2x32xf32>
    %1436 = vector.extract_strided_slice %1421 {offsets = [0, 96], sizes = [2, 32], strides = [1, 1]} : vector<2x128xf32> to vector<2x32xf32>
    %1437 = arith.negf %1436 : vector<2x32xf32>
    %1438 = math.exp %1437 : vector<2x32xf32>
    %cst_320 = arith.constant 1.000000e+00 : f32
    %1439 = vector.broadcast %cst_320 : f32 to vector<2x32xf32>
    %1440 = arith.addf %1439, %1438 : vector<2x32xf32>
    %1441 = arith.divf %1439, %1440 : vector<2x32xf32>
    %1442 = arith.mulf %1433, %1414 : vector<2x32xf32>
    %1443 = arith.mulf %1427, %1435 : vector<2x32xf32>
    %1444 = arith.addf %1442, %1443 : vector<2x32xf32>
    %1445 = math.tanh %1444 : vector<2x32xf32>
    %1446 = arith.mulf %1441, %1445 : vector<2x32xf32>
    %cst_321 = arith.constant dense<0.000000e+00> : vector<2x128xf32>
    %1447 = tpu.matmul %1446, %1295, %cst_321 {dimension_numbers = #tpu.dot_dimension_numbers<[1], [0], [0], [1], [0, 0, 1, 1], [], []>} : vector<2x32xf32>, vector<32x128xf32>, vector<2x128xf32> -> vector<2x128xf32>
    %1448 = vector.broadcast %1296 : vector<1x128xf32> to vector<2x128xf32>
    %1449 = arith.addf %1447, %1448 : vector<2x128xf32>
    %cst_322 = arith.constant dense<0.000000e+00> : vector<2x128xf32>
    %1450 = tpu.matmul %1233, %1294, %cst_322 {dimension_numbers = #tpu.dot_dimension_numbers<[1], [0], [0], [1], [0, 0, 1, 1], [], []>} : vector<2x32xf32>, vector<32x128xf32>, vector<2x128xf32> -> vector<2x128xf32>
    %1451 = arith.addf %1449, %1450 : vector<2x128xf32>
    %1452 = vector.extract_strided_slice %1451 {offsets = [0, 0], sizes = [2, 32], strides = [1, 1]} : vector<2x128xf32> to vector<2x32xf32>
    %1453 = arith.negf %1452 : vector<2x32xf32>
    %1454 = math.exp %1453 : vector<2x32xf32>
    %cst_323 = arith.constant 1.000000e+00 : f32
    %1455 = vector.broadcast %cst_323 : f32 to vector<2x32xf32>
    %1456 = arith.addf %1455, %1454 : vector<2x32xf32>
    %1457 = arith.divf %1455, %1456 : vector<2x32xf32>
    %1458 = vector.extract_strided_slice %1451 {offsets = [0, 32], sizes = [2, 32], strides = [1, 1]} : vector<2x128xf32> to vector<2x32xf32>
    %1459 = arith.negf %1458 : vector<2x32xf32>
    %1460 = math.exp %1459 : vector<2x32xf32>
    %cst_324 = arith.constant 1.000000e+00 : f32
    %1461 = vector.broadcast %cst_324 : f32 to vector<2x32xf32>
    %1462 = arith.addf %1461, %1460 : vector<2x32xf32>
    %1463 = arith.divf %1461, %1462 : vector<2x32xf32>
    %1464 = vector.extract_strided_slice %1451 {offsets = [0, 64], sizes = [2, 32], strides = [1, 1]} : vector<2x128xf32> to vector<2x32xf32>
    %1465 = math.tanh %1464 : vector<2x32xf32>
    %1466 = vector.extract_strided_slice %1451 {offsets = [0, 96], sizes = [2, 32], strides = [1, 1]} : vector<2x128xf32> to vector<2x32xf32>
    %1467 = arith.negf %1466 : vector<2x32xf32>
    %1468 = math.exp %1467 : vector<2x32xf32>
    %cst_325 = arith.constant 1.000000e+00 : f32
    %1469 = vector.broadcast %cst_325 : f32 to vector<2x32xf32>
    %1470 = arith.addf %1469, %1468 : vector<2x32xf32>
    %1471 = arith.divf %1469, %1470 : vector<2x32xf32>
    %1472 = arith.mulf %1463, %1444 : vector<2x32xf32>
    %1473 = arith.mulf %1457, %1465 : vector<2x32xf32>
    %1474 = arith.addf %1472, %1473 : vector<2x32xf32>
    %1475 = math.tanh %1474 : vector<2x32xf32>
    %1476 = arith.mulf %1471, %1475 : vector<2x32xf32>
    %cst_326 = arith.constant dense<0.000000e+00> : vector<2x128xf32>
    %1477 = tpu.matmul %1476, %1295, %cst_326 {dimension_numbers = #tpu.dot_dimension_numbers<[1], [0], [0], [1], [0, 0, 1, 1], [], []>} : vector<2x32xf32>, vector<32x128xf32>, vector<2x128xf32> -> vector<2x128xf32>
    %1478 = vector.broadcast %1296 : vector<1x128xf32> to vector<2x128xf32>
    %1479 = arith.addf %1477, %1478 : vector<2x128xf32>
    %cst_327 = arith.constant dense<0.000000e+00> : vector<2x128xf32>
    %1480 = tpu.matmul %1263, %1294, %cst_327 {dimension_numbers = #tpu.dot_dimension_numbers<[1], [0], [0], [1], [0, 0, 1, 1], [], []>} : vector<2x32xf32>, vector<32x128xf32>, vector<2x128xf32> -> vector<2x128xf32>
    %1481 = arith.addf %1479, %1480 : vector<2x128xf32>
    %1482 = vector.extract_strided_slice %1481 {offsets = [0, 0], sizes = [2, 32], strides = [1, 1]} : vector<2x128xf32> to vector<2x32xf32>
    %1483 = arith.negf %1482 : vector<2x32xf32>
    %1484 = math.exp %1483 : vector<2x32xf32>
    %cst_328 = arith.constant 1.000000e+00 : f32
    %1485 = vector.broadcast %cst_328 : f32 to vector<2x32xf32>
    %1486 = arith.addf %1485, %1484 : vector<2x32xf32>
    %1487 = arith.divf %1485, %1486 : vector<2x32xf32>
    %1488 = vector.extract_strided_slice %1481 {offsets = [0, 32], sizes = [2, 32], strides = [1, 1]} : vector<2x128xf32> to vector<2x32xf32>
    %1489 = arith.negf %1488 : vector<2x32xf32>
    %1490 = math.exp %1489 : vector<2x32xf32>
    %cst_329 = arith.constant 1.000000e+00 : f32
    %1491 = vector.broadcast %cst_329 : f32 to vector<2x32xf32>
    %1492 = arith.addf %1491, %1490 : vector<2x32xf32>
    %1493 = arith.divf %1491, %1492 : vector<2x32xf32>
    %1494 = vector.extract_strided_slice %1481 {offsets = [0, 64], sizes = [2, 32], strides = [1, 1]} : vector<2x128xf32> to vector<2x32xf32>
    %1495 = math.tanh %1494 : vector<2x32xf32>
    %1496 = vector.extract_strided_slice %1481 {offsets = [0, 96], sizes = [2, 32], strides = [1, 1]} : vector<2x128xf32> to vector<2x32xf32>
    %1497 = arith.negf %1496 : vector<2x32xf32>
    %1498 = math.exp %1497 : vector<2x32xf32>
    %cst_330 = arith.constant 1.000000e+00 : f32
    %1499 = vector.broadcast %cst_330 : f32 to vector<2x32xf32>
    %1500 = arith.addf %1499, %1498 : vector<2x32xf32>
    %1501 = arith.divf %1499, %1500 : vector<2x32xf32>
    %1502 = arith.mulf %1493, %1474 : vector<2x32xf32>
    %1503 = arith.mulf %1487, %1495 : vector<2x32xf32>
    %1504 = arith.addf %1502, %1503 : vector<2x32xf32>
    %1505 = math.tanh %1504 : vector<2x32xf32>
    %1506 = arith.mulf %1501, %1505 : vector<2x32xf32>
    %cst_331 = arith.constant dense<0.000000e+00> : vector<2x128xf32>
    %1507 = tpu.matmul %1506, %1295, %cst_331 {dimension_numbers = #tpu.dot_dimension_numbers<[1], [0], [0], [1], [0, 0, 1, 1], [], []>} : vector<2x32xf32>, vector<32x128xf32>, vector<2x128xf32> -> vector<2x128xf32>
    %1508 = vector.broadcast %1296 : vector<1x128xf32> to vector<2x128xf32>
    %1509 = arith.addf %1507, %1508 : vector<2x128xf32>
    %cst_332 = arith.constant dense<0.000000e+00> : vector<2x128xf32>
    %1510 = tpu.matmul %1293, %1294, %cst_332 {dimension_numbers = #tpu.dot_dimension_numbers<[1], [0], [0], [1], [0, 0, 1, 1], [], []>} : vector<2x32xf32>, vector<32x128xf32>, vector<2x128xf32> -> vector<2x128xf32>
    %1511 = arith.addf %1509, %1510 : vector<2x128xf32>
    %1512 = vector.extract_strided_slice %1511 {offsets = [0, 0], sizes = [2, 32], strides = [1, 1]} : vector<2x128xf32> to vector<2x32xf32>
    %1513 = arith.negf %1512 : vector<2x32xf32>
    %1514 = math.exp %1513 : vector<2x32xf32>
    %cst_333 = arith.constant 1.000000e+00 : f32
    %1515 = vector.broadcast %cst_333 : f32 to vector<2x32xf32>
    %1516 = arith.addf %1515, %1514 : vector<2x32xf32>
    %1517 = arith.divf %1515, %1516 : vector<2x32xf32>
    %1518 = vector.extract_strided_slice %1511 {offsets = [0, 32], sizes = [2, 32], strides = [1, 1]} : vector<2x128xf32> to vector<2x32xf32>
    %1519 = arith.negf %1518 : vector<2x32xf32>
    %1520 = math.exp %1519 : vector<2x32xf32>
    %cst_334 = arith.constant 1.000000e+00 : f32
    %1521 = vector.broadcast %cst_334 : f32 to vector<2x32xf32>
    %1522 = arith.addf %1521, %1520 : vector<2x32xf32>
    %1523 = arith.divf %1521, %1522 : vector<2x32xf32>
    %1524 = vector.extract_strided_slice %1511 {offsets = [0, 64], sizes = [2, 32], strides = [1, 1]} : vector<2x128xf32> to vector<2x32xf32>
    %1525 = math.tanh %1524 : vector<2x32xf32>
    %1526 = vector.extract_strided_slice %1511 {offsets = [0, 96], sizes = [2, 32], strides = [1, 1]} : vector<2x128xf32> to vector<2x32xf32>
    %1527 = arith.negf %1526 : vector<2x32xf32>
    %1528 = math.exp %1527 : vector<2x32xf32>
    %cst_335 = arith.constant 1.000000e+00 : f32
    %1529 = vector.broadcast %cst_335 : f32 to vector<2x32xf32>
    %1530 = arith.addf %1529, %1528 : vector<2x32xf32>
    %1531 = arith.divf %1529, %1530 : vector<2x32xf32>
    %1532 = arith.mulf %1523, %1504 : vector<2x32xf32>
    %1533 = arith.mulf %1517, %1525 : vector<2x32xf32>
    %1534 = arith.addf %1532, %1533 : vector<2x32xf32>
    %1535 = math.tanh %1534 : vector<2x32xf32>
    %1536 = arith.mulf %1531, %1535 : vector<2x32xf32>
    %c0_336 = arith.constant 0 : index
    %c0_337 = arith.constant 0 : index
    %1537 = vector.load %arg22[%c0_336, %c0_337] : memref<32x32xf32, #tpu.memory_space<vmem>>, vector<32x32xf32>
    %c0_338 = arith.constant 0 : index
    %c0_339 = arith.constant 0 : index
    %1538 = vector.load %arg23[%c0_338, %c0_339] : memref<1x32xf32, #tpu.memory_space<vmem>>, vector<1x32xf32>
    %c0_340 = arith.constant 0 : index
    %c0_341 = arith.constant 0 : index
    %1539 = vector.load %arg24[%c0_340, %c0_341] : memref<32x32xf32, #tpu.memory_space<vmem>>, vector<32x32xf32>
    %c0_342 = arith.constant 0 : index
    %c0_343 = arith.constant 0 : index
    %1540 = vector.load %arg25[%c0_342, %c0_343] : memref<32x32xf32, #tpu.memory_space<vmem>>, vector<32x32xf32>
    %c0_344 = arith.constant 0 : index
    %c0_345 = arith.constant 0 : index
    %1541 = vector.load %arg26[%c0_344, %c0_345] : memref<1x32xf32, #tpu.memory_space<vmem>>, vector<1x32xf32>
    %c0_346 = arith.constant 0 : index
    %c0_347 = arith.constant 0 : index
    %1542 = vector.load %arg27[%c0_346, %c0_347] : memref<32x64xf32, #tpu.memory_space<vmem>>, vector<32x64xf32>
    %c0_348 = arith.constant 0 : index
    %c0_349 = arith.constant 0 : index
    %1543 = vector.load %arg28[%c0_348, %c0_349] : memref<1x64xf32, #tpu.memory_space<vmem>>, vector<1x64xf32>
    %1544 = vector.extract_strided_slice %1023 {offsets = [0, 0], sizes = [1, 32], strides = [1, 1]} : vector<2x32xf32> to vector<1x32xf32>
    %1545 = vector.extract_strided_slice %1024 {offsets = [0, 0], sizes = [1, 32], strides = [1, 1]} : vector<2x32xf32> to vector<1x32xf32>
    %1546 = vector.extract_strided_slice %1025 {offsets = [0, 0], sizes = [1, 32], strides = [1, 1]} : vector<2x32xf32> to vector<1x32xf32>
    %1547 = vector.extract_strided_slice %1026 {offsets = [0, 0], sizes = [1, 32], strides = [1, 1]} : vector<2x32xf32> to vector<1x32xf32>
    %1548 = vector.extract_strided_slice %1027 {offsets = [0, 0], sizes = [1, 32], strides = [1, 1]} : vector<2x32xf32> to vector<1x32xf32>
    %1549 = vector.extract_strided_slice %1028 {offsets = [0, 0], sizes = [1, 32], strides = [1, 1]} : vector<2x32xf32> to vector<1x32xf32>
    %1550 = vector.extract_strided_slice %1029 {offsets = [0, 0], sizes = [1, 32], strides = [1, 1]} : vector<2x32xf32> to vector<1x32xf32>
    %1551 = vector.extract_strided_slice %1030 {offsets = [0, 0], sizes = [1, 32], strides = [1, 1]} : vector<2x32xf32> to vector<1x32xf32>
    %1552 = tpu.concatenate %1544, %1545, %1546, %1547, %1548, %1549, %1550, %1551 in 0 : vector<1x32xf32>, vector<1x32xf32>, vector<1x32xf32>, vector<1x32xf32>, vector<1x32xf32>, vector<1x32xf32>, vector<1x32xf32>, vector<1x32xf32> -> vector<8x32xf32>
    %1553 = vector.extract_strided_slice %1326 {offsets = [0, 0], sizes = [1, 32], strides = [1, 1]} : vector<2x32xf32> to vector<1x32xf32>
    %1554 = vector.extract_strided_slice %1356 {offsets = [0, 0], sizes = [1, 32], strides = [1, 1]} : vector<2x32xf32> to vector<1x32xf32>
    %1555 = vector.extract_strided_slice %1386 {offsets = [0, 0], sizes = [1, 32], strides = [1, 1]} : vector<2x32xf32> to vector<1x32xf32>
    %1556 = vector.extract_strided_slice %1416 {offsets = [0, 0], sizes = [1, 32], strides = [1, 1]} : vector<2x32xf32> to vector<1x32xf32>
    %1557 = vector.extract_strided_slice %1446 {offsets = [0, 0], sizes = [1, 32], strides = [1, 1]} : vector<2x32xf32> to vector<1x32xf32>
    %1558 = vector.extract_strided_slice %1476 {offsets = [0, 0], sizes = [1, 32], strides = [1, 1]} : vector<2x32xf32> to vector<1x32xf32>
    %1559 = vector.extract_strided_slice %1506 {offsets = [0, 0], sizes = [1, 32], strides = [1, 1]} : vector<2x32xf32> to vector<1x32xf32>
    %1560 = vector.extract_strided_slice %1536 {offsets = [0, 0], sizes = [1, 32], strides = [1, 1]} : vector<2x32xf32> to vector<1x32xf32>
    %1561 = tpu.concatenate %1553, %1554, %1555, %1556, %1557, %1558, %1559, %1560 in 0 : vector<1x32xf32>, vector<1x32xf32>, vector<1x32xf32>, vector<1x32xf32>, vector<1x32xf32>, vector<1x32xf32>, vector<1x32xf32>, vector<1x32xf32> -> vector<8x32xf32>
    %cst_350 = arith.constant dense<0.000000e+00> : vector<8x32xf32>
    %1562 = tpu.matmul %1552, %1537, %cst_350 {dimension_numbers = #tpu.dot_dimension_numbers<[1], [0], [0], [1], [0, 0, 1, 1], [], []>} : vector<8x32xf32>, vector<32x32xf32>, vector<8x32xf32> -> vector<8x32xf32>
    %1563 = vector.broadcast %1538 : vector<1x32xf32> to vector<8x32xf32>
    %1564 = arith.addf %1562, %1563 : vector<8x32xf32>
    %1565 = tpu.transpose %1561, [1, 0] : vector<8x32xf32> -> vector<32x8xf32>
    %cst_351 = arith.constant dense<0.000000e+00> : vector<8x8xf32>
    %1566 = tpu.matmul %1564, %1565, %cst_351 {dimension_numbers = #tpu.dot_dimension_numbers<[1], [0], [0], [1], [0, 0, 1, 1], [], []>} : vector<8x32xf32>, vector<32x8xf32>, vector<8x8xf32> -> vector<8x8xf32>
    %cst_352 = arith.constant dense<0xFF800000> : vector<8xf32>
    %1567 = vector.multi_reduction <maximumf>, %1566, %cst_352 [0] : vector<8x8xf32> to vector<8xf32>
    %1568 = vector.shape_cast %1567 : vector<8xf32> to vector<1x8xf32>
    %1569 = vector.broadcast %1568 : vector<1x8xf32> to vector<8x8xf32>
    %1570 = arith.subf %1566, %1569 : vector<8x8xf32>
    %1571 = math.exp %1570 : vector<8x8xf32>
    %cst_353 = arith.constant dense<0.000000e+00> : vector<8xf32>
    %1572 = vector.multi_reduction <add>, %1571, %cst_353 [0] : vector<8x8xf32> to vector<8xf32>
    %1573 = vector.shape_cast %1572 : vector<8xf32> to vector<1x8xf32>
    %1574 = vector.broadcast %1573 : vector<1x8xf32> to vector<8x8xf32>
    %1575 = arith.divf %1571, %1574 : vector<8x8xf32>
    %c0_354 = arith.constant 0 : index
    %c0_355 = arith.constant 0 : index
    %c0_356 = arith.constant 0 : index
    %1576 = vector.load %arg30[%c0_354, %c0_355, %c0_356] : memref<2x8x8xf32, #tpu.memory_space<vmem>>, vector<1x8x8xf32>
    %1577 = vector.shape_cast %1576 : vector<1x8x8xf32> to vector<8x8xf32>
    %1578 = vector.shape_cast %1575 : vector<8x8xf32> to vector<1x8x8xf32>
    tpu.vector_store %arg30[%c0_354, %c0_355, %c0_356], %1578 {strides = array<i32>} : memref<2x8x8xf32, #tpu.memory_space<vmem>>, vector<1x8x8xf32>,
    %1579 = tpu.transpose %1575, [1, 0] : vector<8x8xf32> -> vector<8x8xf32>
    %cst_357 = arith.constant dense<0.000000e+00> : vector<8x32xf32>
    %1580 = tpu.matmul %1579, %1552, %cst_357 {dimension_numbers = #tpu.dot_dimension_numbers<[1], [0], [0], [1], [0, 0, 1, 1], [], []>} : vector<8x8xf32>, vector<8x32xf32>, vector<8x32xf32> -> vector<8x32xf32>
    %cst_358 = arith.constant dense<0.000000e+00> : vector<8x32xf32>
    %1581 = tpu.matmul %1561, %1539, %cst_358 {dimension_numbers = #tpu.dot_dimension_numbers<[1], [0], [0], [1], [0, 0, 1, 1], [], []>} : vector<8x32xf32>, vector<32x32xf32>, vector<8x32xf32> -> vector<8x32xf32>
    %cst_359 = arith.constant dense<0.000000e+00> : vector<8x32xf32>
    %1582 = tpu.matmul %1580, %1540, %cst_359 {dimension_numbers = #tpu.dot_dimension_numbers<[1], [0], [0], [1], [0, 0, 1, 1], [], []>} : vector<8x32xf32>, vector<32x32xf32>, vector<8x32xf32> -> vector<8x32xf32>
    %1583 = arith.addf %1581, %1582 : vector<8x32xf32>
    %1584 = vector.broadcast %1541 : vector<1x32xf32> to vector<8x32xf32>
    %1585 = arith.addf %1583, %1584 : vector<8x32xf32>
    %1586 = math.tanh %1585 : vector<8x32xf32>
    %cst_360 = arith.constant dense<0.000000e+00> : vector<8x64xf32>
    %1587 = tpu.matmul %1586, %1542, %cst_360 {dimension_numbers = #tpu.dot_dimension_numbers<[1], [0], [0], [1], [0, 0, 1, 1], [], []>} : vector<8x32xf32>, vector<32x64xf32>, vector<8x64xf32> -> vector<8x64xf32>
    %1588 = vector.broadcast %1543 : vector<1x64xf32> to vector<8x64xf32>
    %1589 = arith.addf %1587, %1588 : vector<8x64xf32>
    %c0_361 = arith.constant 0 : index
    %c0_362 = arith.constant 0 : index
    %c0_363 = arith.constant 0 : index
    %1590 = vector.load %arg29[%c0_361, %c0_362, %c0_363] : memref<2x8x64xf32, #tpu.memory_space<vmem>>, vector<1x8x64xf32>
    %1591 = vector.shape_cast %1590 : vector<1x8x64xf32> to vector<8x64xf32>
    %1592 = vector.shape_cast %1589 : vector<8x64xf32> to vector<1x8x64xf32>
    tpu.vector_store %arg29[%c0_361, %c0_362, %c0_363], %1592 {strides = array<i32>} : memref<2x8x64xf32, #tpu.memory_space<vmem>>, vector<1x8x64xf32>,
    %1593 = vector.extract_strided_slice %1023 {offsets = [1, 0], sizes = [1, 32], strides = [1, 1]} : vector<2x32xf32> to vector<1x32xf32>
    %1594 = vector.extract_strided_slice %1024 {offsets = [1, 0], sizes = [1, 32], strides = [1, 1]} : vector<2x32xf32> to vector<1x32xf32>
    %1595 = vector.extract_strided_slice %1025 {offsets = [1, 0], sizes = [1, 32], strides = [1, 1]} : vector<2x32xf32> to vector<1x32xf32>
    %1596 = vector.extract_strided_slice %1026 {offsets = [1, 0], sizes = [1, 32], strides = [1, 1]} : vector<2x32xf32> to vector<1x32xf32>
    %1597 = vector.extract_strided_slice %1027 {offsets = [1, 0], sizes = [1, 32], strides = [1, 1]} : vector<2x32xf32> to vector<1x32xf32>
    %1598 = vector.extract_strided_slice %1028 {offsets = [1, 0], sizes = [1, 32], strides = [1, 1]} : vector<2x32xf32> to vector<1x32xf32>
    %1599 = vector.extract_strided_slice %1029 {offsets = [1, 0], sizes = [1, 32], strides = [1, 1]} : vector<2x32xf32> to vector<1x32xf32>
    %1600 = vector.extract_strided_slice %1030 {offsets = [1, 0], sizes = [1, 32], strides = [1, 1]} : vector<2x32xf32> to vector<1x32xf32>
    %1601 = tpu.concatenate %1593, %1594, %1595, %1596, %1597, %1598, %1599, %1600 in 0 : vector<1x32xf32>, vector<1x32xf32>, vector<1x32xf32>, vector<1x32xf32>, vector<1x32xf32>, vector<1x32xf32>, vector<1x32xf32>, vector<1x32xf32> -> vector<8x32xf32>
    %1602 = vector.extract_strided_slice %1326 {offsets = [1, 0], sizes = [1, 32], strides = [1, 1]} : vector<2x32xf32> to vector<1x32xf32>
    %1603 = vector.extract_strided_slice %1356 {offsets = [1, 0], sizes = [1, 32], strides = [1, 1]} : vector<2x32xf32> to vector<1x32xf32>
    %1604 = vector.extract_strided_slice %1386 {offsets = [1, 0], sizes = [1, 32], strides = [1, 1]} : vector<2x32xf32> to vector<1x32xf32>
    %1605 = vector.extract_strided_slice %1416 {offsets = [1, 0], sizes = [1, 32], strides = [1, 1]} : vector<2x32xf32> to vector<1x32xf32>
    %1606 = vector.extract_strided_slice %1446 {offsets = [1, 0], sizes = [1, 32], strides = [1, 1]} : vector<2x32xf32> to vector<1x32xf32>
    %1607 = vector.extract_strided_slice %1476 {offsets = [1, 0], sizes = [1, 32], strides = [1, 1]} : vector<2x32xf32> to vector<1x32xf32>
    %1608 = vector.extract_strided_slice %1506 {offsets = [1, 0], sizes = [1, 32], strides = [1, 1]} : vector<2x32xf32> to vector<1x32xf32>
    %1609 = vector.extract_strided_slice %1536 {offsets = [1, 0], sizes = [1, 32], strides = [1, 1]} : vector<2x32xf32> to vector<1x32xf32>
    %1610 = tpu.concatenate %1602, %1603, %1604, %1605, %1606, %1607, %1608, %1609 in 0 : vector<1x32xf32>, vector<1x32xf32>, vector<1x32xf32>, vector<1x32xf32>, vector<1x32xf32>, vector<1x32xf32>, vector<1x32xf32>, vector<1x32xf32> -> vector<8x32xf32>
    %cst_364 = arith.constant dense<0.000000e+00> : vector<8x32xf32>
    %1611 = tpu.matmul %1601, %1537, %cst_364 {dimension_numbers = #tpu.dot_dimension_numbers<[1], [0], [0], [1], [0, 0, 1, 1], [], []>} : vector<8x32xf32>, vector<32x32xf32>, vector<8x32xf32> -> vector<8x32xf32>
    %1612 = vector.broadcast %1538 : vector<1x32xf32> to vector<8x32xf32>
    %1613 = arith.addf %1611, %1612 : vector<8x32xf32>
    %1614 = tpu.transpose %1610, [1, 0] : vector<8x32xf32> -> vector<32x8xf32>
    %cst_365 = arith.constant dense<0.000000e+00> : vector<8x8xf32>
    %1615 = tpu.matmul %1613, %1614, %cst_365 {dimension_numbers = #tpu.dot_dimension_numbers<[1], [0], [0], [1], [0, 0, 1, 1], [], []>} : vector<8x32xf32>, vector<32x8xf32>, vector<8x8xf32> -> vector<8x8xf32>
    %cst_366 = arith.constant dense<0xFF800000> : vector<8xf32>
    %1616 = vector.multi_reduction <maximumf>, %1615, %cst_366 [0] : vector<8x8xf32> to vector<8xf32>
    %1617 = vector.shape_cast %1616 : vector<8xf32> to vector<1x8xf32>
    %1618 = vector.broadcast %1617 : vector<1x8xf32> to vector<8x8xf32>
    %1619 = arith.subf %1615, %1618 : vector<8x8xf32>
    %1620 = math.exp %1619 : vector<8x8xf32>
    %cst_367 = arith.constant dense<0.000000e+00> : vector<8xf32>
    %1621 = vector.multi_reduction <add>, %1620, %cst_367 [0] : vector<8x8xf32> to vector<8xf32>
    %1622 = vector.shape_cast %1621 : vector<8xf32> to vector<1x8xf32>
    %1623 = vector.broadcast %1622 : vector<1x8xf32> to vector<8x8xf32>
    %1624 = arith.divf %1620, %1623 : vector<8x8xf32>
    %c1_368 = arith.constant 1 : index
    %c0_369 = arith.constant 0 : index
    %c0_370 = arith.constant 0 : index
    %1625 = vector.load %arg30[%c1_368, %c0_369, %c0_370] : memref<2x8x8xf32, #tpu.memory_space<vmem>>, vector<1x8x8xf32>
    %1626 = vector.shape_cast %1625 : vector<1x8x8xf32> to vector<8x8xf32>
    %1627 = vector.shape_cast %1624 : vector<8x8xf32> to vector<1x8x8xf32>
    tpu.vector_store %arg30[%c1_368, %c0_369, %c0_370], %1627 {strides = array<i32>} : memref<2x8x8xf32, #tpu.memory_space<vmem>>, vector<1x8x8xf32>,
    %1628 = tpu.transpose %1624, [1, 0] : vector<8x8xf32> -> vector<8x8xf32>
    %cst_371 = arith.constant dense<0.000000e+00> : vector<8x32xf32>
    %1629 = tpu.matmul %1628, %1601, %cst_371 {dimension_numbers = #tpu.dot_dimension_numbers<[1], [0], [0], [1], [0, 0, 1, 1], [], []>} : vector<8x8xf32>, vector<8x32xf32>, vector<8x32xf32> -> vector<8x32xf32>
    %cst_372 = arith.constant dense<0.000000e+00> : vector<8x32xf32>
    %1630 = tpu.matmul %1610, %1539, %cst_372 {dimension_numbers = #tpu.dot_dimension_numbers<[1], [0], [0], [1], [0, 0, 1, 1], [], []>} : vector<8x32xf32>, vector<32x32xf32>, vector<8x32xf32> -> vector<8x32xf32>
    %cst_373 = arith.constant dense<0.000000e+00> : vector<8x32xf32>
    %1631 = tpu.matmul %1629, %1540, %cst_373 {dimension_numbers = #tpu.dot_dimension_numbers<[1], [0], [0], [1], [0, 0, 1, 1], [], []>} : vector<8x32xf32>, vector<32x32xf32>, vector<8x32xf32> -> vector<8x32xf32>
    %1632 = arith.addf %1630, %1631 : vector<8x32xf32>
    %1633 = vector.broadcast %1541 : vector<1x32xf32> to vector<8x32xf32>
    %1634 = arith.addf %1632, %1633 : vector<8x32xf32>
    %1635 = math.tanh %1634 : vector<8x32xf32>
    %cst_374 = arith.constant dense<0.000000e+00> : vector<8x64xf32>
    %1636 = tpu.matmul %1635, %1542, %cst_374 {dimension_numbers = #tpu.dot_dimension_numbers<[1], [0], [0], [1], [0, 0, 1, 1], [], []>} : vector<8x32xf32>, vector<32x64xf32>, vector<8x64xf32> -> vector<8x64xf32>
    %1637 = vector.broadcast %1543 : vector<1x64xf32> to vector<8x64xf32>
    %1638 = arith.addf %1636, %1637 : vector<8x64xf32>
    %c1_375 = arith.constant 1 : index
    %c0_376 = arith.constant 0 : index
    %c0_377 = arith.constant 0 : index
    %1639 = vector.load %arg29[%c1_375, %c0_376, %c0_377] : memref<2x8x64xf32, #tpu.memory_space<vmem>>, vector<1x8x64xf32>
    %1640 = vector.shape_cast %1639 : vector<1x8x64xf32> to vector<8x64xf32>
    %1641 = vector.shape_cast %1638 : vector<8x64xf32> to vector<1x8x64xf32>
    tpu.vector_store %arg29[%c1_375, %c0_376, %c0_377], %1641 {strides = array<i32>} : memref<2x8x64xf32, #tpu.memory_space<vmem>>, vector<1x8x64xf32>,
    return
  }
}

</mosaic_0001>

<bundles_post_ra>
// kernel: munoh2_forward.1
= control target key start
LH: loop header
LB: loop body
LE: loop exit
PB: predicated region body
PF: predicated region fallthrough
CT: control target
= control target key end

     0   :  { %s6170_s6 = smov 1   ;;  %s6171_s10 = smov 2   ;;  %s7782_s0 = inlined_call_operand.smem [shape: u32[31], index: -1, kind: input, shape index: {}] }
   0x1   :  { %s6221_s5 = sld [smem:[%s7782_s0]]   ;;  %s6172_s14 = smov 3  }
   0x2   :  { %s6226_s9 = sld [smem:[%s7782_s0 + %s6170_s6]]   ;;  %s6173_s18 = smov 4  }
   0x3   :  { %s6231_s13 = sld [smem:[%s7782_s0 + %s6171_s10]]   ;;  %s6174_s22 = smov 5  }
   0x4   :  { %s6236_s17 = sld [smem:[%s7782_s0 + %s6172_s14]]   ;;  %s6175_s26 = smov 6  }
   0x5   :  { %s6241_s21 = sld [smem:[%s7782_s0 + %s6173_s18]]   ;;  %s6176_s30 = smov 7  }
   0x6   :  { %s6246_s25 = sld [smem:[%s7782_s0 + %s6174_s22]]   ;;  %s6177_s4 = smov 8  }
   0x7   :  { %s6251_s29 = sld [smem:[%s7782_s0 + %s6175_s26]]   ;;  %s6178_s10 = smov 9  }
   0x8   :  { %7794 = sst [smem:[#allocation22_spill]] %s6226_s9  ;;  %s6179_s15 = smov 10  }
   0x9   :  { %s6256_s3 = sld [smem:[%s7782_s0 + %s6176_s30]]   ;;  %s6180_s20 = smov 11  }
   0xa   :  { %s6261_s8 = sld [smem:[%s7782_s0 + %s6177_s4]]   ;;  %s6181_s26 = smov 12  }
   0xb   :  { %s6266_s14 = sld [smem:[%s7782_s0 + %s6178_s10]]   ;;  %s6182_s1 = smov 13  }
   0xc   :  { %s6271_s19 = sld [smem:[%s7782_s0 + %s6179_s15]]   ;;  %s6183_s7 = smov 14  }
   0xd   :  { %s6276_s24 = sld [smem:[%s7782_s0 + %s6180_s20]]   ;;  %s6184_s15 = smov 15  }
   0xe   :  { %s6281_s30 = sld [smem:[%s7782_s0 + %s6181_s26]]   ;;  %s6185_s22 = smov 16  }
   0xf   :  { %s6286_s6 = sld [smem:[%s7782_s0 + %s6182_s1]]   ;;  %s6186_s28 = smov 17  }
  0x10   :  { %s6291_s12 = sld [smem:[%s7782_s0 + %s6183_s7]]   ;;  %s6187_s7 = smov 18  }
  0x11   :  { %s6296_s20 = sld [smem:[%s7782_s0 + %s6184_s15]]   ;;  %s6188_s15 = smov 19  }
  0x12   :  { %s6301_s27 = sld [smem:[%s7782_s0 + %s6185_s22]]   ;;  %s6189_s22 = smov 20  }
  0x13   :  { %s6306_s4 = sld [smem:[%s7782_s0 + %s6186_s28]]   ;;  %s6190_s28 = smov 21  }
  0x14   :  { %7795 = sst [smem:[#allocation23_spill]] %s6281_s30 }
  0x15   :  { %7796 = sst [smem:[#allocation24_spill]] %s6286_s6 }
  0x16   :  { %7797 = sst [smem:[#allocation25_spill]] %s6291_s12 }
  0x17   :  { %s6311_s9 = sld [smem:[%s7782_s0 + %s6187_s7]]   ;;  %s6191_s7 = smov 22  }
  0x18   :  { %7798 = sst [smem:[#allocation26_spill]] %s6301_s27 }
  0x19   :  { %7799 = sst [smem:[#allocation27_spill]] %s6306_s4 }
  0x1a   :  { %s6316_s6 = sld [smem:[%s7782_s0 + %s6188_s15]]   ;;  %s6192_s15 = smov 23  }
  0x1b   :  { %s6321_s27 = sld [smem:[%s7782_s0 + %s6189_s22]]   ;;  %s6193_s22 = smov 24  }
  0x1c   :  { %s6326_s4 = sld [smem:[%s7782_s0 + %s6190_s28]]   ;;  %s6194_s28 = smov 25  }
  0x1d   :  { %7800 = sst [smem:[#allocation28_spill]] %s6311_s9 }
  0x1e   :  { %s6331_s9 = sld [smem:[%s7782_s0 + %s6191_s7]]   ;;  %s6195_s7 = smov 26  }
  0x1f   :  { %s6346_s12 = sld [smem:[%s7782_s0 + %s6194_s28]]   ;;  %s6198_s28 = smov 29  }
  0x20   :  { %7801 = sst [smem:[#allocation29_spill]] %s6316_s6 }
  0x21   :  { %7802 = sst [smem:[#allocation30_spill]] %s6321_s27 }
  0x22   :  { %s6336_s6 = sld [smem:[%s7782_s0 + %s6192_s15]]   ;;  %s6196_s15 = smov 27  }
  0x23   :  { %s6341_s27 = sld [smem:[%s7782_s0 + %s6193_s22]]   ;;  %s6197_s22 = smov 28  }
  0x24   :  { %7803 = sst [smem:[#allocation31_spill]] %s6331_s9 }
  0x25   :  { %s6351_s9 = sld [smem:[%s7782_s0 + %s6195_s7]]   ;;  %s6199_s7 = smov 30  }
  0x26   :  { %s6366_s30 = sld [smem:[%s7782_s0 + %s6198_s28]]  }
  0x28   :  { %7804 = sst [smem:[#allocation32_spill]] %s6336_s6 }
  0x29   :  { %7805 = sst [smem:[#allocation33_spill]] %s6341_s27 }
  0x2a   :  { %s6356_s6 = sld [smem:[%s7782_s0 + %s6196_s15]]  }
  0x2b   :  { %7806 = sst [smem:[#allocation34_spill]] %s6351_s9 }
  0x2c   :  { %s6361_s27 = sld [smem:[%s7782_s0 + %s6197_s22]]  }
  0x2d   :  { %s6371_s9 = sld [smem:[%s7782_s0 + %s6199_s7]]  }
  0x2e   :  { %67 = vsyncpa [#allocation3], 0 }
  0x2f   :  { %68 = vsyncpa [#allocation6], 0 }
  0x30   :  { %69 = vsyncpa [#allocation9], 0 }
  0x31   :  { %70 = vsyncpa [#allocation12], 0 }
  0x32   :  { %71 = vsyncpa [#allocation4], 0  ;;  %s117_s15 = sshll.u32 %s6296_s20, 4  ;;  %s118_s15 = int_to_ptr.hbm [resolvable:$true] %s117_s15 }
  0x33   :  { %72 = vsyncpa [#allocation15], 0  ;;  %s6200_s16 = smov [#allocation5]   ;;  %s154_s22 = sshll.u32 %s6346_s12, 4  ;;  %s155_s22 = int_to_ptr.hbm [resolvable:$true] %s154_s22 }
  0x34   :  { %s119_s18 = sshll.u32 %s6200_s16, 4  ;;  %s5966_s23 = sshra.s32 %s118_s15, 4  ;;  %s120_s18 = int_to_ptr.vmem [resolvable:$true] %s119_s18  ;;  %s5967_s23 = int_to_ptr.hbm [resolvable:$true] %s5966_s23 }
  0x35   :  { %s5968_s0 = scalar_lea.hbm %s5967_s23, 1  ;;  %s5970_s26 = scalar_lea.hbm %s6296_s20, 1 }
  0x36   :  { %p5969_p0 = scmp.ne.s32.totalorder %s5967_s23, %s5968_s0  ;;  %p5971_p1 = scmp.lt.s32.totalorder %s5967_s23, %s6296_s20 }
  0x37   :  { %p5972_p2 = scmp.lt.s32.totalorder %s5970_s26, %s5968_s0 }
  0x39   :  { %p5973_p3 = por %p5972_p2, %p5971_p1 }
  0x3b   :  { %p5974_p4 = pnand %p5973_p3, %p5969_p0 }
  0x3d   :  { %5977 = shalt.err (!%p5974_p4)
}
  0x3e   :  { %122 = dma.hbm_to_vmem [thread:$0]  %s118_s15, 16, %s120_s18, [#allocation6]  }
  0x3f   :  { %s6201_s28 = smov [#allocation8]   ;;  %s5990_s2 = sshra.s32 %s155_s22, 4  ;;  %s5991_s2 = int_to_ptr.hbm [resolvable:$true] %s5990_s2 }
  0x40   :  { %s156_s1 = sshll.u32 %s6201_s28, 4  ;;  %s5992_s7 = scalar_lea.hbm %s5991_s2, 32  ;;  %s157_s1 = int_to_ptr.vmem [resolvable:$true] %s156_s1 }
  0x41   :  { %p5993_p5 = scmp.ne.s32.totalorder %s5991_s2, %s5992_s7  ;;  %s5994_s10 = scalar_lea.hbm %s6346_s12, 32 }
  0x42   :  { %p5995_p6 = scmp.lt.s32.totalorder %s5991_s2, %s6346_s12  ;;  %p5996_p7 = scmp.lt.s32.totalorder %s5994_s10, %s5992_s7 }
  0x44   :  { %p5997_p8 = por %p5996_p7, %p5995_p6 }
  0x46   :  { %p5998_p9 = pnand %p5997_p8, %p5993_p5 }
  0x48   :  { %6001 = shalt.err (!%p5998_p9)
}
  0x49   :  { %s6202_s20 = smov 128   ;;  %s6203_s11 = smov 8  }
  0x4a   :  { %162 = dma.hbm_to_vmem [thread:$0]  %s155_s22, 512, %s157_s1, [#allocation9], %s6202_s20, %s6202_s20, %s6203_s11  }
  0x4b   :  { %s100_s15 = sshll.u32 %s6276_s24, 4  ;;  %s6204_s16 = smov [#allocation2]   ;;  %s101_s15 = int_to_ptr.hbm [resolvable:$true] %s100_s15 }
  0x4c   :  { %s102_s18 = sshll.u32 %s6204_s16, 4  ;;  %s138_s12 = sshll.u32 %s6326_s4, 4  ;;  %s103_s18 = int_to_ptr.vmem [resolvable:$true] %s102_s18  ;;  %s139_s12 = int_to_ptr.hbm [resolvable:$true] %s138_s12 }
  0x4d   :  { %s6014_s23 = sshra.s32 %s101_s15, 4  ;;  %s6018_s26 = scalar_lea.hbm %s6276_s24, 1  ;;  %s6015_s23 = int_to_ptr.hbm [resolvable:$true] %s6014_s23 }
  0x4e   :  { %s6016_s0 = scalar_lea.hbm %s6015_s23, 1  ;;  %p6019_p11 = scmp.lt.s32.totalorder %s6015_s23, %s6276_s24 }
  0x4f   :  { %p6017_p10 = scmp.ne.s32.totalorder %s6015_s23, %s6016_s0  ;;  %p6020_p12 = scmp.lt.s32.totalorder %s6018_s26, %s6016_s0 }
  0x51   :  { %p6021_p13 = por %p6020_p12, %p6019_p11 }
  0x53   :  { %p6022_p0 = pnand %p6021_p13, %p6017_p10 }
  0x55   :  { %6025 = shalt.err (!%p6022_p0)
}
  0x56   :  { %105 = dma.hbm_to_vmem [thread:$0]  %s101_s15, 16, %s103_s18, [#allocation3]  }
  0x57   :  { %s6205_s22 = smov [#allocation7]   ;;  %s169_s1 = sshll.u32 %s6356_s6, 4  ;;  %s6387_s1 = int_to_ptr.hbm [resolvable:$true] %s169_s1 }
  0x58   :  { %s140_s28 = sshll.u32 %s6205_s22, 4  ;;  %s6038_s2 = sshra.s32 %s139_s12, 4  ;;  %s141_s28 = int_to_ptr.vmem [resolvable:$true] %s140_s28  ;;  %s6039_s2 = int_to_ptr.hbm [resolvable:$true] %s6038_s2 }
  0x59   :  { %s6040_s7 = scalar_lea.hbm %s6039_s2, 1  ;;  %s6042_s24 = scalar_lea.hbm %s6326_s4, 1 }
  0x5a   :  { %p6041_p1 = scmp.ne.s32.totalorder %s6039_s2, %s6040_s7  ;;  %p6043_p2 = scmp.lt.s32.totalorder %s6039_s2, %s6326_s4 }
  0x5b   :  { %p6044_p3 = scmp.lt.s32.totalorder %s6042_s24, %s6040_s7 }
  0x5d   :  { %p6045_p4 = por %p6044_p3, %p6043_p2 }
  0x5f   :  { %p6046_p5 = pnand %p6045_p4, %p6041_p1 }
  0x61   :  { %6049 = shalt.err (!%p6046_p5)
}
  0x62   :  { %143 = dma.hbm_to_vmem [thread:$0]  %s139_s12, 16, %s141_s28, [#allocation6]  }
  0x63   :  { %s183_s10 = sshll.u32 %s6361_s27, 4  ;;  %s6206_s15 = smov [#allocation10]   ;;  %s184_s10 = int_to_ptr.hbm [resolvable:$true] %s183_s10 }
  0x64   :  { %s171_s16 = sshll.u32 %s6206_s15, 4  ;;  %s6062_s18 = sshra.s32 %s6387_s1, 4  ;;  %s172_s16 = int_to_ptr.vmem [resolvable:$true] %s171_s16  ;;  %s6063_s18 = int_to_ptr.hbm [resolvable:$true] %s6062_s18 }
  0x65   :  { %s6064_s23 = scalar_lea.hbm %s6063_s18, 32  ;;  %s6066_s0 = scalar_lea.hbm %s6356_s6, 32 }
  0x66   :  { %p6065_p6 = scmp.ne.s32.totalorder %s6063_s18, %s6064_s23  ;;  %p6067_p7 = scmp.lt.s32.totalorder %s6063_s18, %s6356_s6 }
  0x67   :  { %p6068_p8 = scmp.lt.s32.totalorder %s6066_s0, %s6064_s23 }
  0x69   :  { %p6069_p9 = por %p6068_p8, %p6067_p7 }
  0x6b   :  { %p6070_p10 = pnand %p6069_p9, %p6065_p6 }
  0x6d   :  { %6073 = shalt.err (!%p6070_p10)
}
  0x6e   :  { %177 = dma.hbm_to_vmem [thread:$0]  %s6387_s1, 512, %s172_s16, [#allocation9], %s6202_s20, %s6202_s20, %s6203_s11  }
  0x6f   :  { %s6207_s4 = smov [#allocation11]   ;;  %s6086_s26 = sshra.s32 %s184_s10, 4  ;;  %s6087_s26 = int_to_ptr.hbm [resolvable:$true] %s6086_s26 }
  0x70   :  { %s185_s12 = sshll.u32 %s6207_s4, 4  ;;  %s6088_s22 = scalar_lea.hbm %s6087_s26, 1  ;;  %s186_s12 = int_to_ptr.vmem [resolvable:$true] %s185_s12 }
  0x71   :  { %p6089_p11 = scmp.ne.s32.totalorder %s6087_s26, %s6088_s22  ;;  %s6090_s28 = scalar_lea.hbm %s6361_s27, 1 }
  0x72   :  { %p6091_p12 = scmp.lt.s32.totalorder %s6087_s26, %s6361_s27  ;;  %p6092_p13 = scmp.lt.s32.totalorder %s6090_s28, %s6088_s22 }
  0x74   :  { %p6093_p0 = por %p6092_p13, %p6091_p12 }
  0x76   :  { %p6094_p1 = pnand %p6093_p0, %p6089_p11 }
  0x78   :  { %6097 = shalt.err (!%p6094_p1)
}
  0x79   :  { %188 = dma.hbm_to_vmem [thread:$0]  %s184_s10, 16, %s186_s12, [#allocation12]  }
  0x7a   :  { %6158 = dma.done.wait [#allocation3], 16  }
  0x7b   :  { %6159 = vsyncadd [#allocation3], 4294967280 }
  0x7c   :  { %6160 = dma.done.wait [#allocation6], 32  }
  0x7d   :  { %6161 = vsyncadd [#allocation6], 4294967264 }
  0x7e   :  { %6162 = dma.done.wait [#allocation9], 1024  }
  0x7f   :  { %6163 = vsyncadd [#allocation9], 4294966272 }
  0x80   :  { %6164 = dma.done.wait [#allocation12], 16  }
  0x81   :  { %6165 = vsyncadd [#allocation12], 4294967280  ;;  %v6402_v0 = vld [vmem:[%s6236_s17 + $0x18] sm:$0xff]  ;;  %v6405_v1 = vld [vmem:[%s6236_s17 + $0x10] sm:$0xff]  ;;  %vm240_vm0 = vcmask 261120   ;;  %v6208_v9 = vmov 0.0  }
  0x82   :  { %v6408_v2 = vld [vmem:[%s6231_s13 + $0x18] sm:$0xff]  ;;  %256 = vmatpush.msra.mxu0 %v6402_v0  ;;  %v6413_v3 = vld [vmem:[%s6236_s17 + $0x8] sm:$0xff]  ;;  %v6416_v4 = vld [vmem:[%s6231_s13 + $0x10] sm:$0xff]  ;;  %342 = vmatpush.msra.mxu2 %v6402_v0  ;;  %s7815_s6 = sld [smem:[#allocation30_spill]]  ;;  %s6211_s24 = smov [#allocation14]  }
  0x83   :  { %279 = vmatpush.msra.mxu1 %v6408_v2  ;;  %v6419_v5 = vld [vmem:[%s6236_s17] sm:$0xff]  ;;  %v6422_v6 = vld [vmem:[%s6231_s13 + $0x8] sm:$0xff]  ;;  %365 = vmatpush.msra.mxu3 %v6408_v2  ;;  %s6210_s17 = smov 32   ;;  %v6493_v37 = vld [vmem:[%s6246_s25 + $0x18] sm:$0xff]  ;;  %s7816_s27 = sld [smem:[#allocation31_spill]] }
  0x84   :  { %v6425_v7 = vld [vmem:[%s6231_s13] sm:$0xff]  ;;  %257 = vmatpush.msra.mxu0 %v6405_v1  ;;  %343 = vmatpush.msra.mxu2 %v6405_v1  ;;  %s6209_s13 = smov 64   ;;  %v6489_v36 = vld [vmem:[%s6221_s5 + $0x8] sm:$0x3]  ;;  %v6499_v38 = vld [vmem:[%s6246_s25 + $0x10] sm:$0xff]  ;;  %s7817_s1 = sld [smem:[#allocation33_spill]] }
  0x85   :  { %280 = vmatpush.msra.mxu1 %v6416_v4  ;;  %v6432_v8 = vld [vmem:[%s6221_s5] sm:$0x3]  ;;  %366 = vmatpush.msra.mxu3 %v6416_v4  ;;  %v6482_v35 = vld [vmem:[%s6221_s5 + $0x4] sm:$0x3]  ;;  %v5326_v39 = vld [vmem:[%s6221_s5 + $0x2] sm:$0x3] }
  0x86   :  { %258 = vmatpush.msra.mxu0 %v6413_v3  ;;  %344 = vmatpush.msra.mxu2 %v6413_v3  ;;  %v6472_v10 = vld [vmem:[%s6241_s21] ss:$0 sm:$0xff]  ;;  %v6505_v40 = vld [vmem:[%s6246_s25 + $0x8] sm:$0xff]  ;;  %v5328_v43 = vld [vmem:[%s6221_s5 + $0x6] sm:$0x3]  ;;  %s7818_s2 = sld [smem:[#allocation32_spill]] }
  0x87   :  { %281 = vmatpush.msra.mxu1 %v6422_v6  ;;  %367 = vmatpush.msra.mxu3 %v6422_v6  ;;  %v927_v41 = vld [vmem:[%s6246_s25] sm:$0xff]  ;;  %v5331_v42 = vld [vmem:[%s6221_s5 + $0xc] sm:$0x3]  ;;  %v5332_v44 = vld [vmem:[%s6221_s5 + $0xe] sm:$0x3]  ;;  %s7808_s25 = sld [smem:[#allocation25_spill]] }
  0x88   :  { %259 = vmatpush.msra.mxu0 %v6419_v5  ;;  %345 = vmatpush.msra.mxu2 %v6419_v5  ;;  %v5330_v45 = vld [vmem:[%s6221_s5 + $0xa] sm:$0x3]  ;;  %v1601_v48 = vld [vmem:[%s6261_s8 + $0x18] sm:$0xff]  ;;  %v1600_v49 = vld [vmem:[%s6261_s8 + $0x10] sm:$0xff]  ;;  %s7807_s5 = sld [smem:[#allocation23_spill]]  ;;  %s5273_s10 = sshll.u32 %s6211_s24, 4  ;;  %s5274_s10 = int_to_ptr.vmem [resolvable:$true] %s5273_s10 }
  0x89   :  { %282 = vmatpush.msra.mxu1 %v6425_v7  ;;  %260 = vmatmul.f32.vlgmr.msra.gmra.mxu0 %v6208_v9  ;;  %v1599_v50 = vld [vmem:[%s6261_s8 + $0x8] sm:$0xff]  ;;  %v1598_v51 = vld [vmem:[%s6261_s8] sm:$0xff]  ;;  %s7819_s7 = sld [smem:[#allocation34_spill]]  ;;  %s5275_s15 = sshll.u32 %s6371_s9, 4  ;;  %s5276_s15 = int_to_ptr.hbm [resolvable:$true] %s5275_s15 }
  0x8a   :  { %5333 = vmatmul.msk.f32.vlgmr.msra.gmra.mxu1 %vm240_vm0, %v6432_v8  ;;  %368 = vmatpush.msra.mxu3 %v6425_v7  ;;  %s6122_s16 = sshra.s32 %s5276_s15, 4  ;;  %s6126_s23 = scalar_lea.hbm %s6371_s9, 16  ;;  %s6123_s16 = int_to_ptr.hbm [resolvable:$true] %s6122_s16 }
  0x8b   :  { %451 = vmatpush.msrb.mxu1 %v6408_v2  ;;  %428 = vmatpush.msrb.mxu0 %v6402_v0  ;;  %s6124_s18 = scalar_lea.hbm %s6123_s16, 16  ;;  %p6127_p3 = scmp.lt.s32.totalorder %s6123_s16, %s6371_s9 }
  0x8c   :  { %514 = vmatpush.msrb.mxu2 %v6402_v0  ;;  %537 = vmatpush.msrb.mxu3 %v6408_v2  ;;  %p6125_p2 = scmp.ne.s32.totalorder %s6123_s16, %s6124_s18  ;;  %p6128_p4 = scmp.lt.s32.totalorder %s6126_s23, %s6124_s18 }
  0x8d   :  { %452 = vmatpush.msrb.mxu1 %v6416_v4  ;;  %429 = vmatpush.msrb.mxu0 %v6405_v1 }
  0x8e   :  { %515 = vmatpush.msrb.mxu2 %v6405_v1  ;;  %538 = vmatpush.msrb.mxu3 %v6416_v4  ;;  %p6129_p5 = por %p6128_p4, %p6127_p3 }
  0x8f   :  { %453 = vmatpush.msrb.mxu1 %v6422_v6  ;;  %430 = vmatpush.msrb.mxu0 %v6413_v3 }
  0x90   :  { %516 = vmatpush.msrb.mxu2 %v6413_v3  ;;  %539 = vmatpush.msrb.mxu3 %v6422_v6  ;;  %p6130_p6 = pnand %p6129_p5, %p6125_p2 }
  0x91   :  { %454 = vmatpush.msrb.mxu1 %v6425_v7  ;;  %431 = vmatpush.msrb.mxu0 %v6419_v5 }
  0x92   :  { %517 = vmatpush.msrb.mxu2 %v6419_v5  ;;  %540 = vmatpush.msrb.mxu3 %v6425_v7 }
  0x93   :  { %623 = vmatpush.msra.mxu1 %v6408_v2  ;;  %600 = vmatpush.msra.mxu0 %v6402_v0 }
  0x94   :  { %5339 = vmatmul.msk.f32.vlgmr.msrb.gmra.mxu1 %vm240_vm0, %v6482_v35  ;;  %5336 = vmatmul.msk.f32.vlgmr.msra.gmra.mxu3 %vm240_vm0, %v5326_v39 }
  0x95   :  { %624 = vmatpush.msra.mxu1 %v6416_v4  ;;  %601 = vmatpush.msra.mxu0 %v6405_v1 }
  0x96   :  { %709 = vmatpush.msra.mxu3 %v6408_v2 }
  0x97   :  { %625 = vmatpush.msra.mxu1 %v6422_v6  ;;  %602 = vmatpush.msra.mxu0 %v6413_v3 }
  0x98   :  { %710 = vmatpush.msra.mxu3 %v6416_v4 }
  0x99   :  { %626 = vmatpush.msra.mxu1 %v6425_v7  ;;  %603 = vmatpush.msra.mxu0 %v6419_v5 }
  0x9a   :  { %711 = vmatpush.msra.mxu3 %v6422_v6 }
  0x9b   :  { %795 = vmatpush.msrb.mxu1 %v6408_v2 }
  0x9c   :  { %5345 = vmatmul.msk.f32.vlgmr.msra.gmra.mxu1 %vm240_vm0, %v6489_v36  ;;  %712 = vmatpush.msra.mxu3 %v6425_v7 }
  0x9d   :  { %796 = vmatpush.msrb.mxu1 %v6416_v4  ;;  %5342 = vmatmul.msk.f32.vlgmr.msrb.gmra.mxu3 %vm240_vm0, %v5328_v43 }
  0x9e   :  { %881 = vmatpush.msrb.mxu3 %v6408_v2 }
  0x9f   :  { %797 = vmatpush.msrb.mxu1 %v6422_v6 }
  0xa0   :  { %882 = vmatpush.msrb.mxu3 %v6416_v4 }
  0xa1   :  { %798 = vmatpush.msrb.mxu1 %v6425_v7 }
  0xa2   :  { %883 = vmatpush.msrb.mxu3 %v6422_v6 }
  0xa3   :  { %971 = vmatpush.msra.mxu1 %v6493_v37 }
  0xa4   :  { %5351 = vmatmul.msk.f32.vlgmr.msrb.gmra.mxu1 %vm240_vm0, %v5331_v42  ;;  %884 = vmatpush.msrb.mxu3 %v6425_v7 }
  0xa5   :  { %972 = vmatpush.msra.mxu1 %v6499_v38  ;;  %5348 = vmatmul.msk.f32.vlgmr.msra.gmra.mxu3 %vm240_vm0, %v5330_v45 }
  0xa6   :  { %1054 = vmatpush.msra.mxu3 %v6493_v37 }
  0xa7   :  { %973 = vmatpush.msra.mxu1 %v6505_v40 }
  0xa8   :  { %1055 = vmatpush.msra.mxu3 %v6499_v38 }
  0xa9   :  { %974 = vmatpush.msra.mxu1 %v927_v41 }
  0xaa   :  { %1056 = vmatpush.msra.mxu3 %v6505_v40 }
  0xab   :  { %1137 = vmatpush.msrb.mxu1 %v6493_v37 }
  0xac   :  { %5356 = vmatmul.msk.f32.vlgmr.msra.gmra.mxu1 %vm240_vm0, %v5332_v44  ;;  %1057 = vmatpush.msra.mxu3 %v927_v41 }
  0xad   :  { %1138 = vmatpush.msrb.mxu1 %v6499_v38  ;;  %5354 = vmatmul.msk.f32.vlgmr.msrb.gmra.mxu3 %vm240_vm0, %v5332_v44 }
  0xae   :  { %1220 = vmatpush.msrb.mxu3 %v6493_v37 }
  0xaf   :  { %1139 = vmatpush.msrb.mxu1 %v6505_v40 }
  0xb0   :  { %1221 = vmatpush.msrb.mxu3 %v6499_v38 }
  0xb1   :  { %1140 = vmatpush.msrb.mxu1 %v927_v41 }
  0xb2   :  { %1222 = vmatpush.msrb.mxu3 %v6505_v40 }
  0xb3   :  { %1303 = vmatpush.msra.mxu1 %v6493_v37 }
  0xb4   :  { %5362 = vmatmul.msk.f32.vlgmr.msrb.gmra.mxu1 %vm240_vm0, %v5330_v45  ;;  %1223 = vmatpush.msrb.mxu3 %v927_v41 }
  0xb5   :  { %1304 = vmatpush.msra.mxu1 %v6499_v38  ;;  %5359 = vmatmul.msk.f32.vlgmr.msra.gmra.mxu3 %vm240_vm0, %v5331_v42 }
  0xb6   :  { %1386 = vmatpush.msra.mxu3 %v6493_v37 }
  0xb7   :  { %1305 = vmatpush.msra.mxu1 %v6505_v40 }
  0xb8   :  { %1387 = vmatpush.msra.mxu3 %v6499_v38 }
  0xb9   :  { %1306 = vmatpush.msra.mxu1 %v927_v41 }
  0xba   :  { %1388 = vmatpush.msra.mxu3 %v6505_v40 }
  0xbb   :  { %1469 = vmatpush.msrb.mxu1 %v6493_v37 }
  0xbc   :  { %5368 = vmatmul.msk.f32.vlgmr.msra.gmra.mxu1 %vm240_vm0, %v5328_v43  ;;  %1389 = vmatpush.msra.mxu3 %v927_v41 }
  0xbd   :  { %1470 = vmatpush.msrb.mxu1 %v6499_v38  ;;  %5365 = vmatmul.msk.f32.vlgmr.msrb.gmra.mxu3 %vm240_vm0, %v6489_v36 }
  0xbe   :  { %1552 = vmatpush.msrb.mxu3 %v6493_v37 }
  0xbf   :  { %1471 = vmatpush.msrb.mxu1 %v6505_v40 }
  0xc0   :  { %1553 = vmatpush.msrb.mxu3 %v6499_v38 }
  0xc1   :  { %1472 = vmatpush.msrb.mxu1 %v927_v41 }
  0xc2   :  { %1554 = vmatpush.msrb.mxu3 %v6505_v40 }
  0xc3   :  { %1646 = vmatpush.msra.mxu1 %v1601_v48 }
  0xc4   :  { %5374 = vmatmul.msk.f32.vlgmr.msrb.gmra.mxu1 %vm240_vm0, %v5326_v39  ;;  %1555 = vmatpush.msrb.mxu3 %v927_v41 }
  0xc5   :  { %1647 = vmatpush.msra.mxu1 %v1600_v49  ;;  %5371 = vmatmul.msk.f32.vlgmr.msra.gmra.mxu3 %vm240_vm0, %v6482_v35 }
  0xc7   :  { %1648 = vmatpush.msra.mxu1 %v1599_v50 }
  0xc9   :  { %1649 = vmatpush.msra.mxu1 %v1598_v51 }
  0xcd   :  { %5377 = vmatmul.msk.f32.vlgmr.msrb.gmra.mxu3 %vm240_vm0, %v6432_v8 }
 0x106   :  { %v261_v11 = vpop.f32.mrf.mxu0 }
 0x107   :  { %v284_v12 = vpop.f32.mrf.mxu1  ;;  %v262_v13 = vadd.f32 %v6472_v10, %v261_v11 }
 0x109   :  { %v287_v14 = vadd.f32 %v284_v12, %v262_v13 }
 0x10b   :  { %5562 = vtanh.f32 %v287_v14  ;;  %v5334_v16 = vmul.f32 -1.442695, %v287_v14 }
 0x10d   :  { %5564 = vpow2.f32 %v5334_v16 }
 0x111   :  { %v5563_v15 = vpop.eup %5562 }
 0x112   :  { %310 = vrot.lane.b32.xlu0 %v5563_v15, %s6209_s13 }
 0x113   :  { %v5565_v17 = vpop.eup %5564 }
 0x114   :  { %v291_v18 = vadd.f32 1.0, %v5565_v17 }
 0x116   :  { %5566 = vrcp.f32 %v291_v18  ;;  %v303_v24 = vand.u32 2147483648, %v291_v18  ;;  %vm297_vm2 = vweird.f32 %v291_v18  ;;  %v301_v25 = vand.u32 2147483647, %v291_v18 }
 0x117   :  { %v370_v54 = vpop.f32.mrf.mxu3 }
 0x118   :  { %v304_v27 = vor.u32 1.1754944e-38, %v303_v24  ;;  %vm302_vm4 = vcmp.eq.f32.partialorder %v301_v25, 8.507059e+37  ;;  %v456_v24 = vpop.f32.mrf.mxu1 }
 0x11c   :  { %v5567_v19 = vpop.eup %5566 }
 0x11d   :  { %v293_v20 = vmul.f32 %v5567_v19, %v291_v18  ;;  %vm298_vm1 = vweird.f32 %v5567_v19 }
 0x11e   :  { %vm299_vm3 = vmor %vm297_vm2, %vm298_vm1 }
 0x11f   :  { %v294_v21 = vsub.f32 1.0, %v293_v20 }
 0x120   :  { %v542_v50 = vpop.f32.mrf.mxu3 }
 0x121   :  { %v295_v22 = vmul.f32 %v5567_v19, %v294_v21 }
 0x123   :  { %v296_v23 = vadd.f32 %v5567_v19, %v295_v22 }
 0x125   :  { %v300_v26 = vsel %vm299_vm3, %v5567_v19, %v296_v23 }
 0x126   :  { %v305_v29 = vsel %vm302_vm4, %v304_v27, %v300_v26 }
 0x127   :  { %v308_v31 = vmul.f32 0.0, %v305_v29 }
 0x184   :  { %v311_v28 = vpop.permute.xlu0 %310 }
 0x185   :  { %v313_v30 = vmul.f32 %v311_v28, %v305_v29 }
 0x187   :  { %315 = vrot.lane.b32.xlu0 %v313_v30, %s6210_s17 }
 0x1f9   :  { %v316_v32 = vpop.permute.xlu0 %315 }
 0x1fa   :  { %v6477_v33 = vadd.f32 %v316_v32, %v308_v31 }
 0x1fc   :  { %5568 = vtanh.f32 %v6477_v33 }
 0x202   :  { %v5569_v34 = vpop.eup %5568 }
 0x203   :  { %321 = vrot.lane.b32.xlu1 %v5569_v34, %s6209_s13 }
 0x275   :  { %v322_v46 = vpop.permute.xlu1 %321 }
 0x276   :  { %v324_v47 = vmul.f32 %v322_v46, %v305_v29 }
 0x278   :  { %326 = vrot.lane.b32.xlu1 %v324_v47, %s6210_s17 }
 0x2ea   :  { %v6563_v52 = vpop.permute.xlu1 %326 }
 0x2eb   :  { %5335 = vmatmul.msk.f32.vlgmr.msra.gmra.mxu2 %vm240_vm0, %v6563_v52  ;;  %5379 = vmatmul.msk.f32.vlgmr.msra.gmra.mxu1 %vm240_vm0, %v6563_v52 }
 0x2ec   :  { %686 = vmatpush.msra.mxu2 %v6402_v0 }
 0x2ee   :  { %687 = vmatpush.msra.mxu2 %v6405_v1 }
 0x2f0   :  { %688 = vmatpush.msra.mxu2 %v6413_v3 }
 0x2f2   :  { %689 = vmatpush.msra.mxu2 %v6419_v5 }
 0x36e   :  { %v347_v53 = vpop.f32.mrf.mxu2 }
 0x36f   :  { %v348_v55 = vadd.f32 %v6472_v10, %v347_v53 }
 0x371   :  { %v373_v56 = vadd.f32 %v370_v54, %v348_v55 }
 0x373   :  { %5570 = vtanh.f32 %v373_v56  ;;  %v5337_v58 = vmul.f32 -1.442695, %v373_v56 }
 0x375   :  { %5572 = vpow2.f32 %v5337_v58 }
 0x379   :  { %v5571_v57 = vpop.eup %5570 }
 0x37a   :  { %396 = vrot.lane.b32.xlu2 %v5571_v57, %s6209_s13 }
 0x37b   :  { %v5573_v59 = vpop.eup %5572 }
 0x37c   :  { %v377_v60 = vadd.f32 1.0, %v5573_v59 }
 0x37e   :  { %5574 = vrcp.f32 %v377_v60  ;;  %v389_v6 = vand.u32 2147483648, %v377_v60  ;;  %vm383_vm6 = vweird.f32 %v377_v60  ;;  %v387_v7 = vand.u32 2147483647, %v377_v60 }
 0x380   :  { %v390_v11 = vor.u32 1.1754944e-38, %v389_v6  ;;  %vm388_vm8 = vcmp.eq.f32.partialorder %v387_v7, 8.507059e+37 }
 0x384   :  { %v5575_v61 = vpop.eup %5574 }
 0x385   :  { %v379_v62 = vmul.f32 %v5575_v61, %v377_v60  ;;  %vm384_vm5 = vweird.f32 %v5575_v61 }
 0x386   :  { %vm385_vm7 = vmor %vm383_vm6, %vm384_vm5 }
 0x387   :  { %v380_v63 = vsub.f32 1.0, %v379_v62 }
 0x389   :  { %v381_v2 = vmul.f32 %v5575_v61, %v380_v63 }
 0x38b   :  { %v382_v4 = vadd.f32 %v5575_v61, %v381_v2 }
 0x38d   :  { %v386_v8 = vsel %vm385_vm7, %v5575_v61, %v382_v4 }
 0x38e   :  { %v391_v13 = vsel %vm388_vm8, %v390_v11, %v386_v8 }
 0x38f   :  { %v394_v15 = vmul.f32 %v391_v13, %v6477_v33 }
 0x3d4   :  { %v397_v12 = vpop.permute.xlu2 %396 }
 0x3d5   :  { %v399_v14 = vmul.f32 %v397_v12, %v391_v13 }
 0x3d7   :  { %401 = vrot.lane.b32.xlu2 %v399_v14, %s6210_s17 }
 0x431   :  { %v402_v16 = vpop.permute.xlu2 %401 }
 0x432   :  { %v404_v17 = vadd.f32 %v402_v16, %v394_v15 }
 0x434   :  { %5576 = vtanh.f32 %v404_v17 }
 0x43a   :  { %v5577_v18 = vpop.eup %5576 }
 0x43b   :  { %407 = vrot.lane.b32.xlu0 %v5577_v18, %s6209_s13 }
 0x4ad   :  { %v408_v19 = vpop.permute.xlu0 %407 }
 0x4ae   :  { %v410_v20 = vmul.f32 %v408_v19, %v391_v13 }
 0x4b0   :  { %412 = vrot.lane.b32.xlu1 %v410_v20, %s6210_s17 }
 0x522   :  { %v6579_v21 = vpop.permute.xlu1 %412 }
 0x523   :  { %5338 = vmatmul.msk.f32.vlgmr.msrb.gmra.mxu0 %vm240_vm0, %v6579_v21 }
 0x524   :  { %772 = vmatpush.msrb.mxu0 %v6402_v0 }
 0x526   :  { %773 = vmatpush.msrb.mxu0 %v6405_v1 }
 0x528   :  { %774 = vmatpush.msrb.mxu0 %v6413_v3 }
 0x52a   :  { %775 = vmatpush.msrb.mxu0 %v6419_v5 }
 0x5a0   :  { %v433_v22 = vpop.f32.mrf.mxu0 }
 0x5a1   :  { %v434_v23 = vadd.f32 %v6472_v10, %v433_v22 }
 0x5a3   :  { %v459_v25 = vadd.f32 %v456_v24, %v434_v23 }
 0x5a5   :  { %5578 = vtanh.f32 %v459_v25  ;;  %v5340_v27 = vmul.f32 -1.442695, %v459_v25 }
 0x5a7   :  { %5580 = vpow2.f32 %v5340_v27 }
 0x5ab   :  { %v5579_v26 = vpop.eup %5578 }
 0x5ac   :  { %482 = vrot.lane.b32.xlu2 %v5579_v26, %s6209_s13 }
 0x5ad   :  { %v5581_v28 = vpop.eup %5580 }
 0x5ae   :  { %v463_v29 = vadd.f32 1.0, %v5581_v28 }
 0x5b0   :  { %5582 = vrcp.f32 %v463_v29  ;;  %v475_v35 = vand.u32 2147483648, %v463_v29  ;;  %vm469_vm10 = vweird.f32 %v463_v29  ;;  %v473_v36 = vand.u32 2147483647, %v463_v29 }
 0x5b2   :  { %v476_v38 = vor.u32 1.1754944e-38, %v475_v35  ;;  %vm474_vm12 = vcmp.eq.f32.partialorder %v473_v36, 8.507059e+37 }
 0x5b6   :  { %v5583_v30 = vpop.eup %5582 }
 0x5b7   :  { %v465_v31 = vmul.f32 %v5583_v30, %v463_v29  ;;  %vm470_vm9 = vweird.f32 %v5583_v30 }
 0x5b8   :  { %vm471_vm11 = vmor %vm469_vm10, %vm470_vm9 }
 0x5b9   :  { %v466_v32 = vsub.f32 1.0, %v465_v31 }
 0x5bb   :  { %v467_v33 = vmul.f32 %v5583_v30, %v466_v32 }
 0x5bd   :  { %v468_v34 = vadd.f32 %v5583_v30, %v467_v33 }
 0x5bf   :  { %v472_v37 = vsel %vm471_vm11, %v5583_v30, %v468_v34 }
 0x5c0   :  { %v477_v40 = vsel %vm474_vm12, %v476_v38, %v472_v37 }
 0x5c1   :  { %v480_v42 = vmul.f32 %v477_v40, %v404_v17  ;;  %v628_v17 = vpop.f32.mrf.mxu1 }
 0x606   :  { %v483_v39 = vpop.permute.xlu2 %482 }
 0x607   :  { %v485_v41 = vmul.f32 %v483_v39, %v477_v40 }
 0x609   :  { %487 = vrot.lane.b32.xlu0 %v485_v41, %s6210_s17 }
 0x67b   :  { %v488_v43 = vpop.permute.xlu0 %487 }
 0x67c   :  { %v490_v44 = vadd.f32 %v488_v43, %v480_v42 }
 0x67e   :  { %5584 = vtanh.f32 %v490_v44 }
 0x684   :  { %v5585_v45 = vpop.eup %5584 }
 0x685   :  { %493 = vrot.lane.b32.xlu1 %v5585_v45, %s6209_s13 }
 0x6f7   :  { %v494_v46 = vpop.permute.xlu1 %493 }
 0x6f8   :  { %v496_v47 = vmul.f32 %v494_v46, %v477_v40 }
 0x6fa   :  { %498 = vrot.lane.b32.xlu2 %v496_v47, %s6210_s17 }
 0x754   :  { %v6592_v48 = vpop.permute.xlu2 %498 }
 0x755   :  { %5341 = vmatmul.msk.f32.vlgmr.msrb.gmra.mxu2 %vm240_vm0, %v6592_v48 }
 0x756   :  { %858 = vmatpush.msrb.mxu2 %v6402_v0 }
 0x758   :  { %859 = vmatpush.msrb.mxu2 %v6405_v1 }
 0x75a   :  { %860 = vmatpush.msrb.mxu2 %v6413_v3 }
 0x75c   :  { %861 = vmatpush.msrb.mxu2 %v6419_v5 }
 0x7d8   :  { %v519_v49 = vpop.f32.mrf.mxu2 }
 0x7d9   :  { %v520_v51 = vadd.f32 %v6472_v10, %v519_v49 }
 0x7db   :  { %v545_v53 = vadd.f32 %v542_v50, %v520_v51 }
 0x7dd   :  { %5586 = vtanh.f32 %v545_v53  ;;  %v5343_v55 = vmul.f32 -1.442695, %v545_v53 }
 0x7df   :  { %5588 = vpow2.f32 %v5343_v55 }
 0x7e3   :  { %v5587_v54 = vpop.eup %5586 }
 0x7e4   :  { %568 = vrot.lane.b32.xlu0 %v5587_v54, %s6209_s13 }
 0x7e5   :  { %v5589_v56 = vpop.eup %5588 }
 0x7e6   :  { %v549_v57 = vadd.f32 1.0, %v5589_v56 }
 0x7e8   :  { %5590 = vrcp.f32 %v549_v57  ;;  %v561_v5 = vand.u32 2147483648, %v549_v57  ;;  %vm555_vm14 = vweird.f32 %v549_v57  ;;  %v559_v60 = vand.u32 2147483647, %v549_v57 }
 0x7ea   :  { %v562_v62 = vor.u32 1.1754944e-38, %v561_v5  ;;  %vm560_vm1 = vcmp.eq.f32.partialorder %v559_v60, 8.507059e+37 }
 0x7ee   :  { %v5591_v0 = vpop.eup %5590 }
 0x7ef   :  { %v551_v1 = vmul.f32 %v5591_v0, %v549_v57  ;;  %vm556_vm13 = vweird.f32 %v5591_v0 }
 0x7f0   :  { %vm557_vm15 = vmor %vm555_vm14, %vm556_vm13 }
 0x7f1   :  { %v552_v58 = vsub.f32 1.0, %v551_v1 }
 0x7f3   :  { %v553_v3 = vmul.f32 %v5591_v0, %v552_v58 }
 0x7f5   :  { %v554_v59 = vadd.f32 %v5591_v0, %v553_v3 }
 0x7f7   :  { %v558_v61 = vsel %vm557_vm15, %v5591_v0, %v554_v59 }
 0x7f8   :  { %v563_v2 = vsel %vm560_vm1, %v562_v62, %v558_v61 }
 0x7f9   :  { %v566_v6 = vmul.f32 %v563_v2, %v490_v44  ;;  %v714_v44 = vpop.f32.mrf.mxu3 }
 0x856   :  { %v569_v63 = vpop.permute.xlu0 %568 }
 0x857   :  { %v571_v4 = vmul.f32 %v569_v63, %v563_v2 }
 0x859   :  { %573 = vrot.lane.b32.xlu1 %v571_v4, %s6210_s17 }
 0x8cb   :  { %v574_v7 = vpop.permute.xlu1 %573 }
 0x8cc   :  { %v576_v8 = vadd.f32 %v574_v7, %v566_v6  ;;  %v6627_v7 = vld [vmem:[%s6251_s29 + $0x18] sm:$0xff] }
 0x8ce   :  { %5592 = vtanh.f32 %v576_v8 }
 0x8d4   :  { %v5593_v11 = vpop.eup %5592 }
 0x8d5   :  { %579 = vrot.lane.b32.xlu2 %v5593_v11, %s6209_s13  ;;  %v6635_v11 = vld [vmem:[%s6251_s29 + $0x8] sm:$0xff] }
 0x92f   :  { %v580_v12 = vpop.permute.xlu2 %579 }
 0x930   :  { %v582_v13 = vmul.f32 %v580_v12, %v563_v2  ;;  %v6640_v12 = vld [vmem:[%s6251_s29] sm:$0xff] }
 0x932   :  { %584 = vrot.lane.b32.xlu0 %v582_v13, %s6210_s17 }
 0x9a4   :  { %v6605_v14 = vpop.permute.xlu0 %584 }
 0x9a5   :  { %5344 = vmatmul.msk.f32.vlgmr.msra.gmra.mxu0 %vm240_vm0, %v6605_v14 }
 0x9a6   :  { %951 = vmatpush.msra.mxu0 %v6627_v7 }
 0xa22   :  { %v605_v15 = vpop.f32.mrf.mxu0 }
 0xa23   :  { %v606_v16 = vadd.f32 %v6472_v10, %v605_v15  ;;  %v800_v15 = vpop.f32.mrf.mxu1 }
 0xa25   :  { %v631_v18 = vadd.f32 %v628_v17, %v606_v16 }
 0xa27   :  { %5594 = vtanh.f32 %v631_v18  ;;  %v5346_v20 = vmul.f32 -1.442695, %v631_v18 }
 0xa29   :  { %5596 = vpow2.f32 %v5346_v20 }
 0xa2d   :  { %v5595_v19 = vpop.eup %5594 }
 0xa2e   :  { %654 = vrot.lane.b32.xlu1 %v5595_v19, %s6209_s13  ;;  %v6661_v19 = vld [vmem:[%s6256_s3] ss:$0 sm:$0xff]  ;;  %s7811_s3 = sld [smem:[#allocation26_spill]] }
 0xa2f   :  { %v5597_v22 = vpop.eup %5596 }
 0xa30   :  { %v635_v23 = vadd.f32 1.0, %v5597_v22 }
 0xa32   :  { %5598 = vrcp.f32 %v635_v23  ;;  %v647_v29 = vand.u32 2147483648, %v635_v23  ;;  %vm641_vm3 = vweird.f32 %v635_v23  ;;  %v645_v30 = vand.u32 2147483647, %v635_v23 }
 0xa34   :  { %v648_v32 = vor.u32 1.1754944e-38, %v647_v29  ;;  %vm646_vm5 = vcmp.eq.f32.partialorder %v645_v30, 8.507059e+37 }
 0xa38   :  { %v5599_v24 = vpop.eup %5598 }
 0xa39   :  { %v637_v25 = vmul.f32 %v5599_v24, %v635_v23  ;;  %vm642_vm2 = vweird.f32 %v5599_v24  ;;  %v976_v23 = vpop.f32.mrf.mxu1 }
 0xa3a   :  { %vm643_vm4 = vmor %vm641_vm3, %vm642_vm2 }
 0xa3b   :  { %v638_v26 = vsub.f32 1.0, %v637_v25 }
 0xa3d   :  { %v639_v27 = vmul.f32 %v5599_v24, %v638_v26 }
 0xa3f   :  { %v640_v28 = vadd.f32 %v5599_v24, %v639_v27 }
 0xa41   :  { %v644_v31 = vsel %vm643_vm4, %v5599_v24, %v640_v28 }
 0xa42   :  { %v649_v34 = vsel %vm646_vm5, %v648_v32, %v644_v31 }
 0xa43   :  { %v652_v36 = vmul.f32 %v649_v34, %v576_v8  ;;  %v6630_v8 = vld [vmem:[%s6251_s29 + $0x10] sm:$0xff]  ;;  %s7809_s29 = sld [smem:[#allocation24_spill]] }
 0xa44   :  { %952 = vmatpush.msra.mxu0 %v6630_v8 }
 0xa46   :  { %953 = vmatpush.msra.mxu0 %v6635_v11 }
 0xa48   :  { %954 = vmatpush.msra.mxu0 %v6640_v12 }
 0xaa0   :  { %v655_v33 = vpop.permute.xlu1 %654 }
 0xaa1   :  { %v657_v35 = vmul.f32 %v655_v33, %v649_v34 }
 0xaa3   :  { %659 = vrot.lane.b32.xlu2 %v657_v35, %s6210_s17 }
 0xafd   :  { %v660_v37 = vpop.permute.xlu2 %659 }
 0xafe   :  { %v662_v38 = vadd.f32 %v660_v37, %v652_v36 }
 0xb00   :  { %5600 = vtanh.f32 %v662_v38 }
 0xb06   :  { %v5601_v39 = vpop.eup %5600 }
 0xb07   :  { %665 = vrot.lane.b32.xlu0 %v5601_v39, %s6209_s13 }
 0xb79   :  { %v666_v40 = vpop.permute.xlu0 %665 }
 0xb7a   :  { %v668_v41 = vmul.f32 %v666_v40, %v649_v34 }
 0xb7c   :  { %670 = vrot.lane.b32.xlu1 %v668_v41, %s6210_s17 }
 0xbee   :  { %v6614_v42 = vpop.permute.xlu1 %670 }
 0xbef   :  { %5347 = vmatmul.msk.f32.vlgmr.msra.gmra.mxu2 %vm240_vm0, %v6614_v42 }
 0xbf0   :  { %1034 = vmatpush.msra.mxu2 %v6627_v7 }
 0xbf2   :  { %1035 = vmatpush.msra.mxu2 %v6630_v8 }
 0xbf4   :  { %1036 = vmatpush.msra.mxu2 %v6635_v11 }
 0xbf6   :  { %1037 = vmatpush.msra.mxu2 %v6640_v12 }
 0xc72   :  { %v691_v43 = vpop.f32.mrf.mxu2 }
 0xc73   :  { %v692_v45 = vadd.f32 %v6472_v10, %v691_v43 }
 0xc75   :  { %v717_v46 = vadd.f32 %v714_v44, %v692_v45 }
 0xc77   :  { %5602 = vtanh.f32 %v717_v46  ;;  %v5349_v49 = vmul.f32 -1.442695, %v717_v46 }
 0xc79   :  { %5604 = vpow2.f32 %v5349_v49 }
 0xc7d   :  { %v5603_v47 = vpop.eup %5602 }
 0xc7e   :  { %740 = vrot.lane.b32.xlu2 %v5603_v47, %s6209_s13 }
 0xc7f   :  { %v5605_v50 = vpop.eup %5604 }
 0xc80   :  { %v721_v51 = vadd.f32 1.0, %v5605_v50 }
 0xc82   :  { %5606 = vrcp.f32 %v721_v51  ;;  %v733_v0 = vand.u32 2147483648, %v721_v51  ;;  %vm727_vm7 = vweird.f32 %v721_v51  ;;  %v731_v1 = vand.u32 2147483647, %v721_v51 }
 0xc84   :  { %v734_v3 = vor.u32 1.1754944e-38, %v733_v0  ;;  %vm732_vm9 = vcmp.eq.f32.partialorder %v731_v1, 8.507059e+37 }
 0xc88   :  { %v5607_v53 = vpop.eup %5606 }
 0xc89   :  { %v723_v54 = vmul.f32 %v5607_v53, %v721_v51  ;;  %vm728_vm6 = vweird.f32 %v5607_v53 }
 0xc8a   :  { %vm729_vm8 = vmor %vm727_vm7, %vm728_vm6 }
 0xc8b   :  { %v724_v55 = vsub.f32 1.0, %v723_v54 }
 0xc8d   :  { %v725_v56 = vmul.f32 %v5607_v53, %v724_v55 }
 0xc8f   :  { %v726_v57 = vadd.f32 %v5607_v53, %v725_v56 }
 0xc91   :  { %v730_v58 = vsel %vm729_vm8, %v5607_v53, %v726_v57 }
 0xc92   :  { %v735_v5 = vsel %vm732_vm9, %v734_v3, %v730_v58 }
 0xc93   :  { %v738_v61 = vmul.f32 %v735_v5, %v662_v38 }
 0xcd8   :  { %v741_v59 = vpop.permute.xlu2 %740 }
 0xcd9   :  { %v743_v60 = vmul.f32 %v741_v59, %v735_v5 }
 0xcdb   :  { %745 = vrot.lane.b32.xlu0 %v743_v60, %s6210_s17 }
 0xd4d   :  { %v746_v62 = vpop.permute.xlu0 %745 }
 0xd4e   :  { %v6621_v63 = vadd.f32 %v746_v62, %v738_v61 }
 0xd50   :  { %5608 = vtanh.f32 %v6621_v63 }
 0xd56   :  { %v5609_v2 = vpop.eup %5608 }
 0xd57   :  { %751 = vrot.lane.b32.xlu1 %v5609_v2, %s6209_s13 }
 0xdc9   :  { %v752_v4 = vpop.permute.xlu1 %751 }
 0xdca   :  { %v754_v6 = vmul.f32 %v752_v4, %v735_v5 }
 0xdcc   :  { %756 = vrot.lane.b32.xlu2 %v754_v6, %s6210_s17 }
 0xe26   :  { %v6646_v13 = vpop.permute.xlu2 %756 }
 0xe27   :  { %5350 = vmatmul.msk.f32.vlgmr.msrb.gmra.mxu0 %vm240_vm0, %v6646_v13 }
 0xe28   :  { %1117 = vmatpush.msrb.mxu0 %v6627_v7 }
 0xe2a   :  { %1118 = vmatpush.msrb.mxu0 %v6630_v8 }
 0xe2c   :  { %1119 = vmatpush.msrb.mxu0 %v6635_v11 }
 0xe2e   :  { %1120 = vmatpush.msrb.mxu0 %v6640_v12 }
 0xe2f   :  { %955 = vmatmul.f32.vlgmr.msra.gmra.mxu0 %v6208_v9 }
 0xe30   :  { %1283 = vmatpush.msra.mxu0 %v6627_v7 }
 0xe32   :  { %1284 = vmatpush.msra.mxu0 %v6630_v8 }
 0xe34   :  { %1285 = vmatpush.msra.mxu0 %v6635_v11 }
 0xe36   :  { %1286 = vmatpush.msra.mxu0 %v6640_v12 }
 0xea4   :  { %v777_v16 = vpop.f32.mrf.mxu0 }
 0xea5   :  { %v778_v17 = vadd.f32 %v6472_v10, %v777_v16 }
 0xea7   :  { %v803_v18 = vadd.f32 %v800_v15, %v778_v17  ;;  %v6692_v17 = vpop.f32.mrf.mxu3 }
 0xea9   :  { %5610 = vtanh.f32 %v803_v18  ;;  %v5352_v27 = vmul.f32 -1.442695, %v803_v18 }
 0xeac   :  { %v956_v20 = vpop.f32.mrf.mxu0 }
 0xead   :  { %v957_v22 = vadd.f32 %v6661_v19, %v956_v20 }
 0xeaf   :  { %v5611_v24 = vpop.eup %5610  ;;  %v979_v25 = vadd.f32 %v976_v23, %v957_v22  ;;  %v1059_v22 = vpop.f32.mrf.mxu3 }
 0xeb0   :  { %826 = vrot.lane.b32.xlu0 %v5611_v24, %s6209_s13 }
 0xeb1   :  { %5612 = vtanh.f32 %v979_v25  ;;  %v5357_v28 = vmul.f32 -1.442695, %v979_v25 }
 0xeb2   :  { %5614 = vpow2.f32 %v5352_v27 }
 0xeb3   :  { %5616 = vpow2.f32 %v5357_v28 }
 0xeb7   :  { %v5613_v26 = vpop.eup %5612 }
 0xeb8   :  { %1002 = vrot.lane.b32.xlu1 %v5613_v26, %s6209_s13  ;;  %v5615_v10 = vpop.eup %5614 }
 0xeb9   :  { %v807_v29 = vadd.f32 1.0, %v5615_v10  ;;  %v5617_v30 = vpop.eup %5616 }
 0xeba   :  { %v983_v31 = vadd.f32 1.0, %v5617_v30 }
 0xebb   :  { %5618 = vrcp.f32 %v807_v29  ;;  %v819_v40 = vand.u32 2147483648, %v807_v29  ;;  %vm813_vm11 = vweird.f32 %v807_v29  ;;  %v817_v41 = vand.u32 2147483647, %v807_v29 }
 0xebc   :  { %5620 = vrcp.f32 %v983_v31  ;;  %v995_v51 = vand.u32 2147483648, %v983_v31  ;;  %vm989_vm15 = vweird.f32 %v983_v31  ;;  %v993_v53 = vand.u32 2147483647, %v983_v31 }
 0xebd   :  { %v820_v45 = vor.u32 1.1754944e-38, %v819_v40  ;;  %vm818_vm13 = vcmp.eq.f32.partialorder %v817_v41, 8.507059e+37 }
 0xebe   :  { %v996_v55 = vor.u32 1.1754944e-38, %v995_v51  ;;  %vm994_vm2 = vcmp.eq.f32.partialorder %v993_v53, 8.507059e+37  ;;  %v1142_v51 = vpop.f32.mrf.mxu1 }
 0xec1   :  { %v5619_v32 = vpop.eup %5618 }
 0xec2   :  { %v809_v33 = vmul.f32 %v5619_v32, %v807_v29  ;;  %v5621_v35 = vpop.eup %5620  ;;  %vm814_vm10 = vweird.f32 %v5619_v32 }
 0xec3   :  { %v985_v37 = vmul.f32 %v5621_v35, %v983_v31  ;;  %vm815_vm12 = vmor %vm813_vm11, %vm814_vm10  ;;  %vm990_vm14 = vweird.f32 %v5621_v35 }
 0xec4   :  { %v810_v34 = vsub.f32 1.0, %v809_v33  ;;  %vm991_vm1 = vmor %vm989_vm15, %vm990_vm14 }
 0xec5   :  { %v986_v39 = vsub.f32 1.0, %v985_v37 }
 0xec6   :  { %v811_v36 = vmul.f32 %v5619_v32, %v810_v34 }
 0xec7   :  { %v987_v44 = vmul.f32 %v5621_v35, %v986_v39 }
 0xec8   :  { %v812_v38 = vadd.f32 %v5619_v32, %v811_v36 }
 0xec9   :  { %v988_v50 = vadd.f32 %v5621_v35, %v987_v44 }
 0xeca   :  { %v816_v43 = vsel %vm815_vm12, %v5619_v32, %v812_v38 }
 0xecb   :  { %v821_v47 = vsel %vm818_vm13, %v820_v45, %v816_v43  ;;  %v992_v54 = vsel %vm991_vm1, %v5621_v35, %v988_v50 }
 0xecc   :  { %v997_v57 = vsel %vm994_vm2, %v996_v55, %v992_v54  ;;  %v824_v1 = vmul.f32 %v821_v47, %v6621_v63 }
 0xecd   :  { %v1000_v5 = vmul.f32 0.0, %v997_v57 }
 0xf22   :  { %v827_v46 = vpop.permute.xlu0 %826 }
 0xf23   :  { %v829_v49 = vmul.f32 %v827_v46, %v821_v47 }
 0xf25   :  { %831 = vrot.lane.b32.xlu2 %v829_v49, %s6210_s17 }
 0xf2a   :  { %v1003_v56 = vpop.permute.xlu1 %1002 }
 0xf2b   :  { %v1005_v0 = vmul.f32 %v1003_v56, %v997_v57 }
 0xf2d   :  { %1007 = vrot.lane.b32.xlu0 %v1005_v0, %s6210_s17 }
 0xf7f   :  { %v832_v58 = vpop.permute.xlu2 %831 }
 0xf80   :  { %v6669_v3 = vadd.f32 %v832_v58, %v824_v1 }
 0xf82   :  { %5622 = vtanh.f32 %v6669_v3 }
 0xf88   :  { %v5623_v59 = vpop.eup %5622 }
 0xf89   :  { %837 = vrot.lane.b32.xlu1 %v5623_v59, %s6209_s13 }
 0xf9f   :  { %v1008_v60 = vpop.permute.xlu0 %1007 }
 0xfa0   :  { %v1010_v61 = vadd.f32 %v1008_v60, %v1000_v5 }
 0xfa2   :  { %5624 = vtanh.f32 %v1010_v61 }
 0xfa8   :  { %v5625_v62 = vpop.eup %5624 }
 0xfa9   :  { %1013 = vrot.lane.b32.xlu2 %v5625_v62, %s6209_s13 }
 0xffb   :  { %v838_v2 = vpop.permute.xlu1 %837 }
 0xffc   :  { %v840_v4 = vmul.f32 %v838_v2, %v821_v47 }
 0xffe   :  { %842 = vrot.lane.b32.xlu0 %v840_v4, %s6210_s17 }
0x1003   :  { %v1014_v63 = vpop.permute.xlu2 %1013 }
0x1004   :  { %v1016_v6 = vmul.f32 %v1014_v63, %v997_v57 }
0x1006   :  { %1018 = vrot.lane.b32.xlu1 %v1016_v6, %s6210_s17 }
0x1070   :  { %v6676_v15 = vpop.permute.xlu0 %842 }
0x1071   :  { %5353 = vmatmul.msk.f32.vlgmr.msrb.gmra.mxu2 %vm240_vm0, %v6676_v15 }
0x1072   :  { %1200 = vmatpush.msrb.mxu2 %v6627_v7 }
0x1074   :  { %1201 = vmatpush.msrb.mxu2 %v6630_v8 }
0x1076   :  { %1202 = vmatpush.msrb.mxu2 %v6635_v11 }
0x1078   :  { %v6683_v16 = vpop.permute.xlu1 %1018  ;;  %1203 = vmatpush.msrb.mxu2 %v6640_v12 }
0x1079   :  { %5358 = vmatmul.msk.f32.vlgmr.msra.gmra.mxu2 %vm240_vm0, %v6683_v16 }
0x107a   :  { %1366 = vmatpush.msra.mxu2 %v6627_v7 }
0x107c   :  { %1367 = vmatpush.msra.mxu2 %v6630_v8 }
0x107e   :  { %1368 = vmatpush.msra.mxu2 %v6635_v11 }
0x1080   :  { %1369 = vmatpush.msra.mxu2 %v6640_v12 }
0x10f4   :  { %v6694_v18 = vpop.f32.mrf.mxu2 }
0x10fc   :  { %v1039_v20 = vpop.f32.mrf.mxu2 }
0x10fd   :  { %v1040_v23 = vadd.f32 %v6661_v19, %v1039_v20 }
0x10ff   :  { %v1062_v24 = vadd.f32 %v1059_v22, %v1040_v23 }
0x1101   :  { %5626 = vtanh.f32 %v1062_v24  ;;  %v5360_v26 = vmul.f32 -1.442695, %v1062_v24 }
0x1103   :  { %5628 = vpow2.f32 %v5360_v26 }
0x1107   :  { %v5627_v25 = vpop.eup %5626 }
0x1108   :  { %1085 = vrot.lane.b32.xlu2 %v5627_v25, %s6209_s13 }
0x1109   :  { %v5629_v27 = vpop.eup %5628 }
0x110a   :  { %v1066_v28 = vadd.f32 1.0, %v5629_v27 }
0x110c   :  { %5630 = vrcp.f32 %v1066_v28  ;;  %v1078_v33 = vand.u32 2147483648, %v1066_v28  ;;  %vm1072_vm4 = vweird.f32 %v1066_v28  ;;  %v1076_v34 = vand.u32 2147483647, %v1066_v28 }
0x110e   :  { %v1079_v36 = vor.u32 1.1754944e-38, %v1078_v33  ;;  %vm1077_vm6 = vcmp.eq.f32.partialorder %v1076_v34, 8.507059e+37 }
0x1112   :  { %v5631_v10 = vpop.eup %5630 }
0x1113   :  { %v1068_v29 = vmul.f32 %v5631_v10, %v1066_v28  ;;  %vm1073_vm3 = vweird.f32 %v5631_v10 }
0x1114   :  { %vm1074_vm5 = vmor %vm1072_vm4, %vm1073_vm3 }
0x1115   :  { %v1069_v30 = vsub.f32 1.0, %v1068_v29 }
0x1117   :  { %v1070_v31 = vmul.f32 %v5631_v10, %v1069_v30 }
0x1119   :  { %v1071_v32 = vadd.f32 %v5631_v10, %v1070_v31 }
0x111b   :  { %v1075_v35 = vsel %vm1074_vm5, %v5631_v10, %v1071_v32  ;;  %v1225_v10 = vpop.f32.mrf.mxu3 }
0x111c   :  { %v1080_v38 = vsel %vm1077_vm6, %v1079_v36, %v1075_v35 }
0x111d   :  { %v1083_v40 = vmul.f32 %v1080_v38, %v1010_v61 }
0x1162   :  { %v1086_v37 = vpop.permute.xlu2 %1085 }
0x1163   :  { %v1088_v39 = vmul.f32 %v1086_v37, %v1080_v38 }
0x1165   :  { %1090 = vrot.lane.b32.xlu0 %v1088_v39, %s6210_s17 }
0x11d7   :  { %v1091_v41 = vpop.permute.xlu0 %1090 }
0x11d8   :  { %v1093_v43 = vadd.f32 %v1091_v41, %v1083_v40 }
0x11da   :  { %5632 = vtanh.f32 %v1093_v43 }
0x11e0   :  { %v5633_v44 = vpop.eup %5632 }
0x11e1   :  { %1096 = vrot.lane.b32.xlu1 %v5633_v44, %s6209_s13 }
0x1253   :  { %v1097_v45 = vpop.permute.xlu1 %1096 }
0x1254   :  { %v1099_v46 = vmul.f32 %v1097_v45, %v1080_v38 }
0x1256   :  { %1101 = vrot.lane.b32.xlu2 %v1099_v46, %s6210_s17 }
0x12b0   :  { %v6701_v47 = vpop.permute.xlu2 %1101 }
0x12b1   :  { %5361 = vmatmul.msk.f32.vlgmr.msrb.gmra.mxu0 %vm240_vm0, %v6701_v47 }
0x12b2   :  { %1449 = vmatpush.msrb.mxu0 %v6627_v7 }
0x12b4   :  { %1450 = vmatpush.msrb.mxu0 %v6630_v8 }
0x12b6   :  { %1451 = vmatpush.msrb.mxu0 %v6635_v11 }
0x12b8   :  { %1452 = vmatpush.msrb.mxu0 %v6640_v12 }
0x132e   :  { %v1122_v49 = vpop.f32.mrf.mxu0 }
0x132f   :  { %v1123_v50 = vadd.f32 %v6661_v19, %v1122_v49 }
0x1331   :  { %v1145_v53 = vadd.f32 %v1142_v51, %v1123_v50 }
0x1333   :  { %5634 = vtanh.f32 %v1145_v53  ;;  %v5363_v55 = vmul.f32 -1.442695, %v1145_v53 }
0x1335   :  { %5636 = vpow2.f32 %v5363_v55 }
0x1339   :  { %v5635_v54 = vpop.eup %5634 }
0x133a   :  { %1168 = vrot.lane.b32.xlu0 %v5635_v54, %s6209_s13 }
0x133b   :  { %v5637_v56 = vpop.eup %5636 }
0x133c   :  { %v1149_v57 = vadd.f32 1.0, %v5637_v56  ;;  %v1308_v56 = vpop.f32.mrf.mxu1 }
0x133e   :  { %5638 = vrcp.f32 %v1149_v57  ;;  %v1161_v60 = vand.u32 2147483648, %v1149_v57  ;;  %vm1155_vm8 = vweird.f32 %v1149_v57  ;;  %v1159_v61 = vand.u32 2147483647, %v1149_v57 }
0x1340   :  { %v1162_v2 = vor.u32 1.1754944e-38, %v1161_v60  ;;  %vm1160_vm10 = vcmp.eq.f32.partialorder %v1159_v61, 8.507059e+37 }
0x1344   :  { %v5639_v0 = vpop.eup %5638 }
0x1345   :  { %v1151_v1 = vmul.f32 %v5639_v0, %v1149_v57  ;;  %vm1156_vm7 = vweird.f32 %v5639_v0 }
0x1346   :  { %vm1157_vm9 = vmor %vm1155_vm8, %vm1156_vm7 }
0x1347   :  { %v1152_v58 = vsub.f32 1.0, %v1151_v1 }
0x1349   :  { %v1153_v59 = vmul.f32 %v5639_v0, %v1152_v58 }
0x134b   :  { %v1154_v5 = vadd.f32 %v5639_v0, %v1153_v59 }
0x134d   :  { %v1158_v62 = vsel %vm1157_vm9, %v5639_v0, %v1154_v5 }
0x134e   :  { %v1163_v63 = vsel %vm1160_vm10, %v1162_v2, %v1158_v62 }
0x134f   :  { %v1166_v20 = vmul.f32 %v1163_v63, %v1093_v43 }
0x13ac   :  { %v1169_v4 = vpop.permute.xlu0 %1168 }
0x13ad   :  { %v1171_v6 = vmul.f32 %v1169_v4, %v1163_v63 }
0x13af   :  { %1173 = vrot.lane.b32.xlu1 %v1171_v6, %s6210_s17 }
0x1421   :  { %v1174_v22 = vpop.permute.xlu1 %1173 }
0x1422   :  { %v1176_v23 = vadd.f32 %v1174_v22, %v1166_v20 }
0x1424   :  { %5640 = vtanh.f32 %v1176_v23 }
0x142a   :  { %v5641_v24 = vpop.eup %5640 }
0x142b   :  { %1179 = vrot.lane.b32.xlu2 %v5641_v24, %s6209_s13 }
0x1485   :  { %v1180_v25 = vpop.permute.xlu2 %1179 }
0x1486   :  { %v1182_v26 = vmul.f32 %v1180_v25, %v1163_v63 }
0x1488   :  { %1184 = vrot.lane.b32.xlu0 %v1182_v26, %s6210_s17 }
0x14fa   :  { %v6714_v27 = vpop.permute.xlu0 %1184 }
0x14fb   :  { %5364 = vmatmul.msk.f32.vlgmr.msrb.gmra.mxu2 %vm240_vm0, %v6714_v27 }
0x14fc   :  { %1532 = vmatpush.msrb.mxu2 %v6627_v7 }
0x14fe   :  { %1533 = vmatpush.msrb.mxu2 %v6630_v8 }
0x1500   :  { %1534 = vmatpush.msrb.mxu2 %v6635_v11 }
0x1502   :  { %1535 = vmatpush.msrb.mxu2 %v6640_v12 }
0x157e   :  { %v1205_v28 = vpop.f32.mrf.mxu2 }
0x157f   :  { %v1206_v29 = vadd.f32 %v6661_v19, %v1205_v28 }
0x1581   :  { %v1228_v30 = vadd.f32 %v1225_v10, %v1206_v29 }
0x1583   :  { %5642 = vtanh.f32 %v1228_v30  ;;  %v5366_v32 = vmul.f32 -1.442695, %v1228_v30 }
0x1585   :  { %5644 = vpow2.f32 %v5366_v32 }
0x1589   :  { %v5643_v31 = vpop.eup %5642 }
0x158a   :  { %1251 = vrot.lane.b32.xlu1 %v5643_v31, %s6209_s13 }
0x158b   :  { %v5645_v33 = vpop.eup %5644 }
0x158c   :  { %v1232_v34 = vadd.f32 1.0, %v5645_v33  ;;  %v1391_v33 = vpop.f32.mrf.mxu3 }
0x158e   :  { %5646 = vrcp.f32 %v1232_v34  ;;  %v1244_v12 = vand.u32 2147483648, %v1232_v34  ;;  %vm1238_vm12 = vweird.f32 %v1232_v34  ;;  %v1242_v37 = vand.u32 2147483647, %v1232_v34 }
0x1590   :  { %v1245_v39 = vor.u32 1.1754944e-38, %v1244_v12  ;;  %vm1243_vm14 = vcmp.eq.f32.partialorder %v1242_v37, 8.507059e+37 }
0x1594   :  { %v5647_v7 = vpop.eup %5646 }
0x1595   :  { %v1234_v8 = vmul.f32 %v5647_v7, %v1232_v34  ;;  %vm1239_vm11 = vweird.f32 %v5647_v7 }
0x1596   :  { %vm1240_vm13 = vmor %vm1238_vm12, %vm1239_vm11 }
0x1597   :  { %v1235_v35 = vsub.f32 1.0, %v1234_v8 }
0x1599   :  { %v1236_v11 = vmul.f32 %v5647_v7, %v1235_v35 }
0x159b   :  { %v1237_v36 = vadd.f32 %v5647_v7, %v1236_v11 }
0x159d   :  { %v1241_v38 = vsel %vm1240_vm13, %v5647_v7, %v1237_v36 }
0x159e   :  { %v1246_v41 = vsel %vm1243_vm14, %v1245_v39, %v1241_v38 }
0x159f   :  { %v1249_v44 = vmul.f32 %v1246_v41, %v1176_v23 }
0x15fc   :  { %v1252_v40 = vpop.permute.xlu1 %1251 }
0x15fd   :  { %v1254_v43 = vmul.f32 %v1252_v40, %v1246_v41 }
0x15ff   :  { %1256 = vrot.lane.b32.xlu2 %v1254_v43, %s6210_s17 }
0x1659   :  { %v1257_v45 = vpop.permute.xlu2 %1256 }
0x165a   :  { %v1259_v46 = vadd.f32 %v1257_v45, %v1249_v44 }
0x165c   :  { %5648 = vtanh.f32 %v1259_v46 }
0x1662   :  { %v5649_v49 = vpop.eup %5648 }
0x1663   :  { %1262 = vrot.lane.b32.xlu0 %v5649_v49, %s6209_s13 }
0x16d5   :  { %v1263_v50 = vpop.permute.xlu0 %1262 }
0x16d6   :  { %v1265_v51 = vmul.f32 %v1263_v50, %v1246_v41 }
0x16d8   :  { %1267 = vrot.lane.b32.xlu1 %v1265_v51, %s6210_s17 }
0x174a   :  { %v6727_v53 = vpop.permute.xlu1 %1267 }
0x174b   :  { %5367 = vmatmul.msk.f32.vlgmr.msra.gmra.mxu0 %vm240_vm0, %v6727_v53 }
0x17c8   :  { %v1288_v54 = vpop.f32.mrf.mxu0 }
0x17c9   :  { %v1289_v55 = vadd.f32 %v6661_v19, %v1288_v54 }
0x17cb   :  { %v1311_v57 = vadd.f32 %v1308_v56, %v1289_v55 }
0x17cd   :  { %5650 = vtanh.f32 %v1311_v57  ;;  %v5369_v1 = vmul.f32 -1.442695, %v1311_v57 }
0x17cf   :  { %5652 = vpow2.f32 %v5369_v1  ;;  %v6749_v1 = vld [vmem:[%s6271_s19 + $0x18] sm:$0xff] }
0x17d0   :  { %1626 = vmatpush.msra.mxu0 %v6749_v1  ;;  %1735 = vmatpush.msra.mxu3 %v6749_v1 }
0x17d3   :  { %v5651_v0 = vpop.eup %5650 }
0x17d4   :  { %1334 = vrot.lane.b32.xlu2 %v5651_v0, %s6209_s13 }
0x17d5   :  { %v5653_v58 = vpop.eup %5652 }
0x17d6   :  { %v1315_v59 = vadd.f32 1.0, %v5653_v58  ;;  %v6752_v58 = vld [vmem:[%s6271_s19 + $0x10] sm:$0xff] }
0x17d7   :  { %1627 = vmatpush.msra.mxu0 %v6752_v58  ;;  %1736 = vmatpush.msra.mxu3 %v6752_v58 }
0x17d8   :  { %5654 = vrcp.f32 %v1315_v59  ;;  %v1327_v4 = vand.u32 2147483648, %v1315_v59  ;;  %vm1321_vm1 = vweird.f32 %v1315_v59  ;;  %v1325_v63 = vand.u32 2147483647, %v1315_v59 }
0x17da   :  { %v1328_v20 = vor.u32 1.1754944e-38, %v1327_v4  ;;  %vm1326_vm3 = vcmp.eq.f32.partialorder %v1325_v63, 8.507059e+37  ;;  %v6785_v4 = vld [vmem:[%s6266_s14 + $0x18] sm:$0xff]  ;;  %v6790_v63 = vld [vmem:[%s6266_s14 + $0x10] sm:$0xff] }
0x17db   :  { %1776 = vmatpush.msrb.mxu1 %v6785_v4 }
0x17dd   :  { %1777 = vmatpush.msrb.mxu1 %v6790_v63 }
0x17de   :  { %v5655_v5 = vpop.eup %5654 }
0x17df   :  { %v1317_v60 = vmul.f32 %v5655_v5, %v1315_v59  ;;  %vm1322_vm15 = vweird.f32 %v5655_v5  ;;  %v6757_v59 = vld [vmem:[%s6271_s19 + $0x8] sm:$0xff] }
0x17e0   :  { %vm1323_vm2 = vmor %vm1321_vm1, %vm1322_vm15  ;;  %1628 = vmatpush.msra.mxu0 %v6757_v59  ;;  %1737 = vmatpush.msra.mxu3 %v6757_v59 }
0x17e1   :  { %v1318_v61 = vsub.f32 1.0, %v1317_v60  ;;  %v6769_v60 = vld [vmem:[%s6261_s8 + $0x18] sm:$0xff] }
0x17e3   :  { %v1319_v62 = vmul.f32 %v5655_v5, %v1318_v61  ;;  %v6773_v61 = vld [vmem:[%s6261_s8 + $0x10] sm:$0xff] }
0x17e5   :  { %v1320_v2 = vadd.f32 %v5655_v5, %v1319_v62  ;;  %v6777_v62 = vld [vmem:[%s6261_s8 + $0x8] sm:$0xff] }
0x17e7   :  { %v1324_v6 = vsel %vm1323_vm2, %v5655_v5, %v1320_v2  ;;  %v6762_v5 = vld [vmem:[%s6271_s19] sm:$0xff]  ;;  %s7814_s19 = sld [smem:[#allocation29_spill]] }
0x17e8   :  { %v1329_v23 = vsel %vm1326_vm3, %v1328_v20, %v1324_v6  ;;  %1629 = vmatpush.msra.mxu0 %v6762_v5  ;;  %1738 = vmatpush.msra.mxu3 %v6762_v5  ;;  %v6781_v2 = vld [vmem:[%s6261_s8] sm:$0xff]  ;;  %v6795_v6 = vld [vmem:[%s6266_s14 + $0x8] sm:$0xff]  ;;  %s7812_s8 = sld [smem:[#allocation22_spill]] }
0x17e9   :  { %v1332_v25 = vmul.f32 %v1329_v23, %v1259_v46  ;;  %1778 = vmatpush.msrb.mxu1 %v6795_v6  ;;  %v6800_v20 = vld [vmem:[%s6266_s14] sm:$0xff]  ;;  %s7813_s14 = sld [smem:[#allocation28_spill]] }
0x17ea   :  { %1859 = vmatpush.msrb.mxu3 %v6769_v60 }
0x17eb   :  { %1779 = vmatpush.msrb.mxu1 %v6800_v20 }
0x17ec   :  { %1860 = vmatpush.msrb.mxu3 %v6773_v61 }
0x17ed   :  { %1943 = vmatpush.msra.mxu1 %v6749_v1 }
0x17ee   :  { %1861 = vmatpush.msrb.mxu3 %v6777_v62 }
0x17ef   :  { %1944 = vmatpush.msra.mxu1 %v6752_v58 }
0x17f0   :  { %1862 = vmatpush.msrb.mxu3 %v6781_v2 }
0x17f1   :  { %1945 = vmatpush.msra.mxu1 %v6757_v59 }
0x17f3   :  { %1946 = vmatpush.msra.mxu1 %v6762_v5 }
0x182e   :  { %v1335_v22 = vpop.permute.xlu2 %1334 }
0x182f   :  { %v1337_v24 = vmul.f32 %v1335_v22, %v1329_v23 }
0x1831   :  { %1339 = vrot.lane.b32.xlu0 %v1337_v24, %s6210_s17 }
0x18a3   :  { %v1340_v26 = vpop.permute.xlu0 %1339 }
0x18a4   :  { %v1342_v28 = vadd.f32 %v1340_v26, %v1332_v25  ;;  %v1474_v25 = vpop.f32.mrf.mxu1 }
0x18a6   :  { %5656 = vtanh.f32 %v1342_v28 }
0x18ac   :  { %v5657_v10 = vpop.eup %5656 }
0x18ad   :  { %1345 = vrot.lane.b32.xlu1 %v5657_v10, %s6209_s13 }
0x191f   :  { %v1346_v29 = vpop.permute.xlu1 %1345 }
0x1920   :  { %v1348_v30 = vmul.f32 %v1346_v29, %v1329_v23 }
0x1922   :  { %1350 = vrot.lane.b32.xlu2 %v1348_v30, %s6210_s17 }
0x197c   :  { %v6736_v31 = vpop.permute.xlu2 %1350 }
0x197d   :  { %5370 = vmatmul.msk.f32.vlgmr.msra.gmra.mxu2 %vm240_vm0, %v6736_v31 }
0x197e   :  { %1672 = vmatpush.msra.mxu2 %v6785_v4 }
0x1980   :  { %1673 = vmatpush.msra.mxu2 %v6790_v63 }
0x1982   :  { %1674 = vmatpush.msra.mxu2 %v6795_v6 }
0x1984   :  { %1675 = vmatpush.msra.mxu2 %v6800_v20 }
0x1a00   :  { %v1371_v32 = vpop.f32.mrf.mxu2 }
0x1a01   :  { %v1372_v34 = vadd.f32 %v6661_v19, %v1371_v32 }
0x1a03   :  { %v1394_v7 = vadd.f32 %v1391_v33, %v1372_v34 }
0x1a05   :  { %5658 = vtanh.f32 %v1394_v7  ;;  %v5372_v35 = vmul.f32 -1.442695, %v1394_v7 }
0x1a07   :  { %5660 = vpow2.f32 %v5372_v35 }
0x1a0b   :  { %v5659_v8 = vpop.eup %5658 }
0x1a0c   :  { %1417 = vrot.lane.b32.xlu0 %v5659_v8, %s6209_s13 }
0x1a0d   :  { %v5661_v11 = vpop.eup %5660 }
0x1a0e   :  { %v1398_v36 = vadd.f32 1.0, %v5661_v11 }
0x1a10   :  { %5662 = vrcp.f32 %v1398_v36  ;;  %v1410_v41 = vand.u32 2147483648, %v1398_v36  ;;  %vm1404_vm5 = vweird.f32 %v1398_v36  ;;  %v1408_v43 = vand.u32 2147483647, %v1398_v36 }
0x1a12   :  { %v1411_v45 = vor.u32 1.1754944e-38, %v1410_v41  ;;  %vm1409_vm7 = vcmp.eq.f32.partialorder %v1408_v43, 8.507059e+37 }
0x1a16   :  { %v5663_v12 = vpop.eup %5662 }
0x1a17   :  { %v1400_v37 = vmul.f32 %v5663_v12, %v1398_v36  ;;  %vm1405_vm4 = vweird.f32 %v5663_v12 }
0x1a18   :  { %vm1406_vm6 = vmor %vm1404_vm5, %vm1405_vm4 }
0x1a19   :  { %v1401_v38 = vsub.f32 1.0, %v1400_v37 }
0x1a1b   :  { %v1402_v39 = vmul.f32 %v5663_v12, %v1401_v38 }
0x1a1d   :  { %v1403_v40 = vadd.f32 %v5663_v12, %v1402_v39 }
0x1a1f   :  { %v1407_v44 = vsel %vm1406_vm6, %v5663_v12, %v1403_v40 }
0x1a20   :  { %v1412_v49 = vsel %vm1409_vm7, %v1411_v45, %v1407_v44 }
0x1a21   :  { %v1415_v51 = vmul.f32 %v1412_v49, %v1342_v28 }
0x1a7e   :  { %v1418_v46 = vpop.permute.xlu0 %1417 }
0x1a7f   :  { %v1420_v50 = vmul.f32 %v1418_v46, %v1412_v49 }
0x1a81   :  { %1422 = vrot.lane.b32.xlu1 %v1420_v50, %s6210_s17 }
0x1af3   :  { %v1423_v54 = vpop.permute.xlu1 %1422 }
0x1af4   :  { %v6743_v55 = vadd.f32 %v1423_v54, %v1415_v51  ;;  %v1557_v51 = vpop.f32.mrf.mxu3 }
0x1af6   :  { %5664 = vtanh.f32 %v6743_v55 }
0x1afc   :  { %v5665_v56 = vpop.eup %5664 }
0x1afd   :  { %1428 = vrot.lane.b32.xlu2 %v5665_v56, %s6209_s13 }
0x1b57   :  { %v1429_v57 = vpop.permute.xlu2 %1428 }
0x1b58   :  { %v1431_v0 = vmul.f32 %v1429_v57, %v1412_v49 }
0x1b5a   :  { %1433 = vrot.lane.b32.xlu0 %v1431_v0, %s6210_s17 }
0x1bcc   :  { %v6808_v22 = vpop.permute.xlu0 %1433 }
0x1bcd   :  { %5373 = vmatmul.msk.f32.vlgmr.msrb.gmra.mxu0 %vm240_vm0, %v6808_v22 }
0x1bce   :  { %1755 = vmatpush.msrb.mxu0 %v6769_v60 }
0x1bd0   :  { %1756 = vmatpush.msrb.mxu0 %v6773_v61 }
0x1bd2   :  { %1757 = vmatpush.msrb.mxu0 %v6777_v62 }
0x1bd4   :  { %1758 = vmatpush.msrb.mxu0 %v6781_v2 }
0x1bd5   :  { %1630 = vmatmul.f32.vlgmr.msra.gmra.mxu0 %v6208_v9 }
0x1bd6   :  { %1880 = vmatpush.msra.mxu0 %v6785_v4 }
0x1bd8   :  { %1881 = vmatpush.msra.mxu0 %v6790_v63 }
0x1bda   :  { %1882 = vmatpush.msra.mxu0 %v6795_v6 }
0x1bdc   :  { %1883 = vmatpush.msra.mxu0 %v6800_v20 }
0x1bdd   :  { %5383 = vmatmul.msk.f32.vlgmr.msrb.gmra.mxu0 %vm240_vm0, %v6579_v21 }
0x1bde   :  { %2047 = vmatpush.msrb.mxu0 %v6749_v1 }
0x1be0   :  { %2048 = vmatpush.msrb.mxu0 %v6752_v58 }
0x1be2   :  { %2049 = vmatpush.msrb.mxu0 %v6757_v59 }
0x1be4   :  { %2050 = vmatpush.msrb.mxu0 %v6762_v5 }
0x1be5   :  { %5388 = vmatmul.msk.f32.vlgmr.msra.gmra.mxu0 %vm240_vm0, %v6808_v22 }
0x1be6   :  { %2171 = vmatpush.msra.mxu0 %v6769_v60 }
0x1be8   :  { %2172 = vmatpush.msra.mxu0 %v6773_v61 }
0x1bea   :  { %2173 = vmatpush.msra.mxu0 %v6777_v62 }
0x1bec   :  { %2174 = vmatpush.msra.mxu0 %v6781_v2 }
0x1c4a   :  { %v1454_v23 = vpop.f32.mrf.mxu0 }
0x1c4b   :  { %v1455_v24 = vadd.f32 %v6661_v19, %v1454_v23 }
0x1c4d   :  { %v1477_v26 = vadd.f32 %v1474_v25, %v1455_v24 }
0x1c4f   :  { %5666 = vtanh.f32 %v1477_v26  ;;  %v5375_v10 = vmul.f32 -1.442695, %v1477_v26 }
0x1c51   :  { %5668 = vpow2.f32 %v5375_v10 }
0x1c55   :  { %v5667_v28 = vpop.eup %5666 }
0x1c56   :  { %1500 = vrot.lane.b32.xlu1 %v5667_v28, %s6209_s13 }
0x1c57   :  { %v5669_v29 = vpop.eup %5668 }
0x1c58   :  { %v1481_v30 = vadd.f32 1.0, %v5669_v29 }
0x1c5a   :  { %5670 = vrcp.f32 %v1481_v30  ;;  %v1493_v35 = vand.u32 2147483648, %v1481_v30  ;;  %vm1487_vm9 = vweird.f32 %v1481_v30  ;;  %v1491_v11 = vand.u32 2147483647, %v1481_v30 }
0x1c5c   :  { %v1494_v12 = vor.u32 1.1754944e-38, %v1493_v35  ;;  %vm1492_vm11 = vcmp.eq.f32.partialorder %v1491_v11, 8.507059e+37 }
0x1c60   :  { %v5671_v32 = vpop.eup %5670 }
0x1c61   :  { %v1483_v33 = vmul.f32 %v5671_v32, %v1481_v30  ;;  %vm1488_vm8 = vweird.f32 %v5671_v32 }
0x1c62   :  { %vm1489_vm10 = vmor %vm1487_vm9, %vm1488_vm8 }
0x1c63   :  { %v1484_v34 = vsub.f32 1.0, %v1483_v33 }
0x1c65   :  { %v1485_v7 = vmul.f32 %v5671_v32, %v1484_v34 }
0x1c67   :  { %v1486_v8 = vadd.f32 %v5671_v32, %v1485_v7 }
0x1c69   :  { %v1490_v36 = vsel %vm1489_vm10, %v5671_v32, %v1486_v8 }
0x1c6a   :  { %v1495_v38 = vsel %vm1492_vm11, %v1494_v12, %v1490_v36 }
0x1c6b   :  { %v1498_v40 = vmul.f32 %v1495_v38, %v6743_v55 }
0x1cc8   :  { %v1501_v37 = vpop.permute.xlu1 %1500 }
0x1cc9   :  { %v1503_v39 = vmul.f32 %v1501_v37, %v1495_v38 }
0x1ccb   :  { %1505 = vrot.lane.b32.xlu2 %v1503_v39, %s6210_s17  ;;  %v6872_v39 = vld [vmem:[#allocation2] ss:$0 sm:$0xff] }
0x1d25   :  { %v1506_v41 = vpop.permute.xlu2 %1505 }
0x1d26   :  { %v1508_v43 = vadd.f32 %v1506_v41, %v1498_v40  ;;  %v1631_v40 = vpop.f32.mrf.mxu0 }
0x1d27   :  { %v1632_v41 = vadd.f32 %v6872_v39, %v1631_v40 }
0x1d28   :  { %5672 = vtanh.f32 %v1508_v43 }
0x1d2e   :  { %v5673_v44 = vpop.eup %5672 }
0x1d2f   :  { %1511 = vrot.lane.b32.xlu0 %v5673_v44, %s6209_s13 }
0x1da1   :  { %v1512_v45 = vpop.permute.xlu0 %1511 }
0x1da2   :  { %v1514_v46 = vmul.f32 %v1512_v45, %v1495_v38 }
0x1da4   :  { %1516 = vrot.lane.b32.xlu1 %v1514_v46, %s6210_s17 }
0x1e16   :  { %v6839_v49 = vpop.permute.xlu1 %1516 }
0x1e17   :  { %5376 = vmatmul.msk.f32.vlgmr.msrb.gmra.mxu2 %vm240_vm0, %v6839_v49  ;;  %5384 = vmatmul.msk.f32.vlgmr.msrb.gmra.mxu1 %vm240_vm0, %v6839_v49 }
0x1e18   :  { %1839 = vmatpush.msrb.mxu2 %v6749_v1  ;;  %2067 = vmatpush.msrb.mxu1 %v6769_v60 }
0x1e1a   :  { %1840 = vmatpush.msrb.mxu2 %v6752_v58  ;;  %2068 = vmatpush.msrb.mxu1 %v6773_v61 }
0x1e1c   :  { %1841 = vmatpush.msrb.mxu2 %v6757_v59  ;;  %2069 = vmatpush.msrb.mxu1 %v6777_v62 }
0x1e1e   :  { %1842 = vmatpush.msrb.mxu2 %v6762_v5  ;;  %2070 = vmatpush.msrb.mxu1 %v6781_v2 }
0x1e9a   :  { %v1537_v50 = vpop.f32.mrf.mxu2 }
0x1e9b   :  { %v1538_v54 = vadd.f32 %v6661_v19, %v1537_v50 }
0x1e9d   :  { %v1560_v55 = vadd.f32 %v1557_v51, %v1538_v54 }
0x1e9f   :  { %5674 = vtanh.f32 %v1560_v55  ;;  %v5378_v57 = vmul.f32 -1.442695, %v1560_v55 }
0x1ea1   :  { %5676 = vpow2.f32 %v5378_v57 }
0x1ea5   :  { %v5675_v56 = vpop.eup %5674 }
0x1ea6   :  { %1583 = vrot.lane.b32.xlu2 %v5675_v56, %s6209_s13 }
0x1ea7   :  { %v5677_v0 = vpop.eup %5676 }
0x1ea8   :  { %v1564_v23 = vadd.f32 1.0, %v5677_v0 }
0x1eaa   :  { %5678 = vrcp.f32 %v1564_v23  ;;  %v1576_v29 = vand.u32 2147483648, %v1564_v23  ;;  %vm1570_vm13 = vweird.f32 %v1564_v23  ;;  %v1574_v30 = vand.u32 2147483647, %v1564_v23 }
0x1eac   :  { %v1577_v32 = vor.u32 1.1754944e-38, %v1576_v29  ;;  %vm1575_vm15 = vcmp.eq.f32.partialorder %v1574_v30, 8.507059e+37 }
0x1eb0   :  { %v5679_v24 = vpop.eup %5678 }
0x1eb1   :  { %v1566_v25 = vmul.f32 %v5679_v24, %v1564_v23  ;;  %vm1571_vm12 = vweird.f32 %v5679_v24 }
0x1eb2   :  { %vm1572_vm14 = vmor %vm1570_vm13, %vm1571_vm12 }
0x1eb3   :  { %v1567_v26 = vsub.f32 1.0, %v1566_v25 }
0x1eb5   :  { %v1568_v28 = vmul.f32 %v5679_v24, %v1567_v26 }
0x1eb7   :  { %v1569_v10 = vadd.f32 %v5679_v24, %v1568_v28 }
0x1eb9   :  { %v1573_v19 = vsel %vm1572_vm14, %v5679_v24, %v1569_v10 }
0x1eba   :  { %v1578_v34 = vsel %vm1575_vm15, %v1577_v32, %v1573_v19 }
0x1ebb   :  { %v1581_v8 = vmul.f32 %v1578_v34, %v1508_v43  ;;  %v1651_v43 = vpop.f32.mrf.mxu1 }
0x1ebc   :  { %v1654_v44 = vadd.f32 %v1651_v43, %v1632_v41  ;;  %v1760_v41 = vpop.f32.mrf.mxu0 }
0x1f00   :  { %v1584_v33 = vpop.permute.xlu2 %1583 }
0x1f01   :  { %v1586_v7 = vmul.f32 %v1584_v33, %v1578_v34 }
0x1f03   :  { %1588 = vrot.lane.b32.xlu0 %v1586_v7, %s6210_s17 }
0x1f75   :  { %v1589_v35 = vpop.permute.xlu0 %1588 }
0x1f76   :  { %v6856_v11 = vadd.f32 %v1589_v35, %v1581_v8 }
0x1f78   :  { %5680 = vtanh.f32 %v6856_v11 }
0x1f7e   :  { %v5681_v36 = vpop.eup %5680 }
0x1f7f   :  { %1594 = vrot.lane.b32.xlu1 %v5681_v36, %s6209_s13 }
0x1ff1   :  { %v1595_v12 = vpop.permute.xlu1 %1594 }
0x1ff2   :  { %v6860_v37 = vmul.f32 %v1595_v12, %v1578_v34 }
0x1ff4   :  { %1656 = vrot.lane.b32.xlu2 %v6860_v37, %s6210_s17 }
0x204e   :  { %v6864_v38 = vpop.permute.xlu2 %1656 }
0x204f   :  { %5380 = vmatmul.msk.f32.vlgmr.msra.gmra.mxu2 %vm240_vm0, %v6864_v38 }
0x2050   :  { %1963 = vmatpush.msra.mxu2 %v6769_v60 }
0x2052   :  { %1964 = vmatpush.msra.mxu2 %v6773_v61 }
0x2054   :  { %1965 = vmatpush.msra.mxu2 %v6777_v62 }
0x2056   :  { %1966 = vmatpush.msra.mxu2 %v6781_v2 }
0x20d2   :  { %v1677_v45 = vpop.f32.mrf.mxu2 }
0x20d3   :  { %v1680_v46 = vadd.f32 %v1677_v45, %v1654_v44  ;;  %v1781_v44 = vpop.f32.mrf.mxu1 }
0x20d5   :  { %5682 = vtanh.f32 %v1680_v46  ;;  %v5381_v51 = vmul.f32 -1.442695, %v1680_v46 }
0x20d7   :  { %5684 = vpow2.f32 %v5381_v51 }
0x20db   :  { %v5683_v50 = vpop.eup %5682 }
0x20dc   :  { %1703 = vrot.lane.b32.xlu0 %v5683_v50, %s6209_s13 }
0x20dd   :  { %v5685_v54 = vpop.eup %5684 }
0x20de   :  { %v1684_v55 = vadd.f32 1.0, %v5685_v54 }
0x20e0   :  { %5686 = vrcp.f32 %v1684_v55  ;;  %v1696_v25 = vand.u32 2147483648, %v1684_v55  ;;  %vm1690_vm2 = vweird.f32 %v1684_v55  ;;  %v1694_v26 = vand.u32 2147483647, %v1684_v55 }
0x20e2   :  { %v1697_v10 = vor.u32 1.1754944e-38, %v1696_v25  ;;  %vm1695_vm4 = vcmp.eq.f32.partialorder %v1694_v26, 8.507059e+37 }
0x20e6   :  { %v5687_v56 = vpop.eup %5686 }
0x20e7   :  { %v1686_v57 = vmul.f32 %v5687_v56, %v1684_v55  ;;  %vm1691_vm1 = vweird.f32 %v5687_v56 }
0x20e8   :  { %vm1692_vm3 = vmor %vm1690_vm2, %vm1691_vm1 }
0x20e9   :  { %v1687_v0 = vsub.f32 1.0, %v1686_v57 }
0x20eb   :  { %v1688_v23 = vmul.f32 %v5687_v56, %v1687_v0 }
0x20ed   :  { %v1689_v24 = vadd.f32 %v5687_v56, %v1688_v23 }
0x20ef   :  { %v1693_v28 = vsel %vm1692_vm3, %v5687_v56, %v1689_v24 }
0x20f0   :  { %v1698_v30 = vsel %vm1695_vm4, %v1697_v10, %v1693_v28 }
0x20f1   :  { %v1701_v32 = vmul.f32 0.0, %v1698_v30 }
0x214e   :  { %v1704_v29 = vpop.permute.xlu0 %1703 }
0x214f   :  { %v1706_v19 = vmul.f32 %v1704_v29, %v1698_v30 }
0x2151   :  { %1708 = vrot.lane.b32.xlu1 %v1706_v19, %s6210_s17 }
0x21c3   :  { %v1709_v33 = vpop.permute.xlu1 %1708 }
0x21c4   :  { %v1711_v34 = vadd.f32 %v1709_v33, %v1701_v32 }
0x21c6   :  { %5688 = vtanh.f32 %v1711_v34 }
0x21cc   :  { %v5689_v7 = vpop.eup %5688 }
0x21cd   :  { %1714 = vrot.lane.b32.xlu2 %v5689_v7, %s6209_s13 }
0x2227   :  { %v1715_v8 = vpop.permute.xlu2 %1714 }
0x2228   :  { %v6878_v35 = vmul.f32 %v1715_v8, %v1698_v30 }
0x222a   :  { %1719 = vrot.lane.b32.xlu0 %v6878_v35, %s6210_s17 }
0x229c   :  { %v1720_v36 = vpop.permute.xlu0 %1719 }
0x229d   :  { %5382 = vmatmul.msk.f32.vlgmr.msra.gmra.mxu3 %vm240_vm0, %v1720_v36 }
0x229e   :  { %1984 = vmatpush.msra.mxu3 %v6785_v4 }
0x22a0   :  { %1985 = vmatpush.msra.mxu3 %v6790_v63 }
0x22a2   :  { %1986 = vmatpush.msra.mxu3 %v6795_v6 }
0x22a4   :  { %1987 = vmatpush.msra.mxu3 %v6800_v20 }
0x22a5   :  { %5387 = vmatmul.msk.f32.vlgmr.msrb.gmra.mxu3 %vm240_vm0, %v6592_v48 }
0x22a6   :  { %2151 = vmatpush.msrb.mxu3 %v6749_v1 }
0x22a8   :  { %2152 = vmatpush.msrb.mxu3 %v6752_v58 }
0x22aa   :  { %2153 = vmatpush.msrb.mxu3 %v6757_v59 }
0x22ac   :  { %2154 = vmatpush.msrb.mxu3 %v6762_v5 }
0x22ad   :  { %5392 = vmatmul.msk.f32.vlgmr.msra.gmra.mxu3 %vm240_vm0, %v6736_v31 }
0x22ae   :  { %2275 = vmatpush.msra.mxu3 %v6769_v60 }
0x22b0   :  { %2276 = vmatpush.msra.mxu3 %v6773_v61 }
0x22b2   :  { %2277 = vmatpush.msra.mxu3 %v6777_v62 }
0x22b4   :  { %2278 = vmatpush.msra.mxu3 %v6781_v2 }
0x2320   :  { %v1740_v12 = vpop.f32.mrf.mxu3 }
0x2321   :  { %v1741_v40 = vadd.f32 %v6872_v39, %v1740_v12 }
0x2323   :  { %v1763_v43 = vadd.f32 %v1760_v41, %v1741_v40 }
0x2325   :  { %v1784_v45 = vadd.f32 %v1781_v44, %v1763_v43  ;;  %v1885_v44 = vpop.f32.mrf.mxu0 }
0x2327   :  { %5690 = vtanh.f32 %v1784_v45  ;;  %v5385_v50 = vmul.f32 -1.442695, %v1784_v45 }
0x2328   :  { %v1864_v41 = vpop.f32.mrf.mxu3 }
0x2329   :  { %5692 = vpow2.f32 %v5385_v50 }
0x232d   :  { %v5691_v46 = vpop.eup %5690 }
0x232e   :  { %1807 = vrot.lane.b32.xlu1 %v5691_v46, %s6209_s13 }
0x232f   :  { %v5693_v51 = vpop.eup %5692 }
0x2330   :  { %v1788_v54 = vadd.f32 1.0, %v5693_v51 }
0x2332   :  { %5694 = vrcp.f32 %v1788_v54  ;;  %v1800_v24 = vand.u32 2147483648, %v1788_v54  ;;  %vm1794_vm6 = vweird.f32 %v1788_v54  ;;  %v1798_v25 = vand.u32 2147483647, %v1788_v54 }
0x2334   :  { %v1801_v28 = vor.u32 1.1754944e-38, %v1800_v24  ;;  %vm1799_vm8 = vcmp.eq.f32.partialorder %v1798_v25, 8.507059e+37 }
0x2338   :  { %v5695_v55 = vpop.eup %5694 }
0x2339   :  { %v1790_v56 = vmul.f32 %v5695_v55, %v1788_v54  ;;  %vm1795_vm5 = vweird.f32 %v5695_v55 }
0x233a   :  { %vm1796_vm7 = vmor %vm1794_vm6, %vm1795_vm5 }
0x233b   :  { %v1791_v57 = vsub.f32 1.0, %v1790_v56 }
0x233d   :  { %v1792_v0 = vmul.f32 %v5695_v55, %v1791_v57 }
0x233f   :  { %v1793_v23 = vadd.f32 %v5695_v55, %v1792_v0 }
0x2341   :  { %v1797_v26 = vsel %vm1796_vm7, %v5695_v55, %v1793_v23 }
0x2342   :  { %v1802_v29 = vsel %vm1799_vm8, %v1801_v28, %v1797_v26 }
0x2343   :  { %v1805_v19 = vmul.f32 %v1802_v29, %v1711_v34 }
0x23a0   :  { %v1808_v10 = vpop.permute.xlu1 %1807 }
0x23a1   :  { %v1810_v30 = vmul.f32 %v1808_v10, %v1802_v29 }
0x23a3   :  { %1812 = vrot.lane.b32.xlu2 %v1810_v30, %s6210_s17 }
0x23fd   :  { %v1813_v32 = vpop.permute.xlu2 %1812 }
0x23fe   :  { %v1815_v33 = vadd.f32 %v1813_v32, %v1805_v19 }
0x2400   :  { %5696 = vtanh.f32 %v1815_v33 }
0x2406   :  { %v5697_v7 = vpop.eup %5696 }
0x2407   :  { %1818 = vrot.lane.b32.xlu0 %v5697_v7, %s6209_s13 }
0x2479   :  { %v1819_v8 = vpop.permute.xlu0 %1818 }
0x247a   :  { %v6903_v36 = vmul.f32 %v1819_v8, %v1802_v29 }
0x247c   :  { %1823 = vrot.lane.b32.xlu1 %v6903_v36, %s6210_s17 }
0x24ee   :  { %v1824_v12 = vpop.permute.xlu1 %1823 }
0x24ef   :  { %5386 = vmatmul.msk.f32.vlgmr.msrb.gmra.mxu2 %vm240_vm0, %v1824_v12 }
0x24f0   :  { %2088 = vmatpush.msrb.mxu2 %v6785_v4 }
0x24f2   :  { %2089 = vmatpush.msrb.mxu2 %v6790_v63 }
0x24f4   :  { %2090 = vmatpush.msrb.mxu2 %v6795_v6 }
0x24f6   :  { %2091 = vmatpush.msrb.mxu2 %v6800_v20 }
0x24f7   :  { %5391 = vmatmul.msk.f32.vlgmr.msra.gmra.mxu2 %vm240_vm0, %v6605_v14 }
0x24f8   :  { %2255 = vmatpush.msra.mxu2 %v6749_v1 }
0x24fa   :  { %2256 = vmatpush.msra.mxu2 %v6752_v58 }
0x24fc   :  { %2257 = vmatpush.msra.mxu2 %v6757_v59 }
0x24fe   :  { %2258 = vmatpush.msra.mxu2 %v6762_v5 }
0x24ff   :  { %5396 = vmatmul.msk.f32.vlgmr.msrb.gmra.mxu2 %vm240_vm0, %v6727_v53 }
0x2500   :  { %2384 = vmatpush.msrb.mxu2 %v6769_v60 }
0x2502   :  { %2385 = vmatpush.msrb.mxu2 %v6773_v61 }
0x2504   :  { %2386 = vmatpush.msrb.mxu2 %v6777_v62 }
0x2506   :  { %2387 = vmatpush.msrb.mxu2 %v6781_v2 }
0x2572   :  { %v1844_v34 = vpop.f32.mrf.mxu2 }
0x2573   :  { %v1845_v40 = vadd.f32 %v6872_v39, %v1844_v34 }
0x2575   :  { %v1867_v43 = vadd.f32 %v1864_v41, %v1845_v40  ;;  %v1989_v40 = vpop.f32.mrf.mxu3 }
0x2577   :  { %v1888_v45 = vadd.f32 %v1885_v44, %v1867_v43 }
0x2579   :  { %5698 = vtanh.f32 %v1888_v45  ;;  %v5389_v50 = vmul.f32 -1.442695, %v1888_v45 }
0x257a   :  { %v1968_v12 = vpop.f32.mrf.mxu2 }
0x257b   :  { %5700 = vpow2.f32 %v5389_v50 }
0x257f   :  { %v5699_v46 = vpop.eup %5698 }
0x2580   :  { %1911 = vrot.lane.b32.xlu2 %v5699_v46, %s6209_s13 }
0x2581   :  { %v5701_v60 = vpop.eup %5700 }
0x2582   :  { %v1892_v51 = vadd.f32 1.0, %v5701_v60 }
0x2584   :  { %5702 = vrcp.f32 %v1892_v51  ;;  %v1904_v56 = vand.u32 2147483648, %v1892_v51  ;;  %vm1898_vm10 = vweird.f32 %v1892_v51  ;;  %v1902_v57 = vand.u32 2147483647, %v1892_v51 }
0x2586   :  { %v1905_v23 = vor.u32 1.1754944e-38, %v1904_v56  ;;  %vm1903_vm12 = vcmp.eq.f32.partialorder %v1902_v57, 8.507059e+37 }
0x258a   :  { %v5703_v61 = vpop.eup %5702 }
0x258b   :  { %v1894_v62 = vmul.f32 %v5703_v61, %v1892_v51  ;;  %vm1899_vm9 = vweird.f32 %v5703_v61 }
0x258c   :  { %vm1900_vm11 = vmor %vm1898_vm10, %vm1899_vm9 }
0x258d   :  { %v1895_v54 = vsub.f32 1.0, %v1894_v62 }
0x258f   :  { %v1896_v2 = vmul.f32 %v5703_v61, %v1895_v54 }
0x2591   :  { %v1897_v55 = vadd.f32 %v5703_v61, %v1896_v2 }
0x2593   :  { %v1901_v0 = vsel %vm1900_vm11, %v5703_v61, %v1897_v55 }
0x2594   :  { %v1906_v25 = vsel %vm1903_vm12, %v1905_v23, %v1901_v0 }
0x2595   :  { %v1909_v28 = vmul.f32 %v1906_v25, %v1815_v33 }
0x25da   :  { %v1912_v24 = vpop.permute.xlu2 %1911 }
0x25db   :  { %v1914_v26 = vmul.f32 %v1912_v24, %v1906_v25 }
0x25dd   :  { %1916 = vrot.lane.b32.xlu0 %v1914_v26, %s6210_s17  ;;  %v6957_v26 = vld [vmem:[%s7807_s5 + $0x18] sm:$0xff] }
0x264f   :  { %v1917_v10 = vpop.permute.xlu0 %1916 }
0x2650   :  { %v1919_v29 = vadd.f32 %v1917_v10, %v1909_v28  ;;  %v6961_v28 = vld [vmem:[%s7807_s5 + $0x10] sm:$0xff]  ;;  %v6965_v10 = vld [vmem:[%s7807_s5 + $0x8] sm:$0xff] }
0x2652   :  { %5704 = vtanh.f32 %v1919_v29 }
0x2658   :  { %v5705_v30 = vpop.eup %5704 }
0x2659   :  { %1922 = vrot.lane.b32.xlu1 %v5705_v30, %s6209_s13 }
0x26cb   :  { %v1923_v19 = vpop.permute.xlu1 %1922 }
0x26cc   :  { %v6928_v32 = vmul.f32 %v1923_v19, %v1906_v25  ;;  %v6977_v19 = vld [vmem:[%s7808_s25 + $0x18] sm:$0xff] }
0x26ce   :  { %1927 = vrot.lane.b32.xlu2 %v6928_v32, %s6210_s17 }
0x2728   :  { %v1928_v7 = vpop.permute.xlu2 %1927 }
0x2729   :  { %5390 = vmatmul.msk.f32.vlgmr.msra.gmra.mxu1 %vm240_vm0, %v1928_v7  ;;  %v6983_v7 = vld [vmem:[%s7808_s25 + $0x10] sm:$0xff] }
0x272a   :  { %2192 = vmatpush.msra.mxu1 %v6785_v4 }
0x272c   :  { %2193 = vmatpush.msra.mxu1 %v6790_v63 }
0x272e   :  { %2194 = vmatpush.msra.mxu1 %v6795_v6 }
0x2730   :  { %2195 = vmatpush.msra.mxu1 %v6800_v20 }
0x2731   :  { %5395 = vmatmul.msk.f32.vlgmr.msrb.gmra.mxu1 %vm240_vm0, %v6614_v42 }
0x2732   :  { %2359 = vmatpush.msrb.mxu1 %v6749_v1 }
0x2734   :  { %2360 = vmatpush.msrb.mxu1 %v6752_v58 }
0x2736   :  { %2361 = vmatpush.msrb.mxu1 %v6757_v59 }
0x2738   :  { %2362 = vmatpush.msrb.mxu1 %v6762_v5 }
0x2739   :  { %5400 = vmatmul.msk.f32.vlgmr.msra.gmra.mxu1 %vm240_vm0, %v6714_v27 }
0x273a   :  { %2499 = vmatpush.msra.mxu1 %v6957_v26 }
0x273c   :  { %2500 = vmatpush.msra.mxu1 %v6961_v28 }
0x273e   :  { %2501 = vmatpush.msra.mxu1 %v6965_v10 }
0x27a6   :  { %v1948_v33 = vpop.f32.mrf.mxu1 }
0x27a7   :  { %v1949_v8 = vadd.f32 %v6872_v39, %v1948_v33  ;;  %v6987_v33 = vld [vmem:[%s7808_s25 + $0x8] sm:$0xff] }
0x27a9   :  { %v1971_v34 = vadd.f32 %v1968_v12, %v1949_v8  ;;  %v6991_v8 = vld [vmem:[%s7808_s25] sm:$0xff]  ;;  %v7001_v12 = vld [vmem:[%s7809_s29 + $0x18] sm:$0xff] }
0x27ab   :  { %v1992_v41 = vadd.f32 %v1989_v40, %v1971_v34  ;;  %v7006_v34 = vld [vmem:[%s7809_s29 + $0x10] sm:$0xff]  ;;  %v7010_v40 = vld [vmem:[%s7809_s29 + $0x8] sm:$0xff] }
0x27ad   :  { %5706 = vtanh.f32 %v1992_v41  ;;  %v5393_v1 = vmul.f32 -1.442695, %v1992_v41  ;;  %v7014_v41 = vld [vmem:[%s7809_s29] sm:$0xff] }
0x27af   :  { %5708 = vpow2.f32 %v5393_v1  ;;  %v2072_v1 = vpop.f32.mrf.mxu1 }
0x27b3   :  { %v5707_v43 = vpop.eup %5706 }
0x27b4   :  { %2015 = vrot.lane.b32.xlu0 %v5707_v43, %s6209_s13 }
0x27b5   :  { %v5709_v58 = vpop.eup %5708 }
0x27b6   :  { %v1996_v59 = vadd.f32 1.0, %v5709_v58 }
0x27b8   :  { %5710 = vrcp.f32 %v1996_v59  ;;  %v2008_v60 = vand.u32 2147483648, %v1996_v59  ;;  %vm2002_vm14 = vweird.f32 %v1996_v59  ;;  %v2006_v51 = vand.u32 2147483647, %v1996_v59 }
0x27ba   :  { %v2009_v62 = vor.u32 1.1754944e-38, %v2008_v60  ;;  %vm2007_vm1 = vcmp.eq.f32.partialorder %v2006_v51, 8.507059e+37 }
0x27be   :  { %v5711_v5 = vpop.eup %5710 }
0x27bf   :  { %v1998_v44 = vmul.f32 %v5711_v5, %v1996_v59  ;;  %vm2003_vm13 = vweird.f32 %v5711_v5  ;;  %v2093_v59 = vpop.f32.mrf.mxu2 }
0x27c0   :  { %vm2004_vm15 = vmor %vm2002_vm14, %vm2003_vm13 }
0x27c1   :  { %v1999_v45 = vsub.f32 1.0, %v1998_v44 }
0x27c3   :  { %v2000_v46 = vmul.f32 %v5711_v5, %v1999_v45 }
0x27c5   :  { %v2001_v50 = vadd.f32 %v5711_v5, %v2000_v46 }
0x27c7   :  { %v2005_v61 = vsel %vm2004_vm15, %v5711_v5, %v2001_v50 }
0x27c8   :  { %v2010_v2 = vsel %vm2007_vm1, %v2009_v62, %v2005_v61 }
0x27c9   :  { %v2013_v56 = vmul.f32 %v2010_v2, %v1919_v29  ;;  %v6969_v29 = vld [vmem:[%s7807_s5] sm:$0xff] }
0x27ca   :  { %2502 = vmatpush.msra.mxu1 %v6969_v29 }
0x2826   :  { %v2016_v54 = vpop.permute.xlu0 %2015 }
0x2827   :  { %v2018_v55 = vmul.f32 %v2016_v54, %v2010_v2 }
0x2829   :  { %2020 = vrot.lane.b32.xlu1 %v2018_v55, %s6210_s17 }
0x289b   :  { %v2021_v57 = vpop.permute.xlu1 %2020 }
0x289c   :  { %v6948_v0 = vadd.f32 %v2021_v57, %v2013_v56 }
0x289e   :  { %5712 = vtanh.f32 %v6948_v0 }
0x28a4   :  { %v5713_v23 = vpop.eup %5712 }
0x28a5   :  { %2026 = vrot.lane.b32.xlu2 %v5713_v23, %s6209_s13 }
0x28ff   :  { %v2027_v24 = vpop.permute.xlu2 %2026 }
0x2900   :  { %v6952_v25 = vmul.f32 %v2027_v24, %v2010_v2 }
0x2902   :  { %2031 = vrot.lane.b32.xlu0 %v6952_v25, %s6210_s17 }
0x2974   :  { %v2032_v30 = vpop.permute.xlu0 %2031 }
0x2975   :  { %5394 = vmatmul.msk.f32.vlgmr.msrb.gmra.mxu0 %vm240_vm0, %v2032_v30 }
0x2976   :  { %2296 = vmatpush.msrb.mxu0 %v6785_v4 }
0x2978   :  { %2297 = vmatpush.msrb.mxu0 %v6790_v63 }
0x297a   :  { %2298 = vmatpush.msrb.mxu0 %v6795_v6 }
0x297c   :  { %2299 = vmatpush.msrb.mxu0 %v6800_v20 }
0x297d   :  { %5399 = vmatmul.msk.f32.vlgmr.msra.gmra.mxu0 %vm240_vm0, %v6646_v13 }
0x297e   :  { %2479 = vmatpush.msra.mxu0 %v6977_v19 }
0x2980   :  { %2480 = vmatpush.msra.mxu0 %v6983_v7 }
0x2982   :  { %2481 = vmatpush.msra.mxu0 %v6987_v33 }
0x2984   :  { %2482 = vmatpush.msra.mxu0 %v6991_v8 }
0x2985   :  { %5404 = vmatmul.msk.f32.vlgmr.msrb.gmra.mxu0 %vm240_vm0, %v6701_v47 }
0x2986   :  { %2603 = vmatpush.msrb.mxu0 %v6957_v26 }
0x2988   :  { %2604 = vmatpush.msrb.mxu0 %v6961_v28 }
0x298a   :  { %2605 = vmatpush.msrb.mxu0 %v6965_v10 }
0x298c   :  { %2606 = vmatpush.msrb.mxu0 %v6969_v29 }
0x298d   :  { %2483 = vmatmul.f32.vlgmr.msra.gmra.mxu0 %v6208_v9 }
0x298e   :  { %2728 = vmatpush.msra.mxu0 %v7001_v12 }
0x2990   :  { %2729 = vmatpush.msra.mxu0 %v7006_v34 }
0x2992   :  { %2730 = vmatpush.msra.mxu0 %v7010_v40 }
0x2994   :  { %2731 = vmatpush.msra.mxu0 %v7014_v41 }
0x2995   :  { %5414 = vmatmul.msk.f32.vlgmr.msrb.gmra.mxu0 %vm240_vm0, %v6676_v15 }
0x2996   :  { %2895 = vmatpush.msrb.mxu0 %v6977_v19 }
0x2998   :  { %2896 = vmatpush.msrb.mxu0 %v6983_v7 }
0x299a   :  { %2897 = vmatpush.msrb.mxu0 %v6987_v33 }
0x299c   :  { %2898 = vmatpush.msrb.mxu0 %v6991_v8 }
0x299d   :  { %5419 = vmatmul.msk.f32.vlgmr.msra.gmra.mxu0 %vm240_vm0, %v6714_v27 }
0x299e   :  { %3019 = vmatpush.msra.mxu0 %v6957_v26 }
0x29a0   :  { %3020 = vmatpush.msra.mxu0 %v6961_v28 }
0x29a2   :  { %3021 = vmatpush.msra.mxu0 %v6965_v10 }
0x29a4   :  { %3022 = vmatpush.msra.mxu0 %v6969_v29 }
0x29f2   :  { %v2052_v9 = vpop.f32.mrf.mxu0 }
0x29f3   :  { %v2053_v43 = vadd.f32 %v6872_v39, %v2052_v9 }
0x29f5   :  { %v2075_v58 = vadd.f32 %v2072_v1, %v2053_v43 }
0x29f7   :  { %v2096_v5 = vadd.f32 %v2093_v59, %v2075_v58 }
0x29f9   :  { %5714 = vtanh.f32 %v2096_v5  ;;  %v5397_v27 = vmul.f32 -1.442695, %v2096_v5 }
0x29fb   :  { %5716 = vpow2.f32 %v5397_v27 }
0x29ff   :  { %v5715_v44 = vpop.eup %5714 }
0x2a00   :  { %2119 = vrot.lane.b32.xlu1 %v5715_v44, %s6209_s13 }
0x2a01   :  { %v5717_v45 = vpop.eup %5716 }
0x2a02   :  { %v2100_v46 = vadd.f32 1.0, %v5717_v45 }
0x2a04   :  { %5718 = vrcp.f32 %v2100_v46  ;;  %v2112_v54 = vand.u32 2147483648, %v2100_v46  ;;  %vm2106_vm3 = vweird.f32 %v2100_v46  ;;  %v2110_v2 = vand.u32 2147483647, %v2100_v46 }
0x2a06   :  { %v2113_v56 = vor.u32 1.1754944e-38, %v2112_v54  ;;  %vm2111_vm5 = vcmp.eq.f32.partialorder %v2110_v2, 8.507059e+37 }
0x2a0a   :  { %v5719_v50 = vpop.eup %5718 }
0x2a0b   :  { %v2102_v60 = vmul.f32 %v5719_v50, %v2100_v46  ;;  %vm2107_vm2 = vweird.f32 %v5719_v50 }
0x2a0c   :  { %vm2108_vm4 = vmor %vm2106_vm3, %vm2107_vm2 }
0x2a0d   :  { %v2103_v51 = vsub.f32 1.0, %v2102_v60 }
0x2a0f   :  { %v2104_v61 = vmul.f32 %v5719_v50, %v2103_v51 }
0x2a11   :  { %v2105_v62 = vadd.f32 %v5719_v50, %v2104_v61 }
0x2a13   :  { %v2109_v55 = vsel %vm2108_vm4, %v5719_v50, %v2105_v62 }
0x2a14   :  { %v2114_v23 = vsel %vm2111_vm5, %v2113_v56, %v2109_v55  ;;  %v5962_v55 = vld [vmem:[%s6241_s21] ss:$0 sm:$0xff]  ;;  %s7810_s21 = sld [smem:[#allocation27_spill]] }
0x2a15   :  { %v2117_v30 = vmul.f32 %v2114_v23, %v6948_v0  ;;  %v864_v56 = vadd.f32 %v5962_v55, %v6694_v18 }
0x2a72   :  { %v2120_v57 = vpop.permute.xlu1 %2119 }
0x2a73   :  { %v2122_v24 = vmul.f32 %v2120_v57, %v2114_v23 }
0x2a75   :  { %2124 = vrot.lane.b32.xlu2 %v2122_v24, %s6210_s17  ;;  %v889_v24 = vadd.f32 %v6692_v17, %v864_v56 }
0x2acf   :  { %v2125_v9 = vpop.permute.xlu2 %2124 }
0x2ad0   :  { %v2127_v43 = vadd.f32 %v2125_v9, %v2117_v30 }
0x2ad2   :  { %5720 = vtanh.f32 %v2127_v43 }
0x2ad8   :  { %v5721_v1 = vpop.eup %5720 }
0x2ad9   :  { %2130 = vrot.lane.b32.xlu0 %v5721_v1, %s6209_s13 }
0x2b4b   :  { %v2131_v58 = vpop.permute.xlu0 %2130 }
0x2b4c   :  { %v7035_v59 = vmul.f32 %v2131_v58, %v2114_v23 }
0x2b4e   :  { %2135 = vrot.lane.b32.xlu1 %v7035_v59, %s6210_s17 }
0x2bc0   :  { %v2136_v5 = vpop.permute.xlu1 %2135 }
0x2bc1   :  { %5398 = vmatmul.msk.f32.vlgmr.msrb.gmra.mxu3 %vm240_vm0, %v2136_v5 }
0x2bc2   :  { %2405 = vmatpush.msrb.mxu3 %v6785_v4 }
0x2bc4   :  { %2406 = vmatpush.msrb.mxu3 %v6790_v63  ;;  %v2176_v63 = vpop.f32.mrf.mxu0 }
0x2bc6   :  { %2407 = vmatpush.msrb.mxu3 %v6795_v6 }
0x2bc8   :  { %2408 = vmatpush.msrb.mxu3 %v6800_v20  ;;  %v2197_v20 = vpop.f32.mrf.mxu1 }
0x2bc9   :  { %5403 = vmatmul.msk.f32.vlgmr.msra.gmra.mxu3 %vm240_vm0, %v6676_v15 }
0x2bca   :  { %2583 = vmatpush.msra.mxu3 %v6977_v19 }
0x2bcc   :  { %2584 = vmatpush.msra.mxu3 %v6983_v7 }
0x2bce   :  { %2585 = vmatpush.msra.mxu3 %v6987_v33 }
0x2bd0   :  { %2586 = vmatpush.msra.mxu3 %v6991_v8 }
0x2bd1   :  { %5408 = vmatmul.msk.f32.vlgmr.msrb.gmra.mxu3 %vm240_vm0, %v6683_v16 }
0x2bd2   :  { %2707 = vmatpush.msrb.mxu3 %v6957_v26 }
0x2bd4   :  { %2708 = vmatpush.msrb.mxu3 %v6961_v28 }
0x2bd6   :  { %2709 = vmatpush.msrb.mxu3 %v6965_v10 }
0x2bd8   :  { %2710 = vmatpush.msrb.mxu3 %v6969_v29 }
0x2c44   :  { %v2156_v15 = vpop.f32.mrf.mxu3 }
0x2c45   :  { %v2157_v4 = vadd.f32 %v6872_v39, %v2156_v15 }
0x2c47   :  { %v2179_v6 = vadd.f32 %v2176_v63, %v2157_v4  ;;  %v5355_v63 = vmul.f32 -1.442695, %v889_v24 }
0x2c49   :  { %v2200_v0 = vadd.f32 %v2197_v20, %v2179_v6 }
0x2c4b   :  { %5722 = vtanh.f32 %v2200_v0  ;;  %v5401_v27 = vmul.f32 -1.442695, %v2200_v0 }
0x2c4d   :  { %5724 = vpow2.f32 %v5401_v27 }
0x2c51   :  { %v5723_v44 = vpop.eup %5722 }
0x2c52   :  { %2223 = vrot.lane.b32.xlu2 %v5723_v44, %s6209_s13 }
0x2c53   :  { %v5725_v45 = vpop.eup %5724 }
0x2c54   :  { %v2204_v46 = vadd.f32 1.0, %v5725_v45 }
0x2c56   :  { %5726 = vrcp.f32 %v2204_v46  ;;  %v2216_v54 = vand.u32 2147483648, %v2204_v46  ;;  %vm2210_vm7 = vweird.f32 %v2204_v46  ;;  %v2214_v2 = vand.u32 2147483647, %v2204_v46 }
0x2c57   :  { %5728 = vtanh.f32 %v889_v24 }
0x2c58   :  { %v2217_v23 = vor.u32 1.1754944e-38, %v2216_v54  ;;  %vm2215_vm9 = vcmp.eq.f32.partialorder %v2214_v2, 8.507059e+37 }
0x2c5c   :  { %v5727_v50 = vpop.eup %5726 }
0x2c5d   :  { %v2206_v60 = vmul.f32 %v5727_v50, %v2204_v46  ;;  %vm2211_vm6 = vweird.f32 %v5727_v50  ;;  %v5729_v58 = vpop.eup %5728 }
0x2c5e   :  { %vm2212_vm8 = vmor %vm2210_vm7, %vm2211_vm6 }
0x2c5f   :  { %v2207_v51 = vsub.f32 1.0, %v2206_v60 }
0x2c61   :  { %v2208_v61 = vmul.f32 %v5727_v50, %v2207_v51 }
0x2c63   :  { %v2209_v62 = vadd.f32 %v5727_v50, %v2208_v61 }
0x2c65   :  { %v2213_v57 = vsel %vm2212_vm8, %v5727_v50, %v2209_v62 }
0x2c66   :  { %v2218_v9 = vsel %vm2215_vm9, %v2217_v23, %v2213_v57  ;;  %v2280_v23 = vpop.f32.mrf.mxu3 }
0x2c67   :  { %v2221_v5 = vmul.f32 %v2218_v9, %v2127_v43 }
0x2cac   :  { %v2224_v30 = vpop.permute.xlu2 %2223 }
0x2cad   :  { %v2226_v1 = vmul.f32 %v2224_v30, %v2218_v9  ;;  %v2301_v30 = vpop.f32.mrf.mxu0 }
0x2caf   :  { %2228 = vrot.lane.b32.xlu0 %v2226_v1, %s6210_s17 }
0x2cb7   :  { %912 = vrot.lane.b32.xlu0 %v5729_v58, %s6209_s13 }
0x2d21   :  { %v2229_v15 = vpop.permute.xlu0 %2228 }
0x2d22   :  { %v7063_v4 = vadd.f32 %v2229_v15, %v2221_v5 }
0x2d24   :  { %5730 = vtanh.f32 %v7063_v4 }
0x2d25   :  { %5732 = vpow2.f32 %v5355_v63 }
0x2d29   :  { %v913_v62 = vpop.permute.xlu0 %912 }
0x2d2a   :  { %v5731_v18 = vpop.eup %5730 }
0x2d2b   :  { %2234 = vrot.lane.b32.xlu1 %v5731_v18, %s6209_s13  ;;  %v5733_v17 = vpop.eup %5732 }
0x2d2c   :  { %v893_v6 = vadd.f32 1.0, %v5733_v17 }
0x2d2e   :  { %5734 = vrcp.f32 %v893_v6  ;;  %v905_v50 = vand.u32 2147483648, %v893_v6  ;;  %vm899_vm11 = vweird.f32 %v893_v6  ;;  %v903_v60 = vand.u32 2147483647, %v893_v6 }
0x2d30   :  { %v906_v61 = vor.u32 1.1754944e-38, %v905_v50  ;;  %vm904_vm13 = vcmp.eq.f32.partialorder %v903_v60, 8.507059e+37 }
0x2d34   :  { %v5735_v20 = vpop.eup %5734 }
0x2d35   :  { %v895_v0 = vmul.f32 %v5735_v20, %v893_v6  ;;  %vm900_vm10 = vweird.f32 %v5735_v20 }
0x2d36   :  { %vm901_vm12 = vmor %vm899_vm11, %vm900_vm10 }
0x2d37   :  { %v896_v44 = vsub.f32 1.0, %v895_v0 }
0x2d39   :  { %v897_v27 = vmul.f32 %v5735_v20, %v896_v44 }
0x2d3b   :  { %v898_v46 = vadd.f32 %v5735_v20, %v897_v27 }
0x2d3d   :  { %v902_v51 = vsel %vm901_vm12, %v5735_v20, %v898_v46 }
0x2d3e   :  { %v907_v54 = vsel %vm904_vm13, %v906_v61, %v902_v51 }
0x2d3f   :  { %v915_v2 = vmul.f32 %v913_v62, %v907_v54  ;;  %v910_v58 = vmul.f32 %v907_v54, %v6669_v3 }
0x2d9d   :  { %v2235_v45 = vpop.permute.xlu1 %2234 }
0x2d9e   :  { %v7067_v43 = vmul.f32 %v2235_v45, %v2218_v9 }
0x2da0   :  { %2239 = vrot.lane.b32.xlu2 %v7067_v43, %s6210_s17 }
0x2da8   :  { %917 = vrot.lane.b32.xlu2 %v915_v2, %s6210_s17 }
0x2dfa   :  { %v2240_v55 = vpop.permute.xlu2 %2239 }
0x2dfb   :  { %5402 = vmatmul.msk.f32.vlgmr.msra.gmra.mxu2 %vm240_vm0, %v2240_v55 }
0x2dfc   :  { %2520 = vmatpush.msra.mxu2 %v7001_v12 }
0x2dfe   :  { %2521 = vmatpush.msra.mxu2 %v7006_v34 }
0x2e00   :  { %2522 = vmatpush.msra.mxu2 %v7010_v40 }
0x2e02   :  { %2523 = vmatpush.msra.mxu2 %v7014_v41  ;;  %v918_v1 = vpop.permute.xlu2 %917 }
0x2e03   :  { %v7079_v5 = vadd.f32 %v918_v1, %v910_v58  ;;  %v7129_v1 = vld [vmem:[#allocation5] ss:$0 sm:$0xff]  ;;  %v2484_v58 = vpop.f32.mrf.mxu0 }
0x2e7e   :  { %v2260_v56 = vpop.f32.mrf.mxu2 }
0x2e7f   :  { %v2261_v57 = vadd.f32 %v6872_v39, %v2260_v56 }
0x2e81   :  { %v2283_v24 = vadd.f32 %v2280_v23, %v2261_v57 }
0x2e83   :  { %v2304_v9 = vadd.f32 %v2301_v30, %v2283_v24 }
0x2e85   :  { %5736 = vtanh.f32 %v2304_v9  ;;  %v5405_v63 = vmul.f32 -1.442695, %v2304_v9 }
0x2e86   :  { %5738 = vtanh.f32 %v7079_v5 }
0x2e87   :  { %5740 = vpow2.f32 %v5405_v63 }
0x2e8b   :  { %v5737_v15 = vpop.eup %5736 }
0x2e8c   :  { %2327 = vrot.lane.b32.xlu1 %v5737_v15, %s6209_s13  ;;  %v5739_v18 = vpop.eup %5738  ;;  %v2485_v15 = vadd.f32 %v7129_v1, %v2484_v58 }
0x2e8d   :  { %v5741_v39 = vpop.eup %5740 }
0x2e8e   :  { %v2308_v17 = vadd.f32 1.0, %v5741_v39 }
0x2e90   :  { %5742 = vrcp.f32 %v2308_v17  ;;  %v2320_v27 = vand.u32 2147483648, %v2308_v17  ;;  %vm2314_vm15 = vweird.f32 %v2308_v17  ;;  %v2318_v45 = vand.u32 2147483647, %v2308_v17 }
0x2e92   :  { %v2321_v50 = vor.u32 1.1754944e-38, %v2320_v27  ;;  %vm2319_vm2 = vcmp.eq.f32.partialorder %v2318_v45, 8.507059e+37 }
0x2e94   :  { %923 = vrot.lane.b32.xlu1 %v5739_v18, %s6209_s13 }
0x2e96   :  { %v5743_v6 = vpop.eup %5742 }
0x2e97   :  { %v2310_v20 = vmul.f32 %v5743_v6, %v2308_v17  ;;  %vm2315_vm14 = vweird.f32 %v5743_v6 }
0x2e98   :  { %vm2316_vm1 = vmor %vm2314_vm15, %vm2315_vm14 }
0x2e99   :  { %v2311_v0 = vsub.f32 1.0, %v2310_v20 }
0x2e9b   :  { %v2312_v44 = vmul.f32 %v5743_v6, %v2311_v0 }
0x2e9d   :  { %v2313_v3 = vadd.f32 %v5743_v6, %v2312_v44 }
0x2e9f   :  { %v2317_v46 = vsel %vm2316_vm1, %v5743_v6, %v2313_v3 }
0x2ea0   :  { %v2322_v51 = vsel %vm2319_vm2, %v2321_v50, %v2317_v46 }
0x2ea1   :  { %v2325_v55 = vmul.f32 %v2322_v51, %v7063_v4 }
0x2efe   :  { %v2328_v60 = vpop.permute.xlu1 %2327 }
0x2eff   :  { %v2330_v61 = vmul.f32 %v2328_v60, %v2322_v51 }
0x2f01   :  { %2332 = vrot.lane.b32.xlu0 %v2330_v61, %s6210_s17 }
0x2f06   :  { %v924_v62 = vpop.permute.xlu1 %923 }
0x2f07   :  { %v7085_v2 = vmul.f32 %v924_v62, %v907_v54 }
0x2f09   :  { %2368 = vrot.lane.b32.xlu0 %v7085_v2, %s6210_s17 }
0x2f73   :  { %v2333_v56 = vpop.permute.xlu0 %2332 }
0x2f74   :  { %v7090_v57 = vadd.f32 %v2333_v56, %v2325_v55 }
0x2f76   :  { %5744 = vtanh.f32 %v7090_v57 }
0x2f7b   :  { %v2369_v23 = vpop.permute.xlu0 %2368 }
0x2f7c   :  { %v5745_v24 = vpop.eup %5744  ;;  %5407 = vmatmul.msk.f32.vlgmr.msrb.gmra.mxu2 %vm240_vm0, %v2369_v23 }
0x2f7d   :  { %2338 = vrot.lane.b32.xlu2 %v5745_v24, %s6209_s13  ;;  %2687 = vmatpush.msrb.mxu2 %v6977_v19 }
0x2f7f   :  { %2688 = vmatpush.msrb.mxu2 %v6983_v7 }
0x2f81   :  { %2689 = vmatpush.msrb.mxu2 %v6987_v33 }
0x2f83   :  { %2690 = vmatpush.msrb.mxu2 %v6991_v8 }
0x2f84   :  { %5411 = vmatmul.msk.f32.vlgmr.msra.gmra.mxu2 %vm240_vm0, %v6683_v16 }
0x2f85   :  { %2811 = vmatpush.msra.mxu2 %v6957_v26 }
0x2f87   :  { %2812 = vmatpush.msra.mxu2 %v6961_v28 }
0x2f89   :  { %2813 = vmatpush.msra.mxu2 %v6965_v10 }
0x2f8b   :  { %2814 = vmatpush.msra.mxu2 %v6969_v29 }
0x2fd7   :  { %v2339_v4 = vpop.permute.xlu2 %2338 }
0x2fd8   :  { %v7105_v54 = vmul.f32 %v2339_v4, %v2322_v51 }
0x2fda   :  { %2343 = vrot.lane.b32.xlu1 %v7105_v54, %s6210_s17 }
0x2fff   :  { %v7125_v16 = vpop.f32.mrf.mxu2 }
0x304c   :  { %v2344_v30 = vpop.permute.xlu1 %2343 }
0x304d   :  { %5406 = vmatmul.msk.f32.vlgmr.msrb.gmra.mxu1 %vm240_vm0, %v2344_v30 }
0x304e   :  { %2624 = vmatpush.msrb.mxu1 %v7001_v12 }
0x3050   :  { %2625 = vmatpush.msrb.mxu1 %v7006_v34 }
0x3052   :  { %2626 = vmatpush.msrb.mxu1 %v7010_v40 }
0x3054   :  { %2627 = vmatpush.msrb.mxu1 %v7014_v41 }
0x3055   :  { %5410 = vmatmul.msk.f32.vlgmr.msra.gmra.mxu1 %vm240_vm0, %v2369_v23 }
0x3056   :  { %2791 = vmatpush.msra.mxu1 %v6977_v19 }
0x3058   :  { %2792 = vmatpush.msra.mxu1 %v6983_v7 }
0x305a   :  { %2793 = vmatpush.msra.mxu1 %v6987_v33 }
0x305c   :  { %2794 = vmatpush.msra.mxu1 %v6991_v8 }
0x305d   :  { %5415 = vmatmul.msk.f32.vlgmr.msrb.gmra.mxu1 %vm240_vm0, %v6701_v47  ;;  %v2525_v47 = vpop.f32.mrf.mxu2 }
0x305e   :  { %2915 = vmatpush.msrb.mxu1 %v6957_v26 }
0x3060   :  { %2916 = vmatpush.msrb.mxu1 %v6961_v28 }
0x3062   :  { %2917 = vmatpush.msrb.mxu1 %v6965_v10 }
0x3064   :  { %2918 = vmatpush.msrb.mxu1 %v6969_v29 }
0x30ca   :  { %v7127_v9 = vpop.f32.mrf.mxu1 }
0x30d2   :  { %v2504_v18 = vpop.f32.mrf.mxu1 }
0x30d3   :  { %v2507_v63 = vadd.f32 %v2504_v18, %v2485_v15 }
0x30d5   :  { %v2528_v39 = vadd.f32 %v2525_v47, %v2507_v63 }
0x30d7   :  { %5746 = vtanh.f32 %v2528_v39  ;;  %v5412_v6 = vmul.f32 -1.442695, %v2528_v39  ;;  %v2608_v39 = vpop.f32.mrf.mxu0 }
0x30d9   :  { %5748 = vpow2.f32 %v5412_v6 }
0x30da   :  { %v2629_v6 = vpop.f32.mrf.mxu1 }
0x30dd   :  { %v5747_v17 = vpop.eup %5746 }
0x30de   :  { %2551 = vrot.lane.b32.xlu2 %v5747_v17, %s6209_s13 }
0x30df   :  { %v5749_v20 = vpop.eup %5748 }
0x30e0   :  { %v2532_v0 = vadd.f32 1.0, %v5749_v20 }
0x30e2   :  { %5750 = vrcp.f32 %v2532_v0  ;;  %v2544_v50 = vand.u32 2147483648, %v2532_v0  ;;  %vm2538_vm4 = vweird.f32 %v2532_v0  ;;  %v2542_v60 = vand.u32 2147483647, %v2532_v0 }
0x30e4   :  { %v2545_v61 = vor.u32 1.1754944e-38, %v2544_v50  ;;  %vm2543_vm6 = vcmp.eq.f32.partialorder %v2542_v60, 8.507059e+37 }
0x30e8   :  { %v5751_v44 = vpop.eup %5750 }
0x30e9   :  { %v2534_v3 = vmul.f32 %v5751_v44, %v2532_v0  ;;  %vm2539_vm3 = vweird.f32 %v5751_v44 }
0x30ea   :  { %vm2540_vm5 = vmor %vm2538_vm4, %vm2539_vm3 }
0x30eb   :  { %v2535_v27 = vsub.f32 1.0, %v2534_v3 }
0x30ed   :  { %v2536_v45 = vmul.f32 %v5751_v44, %v2535_v27 }
0x30ef   :  { %v2537_v46 = vadd.f32 %v5751_v44, %v2536_v45 }
0x30f1   :  { %v2541_v51 = vsel %vm2540_vm5, %v5751_v44, %v2537_v46 }
0x30f2   :  { %v2546_v55 = vsel %vm2543_vm6, %v2545_v61, %v2541_v51 }
0x30f3   :  { %v2549_v23 = vmul.f32 0.0, %v2546_v55 }
0x3138   :  { %v2552_v62 = vpop.permute.xlu2 %2551 }
0x3139   :  { %v2554_v56 = vmul.f32 %v2552_v62, %v2546_v55 }
0x313b   :  { %2556 = vrot.lane.b32.xlu0 %v2554_v56, %s6210_s17 }
0x31ad   :  { %v2557_v24 = vpop.permute.xlu0 %2556 }
0x31ae   :  { %v2559_v4 = vadd.f32 %v2557_v24, %v2549_v23 }
0x31b0   :  { %5752 = vtanh.f32 %v2559_v4 }
0x31b6   :  { %v5753_v30 = vpop.eup %5752 }
0x31b7   :  { %2562 = vrot.lane.b32.xlu1 %v5753_v30, %s6209_s13 }
0x3229   :  { %v2563_v58 = vpop.permute.xlu1 %2562 }
0x322a   :  { %v7135_v15 = vmul.f32 %v2563_v58, %v2546_v55 }
0x322c   :  { %2567 = vrot.lane.b32.xlu2 %v7135_v15, %s6210_s17 }
0x3286   :  { %v2568_v18 = vpop.permute.xlu2 %2567 }
0x3287   :  { %5413 = vmatmul.msk.f32.vlgmr.msra.gmra.mxu3 %vm240_vm0, %v2568_v18 }
0x3288   :  { %2832 = vmatpush.msra.mxu3 %v7001_v12 }
0x328a   :  { %2833 = vmatpush.msra.mxu3 %v7006_v34 }
0x328c   :  { %2834 = vmatpush.msra.mxu3 %v7010_v40 }
0x328e   :  { %2835 = vmatpush.msra.mxu3 %v7014_v41 }
0x328f   :  { %5418 = vmatmul.msk.f32.vlgmr.msrb.gmra.mxu3 %vm240_vm0, %v6646_v13  ;;  %v7156_v13 = vpop.f32.mrf.mxu3 }
0x3290   :  { %2999 = vmatpush.msrb.mxu3 %v6977_v19 }
0x3292   :  { %3000 = vmatpush.msrb.mxu3 %v6983_v7 }
0x3294   :  { %3001 = vmatpush.msrb.mxu3 %v6987_v33 }
0x3296   :  { %3002 = vmatpush.msrb.mxu3 %v6991_v8 }
0x3297   :  { %5423 = vmatmul.msk.f32.vlgmr.msra.gmra.mxu3 %vm240_vm0, %v6727_v53 }
0x3298   :  { %3123 = vmatpush.msra.mxu3 %v6957_v26 }
0x329a   :  { %3124 = vmatpush.msra.mxu3 %v6961_v28 }
0x329c   :  { %3125 = vmatpush.msra.mxu3 %v6965_v10 }
0x329e   :  { %3126 = vmatpush.msra.mxu3 %v6969_v29 }
0x330a   :  { %v2588_v63 = vpop.f32.mrf.mxu3 }
0x330b   :  { %v2589_v47 = vadd.f32 %v7129_v1, %v2588_v63 }
0x330d   :  { %v2611_v17 = vadd.f32 %v2608_v39, %v2589_v47 }
0x330f   :  { %v2632_v20 = vadd.f32 %v2629_v6, %v2611_v17 }
0x3311   :  { %5754 = vtanh.f32 %v2632_v20  ;;  %v5416_v53 = vmul.f32 -1.442695, %v2632_v20 }
0x3312   :  { %v2712_v6 = vpop.f32.mrf.mxu3 }
0x3313   :  { %5756 = vpow2.f32 %v5416_v53 }
0x3317   :  { %v5755_v0 = vpop.eup %5754 }
0x3318   :  { %2655 = vrot.lane.b32.xlu0 %v5755_v0, %s6209_s13  ;;  %v2733_v0 = vpop.f32.mrf.mxu0 }
0x3319   :  { %v5757_v44 = vpop.eup %5756 }
0x331a   :  { %v2636_v3 = vadd.f32 1.0, %v5757_v44 }
0x331c   :  { %5758 = vrcp.f32 %v2636_v3  ;;  %v2648_v51 = vand.u32 2147483648, %v2636_v3  ;;  %vm2642_vm8 = vweird.f32 %v2636_v3  ;;  %v2646_v61 = vand.u32 2147483647, %v2636_v3 }
0x331e   :  { %v2649_v55 = vor.u32 1.1754944e-38, %v2648_v51  ;;  %vm2647_vm10 = vcmp.eq.f32.partialorder %v2646_v61, 8.507059e+37 }
0x3322   :  { %v5759_v27 = vpop.eup %5758 }
0x3323   :  { %v2638_v45 = vmul.f32 %v5759_v27, %v2636_v3  ;;  %vm2643_vm7 = vweird.f32 %v5759_v27 }
0x3324   :  { %vm2644_vm9 = vmor %vm2642_vm8, %vm2643_vm7 }
0x3325   :  { %v2639_v46 = vsub.f32 1.0, %v2638_v45 }
0x3327   :  { %v2640_v50 = vmul.f32 %v5759_v27, %v2639_v46 }
0x3329   :  { %v2641_v60 = vadd.f32 %v5759_v27, %v2640_v50 }
0x332b   :  { %v2645_v62 = vsel %vm2644_vm9, %v5759_v27, %v2641_v60 }
0x332c   :  { %v2650_v23 = vsel %vm2647_vm10, %v2649_v55, %v2645_v62 }
0x332d   :  { %v2653_v30 = vmul.f32 %v2650_v23, %v2559_v4 }
0x338a   :  { %v2656_v56 = vpop.permute.xlu0 %2655 }
0x338b   :  { %v2658_v24 = vmul.f32 %v2656_v56, %v2650_v23 }
0x338d   :  { %2660 = vrot.lane.b32.xlu1 %v2658_v24, %s6210_s17 }
0x33ff   :  { %v2661_v58 = vpop.permute.xlu1 %2660 }
0x3400   :  { %v2663_v18 = vadd.f32 %v2661_v58, %v2653_v30 }
0x3402   :  { %5760 = vtanh.f32 %v2663_v18 }
0x3408   :  { %v5761_v63 = vpop.eup %5760 }
0x3409   :  { %2666 = vrot.lane.b32.xlu2 %v5761_v63, %s6209_s13 }
0x3463   :  { %v2667_v47 = vpop.permute.xlu2 %2666 }
0x3464   :  { %v7162_v39 = vmul.f32 %v2667_v47, %v2650_v23 }
0x3466   :  { %2671 = vrot.lane.b32.xlu0 %v7162_v39, %s6210_s17 }
0x34d8   :  { %v2672_v17 = vpop.permute.xlu0 %2671 }
0x34d9   :  { %5417 = vmatmul.msk.f32.vlgmr.msrb.gmra.mxu2 %vm240_vm0, %v2672_v17 }
0x34da   :  { %2936 = vmatpush.msrb.mxu2 %v7001_v12 }
0x34dc   :  { %2937 = vmatpush.msrb.mxu2 %v7006_v34 }
0x34de   :  { %2938 = vmatpush.msrb.mxu2 %v7010_v40 }
0x34e0   :  { %2939 = vmatpush.msrb.mxu2 %v7014_v41 }
0x34e1   :  { %5422 = vmatmul.msk.f32.vlgmr.msra.gmra.mxu2 %vm240_vm0, %v6614_v42 }
0x34e2   :  { %3103 = vmatpush.msra.mxu2 %v6977_v19 }
0x34e4   :  { %3104 = vmatpush.msra.mxu2 %v6983_v7 }
0x34e6   :  { %3105 = vmatpush.msra.mxu2 %v6987_v33 }
0x34e8   :  { %3106 = vmatpush.msra.mxu2 %v6991_v8 }
0x34e9   :  { %5427 = vmatmul.msk.f32.vlgmr.msrb.gmra.mxu2 %vm240_vm0, %v6736_v31 }
0x34ea   :  { %3227 = vmatpush.msrb.mxu2 %v6957_v26 }
0x34ec   :  { %3228 = vmatpush.msrb.mxu2 %v6961_v28 }
0x34ee   :  { %3229 = vmatpush.msrb.mxu2 %v6965_v10 }
0x34f0   :  { %3230 = vmatpush.msrb.mxu2 %v6969_v29 }
0x355c   :  { %v2692_v42 = vpop.f32.mrf.mxu2 }
0x355d   :  { %v2693_v4 = vadd.f32 %v7129_v1, %v2692_v42 }
0x355f   :  { %v2715_v20 = vadd.f32 %v2712_v6, %v2693_v4  ;;  %v2837_v6 = vpop.f32.mrf.mxu3 }
0x3561   :  { %v2736_v53 = vadd.f32 %v2733_v0, %v2715_v20 }
0x3563   :  { %5762 = vtanh.f32 %v2736_v53  ;;  %v5420_v31 = vmul.f32 -1.442695, %v2736_v53 }
0x3564   :  { %v2816_v42 = vpop.f32.mrf.mxu2 }
0x3565   :  { %5764 = vpow2.f32 %v5420_v31 }
0x3569   :  { %v5763_v44 = vpop.eup %5762 }
0x356a   :  { %2759 = vrot.lane.b32.xlu1 %v5763_v44, %s6209_s13 }
0x356b   :  { %v5765_v26 = vpop.eup %5764 }
0x356c   :  { %v2740_v3 = vadd.f32 1.0, %v5765_v26 }
0x356e   :  { %5766 = vrcp.f32 %v2740_v3  ;;  %v2752_v46 = vand.u32 2147483648, %v2740_v3  ;;  %vm2746_vm12 = vweird.f32 %v2740_v3  ;;  %v2750_v50 = vand.u32 2147483647, %v2740_v3 }
0x3570   :  { %v2753_v51 = vor.u32 1.1754944e-38, %v2752_v46  ;;  %vm2751_vm14 = vcmp.eq.f32.partialorder %v2750_v50, 8.507059e+37 }
0x3574   :  { %v5767_v28 = vpop.eup %5766 }
0x3575   :  { %v2742_v10 = vmul.f32 %v5767_v28, %v2740_v3  ;;  %vm2747_vm11 = vweird.f32 %v5767_v28 }
0x3576   :  { %vm2748_vm13 = vmor %vm2746_vm12, %vm2747_vm11 }
0x3577   :  { %v2743_v27 = vsub.f32 1.0, %v2742_v10 }
0x3579   :  { %v2744_v29 = vmul.f32 %v5767_v28, %v2743_v27 }
0x357b   :  { %v2745_v45 = vadd.f32 %v5767_v28, %v2744_v29 }
0x357d   :  { %v2749_v60 = vsel %vm2748_vm13, %v5767_v28, %v2745_v45 }
0x357e   :  { %v2754_v62 = vsel %vm2751_vm14, %v2753_v51, %v2749_v60 }
0x357f   :  { %v2757_v56 = vmul.f32 %v2754_v62, %v2663_v18 }
0x35dc   :  { %v2760_v61 = vpop.permute.xlu1 %2759 }
0x35dd   :  { %v2762_v55 = vmul.f32 %v2760_v61, %v2754_v62 }
0x35df   :  { %2764 = vrot.lane.b32.xlu2 %v2762_v55, %s6210_s17 }
0x3639   :  { %v2765_v23 = vpop.permute.xlu2 %2764 }
0x363a   :  { %v2767_v24 = vadd.f32 %v2765_v23, %v2757_v56 }
0x363c   :  { %5768 = vtanh.f32 %v2767_v24 }
0x3642   :  { %v5769_v30 = vpop.eup %5768 }
0x3643   :  { %2770 = vrot.lane.b32.xlu0 %v5769_v30, %s6209_s13  ;;  %v2941_v30 = vpop.f32.mrf.mxu2 }
0x36b5   :  { %v2771_v58 = vpop.permute.xlu0 %2770 }
0x36b6   :  { %v7187_v63 = vmul.f32 %v2771_v58, %v2754_v62 }
0x36b8   :  { %2775 = vrot.lane.b32.xlu1 %v7187_v63, %s6210_s17 }
0x372a   :  { %v2776_v47 = vpop.permute.xlu1 %2775 }
0x372b   :  { %5421 = vmatmul.msk.f32.vlgmr.msra.gmra.mxu1 %vm240_vm0, %v2776_v47 }
0x372c   :  { %3040 = vmatpush.msra.mxu1 %v7001_v12 }
0x372e   :  { %3041 = vmatpush.msra.mxu1 %v7006_v34 }
0x3730   :  { %3042 = vmatpush.msra.mxu1 %v7010_v40 }
0x3732   :  { %3043 = vmatpush.msra.mxu1 %v7014_v41 }
0x3733   :  { %5426 = vmatmul.msk.f32.vlgmr.msrb.gmra.mxu1 %vm240_vm0, %v6605_v14 }
0x3734   :  { %3207 = vmatpush.msrb.mxu1 %v6977_v19 }
0x3736   :  { %3208 = vmatpush.msrb.mxu1 %v6983_v7 }
0x3738   :  { %3209 = vmatpush.msrb.mxu1 %v6987_v33 }
0x373a   :  { %3210 = vmatpush.msrb.mxu1 %v6991_v8 }
0x373b   :  { %5431 = vmatmul.msk.f32.vlgmr.msra.gmra.mxu1 %vm240_vm0, %v6808_v22 }
0x37a8   :  { %v2796_v18 = vpop.f32.mrf.mxu1 }
0x37a9   :  { %v2797_v17 = vadd.f32 %v7129_v1, %v2796_v18 }
0x37ab   :  { %v2819_v4 = vadd.f32 %v2816_v42, %v2797_v17 }
0x37ad   :  { %v2840_v20 = vadd.f32 %v2837_v6, %v2819_v4 }
0x37af   :  { %5770 = vtanh.f32 %v2840_v20  ;;  %v5424_v19 = vmul.f32 -1.442695, %v2840_v20 }
0x37b0   :  { %v2920_v23 = vpop.f32.mrf.mxu1 }
0x37b1   :  { %5772 = vpow2.f32 %v5424_v19 }
0x37b5   :  { %v5771_v14 = vpop.eup %5770 }
0x37b6   :  { %2863 = vrot.lane.b32.xlu2 %v5771_v14, %s6209_s13 }
0x37b7   :  { %v5773_v7 = vpop.eup %5772 }
0x37b8   :  { %v2844_v33 = vadd.f32 1.0, %v5773_v7 }
0x37ba   :  { %5774 = vrcp.f32 %v2844_v33  ;;  %v2856_v31 = vand.u32 2147483648, %v2844_v33  ;;  %vm2850_vm1 = vweird.f32 %v2844_v33  ;;  %v2854_v26 = vand.u32 2147483647, %v2844_v33 }
0x37bc   :  { %v2857_v28 = vor.u32 1.1754944e-38, %v2856_v31  ;;  %vm2855_vm3 = vcmp.eq.f32.partialorder %v2854_v26, 8.507059e+37 }
0x37c0   :  { %v5775_v8 = vpop.eup %5774 }
0x37c1   :  { %v2846_v0 = vmul.f32 %v5775_v8, %v2844_v33  ;;  %vm2851_vm15 = vweird.f32 %v5775_v8 }
0x37c2   :  { %vm2852_vm2 = vmor %vm2850_vm1, %vm2851_vm15 }
0x37c3   :  { %v2847_v53 = vsub.f32 1.0, %v2846_v0 }
0x37c5   :  { %v2848_v22 = vmul.f32 %v5775_v8, %v2847_v53 }
0x37c7   :  { %v2849_v44 = vadd.f32 %v5775_v8, %v2848_v22 }
0x37c9   :  { %v2853_v3 = vsel %vm2852_vm2, %v5775_v8, %v2849_v44 }
0x37ca   :  { %v2858_v27 = vsel %vm2855_vm3, %v2857_v28, %v2853_v3 }
0x37cb   :  { %v2861_v45 = vmul.f32 %v2858_v27, %v2767_v24 }
0x3810   :  { %v2864_v10 = vpop.permute.xlu2 %2863 }
0x3811   :  { %v2866_v29 = vmul.f32 %v2864_v10, %v2858_v27 }
0x3813   :  { %2868 = vrot.lane.b32.xlu0 %v2866_v29, %s6210_s17 }
0x3885   :  { %v2869_v46 = vpop.permute.xlu0 %2868 }
0x3886   :  { %v2871_v50 = vadd.f32 %v2869_v46, %v2861_v45 }
0x3888   :  { %5776 = vtanh.f32 %v2871_v50 }
0x388e   :  { %v5777_v60 = vpop.eup %5776 }
0x388f   :  { %2874 = vrot.lane.b32.xlu1 %v5777_v60, %s6209_s13 }
0x3901   :  { %v2875_v51 = vpop.permute.xlu1 %2874 }
0x3902   :  { %v7208_v61 = vmul.f32 %v2875_v51, %v2858_v27 }
0x3904   :  { %2879 = vrot.lane.b32.xlu2 %v7208_v61, %s6210_s17 }
0x395e   :  { %v2880_v62 = vpop.permute.xlu2 %2879 }
0x395f   :  { %5425 = vmatmul.msk.f32.vlgmr.msrb.gmra.mxu0 %vm240_vm0, %v2880_v62 }
0x3960   :  { %3144 = vmatpush.msrb.mxu0 %v7001_v12 }
0x3962   :  { %3145 = vmatpush.msrb.mxu0 %v7006_v34 }
0x3964   :  { %3146 = vmatpush.msrb.mxu0 %v7010_v40 }
0x3966   :  { %3147 = vmatpush.msrb.mxu0 %v7014_v41 }
0x3967   :  { %5430 = vmatmul.msk.f32.vlgmr.msra.gmra.mxu0 %vm240_vm0, %v6592_v48 }
0x396f   :  { %5435 = vmatmul.msk.f32.vlgmr.msrb.gmra.mxu0 %vm240_vm0, %v6839_v49 }
0x39dc   :  { %v2900_v55 = vpop.f32.mrf.mxu0 }
0x39dd   :  { %v2901_v56 = vadd.f32 %v7129_v1, %v2900_v55 }
0x39df   :  { %v2923_v24 = vadd.f32 %v2920_v23, %v2901_v56 }
0x39e1   :  { %v2944_v58 = vadd.f32 %v2941_v30, %v2923_v24 }
0x39e3   :  { %5778 = vtanh.f32 %v2944_v58  ;;  %v5428_v18 = vmul.f32 -1.442695, %v2944_v58 }
0x39e4   :  { %v3024_v45 = vpop.f32.mrf.mxu0 }
0x39e5   :  { %5780 = vpow2.f32 %v5428_v18 }
0x39e9   :  { %v5779_v47 = vpop.eup %5778 }
0x39ea   :  { %2967 = vrot.lane.b32.xlu0 %v5779_v47, %s6209_s13 }
0x39eb   :  { %v5781_v17 = vpop.eup %5780 }
0x39ec   :  { %v2948_v42 = vadd.f32 1.0, %v5781_v17 }
0x39ee   :  { %5782 = vrcp.f32 %v2948_v42  ;;  %v2960_v14 = vand.u32 2147483648, %v2948_v42  ;;  %vm2954_vm5 = vweird.f32 %v2948_v42  ;;  %v2958_v19 = vand.u32 2147483647, %v2948_v42 }
0x39f0   :  { %v2961_v33 = vor.u32 1.1754944e-38, %v2960_v14  ;;  %vm2959_vm7 = vcmp.eq.f32.partialorder %v2958_v19, 8.507059e+37 }
0x39f4   :  { %v5783_v48 = vpop.eup %5782 }
0x39f5   :  { %v2950_v4 = vmul.f32 %v5783_v48, %v2948_v42  ;;  %vm2955_vm4 = vweird.f32 %v5783_v48 }
0x39f6   :  { %vm2956_vm6 = vmor %vm2954_vm5, %vm2955_vm4 }
0x39f7   :  { %v2951_v6 = vsub.f32 1.0, %v2950_v4 }
0x39f9   :  { %v2952_v49 = vmul.f32 %v5783_v48, %v2951_v6 }
0x39fb   :  { %v2953_v20 = vadd.f32 %v5783_v48, %v2952_v49 }
0x39fd   :  { %v2957_v7 = vsel %vm2956_vm6, %v5783_v48, %v2953_v20 }
0x39fe   :  { %v2962_v0 = vsel %vm2959_vm7, %v2961_v33, %v2957_v7 }
0x39ff   :  { %v2965_v22 = vmul.f32 %v2962_v0, %v2871_v50  ;;  %v3045_v50 = vpop.f32.mrf.mxu1 }
0x3a5c   :  { %v2968_v8 = vpop.permute.xlu0 %2967 }
0x3a5d   :  { %v2970_v53 = vmul.f32 %v2968_v8, %v2962_v0  ;;  %v3149_v8 = vpop.f32.mrf.mxu0 }
0x3a5f   :  { %2972 = vrot.lane.b32.xlu1 %v2970_v53, %s6210_s17 }
0x3ad1   :  { %v2973_v44 = vpop.permute.xlu1 %2972 }
0x3ad2   :  { %v2975_v31 = vadd.f32 %v2973_v44, %v2965_v22 }
0x3ad4   :  { %5784 = vtanh.f32 %v2975_v31 }
0x3ada   :  { %v5785_v26 = vpop.eup %5784 }
0x3adb   :  { %2978 = vrot.lane.b32.xlu2 %v5785_v26, %s6209_s13 }
0x3b35   :  { %v2979_v3 = vpop.permute.xlu2 %2978 }
0x3b36   :  { %v7225_v28 = vmul.f32 %v2979_v3, %v2962_v0 }
0x3b38   :  { %2983 = vrot.lane.b32.xlu0 %v7225_v28, %s6210_s17 }
0x3baa   :  { %v2984_v10 = vpop.permute.xlu0 %2983 }
0x3bab   :  { %5429 = vmatmul.msk.f32.vlgmr.msrb.gmra.mxu3 %vm240_vm0, %v2984_v10 }
0x3bac   :  { %3248 = vmatpush.msrb.mxu3 %v7001_v12 }
0x3bae   :  { %3249 = vmatpush.msrb.mxu3 %v7006_v34 }
0x3bb0   :  { %3250 = vmatpush.msrb.mxu3 %v7010_v40 }
0x3bb2   :  { %3251 = vmatpush.msrb.mxu3 %v7014_v41 }
0x3bb3   :  { %5434 = vmatmul.msk.f32.vlgmr.msra.gmra.mxu3 %vm240_vm0, %v6579_v21 }
0x3bbb   :  { %5439 = vmatmul.msk.f32.vlgmr.msrb.gmra.mxu3 %vm240_vm0, %v6864_v38 }
0x3c2e   :  { %v3004_v27 = vpop.f32.mrf.mxu3 }
0x3c2f   :  { %v3005_v29 = vadd.f32 %v7129_v1, %v3004_v27 }
0x3c31   :  { %v3027_v46 = vadd.f32 %v3024_v45, %v3005_v29 }
0x3c33   :  { %v3048_v60 = vadd.f32 %v3045_v50, %v3027_v46 }
0x3c35   :  { %5786 = vtanh.f32 %v3048_v60  ;;  %v5432_v34 = vmul.f32 -1.442695, %v3048_v60 }
0x3c36   :  { %v3128_v7 = vpop.f32.mrf.mxu3 }
0x3c37   :  { %5788 = vpow2.f32 %v5432_v34  ;;  %v3302_v34 = vadd.f32 %v6860_v37, %v7085_v2 }
0x3c3b   :  { %v5787_v12 = vpop.eup %5786 }
0x3c3c   :  { %3071 = vrot.lane.b32.xlu1 %v5787_v12, %s6209_s13 }
0x3c3d   :  { %v5789_v40 = vpop.eup %5788 }
0x3c3e   :  { %v3052_v41 = vadd.f32 1.0, %v5789_v40  ;;  %v7259_v40 = vld [vmem:[%s7810_s21 + $0x18] sm:$0xff] }
0x3c3f   :  { %3350 = vmatpush.msra.mxu0 %v7259_v40 }
0x3c40   :  { %5790 = vrcp.f32 %v3052_v41  ;;  %v3064_v56 = vand.u32 2147483648, %v3052_v41  ;;  %vm3058_vm9 = vweird.f32 %v3052_v41  ;;  %v3062_v23 = vand.u32 2147483647, %v3052_v41 }
0x3c42   :  { %v3065_v30 = vor.u32 1.1754944e-38, %v3064_v56  ;;  %vm3063_vm11 = vcmp.eq.f32.partialorder %v3062_v23, 8.507059e+37 }
0x3c46   :  { %v5791_v21 = vpop.eup %5790 }
0x3c47   :  { %v3054_v51 = vmul.f32 %v5791_v21, %v3052_v41  ;;  %vm3059_vm8 = vweird.f32 %v5791_v21  ;;  %v7264_v41 = vld [vmem:[%s7810_s21 + $0x10] sm:$0xff] }
0x3c48   :  { %vm3060_vm10 = vmor %vm3058_vm9, %vm3059_vm8  ;;  %3351 = vmatpush.msra.mxu0 %v7264_v41 }
0x3c49   :  { %v3055_v62 = vsub.f32 1.0, %v3054_v51  ;;  %v7272_v51 = vld [vmem:[%s7810_s21] sm:$0xff] }
0x3c4b   :  { %v3056_v38 = vmul.f32 %v5791_v21, %v3055_v62 }
0x3c4d   :  { %v3057_v55 = vadd.f32 %v5791_v21, %v3056_v38 }
0x3c4f   :  { %v3061_v24 = vsel %vm3060_vm10, %v5791_v21, %v3057_v55  ;;  %v7267_v21 = vld [vmem:[%s7810_s21 + $0x8] sm:$0xff] }
0x3c50   :  { %v3066_v47 = vsel %vm3063_vm11, %v3065_v30, %v3061_v24  ;;  %3352 = vmatpush.msra.mxu0 %v7267_v21  ;;  %v7301_v24 = vld [vmem:[%s7811_s3 + $0x18] sm:$0xff]  ;;  %v7304_v30 = vld [vmem:[%s7811_s3 + $0x10] sm:$0xff] }
0x3c51   :  { %v3069_v17 = vmul.f32 %v3066_v47, %v2975_v31  ;;  %3373 = vmatpush.msra.mxu1 %v7301_v24  ;;  %3459 = vmatpush.msra.mxu3 %v7301_v24 }
0x3c52   :  { %3353 = vmatpush.msra.mxu0 %v7272_v51 }
0x3c53   :  { %3374 = vmatpush.msra.mxu1 %v7304_v30  ;;  %3460 = vmatpush.msra.mxu3 %v7304_v30 }
0x3c54   :  { %3522 = vmatpush.msrb.mxu0 %v7259_v40 }
0x3c56   :  { %3523 = vmatpush.msrb.mxu0 %v7264_v41 }
0x3c58   :  { %3524 = vmatpush.msrb.mxu0 %v7267_v21 }
0x3c5a   :  { %3525 = vmatpush.msrb.mxu0 %v7272_v51 }
0x3cae   :  { %v3072_v58 = vpop.permute.xlu1 %3071 }
0x3caf   :  { %v3074_v18 = vmul.f32 %v3072_v58, %v3066_v47  ;;  %v7309_v58 = vld [vmem:[%s7811_s3 + $0x8] sm:$0xff] }
0x3cb0   :  { %3375 = vmatpush.msra.mxu1 %v7309_v58  ;;  %3461 = vmatpush.msra.mxu3 %v7309_v58 }
0x3cb1   :  { %3076 = vrot.lane.b32.xlu2 %v3074_v18, %s6210_s17 }
0x3d0b   :  { %v3077_v42 = vpop.permute.xlu2 %3076 }
0x3d0c   :  { %v7241_v48 = vadd.f32 %v3077_v42, %v3069_v17  ;;  %v3306_v17 = vld [vmem:[%s7812_s8] sm:$0x3] }
0x3d0e   :  { %5792 = vtanh.f32 %v7241_v48 }
0x3d14   :  { %v5793_v4 = vpop.eup %5792 }
0x3d15   :  { %3082 = vrot.lane.b32.xlu0 %v5793_v4, %s6209_s13 }
0x3d87   :  { %v3083_v6 = vpop.permute.xlu0 %3082 }
0x3d88   :  { %v7245_v49 = vmul.f32 %v3083_v6, %v3066_v47  ;;  %v7314_v47 = vld [vmem:[%s7811_s3] sm:$0xff] }
0x3d89   :  { %3376 = vmatpush.msra.mxu1 %v7314_v47  ;;  %3462 = vmatpush.msra.mxu3 %v7314_v47 }
0x3d8a   :  { %3087 = vrot.lane.b32.xlu1 %v7245_v49, %s6210_s17 }
0x3d8b   :  { %3631 = vmatpush.msrb.mxu3 %v7301_v24 }
0x3d8d   :  { %3632 = vmatpush.msrb.mxu3 %v7304_v30 }
0x3d8f   :  { %3633 = vmatpush.msrb.mxu3 %v7309_v58 }
0x3d91   :  { %3634 = vmatpush.msrb.mxu3 %v7314_v47 }
0x3dfc   :  { %v3088_v20 = vpop.permute.xlu1 %3087 }
0x3dfd   :  { %5433 = vmatmul.msk.f32.vlgmr.msra.gmra.mxu2 %vm240_vm0, %v3088_v20 }
0x3dfe   :  { %3436 = vmatpush.msra.mxu2 %v7259_v40 }
0x3e00   :  { %3437 = vmatpush.msra.mxu2 %v7264_v41 }
0x3e02   :  { %3438 = vmatpush.msra.mxu2 %v7267_v21 }
0x3e04   :  { %3439 = vmatpush.msra.mxu2 %v7272_v51 }
0x3e05   :  { %5438 = vmatmul.msk.f32.vlgmr.msrb.gmra.mxu2 %vm240_vm0, %v6563_v52 }
0x3e06   :  { %3608 = vmatpush.msrb.mxu2 %v7259_v40 }
0x3e08   :  { %3609 = vmatpush.msrb.mxu2 %v7264_v41 }
0x3e0a   :  { %3610 = vmatpush.msrb.mxu2 %v7267_v21 }
0x3e0c   :  { %3611 = vmatpush.msrb.mxu2 %v7272_v51 }
0x3e80   :  { %v3108_v14 = vpop.f32.mrf.mxu2 }
0x3e81   :  { %v3109_v19 = vadd.f32 %v7129_v1, %v3108_v14 }
0x3e83   :  { %v3131_v33 = vadd.f32 %v3128_v7, %v3109_v19 }
0x3e85   :  { %v3152_v0 = vadd.f32 %v3149_v8, %v3131_v33 }
0x3e87   :  { %5794 = vtanh.f32 %v3152_v0  ;;  %v5436_v22 = vmul.f32 -1.442695, %v3152_v0 }
0x3e89   :  { %5796 = vpow2.f32 %v5436_v22 }
0x3e8d   :  { %v5795_v53 = vpop.eup %5794 }
0x3e8e   :  { %3175 = vrot.lane.b32.xlu2 %v5795_v53, %s6209_s13 }
0x3e8f   :  { %v5797_v44 = vpop.eup %5796 }
0x3e90   :  { %v3156_v31 = vadd.f32 1.0, %v5797_v44 }
0x3e92   :  { %5798 = vrcp.f32 %v3156_v31  ;;  %v3168_v1 = vand.u32 2147483648, %v3156_v31  ;;  %vm3162_vm13 = vweird.f32 %v3156_v31  ;;  %v3166_v29 = vand.u32 2147483647, %v3156_v31 }
0x3e94   :  { %v3169_v46 = vor.u32 1.1754944e-38, %v3168_v1  ;;  %vm3167_vm15 = vcmp.eq.f32.partialorder %v3166_v29, 8.507059e+37 }
0x3e98   :  { %v5799_v26 = vpop.eup %5798 }
0x3e99   :  { %v3158_v3 = vmul.f32 %v5799_v26, %v3156_v31  ;;  %vm3163_vm12 = vweird.f32 %v5799_v26 }
0x3e9a   :  { %vm3164_vm14 = vmor %vm3162_vm13, %vm3163_vm12 }
0x3e9b   :  { %v3159_v10 = vsub.f32 1.0, %v3158_v3 }
0x3e9d   :  { %v3160_v52 = vmul.f32 %v5799_v26, %v3159_v10 }
0x3e9f   :  { %v3161_v27 = vadd.f32 %v5799_v26, %v3160_v52 }
0x3ea1   :  { %v3165_v45 = vsel %vm3164_vm14, %v5799_v26, %v3161_v27 }
0x3ea2   :  { %v3170_v60 = vsel %vm3167_vm15, %v3169_v46, %v3165_v45  ;;  %v3303_v45 = vadd.f32 %v6856_v11, %v7079_v5  ;;  %v5444_v11 = vld [vmem:[%s7812_s8 + $0x8] sm:$0x3]  ;;  %v7356_v5 = vld [vmem:[%s7814_s19 + $0x18] sm:$0xff] }
0x3ea3   :  { %v3173_v37 = vmul.f32 %v3170_v60, %v7241_v48  ;;  %v7338_v48 = vld [vmem:[%s7813_s14] ss:$0 sm:$0xff] }
0x3ee8   :  { %v3176_v50 = vpop.permute.xlu2 %3175 }
0x3ee9   :  { %v3178_v12 = vmul.f32 %v3176_v50, %v3170_v60 }
0x3eeb   :  { %3180 = vrot.lane.b32.xlu0 %v3178_v12, %s6210_s17 }
0x3ef3   :  { %3334 = vrot.lane.b32.xlu0 %v3302_v34, %s6210_s17  ;;  %v5442_v34 = vld [vmem:[%s7812_s8 + $0x4] sm:$0x3] }
0x3f5d   :  { %v3181_v2 = vpop.permute.xlu0 %3180 }
0x3f5e   :  { %v7287_v62 = vadd.f32 %v3181_v2, %v3173_v37  ;;  %v7361_v37 = vld [vmem:[%s7814_s19 + $0x10] sm:$0xff]  ;;  %v7365_v2 = vld [vmem:[%s7814_s19 + $0x8] sm:$0xff] }
0x3f60   :  { %5800 = vtanh.f32 %v7287_v62 }
0x3f65   :  { %v3335_v38 = vpop.permute.xlu0 %3334 }
0x3f66   :  { %v5801_v55 = vpop.eup %5800  ;;  %5448 = vmatmul.msk.f32.vlgmr.msra.gmra.mxu0 %vm240_vm0, %v3335_v38  ;;  %v7369_v38 = vld [vmem:[%s7814_s19] sm:$0xff] }
0x3f67   :  { %3186 = vrot.lane.b32.xlu1 %v5801_v55, %s6209_s13  ;;  %3694 = vmatpush.msra.mxu0 %v7259_v40  ;;  %v5446_v55 = vld [vmem:[%s7812_s8 + $0xc] sm:$0x3] }
0x3f69   :  { %3695 = vmatpush.msra.mxu0 %v7264_v41 }
0x3f6b   :  { %3696 = vmatpush.msra.mxu0 %v7267_v21 }
0x3f6d   :  { %3697 = vmatpush.msra.mxu0 %v7272_v51 }
0x3fd9   :  { %v3187_v56 = vpop.permute.xlu1 %3186 }
0x3fda   :  { %v7296_v23 = vmul.f32 %v3187_v56, %v3170_v60 }
0x3fdc   :  { %3191 = vrot.lane.b32.xlu2 %v7296_v23, %s6210_s17 }
0x3fe3   :  { %v3355_v4 = vpop.f32.mrf.mxu0 }
0x3fe4   :  { %v3356_v6 = vadd.f32 %v7338_v48, %v3355_v4 }
0x4036   :  { %v3192_v18 = vpop.permute.xlu2 %3191 }
0x4037   :  { %5437 = vmatmul.msk.f32.vlgmr.msrb.gmra.mxu1 %vm240_vm0, %v3192_v18 }
0x4038   :  { %3545 = vmatpush.msrb.mxu1 %v7301_v24 }
0x403a   :  { %3546 = vmatpush.msrb.mxu1 %v7304_v30 }
0x403c   :  { %3547 = vmatpush.msrb.mxu1 %v7309_v58 }
0x403e   :  { %3548 = vmatpush.msrb.mxu1 %v7314_v47 }
0x403f   :  { %5449 = vmatmul.msk.f32.vlgmr.msra.gmra.mxu1 %vm240_vm0, %v3306_v17  ;;  %v5441_v17 = vld [vmem:[%s7812_s8 + $0x2] sm:$0x3] }
0x4040   :  { %3717 = vmatpush.msra.mxu1 %v7301_v24  ;;  %5452 = vmatmul.msk.f32.vlgmr.msra.gmra.mxu3 %vm240_vm0, %v5441_v17 }
0x4041   :  { %3803 = vmatpush.msra.mxu3 %v7301_v24 }
0x4042   :  { %3718 = vmatpush.msra.mxu1 %v7304_v30 }
0x4043   :  { %3804 = vmatpush.msra.mxu3 %v7304_v30 }
0x4044   :  { %3719 = vmatpush.msra.mxu1 %v7309_v58 }
0x4045   :  { %3805 = vmatpush.msra.mxu3 %v7309_v58 }
0x4046   :  { %3720 = vmatpush.msra.mxu1 %v7314_v47 }
0x4047   :  { %5455 = vmatmul.msk.f32.vlgmr.msrb.gmra.mxu1 %vm240_vm0, %v5442_v34  ;;  %3806 = vmatpush.msra.mxu3 %v7314_v47 }
0x4048   :  { %3889 = vmatpush.msrb.mxu1 %v7301_v24 }
0x404a   :  { %3890 = vmatpush.msrb.mxu1 %v7304_v30 }
0x404c   :  { %3891 = vmatpush.msrb.mxu1 %v7309_v58 }
0x404e   :  { %3892 = vmatpush.msrb.mxu1 %v7314_v47 }
0x404f   :  { %5461 = vmatmul.msk.f32.vlgmr.msra.gmra.mxu1 %vm240_vm0, %v5444_v11 }
0x4050   :  { %4070 = vmatpush.msra.mxu1 %v7356_v5 }
0x4052   :  { %4071 = vmatpush.msra.mxu1 %v7361_v37 }
0x4054   :  { %4072 = vmatpush.msra.mxu1 %v7365_v2 }
0x4056   :  { %4073 = vmatpush.msra.mxu1 %v7369_v38 }
0x4057   :  { %5467 = vmatmul.msk.f32.vlgmr.msrb.gmra.mxu1 %vm240_vm0, %v5446_v55 }
0x4058   :  { %4236 = vmatpush.msrb.mxu1 %v7356_v5 }
0x405a   :  { %4237 = vmatpush.msrb.mxu1 %v7361_v37 }
0x405c   :  { %4238 = vmatpush.msrb.mxu1 %v7365_v2 }
0x405e   :  { %4239 = vmatpush.msrb.mxu1 %v7369_v38 }
0x40b4   :  { %v7335_v42 = vpop.f32.mrf.mxu1 }
0x40bc   :  { %v3378_v20 = vpop.f32.mrf.mxu1 }
0x40bd   :  { %v3381_v14 = vadd.f32 %v3378_v20, %v3356_v6  ;;  %v7396_v6 = vpop.f32.mrf.mxu3  ;;  %v7398_v20 = vpop.f32.mrf.mxu2 }
0x40bf   :  { %5802 = vtanh.f32 %v3381_v14  ;;  %v5450_v7 = vmul.f32 -1.442695, %v3381_v14 }
0x40c1   :  { %5804 = vpow2.f32 %v5450_v7 }
0x40c5   :  { %v5803_v19 = vpop.eup %5802 }
0x40c6   :  { %3404 = vrot.lane.b32.xlu1 %v5803_v19, %s6209_s13  ;;  %v3464_v19 = vpop.f32.mrf.mxu3 }
0x40c7   :  { %v5805_v33 = vpop.eup %5804 }
0x40c8   :  { %v3385_v8 = vadd.f32 1.0, %v5805_v33 }
0x40ca   :  { %5806 = vrcp.f32 %v3385_v8  ;;  %v3397_v26 = vand.u32 2147483648, %v3385_v8  ;;  %vm3391_vm2 = vweird.f32 %v3385_v8  ;;  %v3395_v3 = vand.u32 2147483647, %v3385_v8 }
0x40cc   :  { %v3398_v52 = vor.u32 1.1754944e-38, %v3397_v26  ;;  %vm3396_vm4 = vcmp.eq.f32.partialorder %v3395_v3, 8.507059e+37 }
0x40d0   :  { %v5807_v0 = vpop.eup %5806 }
0x40d1   :  { %v3387_v53 = vmul.f32 %v5807_v0, %v3385_v8  ;;  %vm3392_vm1 = vweird.f32 %v5807_v0 }
0x40d2   :  { %vm3393_vm3 = vmor %vm3391_vm2, %vm3392_vm1 }
0x40d3   :  { %v3388_v22 = vsub.f32 1.0, %v3387_v53 }
0x40d5   :  { %v3389_v44 = vmul.f32 %v5807_v0, %v3388_v22 }
0x40d7   :  { %v3390_v31 = vadd.f32 %v5807_v0, %v3389_v44 }
0x40d9   :  { %v3394_v10 = vsel %vm3393_vm3, %v5807_v0, %v3390_v31 }
0x40da   :  { %v3399_v1 = vsel %vm3396_vm4, %v3398_v52, %v3394_v10 }
0x40db   :  { %v3402_v46 = vmul.f32 %v3399_v1, %v3303_v45 }
0x4138   :  { %v3405_v27 = vpop.permute.xlu1 %3404 }
0x4139   :  { %v3407_v29 = vmul.f32 %v3405_v27, %v3399_v1 }
0x413b   :  { %3409 = vrot.lane.b32.xlu2 %v3407_v29, %s6210_s17 }
0x4195   :  { %v3410_v50 = vpop.permute.xlu2 %3409 }
0x4196   :  { %v7345_v60 = vadd.f32 %v3410_v50, %v3402_v46 }
0x4198   :  { %5808 = vtanh.f32 %v7345_v60 }
0x419e   :  { %v5809_v12 = vpop.eup %5808 }
0x419f   :  { %3415 = vrot.lane.b32.xlu0 %v5809_v12, %s6209_s13 }
0x4211   :  { %v3416_v56 = vpop.permute.xlu0 %3415 }
0x4212   :  { %v3418_v18 = vmul.f32 %v3416_v56, %v3399_v1  ;;  %v5443_v56 = vld [vmem:[%s7812_s8 + $0x6] sm:$0x3] }
0x4213   :  { %5458 = vmatmul.msk.f32.vlgmr.msrb.gmra.mxu3 %vm240_vm0, %v5443_v56 }
0x4214   :  { %3420 = vrot.lane.b32.xlu1 %v3418_v18, %s6210_s17  ;;  %3975 = vmatpush.msrb.mxu3 %v7301_v24  ;;  %v5445_v18 = vld [vmem:[%s7812_s8 + $0xa] sm:$0x3] }
0x4216   :  { %3976 = vmatpush.msrb.mxu3 %v7304_v30 }
0x4218   :  { %3977 = vmatpush.msrb.mxu3 %v7309_v58 }
0x421a   :  { %3978 = vmatpush.msrb.mxu3 %v7314_v47 }
0x421b   :  { %5464 = vmatmul.msk.f32.vlgmr.msra.gmra.mxu3 %vm240_vm0, %v5445_v18 }
0x421c   :  { %4153 = vmatpush.msra.mxu3 %v7356_v5 }
0x421e   :  { %4154 = vmatpush.msra.mxu3 %v7361_v37 }
0x4220   :  { %4155 = vmatpush.msra.mxu3 %v7365_v2 }
0x4222   :  { %4156 = vmatpush.msra.mxu3 %v7369_v38 }
0x4286   :  { %v3421_v4 = vpop.permute.xlu1 %3420 }
0x4287   :  { %5451 = vmatmul.msk.f32.vlgmr.msra.gmra.mxu2 %vm240_vm0, %v3421_v4  ;;  %5473 = vmatmul.msk.f32.vlgmr.msra.gmra.mxu1 %vm240_vm0, %v3421_v4  ;;  %v3550_v4 = vpop.f32.mrf.mxu1 }
0x4288   :  { %3780 = vmatpush.msra.mxu2 %v7259_v40  ;;  %4402 = vmatpush.msra.mxu1 %v7356_v5 }
0x428a   :  { %3781 = vmatpush.msra.mxu2 %v7264_v41  ;;  %4403 = vmatpush.msra.mxu1 %v7361_v37 }
0x428c   :  { %3782 = vmatpush.msra.mxu2 %v7267_v21  ;;  %4404 = vmatpush.msra.mxu1 %v7365_v2 }
0x428e   :  { %3783 = vmatpush.msra.mxu2 %v7272_v51  ;;  %4405 = vmatpush.msra.mxu1 %v7369_v38 }
0x430a   :  { %v3441_v14 = vpop.f32.mrf.mxu2 }
0x430b   :  { %v3442_v7 = vadd.f32 %v7338_v48, %v3441_v14 }
0x430d   :  { %v3467_v33 = vadd.f32 %v3464_v19, %v3442_v7 }
0x430f   :  { %5810 = vtanh.f32 %v3467_v33  ;;  %v5453_v0 = vmul.f32 -1.442695, %v3467_v33 }
0x4311   :  { %5812 = vpow2.f32 %v5453_v0 }
0x4315   :  { %v5811_v8 = vpop.eup %5810 }
0x4316   :  { %3490 = vrot.lane.b32.xlu2 %v5811_v8, %s6209_s13 }
0x4317   :  { %v5813_v53 = vpop.eup %5812 }
0x4318   :  { %v3471_v22 = vadd.f32 1.0, %v5813_v53 }
0x431a   :  { %5814 = vrcp.f32 %v3471_v22  ;;  %v3483_v52 = vand.u32 2147483648, %v3471_v22  ;;  %vm3477_vm6 = vweird.f32 %v3471_v22  ;;  %v3481_v27 = vand.u32 2147483647, %v3471_v22 }
0x431c   :  { %v3484_v29 = vor.u32 1.1754944e-38, %v3483_v52  ;;  %vm3482_vm8 = vcmp.eq.f32.partialorder %v3481_v27, 8.507059e+37 }
0x4320   :  { %v5815_v44 = vpop.eup %5814 }
0x4321   :  { %v3473_v31 = vmul.f32 %v5815_v44, %v3471_v22  ;;  %vm3478_vm5 = vweird.f32 %v5815_v44 }
0x4322   :  { %vm3479_vm7 = vmor %vm3477_vm6, %vm3478_vm5 }
0x4323   :  { %v3474_v26 = vsub.f32 1.0, %v3473_v31 }
0x4325   :  { %v3475_v3 = vmul.f32 %v5815_v44, %v3474_v26 }
0x4327   :  { %v3476_v10 = vadd.f32 %v5815_v44, %v3475_v3 }
0x4329   :  { %v3480_v1 = vsel %vm3479_vm7, %v5815_v44, %v3476_v10 }
0x432a   :  { %v3485_v46 = vsel %vm3482_vm8, %v3484_v29, %v3480_v1 }
0x432b   :  { %v3488_v12 = vmul.f32 %v3485_v46, %v7345_v60  ;;  %v5447_v60 = vld [vmem:[%s7812_s8 + $0xe] sm:$0x3] }
0x432c   :  { %5470 = vmatmul.msk.f32.vlgmr.msrb.gmra.mxu3 %vm240_vm0, %v5447_v60  ;;  %v3636_v60 = vpop.f32.mrf.mxu3 }
0x432d   :  { %4319 = vmatpush.msrb.mxu3 %v7356_v5 }
0x432f   :  { %4320 = vmatpush.msrb.mxu3 %v7361_v37 }
0x4331   :  { %4321 = vmatpush.msrb.mxu3 %v7365_v2 }
0x4333   :  { %4322 = vmatpush.msrb.mxu3 %v7369_v38 }
0x4370   :  { %v3491_v45 = vpop.permute.xlu2 %3490 }
0x4371   :  { %v3493_v50 = vmul.f32 %v3491_v45, %v3485_v46 }
0x4373   :  { %3495 = vrot.lane.b32.xlu0 %v3493_v50, %s6210_s17 }
0x43e5   :  { %v3496_v34 = vpop.permute.xlu0 %3495 }
0x43e6   :  { %v7404_v11 = vadd.f32 %v3496_v34, %v3488_v12 }
0x43e8   :  { %5816 = vtanh.f32 %v7404_v11 }
0x43ee   :  { %v5817_v55 = vpop.eup %5816 }
0x43ef   :  { %3501 = vrot.lane.b32.xlu1 %v5817_v55, %s6209_s13 }
0x4461   :  { %v3502_v24 = vpop.permute.xlu1 %3501 }
0x4462   :  { %v3504_v30 = vmul.f32 %v3502_v24, %v3485_v46 }
0x4464   :  { %3506 = vrot.lane.b32.xlu2 %v3504_v30, %s6210_s17 }
0x44be   :  { %v3507_v58 = vpop.permute.xlu2 %3506 }
0x44bf   :  { %5454 = vmatmul.msk.f32.vlgmr.msrb.gmra.mxu0 %vm240_vm0, %v3507_v58  ;;  %5476 = vmatmul.msk.f32.vlgmr.msra.gmra.mxu3 %vm240_vm0, %v3507_v58 }
0x44c0   :  { %3866 = vmatpush.msrb.mxu0 %v7259_v40  ;;  %4485 = vmatpush.msra.mxu3 %v7356_v5 }
0x44c2   :  { %3867 = vmatpush.msrb.mxu0 %v7264_v41  ;;  %4486 = vmatpush.msra.mxu3 %v7361_v37 }
0x44c4   :  { %3868 = vmatpush.msrb.mxu0 %v7267_v21  ;;  %4487 = vmatpush.msra.mxu3 %v7365_v2 }
0x44c6   :  { %3869 = vmatpush.msrb.mxu0 %v7272_v51  ;;  %4488 = vmatpush.msra.mxu3 %v7369_v38 }
0x453c   :  { %v3527_v47 = vpop.f32.mrf.mxu0 }
0x453d   :  { %v3528_v17 = vadd.f32 %v7338_v48, %v3527_v47 }
0x453f   :  { %v3553_v14 = vadd.f32 %v3550_v4, %v3528_v17 }
0x4541   :  { %5818 = vtanh.f32 %v3553_v14  ;;  %v5456_v7 = vmul.f32 -1.442695, %v3553_v14 }
0x4543   :  { %5820 = vpow2.f32 %v5456_v7 }
0x4547   :  { %v5819_v19 = vpop.eup %5818 }
0x4548   :  { %3576 = vrot.lane.b32.xlu0 %v5819_v19, %s6209_s13 }
0x4549   :  { %v5821_v33 = vpop.eup %5820 }
0x454a   :  { %v3557_v8 = vadd.f32 1.0, %v5821_v33 }
0x454c   :  { %5822 = vrcp.f32 %v3557_v8  ;;  %v3569_v26 = vand.u32 2147483648, %v3557_v8  ;;  %vm3563_vm10 = vweird.f32 %v3557_v8  ;;  %v3567_v3 = vand.u32 2147483647, %v3557_v8 }
0x454e   :  { %v3570_v52 = vor.u32 1.1754944e-38, %v3569_v26  ;;  %vm3568_vm12 = vcmp.eq.f32.partialorder %v3567_v3, 8.507059e+37 }
0x4552   :  { %v5823_v0 = vpop.eup %5822 }
0x4553   :  { %v3559_v53 = vmul.f32 %v5823_v0, %v3557_v8  ;;  %vm3564_vm9 = vweird.f32 %v5823_v0 }
0x4554   :  { %vm3565_vm11 = vmor %vm3563_vm10, %vm3564_vm9 }
0x4555   :  { %v3560_v22 = vsub.f32 1.0, %v3559_v53 }
0x4557   :  { %v3561_v44 = vmul.f32 %v5823_v0, %v3560_v22 }
0x4559   :  { %v3562_v31 = vadd.f32 %v5823_v0, %v3561_v44 }
0x455b   :  { %v3566_v10 = vsel %vm3565_vm11, %v5823_v0, %v3562_v31 }
0x455c   :  { %v3571_v1 = vsel %vm3568_vm12, %v3570_v52, %v3566_v10 }
0x455d   :  { %v3574_v45 = vmul.f32 %v3571_v1, %v7404_v11 }
0x45ba   :  { %v3577_v27 = vpop.permute.xlu0 %3576 }
0x45bb   :  { %v3579_v29 = vmul.f32 %v3577_v27, %v3571_v1 }
0x45bd   :  { %3581 = vrot.lane.b32.xlu1 %v3579_v29, %s6210_s17  ;;  %v3722_v29 = vpop.f32.mrf.mxu1 }
0x462f   :  { %v3582_v46 = vpop.permute.xlu1 %3581 }
0x4630   :  { %v3584_v50 = vadd.f32 %v3582_v46, %v3574_v45 }
0x4632   :  { %5824 = vtanh.f32 %v3584_v50 }
0x4638   :  { %v5825_v12 = vpop.eup %5824 }
0x4639   :  { %3587 = vrot.lane.b32.xlu2 %v5825_v12, %s6209_s13 }
0x4693   :  { %v3588_v34 = vpop.permute.xlu2 %3587 }
0x4694   :  { %v3590_v55 = vmul.f32 %v3588_v34, %v3571_v1 }
0x4696   :  { %3592 = vrot.lane.b32.xlu0 %v3590_v55, %s6210_s17 }
0x4708   :  { %v3593_v56 = vpop.permute.xlu0 %3592 }
0x4709   :  { %5457 = vmatmul.msk.f32.vlgmr.msrb.gmra.mxu2 %vm240_vm0, %v3593_v56  ;;  %5479 = vmatmul.msk.f32.vlgmr.msrb.gmra.mxu1 %vm240_vm0, %v3593_v56 }
0x470a   :  { %3952 = vmatpush.msrb.mxu2 %v7259_v40  ;;  %4568 = vmatpush.msrb.mxu1 %v7356_v5 }
0x470c   :  { %3953 = vmatpush.msrb.mxu2 %v7264_v41  ;;  %4569 = vmatpush.msrb.mxu1 %v7361_v37 }
0x470e   :  { %3954 = vmatpush.msrb.mxu2 %v7267_v21  ;;  %4570 = vmatpush.msrb.mxu1 %v7365_v2 }
0x4710   :  { %3955 = vmatpush.msrb.mxu2 %v7272_v51  ;;  %4571 = vmatpush.msrb.mxu1 %v7369_v38 }
0x478c   :  { %v3613_v11 = vpop.f32.mrf.mxu2 }
0x478d   :  { %v3614_v18 = vadd.f32 %v7338_v48, %v3613_v11 }
0x478f   :  { %v3639_v24 = vadd.f32 %v3636_v60, %v3614_v18 }
0x4791   :  { %5826 = vtanh.f32 %v3639_v24  ;;  %v5459_v41 = vmul.f32 -1.442695, %v3639_v24 }
0x4793   :  { %5828 = vpow2.f32 %v5459_v41 }
0x4797   :  { %v5827_v40 = vpop.eup %5826 }
0x4798   :  { %3662 = vrot.lane.b32.xlu1 %v5827_v40, %s6209_s13 }
0x4799   :  { %v5829_v30 = vpop.eup %5828 }
0x479a   :  { %v3643_v58 = vadd.f32 1.0, %v5829_v30  ;;  %v5963_v30 = vld [vmem:[#allocation2] ss:$0 sm:$0xff] }
0x479c   :  { %5830 = vrcp.f32 %v3643_v58  ;;  %v3655_v14 = vand.u32 2147483648, %v3643_v58  ;;  %vm3649_vm14 = vweird.f32 %v3643_v58  ;;  %v3653_v19 = vand.u32 2147483647, %v3643_v58 }
0x479e   :  { %v3656_v33 = vor.u32 1.1754944e-38, %v3655_v14  ;;  %vm3654_vm1 = vcmp.eq.f32.partialorder %v3653_v19, 8.507059e+37 }
0x47a2   :  { %v5831_v21 = vpop.eup %5830 }
0x47a3   :  { %v3645_v47 = vmul.f32 %v5831_v21, %v3643_v58  ;;  %vm3650_vm13 = vweird.f32 %v5831_v21  ;;  %v2365_v58 = vadd.f32 %v5963_v30, %v7127_v9 }
0x47a4   :  { %vm3651_vm15 = vmor %vm3649_vm14, %vm3650_vm13  ;;  %vm4742_vm14 = vcmask 1040384  }
0x47a5   :  { %v3646_v17 = vsub.f32 1.0, %v3645_v47 }
0x47a7   :  { %v3647_v51 = vmul.f32 %v5831_v21, %v3646_v17 }
0x47a9   :  { %v3648_v4 = vadd.f32 %v5831_v21, %v3647_v51  ;;  %v2392_v51 = vadd.f32 %v7125_v16, %v2365_v58 }
0x47ab   :  { %v3652_v7 = vsel %vm3651_vm15, %v5831_v21, %v3648_v4  ;;  %v2413_v4 = vadd.f32 %v7156_v13, %v2392_v51  ;;  %vm4744_vm15 = vcmask 1041408  }
0x47ac   :  { %v3657_v0 = vsel %vm3654_vm1, %v3656_v33, %v3652_v7  ;;  %vm4746_vm1 = vcmask 1042432  }
0x47ad   :  { %v3660_v22 = vmul.f32 %v3657_v0, %v3584_v50  ;;  %v5409_v7 = vmul.f32 -1.442695, %v2413_v4 }
0x480a   :  { %v3663_v8 = vpop.permute.xlu1 %3662 }
0x480b   :  { %v3665_v53 = vmul.f32 %v3663_v8, %v3657_v0 }
0x480d   :  { %3667 = vrot.lane.b32.xlu2 %v3665_v53, %s6210_s17  ;;  %v5964_v53 = vld [vmem:[#allocation5] ss:$0 sm:$0xff] }
0x480e   :  { %v3213_v16 = vadd.f32 %v5964_v53, %v7335_v42  ;;  %v3295_v53 = vadd.f32 %v7296_v23, %v6903_v36 }
0x4810   :  { %v3235_v13 = vadd.f32 %v7398_v20, %v3213_v16  ;;  %v3299_v16 = vadd.f32 %v7187_v63, %v7067_v43 }
0x4812   :  { %v4734_v43 = vrot.slane %v3299_v16, 3 }
0x4867   :  { %v3668_v44 = vpop.permute.xlu2 %3667 }
0x4868   :  { %v3670_v31 = vadd.f32 %v3668_v44, %v3660_v22 }
0x486a   :  { %5832 = vtanh.f32 %v3670_v31 }
0x4870   :  { %v5833_v26 = vpop.eup %5832 }
0x4871   :  { %3673 = vrot.lane.b32.xlu0 %v5833_v26, %s6209_s13 }
0x48e3   :  { %v3674_v3 = vpop.permute.xlu0 %3673 }
0x48e4   :  { %v3676_v10 = vmul.f32 %v3674_v3, %v3657_v0 }
0x48e6   :  { %3678 = vrot.lane.b32.xlu1 %v3676_v10, %s6210_s17 }
0x4958   :  { %v3679_v52 = vpop.permute.xlu1 %3678 }
0x4959   :  { %5460 = vmatmul.msk.f32.vlgmr.msra.gmra.mxu0 %vm240_vm0, %v3679_v52  ;;  %5482 = vmatmul.msk.f32.vlgmr.msrb.gmra.mxu3 %vm240_vm0, %v3679_v52 }
0x495a   :  { %4656 = vmatpush.msrb.mxu3 %v7356_v5 }
0x495c   :  { %4657 = vmatpush.msrb.mxu3 %v7361_v37 }
0x495e   :  { %4658 = vmatpush.msrb.mxu3 %v7365_v2 }
0x4960   :  { %4659 = vmatpush.msrb.mxu3 %v7369_v38 }
0x49d6   :  { %v3699_v27 = vpop.f32.mrf.mxu0 }
0x49d7   :  { %v3700_v1 = vadd.f32 %v7338_v48, %v3699_v27 }
0x49d9   :  { %v3725_v45 = vadd.f32 %v3722_v29, %v3700_v1 }
0x49db   :  { %5834 = vtanh.f32 %v3725_v45  ;;  %v5462_v50 = vmul.f32 -1.442695, %v3725_v45 }
0x49dd   :  { %5836 = vpow2.f32 %v5462_v50 }
0x49e1   :  { %v5835_v46 = vpop.eup %5834 }
0x49e2   :  { %3748 = vrot.lane.b32.xlu2 %v5835_v46, %s6209_s13 }
0x49e3   :  { %v5837_v12 = vpop.eup %5836 }
0x49e4   :  { %v3729_v34 = vadd.f32 1.0, %v5837_v12 }
0x49e6   :  { %5838 = vrcp.f32 %v3729_v34  ;;  %v3741_v38 = vand.u32 2147483648, %v3729_v34  ;;  %vm3735_vm3 = vweird.f32 %v3729_v34  ;;  %v3739_v11 = vand.u32 2147483647, %v3729_v34 }
0x49e8   :  { %v3742_v60 = vor.u32 1.1754944e-38, %v3741_v38  ;;  %vm3740_vm5 = vcmp.eq.f32.partialorder %v3739_v11, 8.507059e+37 }
0x49ec   :  { %v5839_v5 = vpop.eup %5838 }
0x49ed   :  { %v3731_v37 = vmul.f32 %v5839_v5, %v3729_v34  ;;  %vm3736_vm2 = vweird.f32 %v5839_v5 }
0x49ee   :  { %vm3737_vm4 = vmor %vm3735_vm3, %vm3736_vm2  ;;  %vm4748_vm2 = vcmask 1043456   ;;  %vm4750_vm3 = vcmask 1044480  }
0x49ef   :  { %v3732_v55 = vsub.f32 1.0, %v3731_v37 }
0x49f1   :  { %v3733_v2 = vmul.f32 %v5839_v5, %v3732_v55 }
0x49f3   :  { %v3734_v56 = vadd.f32 %v5839_v5, %v3733_v2 }
0x49f5   :  { %v3738_v18 = vsel %vm3737_vm4, %v5839_v5, %v3734_v56  ;;  %vm4752_vm4 = vcmask 1045504  }
0x49f6   :  { %v3743_v40 = vsel %vm3740_vm5, %v3742_v60, %v3738_v18  ;;  %vm4754_vm5 = vcmask 1046528  }
0x49f7   :  { %v3746_v21 = vmul.f32 %v3743_v40, %v3670_v31  ;;  %v3256_v31 = vadd.f32 %v7396_v6, %v3235_v13  ;;  %v3296_v13 = vadd.f32 %v7245_v49, %v6928_v32 }
0x49f9   :  { %v5440_v6 = vmul.f32 -1.442695, %v3256_v31 }
0x4a3c   :  { %v3749_v24 = vpop.permute.xlu2 %3748 }
0x4a3d   :  { %v3751_v41 = vmul.f32 %v3749_v24, %v3743_v40 }
0x4a3f   :  { %3753 = vrot.lane.b32.xlu0 %v3751_v41, %s6210_s17 }
0x4ab1   :  { %v3754_v47 = vpop.permute.xlu0 %3753 }
0x4ab2   :  { %v7468_v17 = vadd.f32 %v3754_v47, %v3746_v21 }
0x4ab4   :  { %5840 = vtanh.f32 %v7468_v17 }
0x4ab5   :  { %5842 = vtanh.f32 %v2413_v4 }
0x4ab6   :  { %5844 = vpow2.f32 %v5409_v7 }
0x4aba   :  { %v5841_v14 = vpop.eup %5840 }
0x4abb   :  { %3759 = vrot.lane.b32.xlu1 %v5841_v14, %s6209_s13  ;;  %v5843_v19 = vpop.eup %5842 }
0x4abc   :  { %v5845_v9 = vpop.eup %5844 }
0x4abd   :  { %v2417_v33 = vadd.f32 1.0, %v5845_v9  ;;  %v3808_v9 = vpop.f32.mrf.mxu3 }
0x4abf   :  { %5846 = vrcp.f32 %v2417_v33  ;;  %v2429_v52 = vand.u32 2147483648, %v2417_v33  ;;  %vm2423_vm7 = vweird.f32 %v2417_v33  ;;  %v2427_v27 = vand.u32 2147483647, %v2417_v33 }
0x4ac0   :  { %5848 = vtanh.f32 %v3256_v31 }
0x4ac1   :  { %v2430_v29 = vor.u32 1.1754944e-38, %v2429_v52  ;;  %vm2428_vm9 = vcmp.eq.f32.partialorder %v2427_v27, 8.507059e+37  ;;  %5850 = vpow2.f32 %v5440_v6 }
0x4ac3   :  { %2436 = vrot.lane.b32.xlu1 %v5843_v19, %s6209_s13 }
0x4ac5   :  { %v5847_v8 = vpop.eup %5846 }
0x4ac6   :  { %v2419_v0 = vmul.f32 %v5847_v8, %v2417_v33  ;;  %vm2424_vm6 = vweird.f32 %v5847_v8  ;;  %v5849_v46 = vpop.eup %5848 }
0x4ac7   :  { %vm2425_vm8 = vmor %vm2423_vm7, %vm2424_vm6  ;;  %v5851_v50 = vpop.eup %5850 }
0x4ac8   :  { %v2420_v22 = vsub.f32 1.0, %v2419_v0  ;;  %v3260_v12 = vadd.f32 1.0, %v5851_v50 }
0x4aca   :  { %v2421_v44 = vmul.f32 %v5847_v8, %v2420_v22  ;;  %5852 = vrcp.f32 %v3260_v12  ;;  %v3272_v38 = vand.u32 2147483648, %v3260_v12  ;;  %vm3266_vm11 = vweird.f32 %v3260_v12 }
0x4acb   :  { %v3270_v11 = vand.u32 2147483647, %v3260_v12  ;;  %v3297_v22 = vadd.f32 %v7225_v28, %v6952_v25 }
0x4acc   :  { %v2422_v10 = vadd.f32 %v5847_v8, %v2421_v44  ;;  %v3273_v60 = vor.u32 1.1754944e-38, %v3272_v38 }
0x4acd   :  { %vm3271_vm13 = vcmp.eq.f32.partialorder %v3270_v11, 8.507059e+37  ;;  %v4728_v63 = vrot.slane %v3297_v22, 5  ;;  %v5005_v52 = vrot.slane %v3297_v22, 6  ;;  %v7550_v22 = vld [vmem:[%s7815_s6] sm:$0xff] }
0x4ace   :  { %v2426_v1 = vsel %vm2425_vm8, %v5847_v8, %v2422_v10  ;;  %v4725_v10 = vrot.slane %v3296_v13, 6 }
0x4acf   :  { %v2431_v45 = vsel %vm2428_vm9, %v2430_v29, %v2426_v1 }
0x4ad0   :  { %v5853_v34 = vpop.eup %5852  ;;  %v2434_v30 = vmul.f32 %v2431_v45, %v7090_v57 }
0x4ad1   :  { %v3262_v5 = vmul.f32 %v5853_v34, %v3260_v12  ;;  %vm3267_vm10 = vweird.f32 %v5853_v34 }
0x4ad2   :  { %vm3268_vm12 = vmor %vm3266_vm11, %vm3267_vm10 }
0x4ad3   :  { %v3263_v37 = vsub.f32 1.0, %v3262_v5 }
0x4ad5   :  { %v3264_v55 = vmul.f32 %v5853_v34, %v3263_v37 }
0x4ad7   :  { %v3265_v56 = vadd.f32 %v5853_v34, %v3264_v55 }
0x4ad9   :  { %v3269_v18 = vsel %vm3268_vm12, %v5853_v34, %v3265_v56 }
0x4b2d   :  { %v3760_v26 = vpop.permute.xlu1 %3759 }
0x4b2e   :  { %v3762_v3 = vmul.f32 %v3760_v26, %v3743_v40  ;;  %v3274_v40 = vsel %vm3271_vm13, %v3273_v60, %v3269_v18 }
0x4b2f   :  { %v3277_v51 = vmul.f32 %v3274_v40, %v7287_v62  ;;  %v3300_v62 = vadd.f32 %v7162_v39, %v7105_v54  ;;  %v3298_v54 = vadd.f32 %v7208_v61, %v7035_v59  ;;  %v4722_v39 = vrot.slane %v3295_v53, 7 }
0x4b30   :  { %3764 = vrot.lane.b32.xlu2 %v3762_v3, %s6210_s17  ;;  %v5003_v59 = vrot.slane %v3296_v13, 7 }
0x4b31   :  { %v4737_v3 = vrot.slane %v3300_v62, 2  ;;  %v4731_v49 = vrot.slane %v3298_v54, 4  ;;  %v5007_v1 = vrot.slane %v3298_v54, 5  ;;  %v5011_v6 = vrot.slane %v3300_v62, 3 }
0x4b35   :  { %v2437_v42 = vpop.permute.xlu1 %2436 }
0x4b36   :  { %v2439_v20 = vmul.f32 %v2437_v42, %v2431_v45  ;;  %v5009_v42 = vrot.slane %v3299_v16, 4  ;;  %v7540_v16 = vld [vmem:[%s7815_s6 + $0x10] sm:$0xff] }
0x4b38   :  { %3279 = vrot.lane.b32.xlu2 %v5849_v46, %s6209_s13  ;;  %2441 = vrot.lane.b32.xlu1 %v2439_v20, %s6210_s17 }
0x4b8a   :  { %v3765_v2 = vpop.permute.xlu2 %3764 }
0x4b8b   :  { %5463 = vmatmul.msk.f32.vlgmr.msra.gmra.mxu2 %vm240_vm0, %v3765_v2  ;;  %5485 = vmatmul.msk.f32.vlgmr.msra.gmra.mxu1 %vm240_vm0, %v3765_v2 }
0x4b92   :  { %v3280_v24 = vpop.permute.xlu2 %3279 }
0x4b93   :  { %v3282_v41 = vmul.f32 %v3280_v24, %v3274_v40 }
0x4b95   :  { %3284 = vrot.lane.b32.xlu2 %v3282_v41, %s6210_s17 }
0x4baa   :  { %v2442_v58 = vpop.permute.xlu1 %2441 }
0x4bab   :  { %v7485_v21 = vadd.f32 %v2442_v58, %v2434_v30 }
0x4bad   :  { %5854 = vtanh.f32 %v7485_v21 }
0x4bb3   :  { %v5855_v47 = vpop.eup %5854 }
0x4bb4   :  { %2447 = vrot.lane.b32.xlu1 %v5855_v47, %s6209_s13 }
0x4bef   :  { %v3285_v4 = vpop.permute.xlu2 %3284 }
0x4bf0   :  { %v7490_v14 = vadd.f32 %v3285_v4, %v3277_v51 }
0x4bf2   :  { %5856 = vtanh.f32 %v7490_v14 }
0x4bf8   :  { %v5857_v19 = vpop.eup %5856 }
0x4bf9   :  { %3290 = vrot.lane.b32.xlu2 %v5857_v19, %s6209_s13 }
0x4c0e   :  { %v3785_v7 = vpop.f32.mrf.mxu2 }
0x4c0f   :  { %v3786_v57 = vadd.f32 %v7338_v48, %v3785_v7 }
0x4c11   :  { %v3811_v33 = vadd.f32 %v3808_v9, %v3786_v57 }
0x4c13   :  { %5858 = vtanh.f32 %v3811_v33  ;;  %v5465_v55 = vmul.f32 -1.442695, %v3811_v33 }
0x4c15   :  { %5860 = vpow2.f32 %v5465_v55 }
0x4c19   :  { %v5859_v8 = vpop.eup %5858 }
0x4c1a   :  { %3834 = vrot.lane.b32.xlu0 %v5859_v8, %s6209_s13 }
0x4c1b   :  { %v5861_v38 = vpop.eup %5860 }
0x4c1c   :  { %v3815_v11 = vadd.f32 1.0, %v5861_v38 }
0x4c1e   :  { %5862 = vrcp.f32 %v3815_v11  ;;  %v3827_v30 = vand.u32 2147483648, %v3815_v11  ;;  %vm3821_vm7 = vweird.f32 %v3815_v11  ;;  %v3825_v58 = vand.u32 2147483647, %v3815_v11 }
0x4c20   :  { %v3828_v51 = vor.u32 1.1754944e-38, %v3827_v30  ;;  %vm3826_vm9 = vcmp.eq.f32.partialorder %v3825_v58, 8.507059e+37 }
0x4c24   :  { %v5863_v18 = vpop.eup %5862 }
0x4c25   :  { %v3817_v60 = vmul.f32 %v5863_v18, %v3815_v11  ;;  %vm3822_vm6 = vweird.f32 %v5863_v18 }
0x4c26   :  { %v2448_v0 = vpop.permute.xlu1 %2447  ;;  %vm3823_vm8 = vmor %vm3821_vm7, %vm3822_vm6 }
0x4c27   :  { %v2450_v31 = vmul.f32 %v2448_v0, %v2431_v45  ;;  %v3818_v24 = vsub.f32 1.0, %v3817_v60 }
0x4c29   :  { %v3301_v25 = vadd.f32 %v7135_v15, %v2450_v31 }
0x4c2b   :  { %v4740_v45 = vrot.slane %v3301_v25, 1  ;;  %v5013_v34 = vrot.slane %v3301_v25, 2 }
0x4c53   :  { %v3291_v44 = vpop.permute.xlu2 %3290 }
0x4c54   :  { %v3293_v26 = vmul.f32 %v3291_v44, %v3274_v40  ;;  %v3819_v40 = vmul.f32 %v5863_v18, %v3818_v24 }
0x4c56   :  { %v3294_v36 = vadd.f32 %v3293_v26, %v6878_v35  ;;  %v3304_v23 = vadd.f32 %v3293_v26, %v2450_v31  ;;  %v3820_v41 = vadd.f32 %v5863_v18, %v3819_v40  ;;  %v3894_v31 = vpop.f32.mrf.mxu1 }
0x4c58   :  { %v4743_v32 = vsel %vm4742_vm14, %v3294_v36, %v4722_v39  ;;  %v5001_v28 = vrot.slane %v3294_v36, 1  ;;  %4034 = vrot.lane.b32.xlu1 %v3304_v23, %s6210_s17  ;;  %v3824_v47 = vsel %vm3823_vm8, %v5863_v18, %v3820_v41  ;;  %v7568_v39 = vld [vmem:[#allocation7] ss:$0 sm:$0xff] }
0x4c59   :  { %v4745_v61 = vsel %vm4744_vm15, %v4743_v32, %v4725_v10  ;;  %v3829_v19 = vsel %vm3826_vm9, %v3828_v51, %v3824_v47  ;;  %v3305_v51 = vadd.f32 %v7490_v14, %v7485_v21 }
0x4c5a   :  { %v4747_v35 = vsel %vm4746_vm1, %v4745_v61, %v4728_v63  ;;  %v5015_v27 = vsel %vm4742_vm14, %v5001_v28, %v3295_v53  ;;  %v3832_v57 = vmul.f32 %v3829_v19, %v7468_v17  ;;  %v7537_v53 = vld [vmem:[%s7815_s6 + $0x18] sm:$0xff]  ;;  %v7545_v17 = vld [vmem:[%s7815_s6 + $0x8] sm:$0xff] }
0x4c5b   :  { %v5016_v15 = vsel %vm4744_vm15, %v5015_v27, %v5003_v59  ;;  %v4749_v29 = vsel %vm4748_vm2, %v4747_v35, %v4731_v49  ;;  %4050 = vmatpush.msra.mxu0 %v7537_v53  ;;  %4133 = vmatpush.msra.mxu2 %v7537_v53 }
0x4c5c   :  { %v4751_v20 = vsel %vm4750_vm3, %v4749_v29, %v4734_v43  ;;  %v5017_v46 = vsel %vm4746_vm1, %v5016_v15, %v5005_v52 }
0x4c5d   :  { %v4753_v50 = vsel %vm4752_vm4, %v4751_v20, %v4737_v3  ;;  %v5018_v12 = vsel %vm4748_vm2, %v5017_v46, %v5007_v1  ;;  %4051 = vmatpush.msra.mxu0 %v7540_v16  ;;  %4134 = vmatpush.msra.mxu2 %v7540_v16 }
0x4c5e   :  { %v7522_v5 = vsel %vm4754_vm5, %v4753_v50, %v4740_v45  ;;  %v5019_v37 = vsel %vm4750_vm3, %v5018_v12, %v5009_v42  ;;  %v4075_v43 = vpop.f32.mrf.mxu1 }
0x4c5f   :  { %v5020_v2 = vsel %vm4752_vm4, %v5019_v37, %v5011_v6  ;;  %4052 = vmatpush.msra.mxu0 %v7545_v17  ;;  %4135 = vmatpush.msra.mxu2 %v7545_v17 }
0x4c60   :  { %v7527_v56 = vsel %vm4754_vm5, %v5020_v2, %v5013_v34 }
0x4c61   :  { %4053 = vmatpush.msra.mxu0 %v7550_v22  ;;  %4136 = vmatpush.msra.mxu2 %v7550_v22 }
0x4c8c   :  { %v3835_v4 = vpop.permute.xlu0 %3834 }
0x4c8d   :  { %v3837_v7 = vmul.f32 %v3835_v4, %v3829_v19 }
0x4c8f   :  { %3839 = vrot.lane.b32.xlu0 %v3837_v7, %s6210_s17 }
0x4cca   :  { %v4035_v44 = vpop.permute.xlu1 %4034 }
0x4d01   :  { %v3840_v9 = vpop.permute.xlu0 %3839 }
0x4d02   :  { %v7531_v33 = vadd.f32 %v3840_v9, %v3832_v57 }
0x4d04   :  { %5864 = vtanh.f32 %v7531_v33 }
0x4d0a   :  { %v5865_v8 = vpop.eup %5864 }
0x4d0b   :  { %3845 = vrot.lane.b32.xlu0 %v5865_v8, %s6209_s13 }
0x4d7d   :  { %v3846_v62 = vpop.permute.xlu0 %3845 }
0x4d7e   :  { %v3848_v0 = vmul.f32 %v3846_v62, %v3829_v19 }
0x4d80   :  { %3850 = vrot.lane.b32.xlu0 %v3848_v0, %s6210_s17 }
0x4df2   :  { %v3851_v13 = vpop.permute.xlu0 %3850 }
0x4df3   :  { %5466 = vmatmul.msk.f32.vlgmr.msrb.gmra.mxu0 %vm240_vm0, %v3851_v13  ;;  %5488 = vmatmul.msk.f32.vlgmr.msra.gmra.mxu3 %vm240_vm0, %v3851_v13  ;;  %v7599_v13 = vpop.f32.mrf.mxu3 }
0x4df4   :  { %4216 = vmatpush.msrb.mxu0 %v7537_v53 }
0x4df6   :  { %4217 = vmatpush.msrb.mxu0 %v7540_v16 }
0x4df8   :  { %4218 = vmatpush.msrb.mxu0 %v7545_v17 }
0x4dfa   :  { %4219 = vmatpush.msrb.mxu0 %v7550_v22 }
0x4dfb   :  { %5472 = vmatmul.msk.f32.vlgmr.msra.gmra.mxu0 %vm240_vm0, %v4035_v44 }
0x4dfc   :  { %4382 = vmatpush.msra.mxu0 %v7537_v53 }
0x4dfe   :  { %4383 = vmatpush.msra.mxu0 %v7540_v16 }
0x4e00   :  { %4384 = vmatpush.msra.mxu0 %v7545_v17 }
0x4e02   :  { %4385 = vmatpush.msra.mxu0 %v7550_v22 }
0x4e70   :  { %v3871_v26 = vpop.f32.mrf.mxu0 }
0x4e71   :  { %v3872_v3 = vadd.f32 %v7338_v48, %v3871_v26 }
0x4e73   :  { %v3897_v54 = vadd.f32 %v3894_v31, %v3872_v3  ;;  %v4158_v3 = vpop.f32.mrf.mxu3 }
0x4e75   :  { %5866 = vtanh.f32 %v3897_v54  ;;  %v5468_v32 = vmul.f32 -1.442695, %v3897_v54 }
0x4e78   :  { %v4055_v36 = vpop.f32.mrf.mxu0 }
0x4e79   :  { %v4056_v23 = vadd.f32 %v7568_v39, %v4055_v36 }
0x4e7b   :  { %v5867_v63 = vpop.eup %5866  ;;  %v4078_v10 = vadd.f32 %v4075_v43, %v4056_v23 }
0x4e7c   :  { %3920 = vrot.lane.b32.xlu2 %v5867_v63, %s6209_s13 }
0x4e7d   :  { %5868 = vtanh.f32 %v4078_v10  ;;  %v5474_v52 = vmul.f32 -1.442695, %v4078_v10 }
0x4e7e   :  { %5870 = vpow2.f32 %v5468_v32 }
0x4e83   :  { %v5869_v25 = vpop.eup %5868 }
0x4e84   :  { %4101 = vrot.lane.b32.xlu0 %v5869_v25, %s6209_s13  ;;  %v5871_v28 = vpop.eup %5870 }
0x4e85   :  { %v3901_v48 = vadd.f32 1.0, %v5871_v28 }
0x4e87   :  { %5872 = vrcp.f32 %v3901_v48  ;;  %v3913_v1 = vand.u32 2147483648, %v3901_v48  ;;  %vm3907_vm11 = vweird.f32 %v3901_v48  ;;  %v3911_v15 = vand.u32 2147483647, %v3901_v48 }
0x4e88   :  { %5874 = vpow2.f32 %v5474_v52 }
0x4e89   :  { %v3914_v45 = vor.u32 1.1754944e-38, %v3913_v1  ;;  %vm3912_vm13 = vcmp.eq.f32.partialorder %v3911_v15, 8.507059e+37 }
0x4e8d   :  { %v5873_v49 = vpop.eup %5872 }
0x4e8e   :  { %v3903_v59 = vmul.f32 %v5873_v49, %v3901_v48  ;;  %vm3908_vm10 = vweird.f32 %v5873_v49  ;;  %v5875_v29 = vpop.eup %5874 }
0x4e8f   :  { %vm3909_vm12 = vmor %vm3907_vm11, %vm3908_vm10  ;;  %v4082_v20 = vadd.f32 1.0, %v5875_v29 }
0x4e90   :  { %v3904_v61 = vsub.f32 1.0, %v3903_v59 }
0x4e91   :  { %5876 = vrcp.f32 %v4082_v20  ;;  %v4094_v38 = vand.u32 2147483648, %v4082_v20  ;;  %vm4088_vm7 = vweird.f32 %v4082_v20  ;;  %v4092_v11 = vand.u32 2147483647, %v4082_v20 }
0x4e92   :  { %v3905_v35 = vmul.f32 %v5873_v49, %v3904_v61 }
0x4e93   :  { %v4095_v60 = vor.u32 1.1754944e-38, %v4094_v38  ;;  %vm4093_vm9 = vcmp.eq.f32.partialorder %v4092_v11, 8.507059e+37 }
0x4e94   :  { %v3906_v27 = vadd.f32 %v5873_v49, %v3905_v35 }
0x4e96   :  { %v3910_v42 = vsel %vm3909_vm12, %v5873_v49, %v3906_v27 }
0x4e97   :  { %v3915_v46 = vsel %vm3912_vm13, %v3914_v45, %v3910_v42  ;;  %v5877_v12 = vpop.eup %5876 }
0x4e98   :  { %v4084_v34 = vmul.f32 %v5877_v12, %v4082_v20  ;;  %vm4089_vm6 = vweird.f32 %v5877_v12  ;;  %v3918_v30 = vmul.f32 %v3915_v46, %v7531_v33 }
0x4e99   :  { %vm4090_vm8 = vmor %vm4088_vm7, %vm4089_vm6 }
0x4e9a   :  { %v4085_v37 = vsub.f32 1.0, %v4084_v34  ;;  %v4241_v34 = vpop.f32.mrf.mxu1 }
0x4e9c   :  { %v4086_v55 = vmul.f32 %v5877_v12, %v4085_v37 }
0x4e9e   :  { %v4087_v2 = vadd.f32 %v5877_v12, %v4086_v55 }
0x4ea0   :  { %v4091_v18 = vsel %vm4090_vm8, %v5877_v12, %v4087_v2 }
0x4ea1   :  { %v4096_v40 = vsel %vm4093_vm9, %v4095_v60, %v4091_v18 }
0x4ea2   :  { %v4099_v4 = vmul.f32 %v4096_v40, %v3305_v51 }
0x4ed6   :  { %v3921_v6 = vpop.permute.xlu2 %3920 }
0x4ed7   :  { %v3923_v50 = vmul.f32 %v3921_v6, %v3915_v46 }
0x4ed9   :  { %3925 = vrot.lane.b32.xlu1 %v3923_v50, %s6210_s17 }
0x4ef6   :  { %v4102_v24 = vpop.permute.xlu0 %4101 }
0x4ef7   :  { %v4104_v41 = vmul.f32 %v4102_v24, %v4096_v40 }
0x4ef9   :  { %4106 = vrot.lane.b32.xlu2 %v4104_v41, %s6210_s17 }
0x4f4b   :  { %v3926_v58 = vpop.permute.xlu1 %3925 }
0x4f4c   :  { %v7576_v47 = vadd.f32 %v3926_v58, %v3918_v30 }
0x4f4e   :  { %5878 = vtanh.f32 %v7576_v47 }
0x4f53   :  { %v4107_v19 = vpop.permute.xlu2 %4106 }
0x4f54   :  { %v5879_v7 = vpop.eup %5878  ;;  %v4109_v57 = vadd.f32 %v4107_v19, %v4099_v4 }
0x4f55   :  { %3931 = vrot.lane.b32.xlu0 %v5879_v7, %s6209_s13 }
0x4f56   :  { %5880 = vtanh.f32 %v4109_v57 }
0x4f5c   :  { %v5881_v9 = vpop.eup %5880 }
0x4f5d   :  { %4112 = vrot.lane.b32.xlu1 %v5881_v9, %s6209_s13 }
0x4fc7   :  { %v3932_v8 = vpop.permute.xlu0 %3931 }
0x4fc8   :  { %v3934_v33 = vmul.f32 %v3932_v8, %v3915_v46 }
0x4fca   :  { %3936 = vrot.lane.b32.xlu2 %v3934_v33, %s6210_s17 }
0x4fcf   :  { %v4113_v62 = vpop.permute.xlu1 %4112 }
0x4fd0   :  { %v7584_v0 = vmul.f32 %v4113_v62, %v4096_v40 }
0x4fd2   :  { %4117 = vrot.lane.b32.xlu0 %v7584_v0, %s6210_s17 }
0x5024   :  { %v3937_v21 = vpop.permute.xlu2 %3936 }
0x5025   :  { %5469 = vmatmul.msk.f32.vlgmr.msrb.gmra.mxu2 %vm240_vm0, %v3937_v21  ;;  %5491 = vmatmul.msk.f32.vlgmr.msrb.gmra.mxu1 %vm240_vm0, %v3937_v21 }
0x5026   :  { %4299 = vmatpush.msrb.mxu2 %v7537_v53 }
0x5028   :  { %4300 = vmatpush.msrb.mxu2 %v7540_v16 }
0x502a   :  { %4301 = vmatpush.msrb.mxu2 %v7545_v17 }
0x502c   :  { %4302 = vmatpush.msrb.mxu2 %v7550_v22 }
0x5044   :  { %v4118_v14 = vpop.permute.xlu0 %4117 }
0x5045   :  { %5475 = vmatmul.msk.f32.vlgmr.msra.gmra.mxu2 %vm240_vm0, %v4118_v14 }
0x5046   :  { %4465 = vmatpush.msra.mxu2 %v7537_v53 }
0x5048   :  { %4466 = vmatpush.msra.mxu2 %v7540_v16 }
0x504a   :  { %4467 = vmatpush.msra.mxu2 %v7545_v17 }
0x504c   :  { %4468 = vmatpush.msra.mxu2 %v7550_v22 }
0x50a8   :  { %v7601_v44 = vpop.f32.mrf.mxu2 }
0x50c8   :  { %v4138_v31 = vpop.f32.mrf.mxu2 }
0x50c9   :  { %v4139_v26 = vadd.f32 %v7568_v39, %v4138_v31 }
0x50cb   :  { %v4161_v54 = vadd.f32 %v4158_v3, %v4139_v26  ;;  %v5022_v26 = vrot.slane %v7584_v0, 1 }
0x50cd   :  { %5882 = vtanh.f32 %v4161_v54  ;;  %v5477_v23 = vmul.f32 -1.442695, %v4161_v54 }
0x50cf   :  { %5884 = vpow2.f32 %v5477_v23 }
0x50d3   :  { %v5883_v36 = vpop.eup %5882 }
0x50d4   :  { %4184 = vrot.lane.b32.xlu1 %v5883_v36, %s6209_s13 }
0x50d5   :  { %v5885_v43 = vpop.eup %5884 }
0x50d6   :  { %v4165_v63 = vadd.f32 1.0, %v5885_v43 }
0x50d8   :  { %5886 = vrcp.f32 %v4165_v63  ;;  %v4177_v49 = vand.u32 2147483648, %v4165_v63  ;;  %vm4171_vm11 = vweird.f32 %v4165_v63  ;;  %v4175_v59 = vand.u32 2147483647, %v4165_v63 }
0x50da   :  { %v4178_v52 = vor.u32 1.1754944e-38, %v4177_v49  ;;  %vm4176_vm13 = vcmp.eq.f32.partialorder %v4175_v59, 8.507059e+37 }
0x50de   :  { %v5887_v10 = vpop.eup %5886 }
0x50df   :  { %v4167_v25 = vmul.f32 %v5887_v10, %v4165_v63  ;;  %vm4172_vm10 = vweird.f32 %v5887_v10 }
0x50e0   :  { %vm4173_vm12 = vmor %vm4171_vm11, %vm4172_vm10 }
0x50e1   :  { %v4168_v32 = vsub.f32 1.0, %v4167_v25 }
0x50e3   :  { %v4169_v28 = vmul.f32 %v5887_v10, %v4168_v32  ;;  %v4324_v32 = vpop.f32.mrf.mxu3 }
0x50e5   :  { %v4170_v48 = vadd.f32 %v5887_v10, %v4169_v28 }
0x50e7   :  { %v4174_v61 = vsel %vm4173_vm12, %v5887_v10, %v4170_v48 }
0x50e8   :  { %v4179_v27 = vsel %vm4176_vm13, %v4178_v52, %v4174_v61 }
0x50e9   :  { %v4182_v15 = vmul.f32 %v4179_v27, %v4109_v57 }
0x5146   :  { %v4185_v35 = vpop.permute.xlu1 %4184 }
0x5147   :  { %v4187_v1 = vmul.f32 %v4185_v35, %v4179_v27 }
0x5149   :  { %4189 = vrot.lane.b32.xlu2 %v4187_v1, %s6210_s17 }
0x51a3   :  { %v4190_v29 = vpop.permute.xlu2 %4189 }
0x51a4   :  { %v4192_v42 = vadd.f32 %v4190_v29, %v4182_v15 }
0x51a6   :  { %5888 = vtanh.f32 %v4192_v42 }
0x51ac   :  { %v5889_v45 = vpop.eup %5888 }
0x51ad   :  { %4195 = vrot.lane.b32.xlu0 %v5889_v45, %s6209_s13 }
0x521f   :  { %v4196_v20 = vpop.permute.xlu0 %4195 }
0x5220   :  { %v4198_v46 = vmul.f32 %v4196_v20, %v4179_v27 }
0x5222   :  { %4200 = vrot.lane.b32.xlu1 %v4198_v46, %s6210_s17  ;;  %v4756_v21 = vrot.slane %v4198_v46, 7  ;;  %v5036_v23 = vsel %vm4742_vm14, %v5022_v26, %v4198_v46 }
0x5224   :  { %v4771_v36 = vsel %vm4742_vm14, %v7584_v0, %v4756_v21 }
0x5294   :  { %v4201_v6 = vpop.permute.xlu1 %4200 }
0x5295   :  { %5478 = vmatmul.msk.f32.vlgmr.msrb.gmra.mxu0 %vm240_vm0, %v4201_v6 }
0x5296   :  { %4548 = vmatpush.msrb.mxu0 %v7537_v53 }
0x5298   :  { %4549 = vmatpush.msrb.mxu0 %v7540_v16 }
0x529a   :  { %4550 = vmatpush.msrb.mxu0 %v7545_v17 }
0x529c   :  { %4551 = vmatpush.msrb.mxu0 %v7550_v22 }
0x5312   :  { %v4221_v50 = vpop.f32.mrf.mxu0 }
0x5313   :  { %v4222_v12 = vadd.f32 %v7568_v39, %v4221_v50 }
0x5315   :  { %v4244_v37 = vadd.f32 %v4241_v34, %v4222_v12 }
0x5317   :  { %5890 = vtanh.f32 %v4244_v37  ;;  %v5480_v2 = vmul.f32 -1.442695, %v4244_v37 }
0x5319   :  { %5892 = vpow2.f32 %v5480_v2 }
0x531d   :  { %v5891_v55 = vpop.eup %5890 }
0x531e   :  { %4267 = vrot.lane.b32.xlu2 %v5891_v55, %s6209_s13 }
0x531f   :  { %v5893_v38 = vpop.eup %5892 }
0x5320   :  { %v4248_v11 = vadd.f32 1.0, %v5893_v38 }
0x5322   :  { %5894 = vrcp.f32 %v4248_v11  ;;  %v4260_v30 = vand.u32 2147483648, %v4248_v11  ;;  %vm4254_vm7 = vweird.f32 %v4248_v11  ;;  %v4258_v58 = vand.u32 2147483647, %v4248_v11 }
0x5324   :  { %v4261_v4 = vor.u32 1.1754944e-38, %v4260_v30  ;;  %vm4259_vm9 = vcmp.eq.f32.partialorder %v4258_v58, 8.507059e+37 }
0x5328   :  { %v5895_v18 = vpop.eup %5894 }
0x5329   :  { %v4250_v60 = vmul.f32 %v5895_v18, %v4248_v11  ;;  %vm4255_vm6 = vweird.f32 %v5895_v18 }
0x532a   :  { %vm4256_vm8 = vmor %vm4254_vm7, %vm4255_vm6 }
0x532b   :  { %v4251_v24 = vsub.f32 1.0, %v4250_v60 }
0x532d   :  { %v4252_v40 = vmul.f32 %v5895_v18, %v4251_v24  ;;  %v4407_v24 = vpop.f32.mrf.mxu1 }
0x532f   :  { %v4253_v41 = vadd.f32 %v5895_v18, %v4252_v40 }
0x5331   :  { %v4257_v51 = vsel %vm4256_vm8, %v5895_v18, %v4253_v41 }
0x5332   :  { %v4262_v7 = vsel %vm4259_vm9, %v4261_v4, %v4257_v51 }
0x5333   :  { %v4265_v9 = vmul.f32 %v4262_v7, %v4192_v42 }
0x5378   :  { %v4268_v19 = vpop.permute.xlu2 %4267 }
0x5379   :  { %v4270_v57 = vmul.f32 %v4268_v19, %v4262_v7 }
0x537b   :  { %4272 = vrot.lane.b32.xlu0 %v4270_v57, %s6210_s17 }
0x53ed   :  { %v4273_v8 = vpop.permute.xlu0 %4272 }
0x53ee   :  { %v4275_v33 = vadd.f32 %v4273_v8, %v4265_v9 }
0x53f0   :  { %5896 = vtanh.f32 %v4275_v33 }
0x53f6   :  { %v5897_v62 = vpop.eup %5896 }
0x53f7   :  { %4278 = vrot.lane.b32.xlu1 %v5897_v62, %s6209_s13 }
0x5469   :  { %v4279_v14 = vpop.permute.xlu1 %4278 }
0x546a   :  { %v4281_v31 = vmul.f32 %v4279_v14, %v4262_v7 }
0x546c   :  { %v4758_v3 = vrot.slane %v4281_v31, 6  ;;  %v5024_v54 = vrot.slane %v4281_v31, 7  ;;  %4283 = vrot.lane.b32.xlu2 %v4281_v31, %s6210_s17 }
0x546e   :  { %v4772_v43 = vsel %vm4744_vm15, %v4771_v36, %v4758_v3  ;;  %v5037_v63 = vsel %vm4744_vm15, %v5036_v23, %v5024_v54 }
0x54c6   :  { %v4284_v10 = vpop.permute.xlu2 %4283 }
0x54c7   :  { %5481 = vmatmul.msk.f32.vlgmr.msrb.gmra.mxu2 %vm240_vm0, %v4284_v10 }
0x54c8   :  { %4631 = vmatpush.msrb.mxu2 %v7537_v53 }
0x54ca   :  { %4632 = vmatpush.msrb.mxu2 %v7540_v16 }
0x54cc   :  { %4633 = vmatpush.msrb.mxu2 %v7545_v17 }
0x54ce   :  { %4634 = vmatpush.msrb.mxu2 %v7550_v22 }
0x554a   :  { %v4304_v25 = vpop.f32.mrf.mxu2 }
0x554b   :  { %v4305_v0 = vadd.f32 %v7568_v39, %v4304_v25 }
0x554d   :  { %v4327_v28 = vadd.f32 %v4324_v32, %v4305_v0 }
0x554f   :  { %5898 = vtanh.f32 %v4327_v28  ;;  %v5483_v49 = vmul.f32 -1.442695, %v4327_v28 }
0x5551   :  { %5900 = vpow2.f32 %v5483_v49 }
0x5555   :  { %v5899_v48 = vpop.eup %5898 }
0x5556   :  { %4350 = vrot.lane.b32.xlu0 %v5899_v48, %s6209_s13 }
0x5557   :  { %v5901_v59 = vpop.eup %5900 }
0x5558   :  { %v4331_v61 = vadd.f32 1.0, %v5901_v59  ;;  %v4490_v59 = vpop.f32.mrf.mxu3 }
0x555a   :  { %5902 = vrcp.f32 %v4331_v61  ;;  %v4343_v22 = vand.u32 2147483648, %v4331_v61  ;;  %vm4337_vm15 = vweird.f32 %v4331_v61  ;;  %v4341_v27 = vand.u32 2147483647, %v4331_v61 }
0x555c   :  { %v4344_v15 = vor.u32 1.1754944e-38, %v4343_v22  ;;  %vm4342_vm11 = vcmp.eq.f32.partialorder %v4341_v27, 8.507059e+37 }
0x5560   :  { %v5903_v53 = vpop.eup %5902 }
0x5561   :  { %v4333_v16 = vmul.f32 %v5903_v53, %v4331_v61  ;;  %vm4338_vm14 = vweird.f32 %v5903_v53 }
0x5562   :  { %vm4339_vm10 = vmor %vm4337_vm15, %vm4338_vm14 }
0x5563   :  { %v4334_v52 = vsub.f32 1.0, %v4333_v16 }
0x5565   :  { %v4335_v17 = vmul.f32 %v5903_v53, %v4334_v52 }
0x5567   :  { %v4336_v35 = vadd.f32 %v5903_v53, %v4335_v17 }
0x5569   :  { %v4340_v1 = vsel %vm4339_vm10, %v5903_v53, %v4336_v35 }
0x556a   :  { %v4345_v42 = vsel %vm4342_vm11, %v4344_v15, %v4340_v1 }
0x556b   :  { %v4348_v20 = vmul.f32 %v4345_v42, %v4275_v33 }
0x55c8   :  { %v4351_v29 = vpop.permute.xlu0 %4350 }
0x55c9   :  { %v4353_v45 = vmul.f32 %v4351_v29, %v4345_v42 }
0x55cb   :  { %4355 = vrot.lane.b32.xlu1 %v4353_v45, %s6210_s17 }
0x563d   :  { %v4356_v46 = vpop.permute.xlu1 %4355 }
0x563e   :  { %v4358_v6 = vadd.f32 %v4356_v46, %v4348_v20 }
0x5640   :  { %5904 = vtanh.f32 %v4358_v6 }
0x5646   :  { %v5905_v50 = vpop.eup %5904 }
0x5647   :  { %4361 = vrot.lane.b32.xlu2 %v5905_v50, %s6209_s13 }
0x56a1   :  { %v4362_v12 = vpop.permute.xlu2 %4361 }
0x56a2   :  { %v4364_v34 = vmul.f32 %v4362_v12, %v4345_v42 }
0x56a4   :  { %v4760_v37 = vrot.slane %v4364_v34, 5  ;;  %v5026_v55 = vrot.slane %v4364_v34, 6  ;;  %4366 = vrot.lane.b32.xlu0 %v4364_v34, %s6210_s17 }
0x56a6   :  { %v4773_v2 = vsel %vm4746_vm1, %v4772_v43, %v4760_v37  ;;  %v5038_v38 = vsel %vm4746_vm1, %v5037_v63, %v5026_v55  ;;  %v5965_v55 = vld [vmem:[%s7813_s14] ss:$0 sm:$0xff] }
0x5716   :  { %v4367_v11 = vpop.permute.xlu0 %4366 }
0x5717   :  { %5484 = vmatmul.msk.f32.vlgmr.msra.gmra.mxu0 %vm240_vm0, %v4367_v11 }
0x5794   :  { %v4387_v18 = vpop.f32.mrf.mxu0 }
0x5795   :  { %v4388_v60 = vadd.f32 %v7568_v39, %v4387_v18 }
0x5797   :  { %v4410_v40 = vadd.f32 %v4407_v24, %v4388_v60 }
0x5799   :  { %5906 = vtanh.f32 %v4410_v40  ;;  %v5486_v30 = vmul.f32 -1.442695, %v4410_v40 }
0x579b   :  { %5908 = vpow2.f32 %v5486_v30 }
0x579f   :  { %v5907_v41 = vpop.eup %5906 }
0x57a0   :  { %4433 = vrot.lane.b32.xlu1 %v5907_v41, %s6209_s13 }
0x57a1   :  { %v5909_v58 = vpop.eup %5908 }
0x57a2   :  { %v4414_v51 = vadd.f32 1.0, %v5909_v58 }
0x57a4   :  { %5910 = vrcp.f32 %v4414_v51  ;;  %v4426_v8 = vand.u32 2147483648, %v4414_v51  ;;  %vm4420_vm12 = vweird.f32 %v4414_v51  ;;  %v4424_v33 = vand.u32 2147483647, %v4414_v51 }
0x57a6   :  { %v4427_v21 = vor.u32 1.1754944e-38, %v4426_v8  ;;  %vm4425_vm6 = vcmp.eq.f32.partialorder %v4424_v33, 8.507059e+37  ;;  %v4573_v8 = vpop.f32.mrf.mxu1 }
0x57aa   :  { %v5911_v4 = vpop.eup %5910 }
0x57ab   :  { %v4416_v19 = vmul.f32 %v5911_v4, %v4414_v51  ;;  %vm4421_vm1 = vweird.f32 %v5911_v4 }
0x57ac   :  { %vm4422_vm13 = vmor %vm4420_vm12, %vm4421_vm1 }
0x57ad   :  { %v4417_v7 = vsub.f32 1.0, %v4416_v19 }
0x57af   :  { %v4418_v57 = vmul.f32 %v5911_v4, %v4417_v7 }
0x57b1   :  { %v4419_v9 = vadd.f32 %v5911_v4, %v4418_v57 }
0x57b3   :  { %v4423_v62 = vsel %vm4422_vm13, %v5911_v4, %v4419_v9 }
0x57b4   :  { %v4428_v31 = vsel %vm4425_vm6, %v4427_v21, %v4423_v62 }
0x57b5   :  { %v4431_v3 = vmul.f32 %v4428_v31, %v4358_v6 }
0x5812   :  { %v4434_v14 = vpop.permute.xlu1 %4433 }
0x5813   :  { %v4436_v26 = vmul.f32 %v4434_v14, %v4428_v31 }
0x5815   :  { %4438 = vrot.lane.b32.xlu2 %v4436_v26, %s6210_s17 }
0x586f   :  { %v4439_v54 = vpop.permute.xlu2 %4438 }
0x5870   :  { %v4441_v36 = vadd.f32 %v4439_v54, %v4431_v3 }
0x5872   :  { %5912 = vtanh.f32 %v4441_v36 }
0x5878   :  { %v5913_v23 = vpop.eup %5912 }
0x5879   :  { %4444 = vrot.lane.b32.xlu0 %v5913_v23, %s6209_s13 }
0x58eb   :  { %v4445_v43 = vpop.permute.xlu0 %4444 }
0x58ec   :  { %v4447_v63 = vmul.f32 %v4445_v43, %v4428_v31 }
0x58ee   :  { %v4762_v10 = vrot.slane %v4447_v63, 4  ;;  %v5028_v25 = vrot.slane %v4447_v63, 5  ;;  %4449 = vrot.lane.b32.xlu1 %v4447_v63, %s6210_s17 }
0x58f0   :  { %v4774_v0 = vsel %vm4748_vm2, %v4773_v2, %v4762_v10  ;;  %v5039_v32 = vsel %vm4748_vm2, %v5038_v38, %v5028_v25  ;;  %v3958_v2 = vadd.f32 %v5965_v55, %v7601_v44 }
0x58f2   :  { %v3983_v38 = vadd.f32 %v7599_v13, %v3958_v2 }
0x58f4   :  { %v5471_v58 = vmul.f32 -1.442695, %v3983_v38 }
0x5960   :  { %v4450_v28 = vpop.permute.xlu1 %4449 }
0x5961   :  { %5487 = vmatmul.msk.f32.vlgmr.msra.gmra.mxu2 %vm240_vm0, %v4450_v28 }
0x59e4   :  { %v4470_v48 = vpop.f32.mrf.mxu2 }
0x59e5   :  { %v4471_v49 = vadd.f32 %v7568_v39, %v4470_v48 }
0x59e7   :  { %v4493_v61 = vadd.f32 %v4490_v59, %v4471_v49 }
0x59e9   :  { %5914 = vtanh.f32 %v4493_v61  ;;  %v5489_v16 = vmul.f32 -1.442695, %v4493_v61 }
0x59eb   :  { %5916 = vpow2.f32 %v5489_v16 }
0x59ef   :  { %v5915_v53 = vpop.eup %5914 }
0x59f0   :  { %4516 = vrot.lane.b32.xlu2 %v5915_v53, %s6209_s13 }
0x59f1   :  { %v5917_v52 = vpop.eup %5916 }
0x59f2   :  { %v4497_v17 = vadd.f32 1.0, %v5917_v52 }
0x59f4   :  { %5918 = vrcp.f32 %v4497_v17  ;;  %v4509_v29 = vand.u32 2147483648, %v4497_v17  ;;  %vm4503_vm7 = vweird.f32 %v4497_v17  ;;  %v4507_v42 = vand.u32 2147483647, %v4497_v17 }
0x59f6   :  { %v4510_v20 = vor.u32 1.1754944e-38, %v4509_v29  ;;  %vm4508_vm9 = vcmp.eq.f32.partialorder %v4507_v42, 8.507059e+37 }
0x59fa   :  { %v5919_v35 = vpop.eup %5918 }
0x59fb   :  { %v4499_v22 = vmul.f32 %v5919_v35, %v4497_v17  ;;  %vm4504_vm2 = vweird.f32 %v5919_v35 }
0x59fc   :  { %vm4505_vm8 = vmor %vm4503_vm7, %vm4504_vm2 }
0x59fd   :  { %v4500_v27 = vsub.f32 1.0, %v4499_v22 }
0x59ff   :  { %v4501_v1 = vmul.f32 %v5919_v35, %v4500_v27 }
0x5a01   :  { %v4502_v15 = vadd.f32 %v5919_v35, %v4501_v1 }
0x5a03   :  { %v4506_v45 = vsel %vm4505_vm8, %v5919_v35, %v4502_v15 }
0x5a04   :  { %v4511_v6 = vsel %vm4508_vm9, %v4510_v20, %v4506_v45 }
0x5a05   :  { %v4514_v12 = vmul.f32 %v4511_v6, %v4441_v36 }
0x5a4a   :  { %v4517_v46 = vpop.permute.xlu2 %4516 }
0x5a4b   :  { %v4519_v50 = vmul.f32 %v4517_v46, %v4511_v6 }
0x5a4d   :  { %4521 = vrot.lane.b32.xlu0 %v4519_v50, %s6210_s17 }
0x5abf   :  { %v4522_v34 = vpop.permute.xlu0 %4521 }
0x5ac0   :  { %v7648_v37 = vadd.f32 %v4522_v34, %v4514_v12 }
0x5ac2   :  { %5920 = vtanh.f32 %v7648_v37 }
0x5ac3   :  { %5922 = vtanh.f32 %v3983_v38 }
0x5ac4   :  { %5924 = vpow2.f32 %v5471_v58 }
0x5ac8   :  { %v5921_v11 = vpop.eup %5920 }
0x5ac9   :  { %4527 = vrot.lane.b32.xlu1 %v5921_v11, %s6209_s13  ;;  %v5923_v18 = vpop.eup %5922  ;;  %v4705_v11 = vld [vmem:[%s7816_s27 + $0x18] sm:$0xff] }
0x5aca   :  { %v5925_v51 = vpop.eup %5924  ;;  %4798 = vmatpush.msra.mxu0 %v4705_v11 }
0x5acb   :  { %v3987_v4 = vadd.f32 1.0, %v5925_v51 }
0x5acd   :  { %5926 = vrcp.f32 %v3987_v4  ;;  %v3999_v26 = vand.u32 2147483648, %v3987_v4  ;;  %vm3993_vm14 = vweird.f32 %v3987_v4  ;;  %v3997_v3 = vand.u32 2147483647, %v3987_v4 }
0x5acf   :  { %v4000_v36 = vor.u32 1.1754944e-38, %v3999_v26  ;;  %vm3998_vm10 = vcmp.eq.f32.partialorder %v3997_v3, 8.507059e+37 }
0x5ad1   :  { %4006 = vrot.lane.b32.xlu1 %v5923_v18, %s6209_s13  ;;  %v4704_v18 = vld [vmem:[%s7816_s27 + $0x10] sm:$0xff] }
0x5ad2   :  { %4799 = vmatpush.msra.mxu0 %v4704_v18 }
0x5ad3   :  { %v5927_v19 = vpop.eup %5926 }
0x5ad4   :  { %v3989_v7 = vmul.f32 %v5927_v19, %v3987_v4 }
0x5ad6   :  { %v3990_v33 = vsub.f32 1.0, %v3989_v7 }
0x5ad8   :  { %v3991_v21 = vmul.f32 %v5927_v19, %v3990_v33 }
0x5ada   :  { %v3992_v14 = vadd.f32 %v5927_v19, %v3991_v21 }
0x5b3b   :  { %v4528_v60 = vpop.permute.xlu1 %4527 }
0x5b3c   :  { %v4530_v24 = vmul.f32 %v4528_v60, %v4511_v6  ;;  %v4703_v60 = vld [vmem:[%s7816_s27 + $0x8] sm:$0xff] }
0x5b3d   :  { %4800 = vmatpush.msra.mxu0 %v4703_v60 }
0x5b3e   :  { %v4764_v40 = vrot.slane %v4530_v24, 3  ;;  %v5030_v41 = vrot.slane %v4530_v24, 4  ;;  %4532 = vrot.lane.b32.xlu2 %v4530_v24, %s6210_s17  ;;  %v4702_v24 = vld [vmem:[%s7816_s27] sm:$0xff] }
0x5b3f   :  { %4801 = vmatpush.msra.mxu0 %v4702_v24 }
0x5b40   :  { %v7658_v30 = vsel %vm4750_vm3, %v4774_v0, %v4764_v40  ;;  %v7661_v44 = vsel %vm4750_vm3, %v5039_v32, %v5030_v41  ;;  %vm3994_vm3 = vweird.f32 %v5927_v19 }
0x5b41   :  { %vm3995_vm15 = vmor %vm3993_vm14, %vm3994_vm3 }
0x5b42   :  { %v3996_v54 = vsel %vm3995_vm15, %v5927_v19, %v3992_v14 }
0x5b43   :  { %v4007_v23 = vpop.permute.xlu1 %4006  ;;  %v4001_v43 = vsel %vm3998_vm10, %v4000_v36, %v3996_v54  ;;  %v7700_v54 = vld [vmem:[%s7817_s1 + $0x18] sm:$0xff]  ;;  %v7704_v36 = vld [vmem:[%s7817_s1 + $0x10] sm:$0xff] }
0x5b44   :  { %v4009_v63 = vmul.f32 %v4007_v23, %v4001_v43  ;;  %v4004_v27 = vmul.f32 %v4001_v43, %v7576_v47  ;;  %v7707_v23 = vld [vmem:[%s7817_s1 + $0x8] sm:$0xff] }
0x5b98   :  { %v4533_v13 = vpop.permute.xlu2 %4532 }
0x5b99   :  { %5490 = vmatmul.msk.f32.vlgmr.msrb.gmra.mxu0 %vm240_vm0, %v4533_v13 }
0x5b9a   :  { %4959 = vmatpush.msrb.mxu0 %v7700_v54 }
0x5b9c   :  { %4960 = vmatpush.msrb.mxu0 %v7704_v36 }
0x5b9e   :  { %4961 = vmatpush.msrb.mxu0 %v7707_v23 }
0x5c16   :  { %v4553_v57 = vpop.f32.mrf.mxu0 }
0x5c17   :  { %v4554_v9 = vadd.f32 %v7568_v39, %v4553_v57 }
0x5c19   :  { %v4576_v62 = vadd.f32 %v4573_v8, %v4554_v9 }
0x5c1b   :  { %5928 = vtanh.f32 %v4576_v62  ;;  %v5492_v10 = vmul.f32 -1.442695, %v4576_v62 }
0x5c1d   :  { %5930 = vpow2.f32 %v5492_v10 }
0x5c21   :  { %v5929_v31 = vpop.eup %5928 }
0x5c22   :  { %4599 = vrot.lane.b32.xlu0 %v5929_v31, %s6209_s13 }
0x5c23   :  { %v5931_v25 = vpop.eup %5930 }
0x5c24   :  { %v4580_v0 = vadd.f32 1.0, %v5931_v25 }
0x5c26   :  { %5932 = vrcp.f32 %v4580_v0  ;;  %v4592_v61 = vand.u32 2147483648, %v4580_v0  ;;  %vm4586_vm1 = vweird.f32 %v4580_v0  ;;  %v4590_v53 = vand.u32 2147483647, %v4580_v0 }
0x5c28   :  { %v4593_v52 = vor.u32 1.1754944e-38, %v4592_v61  ;;  %vm4591_vm13 = vcmp.eq.f32.partialorder %v4590_v53, 8.507059e+37  ;;  %v7726_v53 = vld [vmem:[#allocation8 + $0x18] sm:$0xff] }
0x5c29   :  { %4939 = vmatpush.msra.mxu3 %v7726_v53 }
0x5c2a   :  { %4011 = vrot.lane.b32.xlu0 %v4009_v63, %s6210_s17 }
0x5c2c   :  { %v5933_v32 = vpop.eup %5932 }
0x5c2d   :  { %v4582_v28 = vmul.f32 %v5933_v32, %v4580_v0  ;;  %vm4587_vm11 = vweird.f32 %v5933_v32 }
0x5c2e   :  { %vm4588_vm12 = vmor %vm4586_vm1, %vm4587_vm11 }
0x5c2f   :  { %v4583_v48 = vsub.f32 1.0, %v4582_v28 }
0x5c31   :  { %v4584_v49 = vmul.f32 %v5933_v32, %v4583_v48 }
0x5c33   :  { %v4585_v59 = vadd.f32 %v5933_v32, %v4584_v49 }
0x5c35   :  { %v4589_v16 = vsel %vm4588_vm12, %v5933_v32, %v4585_v59  ;;  %vm4998_vm12 = vcmask 523264  }
0x5c36   :  { %v4594_v35 = vsel %vm4591_vm13, %v4593_v52, %v4589_v16  ;;  %v7729_v16 = vld [vmem:[#allocation8 + $0x10] sm:$0xff]  ;;  %v7732_v52 = vld [vmem:[#allocation8 + $0x8] sm:$0xff] }
0x5c37   :  { %v4597_v42 = vmul.f32 %v4594_v35, %v7648_v37  ;;  %4940 = vmatpush.msra.mxu3 %v7729_v16 }
0x5c39   :  { %4941 = vmatpush.msra.mxu3 %v7732_v52 }
0x5c94   :  { %v4600_v17 = vpop.permute.xlu0 %4599 }
0x5c95   :  { %v4602_v22 = vmul.f32 %v4600_v17, %v4594_v35  ;;  %v7734_v17 = vld [vmem:[#allocation8] sm:$0xff] }
0x5c96   :  { %4942 = vmatpush.msra.mxu3 %v7734_v17 }
0x5c97   :  { %4604 = vrot.lane.b32.xlu2 %v4602_v22, %s6210_s17 }
0x5c9c   :  { %v4012_v1 = vpop.permute.xlu0 %4011 }
0x5c9d   :  { %v4014_v15 = vadd.f32 %v4012_v1, %v4004_v27 }
0x5c9f   :  { %5934 = vtanh.f32 %v4014_v15 }
0x5ca5   :  { %v5935_v29 = vpop.eup %5934 }
0x5ca6   :  { %4017 = vrot.lane.b32.xlu2 %v5935_v29, %s6209_s13 }
0x5cf1   :  { %v4605_v45 = vpop.permute.xlu2 %4604 }
0x5cf2   :  { %v7671_v20 = vadd.f32 %v4605_v45, %v4597_v42 }
0x5cf4   :  { %5936 = vtanh.f32 %v7671_v20 }
0x5cfa   :  { %v5937_v46 = vpop.eup %5936 }
0x5cfb   :  { %4610 = vrot.lane.b32.xlu1 %v5937_v46, %s6209_s13 }
0x5d00   :  { %v4018_v6 = vpop.permute.xlu2 %4017 }
0x5d01   :  { %v4020_v47 = vmul.f32 %v4018_v6, %v4001_v43  ;;  %v7711_v43 = vld [vmem:[%s7817_s1] sm:$0xff] }
0x5d02   :  { %4962 = vmatpush.msrb.mxu0 %v7711_v43 }
0x5d03   :  { %4640 = vrot.lane.b32.xlu1 %v4020_v47, %s6210_s17 }
0x5d6d   :  { %v4611_v50 = vpop.permute.xlu1 %4610 }
0x5d6e   :  { %v4613_v12 = vmul.f32 %v4611_v50, %v4594_v35  ;;  %v5559_v35 = vld [vmem:[%s7818_s2] ss:$0 sm:$0xff] }
0x5d70   :  { %v4766_v34 = vrot.slane %v4613_v12, 2  ;;  %v5032_v37 = vrot.slane %v4613_v12, 3  ;;  %4615 = vrot.lane.b32.xlu0 %v4613_v12, %s6210_s17 }
0x5d72   :  { %v7679_v55 = vsel %vm4752_vm4, %v7658_v30, %v4766_v34  ;;  %v7683_v2 = vsel %vm4752_vm4, %v7661_v44, %v5032_v37 }
0x5d75   :  { %v4641_v38 = vpop.permute.xlu1 %4640 }
0x5d76   :  { %5494 = vmatmul.msk.f32.vlgmr.msrb.gmra.mxu3 %vm240_vm0, %v4641_v38 }
0x5d78   :  { %4782 = vrot.lane.b32.xlu0 %v7522_v5, %s6210_s17 }
0x5de2   :  { %v4616_v40 = vpop.permute.xlu0 %4615 }
0x5de3   :  { %5493 = vmatmul.msk.f32.vlgmr.msrb.gmra.mxu2 %vm240_vm0, %v4616_v40 }
0x5dea   :  { %v4783_v41 = vpop.permute.xlu0 %4782 }
0x5deb   :  { %5496 = vmatmul.msk.f32.vlgmr.msra.gmra.mxu0 %vm240_vm0, %v4783_v41  ;;  %4919 = vmatpush.msra.mxu2 %v4783_v41 }
0x5ded   :  { %5060 = vmatpush.msrb.mxu2 %v4705_v11 }
0x5def   :  { %5061 = vmatpush.msrb.mxu2 %v4704_v18 }
0x5df1   :  { %5062 = vmatpush.msrb.mxu2 %v4703_v60 }
0x5df3   :  { %5063 = vmatpush.msrb.mxu2 %v4702_v24 }
0x5df9   :  { %v4661_v44 = vpop.f32.mrf.mxu3 }
0x5e66   :  { %v4636_v5 = vpop.f32.mrf.mxu2 }
0x5e67   :  { %v4637_v30 = vadd.f32 %v7568_v39, %v4636_v5 }
0x5e68   :  { %v4803_v22 = vpop.f32.mrf.mxu0 }
0x5e69   :  { %v4664_v13 = vadd.f32 %v4661_v44, %v4637_v30  ;;  %v4804_v1 = vadd.f32 %v5559_v35, %v4803_v22 }
0x5e6b   :  { %5938 = vtanh.f32 %v4664_v13  ;;  %v5495_v51 = vmul.f32 -1.442695, %v4664_v13 }
0x5e6d   :  { %5940 = vpow2.f32 %v5495_v51 }
0x5e71   :  { %v5939_v58 = vpop.eup %5938 }
0x5e72   :  { %4687 = vrot.lane.b32.xlu2 %v5939_v58, %s6209_s13 }
0x5e73   :  { %v5941_v4 = vpop.eup %5940 }
0x5e74   :  { %v4668_v19 = vadd.f32 1.0, %v5941_v4 }
0x5e76   :  { %5942 = vrcp.f32 %v4668_v19  ;;  %v4680_v39 = vand.u32 2147483648, %v4668_v19  ;;  %vm4674_vm6 = vweird.f32 %v4668_v19  ;;  %v4678_v62 = vand.u32 2147483647, %v4668_v19 }
0x5e78   :  { %v4681_v14 = vor.u32 1.1754944e-38, %v4680_v39  ;;  %vm4679_vm7 = vcmp.eq.f32.partialorder %v4678_v62, 8.507059e+37  ;;  %v4719_v39 = vld [vmem:[#allocation10 + $0x18] sm:$0xff]  ;;  %v4718_v62 = vld [vmem:[#allocation10 + $0x10] sm:$0xff] }
0x5e7c   :  { %v5943_v7 = vpop.eup %5942 }
0x5e7d   :  { %v4670_v57 = vmul.f32 %v5943_v7, %v4668_v19  ;;  %vm4675_vm4 = vweird.f32 %v5943_v7 }
0x5e7e   :  { %vm4676_vm2 = vmor %vm4674_vm6, %vm4675_vm4 }
0x5e7f   :  { %v4671_v9 = vsub.f32 1.0, %v4670_v57 }
0x5e81   :  { %v4672_v8 = vmul.f32 %v5943_v7, %v4671_v9 }
0x5e83   :  { %v4673_v33 = vadd.f32 %v5943_v7, %v4672_v8 }
0x5e85   :  { %v4677_v21 = vsel %vm4676_vm2, %v5943_v7, %v4673_v33 }
0x5e86   :  { %v4682_v26 = vsel %vm4679_vm7, %v4681_v14, %v4677_v21  ;;  %v4717_v21 = vld [vmem:[#allocation10 + $0x8] sm:$0xff]  ;;  %v4716_v14 = vld [vmem:[#allocation10] sm:$0xff] }
0x5e87   :  { %v4685_v63 = vmul.f32 %v4682_v26, %v7671_v20 }
0x5ecc   :  { %v4688_v31 = vpop.permute.xlu2 %4687 }
0x5ecd   :  { %v4690_v3 = vmul.f32 %v4688_v31, %v4682_v26  ;;  %v5560_v31 = vld [vmem:[%s7819_s7] ss:$0 sm:$0xff] }
0x5ecf   :  { %4692 = vrot.lane.b32.xlu1 %v4690_v3, %s6210_s17 }
0x5ed7   :  { %5044 = vrot.lane.b32.xlu1 %v7527_v56, %s6210_s17 }
0x5f41   :  { %v4693_v10 = vpop.permute.xlu1 %4692 }
0x5f42   :  { %v4695_v56 = vadd.f32 %v4693_v10, %v4685_v63 }
0x5f44   :  { %5944 = vtanh.f32 %v4695_v56 }
0x5f49   :  { %v7716_v25 = vpop.permute.xlu1 %5044 }
0x5f4a   :  { %v5945_v0 = vpop.eup %5944  ;;  %5181 = vmatpush.msra.mxu0 %v7716_v25 }
0x5f4b   :  { %4698 = vrot.lane.b32.xlu2 %v5945_v0, %s6209_s13 }
0x5fa5   :  { %v4699_v32 = vpop.permute.xlu2 %4698 }
0x5fa6   :  { %v4701_v28 = vmul.f32 %v4699_v32, %v4682_v26 }
0x5fa8   :  { %v4769_v48 = vrot.slane %v4701_v28, 1  ;;  %v5034_v59 = vrot.slane %v4701_v28, 2 }
0x5faa   :  { %v4777_v49 = vsel %vm4754_vm5, %v7679_v55, %v4769_v48  ;;  %v5042_v61 = vsel %vm4754_vm5, %v7683_v2, %v5034_v59  ;;  %vm4834_vm5 = vcmask 64512  }
0x5fab   :  { %4807 = vrot.lane.b32.xlu0 %v4777_v49, %s6210_s17 }
0x5fb3   :  { %5069 = vrot.lane.b32.xlu0 %v5042_v61, %s6210_s17 }
0x601d   :  { %v4808_v27 = vpop.permute.xlu0 %4807 }
0x601e   :  { %5497 = vmatpush.xpose.msk.msra.mxu1 %vm240_vm0, %v4808_v27  ;;  %5501 = vmatmul.msk.f32.vlgmr.msrb.gmra.mxu0 %vm240_vm0, %v4808_v27 }
0x6021   :  { %5498 = vmatmul.msk.f32.vlgmr.msra.gmra.mxu1 %vm240_vm0, %v4804_v1 }
0x6022   :  { %4990 = vmatpush.msrb.mxu1 %v4719_v39 }
0x6024   :  { %4991 = vmatpush.msrb.mxu1 %v4718_v62 }
0x6025   :  { %v5070_v15 = vpop.permute.xlu0 %5069 }
0x6026   :  { %5504 = vmatpush.xpose.msk.msrb.mxu3 %vm240_vm0, %v5070_v15  ;;  %4992 = vmatpush.msrb.mxu1 %v4717_v21 }
0x6028   :  { %4993 = vmatpush.msrb.mxu1 %v4716_v14 }
0x602a   :  { %5201 = vmatpush.msra.mxu1 %v7726_v53 }
0x602c   :  { %5202 = vmatpush.msra.mxu1 %v7729_v16 }
0x602e   :  { %5203 = vmatpush.msra.mxu1 %v7732_v52 }
0x6030   :  { %5204 = vmatpush.msra.mxu1 %v7734_v17 }
0x609b   :  { %v4964_v26 = vpop.f32.mrf.mxu0 }
0x609e   :  { %v4831_v29 = vpop.f32.mrf.mxu1 }
0x609f   :  { %v4835_v42 = vsel %vm4834_vm5, %v4831_v29, -inf }
0x60a0   :  { %v4836_v45 = vrot.slane %v4835_v42, 4 }
0x60a2   :  { %v4837_v20 = vmax.f32 %v4835_v42, %v4836_v45 }
0x60a4   :  { %v4838_v46 = vrot.slane %v4837_v20, 2 }
0x60a6   :  { %v4839_v6 = vmax.f32 %v4837_v20, %v4838_v46 }
0x60a8   :  { %v4840_v47 = vrot.slane %v4839_v6, 1 }
0x60aa   :  { %v4841_v50 = vmax.f32 %v4839_v6, %v4840_v47 }
0x60ac   :  { %v4842_v12 = vsub.f32 %v4831_v29, %v4841_v50 }
0x60ae   :  { %v4843_v34 = vmul.f32 1.442695, %v4842_v12  ;;  %v5561_v12 = vld [vmem:[#allocation11] ss:$0 sm:$0xff] }
0x60b0   :  { %5946 = vpow2.f32 %v4843_v34 }
0x60b6   :  { %v5947_v37 = vpop.eup %5946 }
0x60b7   :  { %v4845_v55 = vsel %vm4834_vm5, %v5947_v37, 0.0 }
0x60b8   :  { %v4846_v2 = vrot.slane %v4845_v55, 4 }
0x60ba   :  { %v4847_v38 = vadd.f32 %v4846_v2, %v4845_v55 }
0x60bc   :  { %v4848_v11 = vrot.slane %v4847_v38, 2 }
0x60be   :  { %v4849_v18 = vadd.f32 %v4848_v11, %v4847_v38 }
0x60c0   :  { %v4850_v60 = vrot.slane %v4849_v18, 1 }
0x60c2   :  { %v4851_v24 = vadd.f32 %v4850_v60, %v4849_v18 }
0x60c4   :  { %5948 = vrcp.f32 %v4851_v24  ;;  %v4863_v30 = vand.u32 2147483648, %v4851_v24  ;;  %v4861_v13 = vand.u32 2147483647, %v4851_v24  ;;  %vm4857_vm9 = vweird.f32 %v4851_v24 }
0x60c6   :  { %v4864_v51 = vor.u32 1.1754944e-38, %v4863_v30  ;;  %vm4862_vm14 = vcmp.eq.f32.partialorder %v4861_v13, 8.507059e+37 }
0x60ca   :  { %v5949_v40 = vpop.eup %5948 }
0x60cb   :  { %v4853_v41 = vmul.f32 %v5949_v40, %v4851_v24  ;;  %vm4858_vm8 = vweird.f32 %v5949_v40 }
0x60cc   :  { %vm4859_vm3 = vmor %vm4857_vm9, %vm4858_vm8 }
0x60cd   :  { %v4854_v5 = vsub.f32 1.0, %v4853_v41 }
0x60cf   :  { %v4855_v44 = vmul.f32 %v5949_v40, %v4854_v5 }
0x60d1   :  { %v4856_v58 = vadd.f32 %v5949_v40, %v4855_v44 }
0x60d3   :  { %v4860_v4 = vsel %vm4859_vm3, %v5949_v40, %v4856_v58 }
0x60d4   :  { %v4865_v19 = vsel %vm4862_vm14, %v4864_v51, %v4860_v4 }
0x60d5   :  { %v4866_v7 = vmul.f32 %v5947_v37, %v4865_v19 }
0x60d7   :  { %4868 = vxpose.xlu2.b32.start.end [1/1] (short) (narrow) %v4866_v7, 8  ;;  %4867 = vst.msk [vmem:[#allocation14] sm:$0xff] %vm4834_vm5, %v4866_v7 }
0x6170   :  { %v4884_v57 = vpop.trf.xlu2 }
0x6171   :  { %5499 = vmatmul.msk.f32.vlgmr.msra.gmra.mxu2 %vm4834_vm5, %v4884_v57 }
0x6172   :  { %5221 = vmatpush.msra.mxu2 %v7700_v54 }
0x6174   :  { %5222 = vmatpush.msra.mxu2 %v7704_v36 }
0x6176   :  { %5223 = vmatpush.msra.mxu2 %v7707_v23 }
0x6178   :  { %5224 = vmatpush.msra.mxu2 %v7711_v43 }
0x6179   :  { %5503 = vmatmul.msk.f32.vlgmr.msrb.gmra.mxu2 %vm240_vm0, %v7716_v25 }
0x6181   :  { %5508 = vmatmul.msk.f32.vlgmr.msra.gmra.mxu2 %vm240_vm0, %v5070_v15 }
0x61f4   :  { %v4921_v9 = vpop.f32.mrf.mxu2 }
0x61f5   :  { %5500 = vmatmul.msk.f32.vlgmr.msra.gmra.mxu3 %vm240_vm0, %v4921_v9 }
0x61f6   :  { %5246 = vmatpush.msra.mxu3 %v4719_v39 }
0x61f8   :  { %5247 = vmatpush.msra.mxu3 %v4718_v62 }
0x61fa   :  { %5248 = vmatpush.msra.mxu3 %v4717_v21 }
0x61fc   :  { %v5065_v8 = vpop.f32.mrf.mxu2  ;;  %5249 = vmatpush.msra.mxu3 %v4716_v14 }
0x61fd   :  { %v5066_v33 = vadd.f32 %v5559_v35, %v5065_v8 }
0x61ff   :  { %5505 = vmatmul.msk.f32.vlgmr.msrb.gmra.mxu3 %vm240_vm0, %v5066_v33 }
0x6204   :  { %v5226_v38 = vpop.f32.mrf.mxu2 }
0x6278   :  { %v4944_v3 = vpop.f32.mrf.mxu3 }
0x6279   :  { %v4965_v54 = vadd.f32 %v4964_v26, %v4944_v3 }
0x627b   :  { %v4970_v36 = vadd.f32 %v5560_v31, %v4965_v54 }
0x627d   :  { %5950 = vtanh.f32 %v4970_v36 }
0x6282   :  { %v5093_v23 = vpop.f32.mrf.mxu3 }
0x6283   :  { %v5951_v43 = vpop.eup %5950  ;;  %v5096_v63 = vsel %vm4834_vm5, %v5093_v23, -inf }
0x6284   :  { %v5097_v10 = vrot.slane %v5096_v63, 4  ;;  %5502 = vmatmul.msk.f32.vlgmr.msrb.gmra.mxu1 %vm240_vm0, %v5951_v43 }
0x6286   :  { %v5098_v56 = vmax.f32 %v5096_v63, %v5097_v10 }
0x6288   :  { %v5099_v25 = vrot.slane %v5098_v56, 2 }
0x628a   :  { %v5100_v0 = vmax.f32 %v5098_v56, %v5099_v25 }
0x628c   :  { %v5101_v32 = vrot.slane %v5100_v0, 1 }
0x628e   :  { %v5102_v28 = vmax.f32 %v5100_v0, %v5101_v32 }
0x6290   :  { %v5103_v48 = vsub.f32 %v5093_v23, %v5102_v28 }
0x6292   :  { %v5104_v49 = vmul.f32 1.442695, %v5103_v48 }
0x6294   :  { %5952 = vpow2.f32 %v5104_v49 }
0x629a   :  { %v5953_v59 = vpop.eup %5952 }
0x629b   :  { %v5106_v61 = vsel %vm4834_vm5, %v5953_v59, 0.0 }
0x629c   :  { %v5107_v53 = vrot.slane %v5106_v61, 4 }
0x629e   :  { %v5108_v16 = vadd.f32 %v5107_v53, %v5106_v61 }
0x62a0   :  { %v5109_v52 = vrot.slane %v5108_v16, 2 }
0x62a2   :  { %v5110_v17 = vadd.f32 %v5109_v52, %v5108_v16 }
0x62a4   :  { %v5111_v35 = vrot.slane %v5110_v17, 1 }
0x62a6   :  { %v5112_v22 = vadd.f32 %v5111_v35, %v5110_v17 }
0x62a8   :  { %5954 = vrcp.f32 %v5112_v22  ;;  %v5124_v29 = vand.u32 2147483648, %v5112_v22  ;;  %v5122_v45 = vand.u32 2147483647, %v5112_v22  ;;  %vm5118_vm10 = vweird.f32 %v5112_v22 }
0x62aa   :  { %v5125_v46 = vor.u32 1.1754944e-38, %v5124_v29  ;;  %vm5123_vm1 = vcmp.eq.f32.partialorder %v5122_v45, 8.507059e+37 }
0x62ae   :  { %v5955_v27 = vpop.eup %5954 }
0x62af   :  { %v5114_v1 = vmul.f32 %v5955_v27, %v5112_v22  ;;  %vm5119_vm15 = vweird.f32 %v5955_v27 }
0x62b0   :  { %vm5120_vm11 = vmor %vm5118_vm10, %vm5119_vm15 }
0x62b1   :  { %v5115_v15 = vsub.f32 1.0, %v5114_v1 }
0x62b3   :  { %v5116_v42 = vmul.f32 %v5955_v27, %v5115_v15 }
0x62b5   :  { %v5117_v20 = vadd.f32 %v5955_v27, %v5116_v42 }
0x62b7   :  { %v5121_v6 = vsel %vm5120_vm11, %v5955_v27, %v5117_v20 }
0x62b8   :  { %v5126_v47 = vsel %vm5123_vm1, %v5125_v46, %v5121_v6 }
0x62b9   :  { %v5127_v50 = vmul.f32 %v5953_v59, %v5126_v47 }
0x62bb   :  { %5130 = vxpose.xlu1.b32.start.end [1/1] (short) (narrow) %v5127_v50, 8  ;;  %5129 = vst.msk [vmem:[#allocation14 + $0x8] sm:$0xff] %vm4834_vm5, %v5127_v50 }
0x6301   :  { %v4995_v34 = vpop.f32.mrf.mxu1 }
0x6302   :  { %v4996_v37 = vadd.f32 %v5561_v12, %v4995_v34 }
0x6304   :  { %4999 = vst.msk [vmem:[#allocation13] sm:$0xff] %vm4998_vm12, %v4996_v37 }
0x635f   :  { %v5146_v55 = vpop.trf.xlu1 }
0x6360   :  { %5506 = vmatmul.msk.f32.vlgmr.msra.gmra.mxu0 %vm4834_vm5, %v5146_v55 }
0x63dd   :  { %v5183_v2 = vpop.f32.mrf.mxu0 }
0x63de   :  { %5507 = vmatmul.msk.f32.vlgmr.msra.gmra.mxu1 %vm240_vm0, %v5183_v2 }
0x645b   :  { %v5206_v11 = vpop.f32.mrf.mxu1 }
0x645c   :  { %v5227_v18 = vadd.f32 %v5226_v38, %v5206_v11 }
0x645e   :  { %v5229_v60 = vadd.f32 %v5560_v31, %v5227_v18 }
0x6460   :  { %5956 = vtanh.f32 %v5229_v60 }
0x6466   :  { %v5957_v24 = vpop.eup %5956 }
0x6467   :  { %5509 = vmatmul.msk.f32.vlgmr.msra.gmra.mxu3 %vm240_vm0, %v5957_v24 }
0x6468   :  { %6133 = shalt.err (!%p6130_p6)
}
0x6469   :  { %5281 = dma.vmem_to_hbm [thread:$0]  %s5274_s10, 256, %s5276_s15, [#allocation15], %s6202_s20, %s6202_s20, %s6203_s11  }
0x646a   :  { %s6212_s0 = smov [#allocation13]   ;;  %s5262_s12 = sshll.u32 %s6366_s30, 4  ;;  %s5263_s12 = int_to_ptr.hbm [resolvable:$true] %s5262_s12 }
0x646b   :  { %s5260_s4 = sshll.u32 %s6212_s0, 4  ;;  %s6146_s9 = sshra.s32 %s5263_s12, 4  ;;  %s5261_s4 = int_to_ptr.vmem [resolvable:$true] %s5260_s4  ;;  %s6147_s9 = int_to_ptr.hbm [resolvable:$true] %s6146_s9 }
0x646c   :  { %s6148_s26 = scalar_lea.hbm %s6147_s9, 16  ;;  %s6150_s22 = scalar_lea.hbm %s6366_s30, 16 }
0x646d   :  { %p6149_p7 = scmp.ne.s32.totalorder %s6147_s9, %s6148_s26  ;;  %p6151_p8 = scmp.lt.s32.totalorder %s6147_s9, %s6366_s30 }
0x646e   :  { %p6152_p9 = scmp.lt.s32.totalorder %s6150_s22, %s6148_s26 }
0x6470   :  { %p6153_p10 = por %p6152_p9, %p6151_p8 }
0x6472   :  { %p6154_p11 = pnand %p6153_p10, %p6149_p7 }
0x64ea   :  { %v5251_v40 = vpop.f32.mrf.mxu3 }
0x64eb   :  { %v5252_v41 = vadd.f32 %v5561_v12, %v5251_v40 }
0x64ed   :  { %5255 = vst.msk [vmem:[#allocation13 + $0x8] sm:$0xff] %vm4998_vm12, %v5252_v41 }
0x64ee   :  { %6157 = shalt.err (!%p6154_p11)
}
0x64ef   :  { %5268 = dma.vmem_to_hbm [thread:$0]  %s5261_s4, 256, %s5263_s12, [#allocation4], %s6202_s20, %s6202_s20, %s6203_s11  }
0x64f0   :  { %6166 = dma.done.wait [#allocation4], 256  }
0x64f1   :  { %6167 = vsyncadd [#allocation4], 4294967040 }
0x64f2   :  { %6168 = dma.done.wait [#allocation15], 256  }
0x64f3   :  { %6169 = vsyncadd [#allocation15], 4294967040 }
0x64f4   :  { %5290 = vsyncpa [#allocation3], 1 }
0x64f5   :  { %5291 = vsyncpa [#allocation6], 1 }
0x64f6   :  { %5292 = vsyncpa [#allocation9], 1 }
0x64f7   :  { %5293 = vsyncpa [#allocation12], 1 }
0x64f8   :  { %5294 = vsyncpa [#allocation4], 1 }
0x64f9   :  { %5295 = vsyncpa [#allocation15], 1 }

</bundles_post_ra>
